<compile_context>
chip_gen: v6e
topology: v6e:2x2x1
jax: 0.10.0
libtpu: 0.0.40
codegen_flags: <defaults>
</compile_context>

<pallas_src>
import functools

import jax
import jax.numpy as jnp
import numpy as np
from jax.experimental import pallas as pl
from jax.experimental.pallas import tpu as pltpu


def aux_classifier_kernel(x_ref, scale_ref, w1_ref, b1_ref, w2_ref, b2_ref, out_ref):
    # Pooling: reduce x over the feature dim D (XLU), then apply the prefolded
    # (1 - mask) / den scale on the small (tb, S) result (VPU).
    # NOTE: mask is applied after the sum; identical to the reference for finite x.
    xsum = jnp.sum(x_ref[...], axis=-1)                  # (tb, S)
    pooled = scale_ref[...] * xsum                       # (tb, S)

    # First Linear with eval-mode BatchNorm folded into w1/b1, then ReLU.
    h = jnp.maximum(
        jnp.dot(pooled, w1_ref[...], preferred_element_type=jnp.float32)
        + b1_ref[...], 0.0)                              # (tb, D)

    # TODO(synk): nn.Dropout is identity at inference; training-mode random
    # masking is not implemented.
    out_ref[...] = (jnp.dot(h, w2_ref[...], preferred_element_type=jnp.float32)
                    + b2_ref[...])                       # (tb, Cp)


@functools.partial(jax.jit, static_argnames=("tb",))
def aux_classifier_forward(x, mask, w1, b1, gamma, beta, mean, var, w2, b2, *, tb=64):
    B, S, D = x.shape
    C = w2.shape[1]
    tb = min(tb, B)
    assert B % tb == 0, "tb must divide B"
    assert tb == B or tb % 8 == 0, "tb must be a multiple of 8 (or == B)"

    # Fold eval-mode BatchNorm1d (eps=1e-5) into the first Linear.
    bn_scale = gamma * jax.lax.rsqrt(var + 1e-5)          # (1, D)
    w1f = w1 * bn_scale                                   # scale output columns
    b1f = (b1 - mean) * bn_scale + beta                   # (1, D)

    # Lane-pad num_classes up to a multiple of 128 so the output store is unmasked.
    Cp = max(128, ((C + 127) // 128) * 128)
    w2p = jnp.pad(w2, ((0, 0), (0, Cp - C)))
    b2p = jnp.pad(b2, ((0, 0), (0, Cp - C)))

    # Fold (mask <= 0.5) keep-factor and the quirky trailing-axis denominator
    # 1/(mask[s, :].sum() + 1e-8) into one exact (B, S) scale (no approx recip).
    keep = jnp.where(mask > 0.5, 0.0, 1.0).astype(jnp.float32)
    inv_den = 1.0 / (jnp.sum(mask, axis=-1) + 1e-8)       # (S,), indexed by s (quirk)
    scale = keep * inv_den[None, :]                       # (B, S)

    # Raise the scoped-VMEM limit to cover the double-buffered blocks (stays well
    # under v7x's 64 MiB physical VMEM at the default tb=64, S=D=256 config).
    block_bytes = 4 * (tb * S * D + tb * S + S * D + D + D * Cp + Cp + tb * Cp)
    vmem_limit = int(max(32 * 1024 * 1024, 2 * block_bytes + (4 << 20)))

    out = pl.pallas_call(
        aux_classifier_kernel,
        out_shape=jax.ShapeDtypeStruct((B, Cp), jnp.float32),
        grid_spec=pltpu.PrefetchScalarGridSpec(
            num_scalar_prefetch=0,
            grid=(B // tb,),
            in_specs=[
                pl.BlockSpec((tb, S, D), lambda i: (i, 0, 0)),   # x: contiguous block
                pl.BlockSpec((tb, S), lambda i: (i, 0)),          # folded scale
                pl.BlockSpec((S, D), lambda i: (0, 0)),           # W1 (BN-folded), resident
                pl.BlockSpec((1, D), lambda i: (0, 0)),           # b1 (BN-folded)
                pl.BlockSpec((D, Cp), lambda i: (0, 0)),          # W2 (lane-padded)
                pl.BlockSpec((1, Cp), lambda i: (0, 0)),          # b2 (lane-padded)
            ],
            out_specs=pl.BlockSpec((tb, Cp), lambda i: (i, 0)),
        ),
        compiler_params=pltpu.CompilerParams(
            dimension_semantics=("parallel",),
            vmem_limit_bytes=vmem_limit),
    )(x, scale, w1f, b1f, w2p, b2p)
    return out[:, :C]


def ref_forward(x, mask, w1, b1, gamma, beta, mean, var, w2, b2):
    """Pure-JAX reference mirroring the PyTorch forward (eval mode)."""
    xm = jnp.where(mask[:, :, None] > 0.5, 0.0, x)
    pooled = xm.sum(-1) / (mask.sum(-1) + 1e-8)   # trailing-axis broadcast (quirk)
    h = pooled @ w1 + b1[0]
    h = (h - mean[0]) / jnp.sqrt(var[0] + 1e-5) * gamma[0] + beta[0]
    h = jnp.maximum(h, 0.0)
    return h @ w2 + b2[0]


if __name__ == "__main__":
    key = jax.random.PRNGKey(0)
    ks = jax.random.split(key, 10)

    # The torch forward (level='local') only type-checks when B == S == input_dim.
    B = S = D = 128
    C = 10  # num_classes

    x = jax.random.normal(ks[0], (B, S, D), jnp.float32)
    mask = jax.random.bernoulli(ks[1], 0.5, (B, S)).astype(jnp.float32)
    mask = mask.at[:, 0].set(1.0)   # at least one masked position per row

    # Deterministic synthetic parameters.  Linear weights pre-transposed to (in, out).
    w1 = 0.1 * jax.random.normal(ks[2], (D, D), jnp.float32)
    b1 = 0.1 * jax.random.normal(ks[3], (1, D), jnp.float32)
    gamma = 1.0 + 0.1 * jax.random.normal(ks[4], (1, D), jnp.float32)
    beta = 0.1 * jax.random.normal(ks[5], (1, D), jnp.float32)
    mean = 0.1 * jax.random.normal(ks[6], (1, D), jnp.float32)
    var = jax.random.uniform(ks[7], (1, D), jnp.float32, minval=0.5, maxval=1.5)
    w2 = 0.1 * jax.random.normal(ks[8], (D, C), jnp.float32)
    b2 = 0.1 * jax.random.normal(ks[9], (1, C), jnp.float32)

    out = aux_classifier_forward(x, mask, w1, b1, gamma, beta, mean, var, w2, b2)
    out = jax.block_until_ready(out)
    assert out.shape == (B, C)

    ref = ref_forward(x, mask, w1, b1, gamma, beta, mean, var, w2, b2)
    # 2e-3 slack covers default MXU matmul precision differences vs the XLA ref.
    np.testing.assert_allclose(np.asarray(out), np.asarray(ref),
                               rtol=2e-3, atol=2e-3)

    print("KERNEL_OK")
</pallas_src>

<mosaic_0001>
module attributes {stable_mosaic.version = 11 : i64} {
  func.func @aux_classifier_kernel(%arg0: i32, %arg1: memref<64x128x128xf32, #tpu.memory_space<vmem>>, %arg2: memref<64x128xf32, #tpu.memory_space<vmem>>, %arg3: memref<128x128xf32, #tpu.memory_space<vmem>>, %arg4: memref<1x128xf32, #tpu.memory_space<vmem>>, %arg5: memref<128x128xf32, #tpu.memory_space<vmem>>, %arg6: memref<1x128xf32, #tpu.memory_space<vmem>>, %arg7: memref<64x128xf32, #tpu.memory_space<vmem>>) attributes {dimension_semantics = [#tpu.dimension_semantics<parallel>], iteration_bounds = array<i64: 2>, scalar_prefetch = 0 : i64, scratch_operands = 0 : i64, tpu.core_type = #tpu.core_type<tc>, window_params = [{transform_indices = @transform_0, window_bounds = array<i64: 64, 128, 128>}, {transform_indices = @transform_1, window_bounds = array<i64: 64, 128>}, {pipeline_mode = #tpu.pipeline_mode<synchronous>, transform_indices = @transform_2, window_bounds = array<i64: 128, 128>}, {pipeline_mode = #tpu.pipeline_mode<synchronous>, transform_indices = @transform_3, window_bounds = array<i64: 1, 128>}, {pipeline_mode = #tpu.pipeline_mode<synchronous>, transform_indices = @transform_4, window_bounds = array<i64: 128, 128>}, {pipeline_mode = #tpu.pipeline_mode<synchronous>, transform_indices = @transform_5, window_bounds = array<i64: 1, 128>}, {transform_indices = @transform_6, window_bounds = array<i64: 64, 128>}]} {
    %c0 = arith.constant 0 : index
    %c0_0 = arith.constant 0 : index
    %c0_1 = arith.constant 0 : index
    %0 = vector.load %arg1[%c0, %c0_0, %c0_1] : memref<64x128x128xf32, #tpu.memory_space<vmem>>, vector<64x128x128xf32>
    %cst = arith.constant dense<0.000000e+00> : vector<64x128xf32>
    %1 = vector.multi_reduction <add>, %0, %cst [2] : vector<64x128x128xf32> to vector<64x128xf32>
    %c0_2 = arith.constant 0 : index
    %c0_3 = arith.constant 0 : index
    %2 = vector.load %arg2[%c0_2, %c0_3] : memref<64x128xf32, #tpu.memory_space<vmem>>, vector<64x128xf32>
    %3 = arith.mulf %2, %1 : vector<64x128xf32>
    %c0_4 = arith.constant 0 : index
    %c0_5 = arith.constant 0 : index
    %4 = vector.load %arg3[%c0_4, %c0_5] : memref<128x128xf32, #tpu.memory_space<vmem>>, vector<128x128xf32>
    %cst_6 = arith.constant dense<0.000000e+00> : vector<64x128xf32>
    %5 = tpu.matmul %3, %4, %cst_6 {dimension_numbers = #tpu.dot_dimension_numbers<[1], [0], [0], [1], [0, 0, 1, 1], [], []>} : vector<64x128xf32>, vector<128x128xf32>, vector<64x128xf32> -> vector<64x128xf32>
    %c0_7 = arith.constant 0 : index
    %c0_8 = arith.constant 0 : index
    %6 = vector.load %arg4[%c0_7, %c0_8] : memref<1x128xf32, #tpu.memory_space<vmem>>, vector<1x128xf32>
    %7 = vector.broadcast %6 : vector<1x128xf32> to vector<64x128xf32>
    %8 = arith.addf %5, %7 : vector<64x128xf32>
    %cst_9 = arith.constant 0.000000e+00 : f32
    %9 = vector.broadcast %cst_9 : f32 to vector<64x128xf32>
    %10 = arith.maximumf %8, %9 : vector<64x128xf32>
    %c0_10 = arith.constant 0 : index
    %c0_11 = arith.constant 0 : index
    %11 = vector.load %arg5[%c0_10, %c0_11] : memref<128x128xf32, #tpu.memory_space<vmem>>, vector<128x128xf32>
    %cst_12 = arith.constant dense<0.000000e+00> : vector<64x128xf32>
    %12 = tpu.matmul %10, %11, %cst_12 {dimension_numbers = #tpu.dot_dimension_numbers<[1], [0], [0], [1], [0, 0, 1, 1], [], []>} : vector<64x128xf32>, vector<128x128xf32>, vector<64x128xf32> -> vector<64x128xf32>
    %c0_13 = arith.constant 0 : index
    %c0_14 = arith.constant 0 : index
    %13 = vector.load %arg6[%c0_13, %c0_14] : memref<1x128xf32, #tpu.memory_space<vmem>>, vector<1x128xf32>
    %14 = vector.broadcast %13 : vector<1x128xf32> to vector<64x128xf32>
    %15 = arith.addf %12, %14 : vector<64x128xf32>
    %c0_15 = arith.constant 0 : index
    %c0_16 = arith.constant 0 : index
    %16 = vector.load %arg7[%c0_15, %c0_16] : memref<64x128xf32, #tpu.memory_space<vmem>>, vector<64x128xf32>
    tpu.vector_store %arg7[%c0_15, %c0_16], %15 {strides = array<i32>} : memref<64x128xf32, #tpu.memory_space<vmem>>, vector<64x128xf32>,
    return
  }
  func.func @transform_0(%arg0: i32) -> (i32, i32, i32) {
    %c0_i32 = arith.constant 0 : i32
    %c0_i32_0 = arith.constant 0 : i32
    %c0_i32_1 = arith.constant 0 : i32
    return %arg0, %c0_i32, %c0_i32_0 : i32, i32, i32
  }
  func.func @transform_1(%arg0: i32) -> (i32, i32) {
    %c0_i32 = arith.constant 0 : i32
    %c0_i32_0 = arith.constant 0 : i32
    return %arg0, %c0_i32 : i32, i32
  }
  func.func @transform_2(%arg0: i32) -> (i32, i32) {
    %c0_i32 = arith.constant 0 : i32
    %c0_i32_0 = arith.constant 0 : i32
    %c0_i32_1 = arith.constant 0 : i32
    return %c0_i32, %c0_i32_0 : i32, i32
  }
  func.func @transform_3(%arg0: i32) -> (i32, i32) {
    %c0_i32 = arith.constant 0 : i32
    %c0_i32_0 = arith.constant 0 : i32
    %c0_i32_1 = arith.constant 0 : i32
    return %c0_i32, %c0_i32_0 : i32, i32
  }
  func.func @transform_4(%arg0: i32) -> (i32, i32) {
    %c0_i32 = arith.constant 0 : i32
    %c0_i32_0 = arith.constant 0 : i32
    %c0_i32_1 = arith.constant 0 : i32
    return %c0_i32, %c0_i32_0 : i32, i32
  }
  func.func @transform_5(%arg0: i32) -> (i32, i32) {
    %c0_i32 = arith.constant 0 : i32
    %c0_i32_0 = arith.constant 0 : i32
    %c0_i32_1 = arith.constant 0 : i32
    return %c0_i32, %c0_i32_0 : i32, i32
  }
  func.func @transform_6(%arg0: i32) -> (i32, i32) {
    %c0_i32 = arith.constant 0 : i32
    %c0_i32_0 = arith.constant 0 : i32
    return %arg0, %c0_i32 : i32, i32
  }
}

</mosaic_0001>

<bundles_post_ra>
// kernel: aux_classifier_forward.1
= control target key start
LH: loop header
LB: loop body
LE: loop exit
PB: predicated region body
PF: predicated region fallthrough
CT: control target
= control target key end

     0   :  { %11 = vsyncpa [#allocation3], 0  ;;  %s14367_s0 = inlined_call_operand.hbm [shape: f32[128,128,128], index: 0, kind: input, shape index: {}]   ;;  %s14368_s1 = inlined_call_operand.vmem [shape: f32[128,128], index: 1, kind: input, shape index: {}]   ;;  %s14369_s2 = inlined_call_operand.vmem [shape: f32[128,128], index: 2, kind: input, shape index: {}]   ;;  %s14370_s3 = inlined_call_operand.vmem [shape: f32[1,128], index: 3, kind: input, shape index: {}]   ;;  %s14371_s4 = inlined_call_operand.vmem [shape: f32[128,128], index: 4, kind: input, shape index: {}]   ;;  %s14372_s5 = inlined_call_operand.vmem [shape: f32[1,128], index: 5, kind: input, shape index: {}]   ;;  %s14373_s6 = inlined_call_operand.vmem [shape: f32[128,128], index: 6, kind: output, shape index: {}]  }
   0x1   :  { %13 = vsyncpa [#allocation3 + $0x1], 0  ;;  %s10223_s21 = smov 0   ;;  %s10225_s22 = smov 0  }
   0x2   :  { %s10227_s23 = smov 0   ;;  %s10229_s24 = smov 0  }
   0x3 LB: > { %s9919_s25 = sadd.s32 4294967295, %s10183_s24   ;;  %s10243_s26 = sadd.s32 1, %s10183_s24   ;;  %s10183_s24 = sphi %s10229_s24, %s14476_s24   ;;  %s10179_s23 = sphi %s10227_s23, %s14475_s23   ;;  %s10175_s22 = sphi %s10225_s22, %s14474_s22   ;;  %s10171_s21 = sphi %s10223_s21, %s14473_s21  }
   0x4   : > { %s23_s27 = ssub.s32 %s10183_s24, %s10243_s26  ;;  %s26_s28 = sadd.s32 1, %s10179_s23 }
   0x5   : > { %p24_p0 = scmp.eq.s32.totalorder %s23_s27, 0  ;;  %p33_p1 = scmp.ne.s32.totalorder %s10179_s23, %s10175_s22 }
   0x6   : > { %p34_p2 = scmp.eq.s32.totalorder %s10183_s24, 0  ;;  %p39_p3 = scmp.ne.s32.totalorder %s10175_s22, %s10171_s21 }
   0x7   : > { %s10253_s29 = scalar_select %p24_p0, %s10179_s23, %s26_s28  }
   0x8   : > { %p35_p4 = por %p34_p2, %p33_p1  ;;  %p40_p5 = scmp.eq.s32.totalorder %s9919_s25, 0 }
   0x9   : > { %p10081_p6 = scmp.lt.s32.totalorder %s10183_s24, 2  ;;  %s211_s7 = sand.u32 1, %s10179_s23  }
   0xa   : > { %p10258_p7 = por %p40_p5, %p39_p3  ;;  %s9923_s8 = sshll.u32 %s211_s7, 13 }
   0xb   : > { %s9938_s9 = sshll.u32 %s10183_s24, 17  ;;  %s215_s13 = scalar_lea.vmem [#allocation2], %s9923_s8 }
   0xc   : > { %s14382_s30 = scalar_select %p10258_p7, 1, 0 }
   0xd   : > { %s10267_s12 = scalar_lea.hbm %s14367_s0, %s9938_s9  ;;  %s223_s14 = sshll.u32 %s215_s13, 4  ;;  %s10269_s14 = int_to_ptr.vmem [resolvable:$true] %s223_s14 }
   0xe   : > { %p10271_p8 = pnand %p10081_p6, %p35_p4  ;;  %s10276_s16 = scalar_lea.sflag [#allocation3], %s211_s7 }
   0xf   : > { %s10121_s17 = scalar_lea.hbm %s10267_s12, 131072  ;;  %s10126_s20 = scalar_lea.hbm %s14367_s0, 262144 }
  0x10   : > { %p10122_p10 = scmp.ne.s32.totalorder %s10267_s12, %s10121_s17  ;;  %p10123_p11 = pneg %p10271_p8 }
  0x11   : > { %p10127_p0 = scmp.lt.s32.totalorder %s10267_s12, %s14367_s0  ;;  %p10128_p1 = scmp.lt.s32.totalorder %s10126_s20, %s10121_s17 }
  0x12   : > { %p10124_p12 = pnand %p10123_p11, %p10122_p10 }
  0x13   : > { %p10129_p2 = por %p10128_p1, %p10127_p0 }
  0x14   : > { %p10125_p13 = pneg %p10124_p12 }
  0x16   : > { %p10130_p3 = pnand %p10129_p2, %p10125_p13 }
  0x18   : > { %10133 = shalt.err (!%p10130_p3)
}
  0x19   : > { %s10134_s28 = scalar_lea.vmem %s10269_s14, 131072  ;;  %s10185_s7 = smov [#allocation2]  }
  0x1a   : > { %p10135_p4 = scmp.ne.s32.totalorder %s10269_s14, %s10134_s28  ;;  %s10139_s8 = sshll.u32 %s10185_s7, 4  ;;  %s10140_s8 = int_to_ptr.vmem [resolvable:$false] %s10139_s8 }
  0x1b   : > { %s10141_s9 = scalar_lea.vmem %s10140_s8, 262144  ;;  %p10142_p10 = scmp.lt.s32.totalorder %s10269_s14, %s10140_s8 }
  0x1c   : > { %p10137_p5 = pnand %p10135_p4, %p10123_p11  ;;  %p10143_p12 = scmp.lt.s32.totalorder %s10141_s9, %s10134_s28 }
  0x1e   : > { %p10138_p6 = pneg %p10137_p5  ;;  %p10144_p9 = por %p10143_p12, %p10142_p10 }
  0x20   : > { %p10145_p7 = pnand %p10144_p9, %p10138_p6 }
  0x22   : > { %10148 = shalt.err (!%p10145_p7)
}
  0x23   : > { %s10186_s10 = smov 128   ;;  %s10187_s11 = smov 8  }
  0x24   : > { %10080 = dma.hbm_to_vmem [thread:$0]  (!%p10271_p8), %s10267_s12, 131072, %s10269_s14, %s10276_s16, %s10186_s10, %s10186_s10, %s10187_s11  }
  0x25   : > { %p240_p11 = scmp.lt.s32.totalorder %s10183_s24, 3  ;;  %p14384_p13 = scmp.ge.s32.totalorder %s10183_s24, 1 }
  0x27   : > { %p241_p0 = pnand %p14384_p13, %p240_p11 }
  0x28   : > { %s246_s13 = sand.u32 (!%p241_p0), 1, %s10175_s22   ;;  %p14385_p7 = scmp.ne.s32.totalorder (!%p241_p0), %s14382_s30, 0 }
  0x29   : > { %244 = sbr.rel (%p241_p0) target bundleno = 2636 (0xa4c), region = 44  ;;  %s9928_s17 = sshll.u32 (!%p241_p0), %s246_s13, 13 }
  0x2a   : > { %s247_s18 = scalar_lea.sflag (!%p241_p0), [#allocation3], %s246_s13  ;;  %s10301_s19 = scalar_lea.vmem (!%p241_p0), [#allocation2], %s9928_s17 }
  0x2e   : > { %10166 = dma.done.wait (%p14385_p7), %s247_s18, 131072  }
  0x2f   : > { %10168 = vsyncadd (%p14385_p7), %s247_s18, 4294836224  ;;  %v299_v0 = vld [vmem:[%s10301_s19 + $0x10] sm:$0xff]  ;;  %v297_v1 = vld [vmem:[%s10301_s19] sm:$0xff]  ;;  %vm4412_vm0 = vcmask 130112   ;;  %vm4419_vm1 = vcmask 195712   ;;  %vm4426_vm2 = vcmask 261312  }
  0x30   : > { %1325 = vadd.xlane.f32.xlu1 %v299_v0  ;;  %1321 = vadd.xlane.f32.xlu0 %v297_v1  ;;  %v300_v2 = vld [vmem:[%s10301_s19 + $0x18] sm:$0xff]  ;;  %v298_v3 = vld [vmem:[%s10301_s19 + $0x8] sm:$0xff]  ;;  %v301_v5 = vld [vmem:[%s10301_s19 + $0x20] sm:$0xff]  ;;  %vm4433_vm3 = vcmask 326912   ;;  %vm4440_vm4 = vcmask 392512   ;;  %vm4447_vm5 = vcmask 458112  }
  0x31   : > { %v302_v4 = vld [vmem:[%s10301_s19 + $0x28] sm:$0xff]  ;;  %v304_v6 = vld [vmem:[%s10301_s19 + $0x38] sm:$0xff]  ;;  %v303_v7 = vld [vmem:[%s10301_s19 + $0x30] sm:$0xff]  ;;  %vm4454_vm6 = vcmask 523712   ;;  %vm4461_vm7 = vcmask 589312   ;;  %vm4468_vm8 = vcmask 654912  }
  0x32   : > { %v306_v8 = vld [vmem:[%s10301_s19 + $0x48] sm:$0xff]  ;;  %v305_v9 = vld [vmem:[%s10301_s19 + $0x40] sm:$0xff]  ;;  %v308_v10 = vld [vmem:[%s10301_s19 + $0x58] sm:$0xff]  ;;  %vm4475_vm9 = vcmask 720512   ;;  %vm4482_vm10 = vcmask 786112   ;;  %vm14380_vm11 = vcmask 851712  }
  0x33   : > { %v307_v11 = vld [vmem:[%s10301_s19 + $0x50] sm:$0xff]  ;;  %v310_v12 = vld [vmem:[%s10301_s19 + $0x68] sm:$0xff]  ;;  %v309_v13 = vld [vmem:[%s10301_s19 + $0x60] sm:$0xff]  ;;  %vm4496_vm12 = vcmask 917312   ;;  %vm4503_vm13 = vcmask 982912   ;;  %vm4510_vm14 = vcmask 1048512  }
  0x34   : > { %1327 = vadd.xlane.f32.xlu1 %v300_v2  ;;  %1323 = vadd.xlane.f32.xlu0 %v298_v3  ;;  %v312_v14 = vld [vmem:[%s10301_s19 + $0x78] sm:$0xff]  ;;  %v311_v15 = vld [vmem:[%s10301_s19 + $0x70] sm:$0xff]  ;;  %v314_v16 = vld [vmem:[%s10301_s19 + $0x88] sm:$0xff]  ;;  %v4401_v2 = vlaneseq  ;;  %vm14375_vm15 = vcmask 1041409   ;;  %s9929_s30 = sshll.u32 %s9919_s25, 3 }
  0x35   : > { %v313_v17 = vld [vmem:[%s10301_s19 + $0x80] sm:$0xff]  ;;  %v316_v18 = vld [vmem:[%s10301_s19 + $0x98] sm:$0xff]  ;;  %v315_v19 = vld [vmem:[%s10301_s19 + $0x90] sm:$0xff]  ;;  %p286_p8 = scmp.lt.s32.totalorder %s9929_s30, 15 }
  0x36   : > { %v318_v20 = vld [vmem:[%s10301_s19 + $0xa8] sm:$0xff]  ;;  %v317_v21 = vld [vmem:[%s10301_s19 + $0xa0] sm:$0xff]  ;;  %v320_v22 = vld [vmem:[%s10301_s19 + $0xb8] sm:$0xff] }
  0x37   : > { %v319_v23 = vld [vmem:[%s10301_s19 + $0xb0] sm:$0xff]  ;;  %v322_v24 = vld [vmem:[%s10301_s19 + $0xc8] sm:$0xff]  ;;  %v321_v25 = vld [vmem:[%s10301_s19 + $0xc0] sm:$0xff]  ;;  %s14478_s30 = smov (!%p286_p8, %s9929_s30), 15 }
  0x38   : > { %1331 = vadd.xlane.f32.xlu1 %v302_v4  ;;  %1329 = vadd.xlane.f32.xlu0 %v301_v5  ;;  %v324_v26 = vld [vmem:[%s10301_s19 + $0xd8] sm:$0xff]  ;;  %v323_v27 = vld [vmem:[%s10301_s19 + $0xd0] sm:$0xff]  ;;  %v326_v28 = vld [vmem:[%s10301_s19 + $0xe8] sm:$0xff]  ;;  %v10375_v5 = vand.u32 127, %v4401_v2  ;;  %s9930_s24 = sshll.u32 %s14478_s30, 3 }
  0x39   : > { %v325_v29 = vld [vmem:[%s10301_s19 + $0xe0] sm:$0xff]  ;;  %v328_v30 = vld [vmem:[%s10301_s19 + $0xf8] sm:$0xff]  ;;  %v327_v31 = vld [vmem:[%s10301_s19 + $0xf0] sm:$0xff]  ;;  %s10884_s14 = scalar_lea.vmem %s14368_s1, %s9930_s24  ;;  %s12102_s7 = scalar_lea.vmem %s14373_s6, %s9930_s24 }
  0x3a   : > { %v330_v32 = vld [vmem:[%s10301_s19 + $0x108] sm:$0xff]  ;;  %v329_v33 = vld [vmem:[%s10301_s19 + $0x100] sm:$0xff]  ;;  %v332_v34 = vld [vmem:[%s10301_s19 + $0x118] sm:$0xff] }
  0x3b   : > { %v331_v35 = vld [vmem:[%s10301_s19 + $0x110] sm:$0xff]  ;;  %v334_v36 = vld [vmem:[%s10301_s19 + $0x128] sm:$0xff]  ;;  %v333_v37 = vld [vmem:[%s10301_s19 + $0x120] sm:$0xff] }
  0x3c   : > { %1335 = vadd.xlane.f32.xlu1 %v304_v6  ;;  %1333 = vadd.xlane.f32.xlu0 %v303_v7  ;;  %v336_v38 = vld [vmem:[%s10301_s19 + $0x138] sm:$0xff]  ;;  %v335_v39 = vld [vmem:[%s10301_s19 + $0x130] sm:$0xff]  ;;  %v338_v40 = vld [vmem:[%s10301_s19 + $0x148] sm:$0xff] }
  0x3d   : > { %v337_v41 = vld [vmem:[%s10301_s19 + $0x140] sm:$0xff]  ;;  %v340_v42 = vld [vmem:[%s10301_s19 + $0x158] sm:$0xff]  ;;  %v339_v43 = vld [vmem:[%s10301_s19 + $0x150] sm:$0xff] }
  0x3e   : > { %v342_v44 = vld [vmem:[%s10301_s19 + $0x168] sm:$0xff]  ;;  %v341_v45 = vld [vmem:[%s10301_s19 + $0x160] sm:$0xff]  ;;  %v344_v46 = vld [vmem:[%s10301_s19 + $0x178] sm:$0xff] }
  0x3f   : > { %v343_v47 = vld [vmem:[%s10301_s19 + $0x170] sm:$0xff]  ;;  %v346_v48 = vld [vmem:[%s10301_s19 + $0x188] sm:$0xff]  ;;  %v345_v49 = vld [vmem:[%s10301_s19 + $0x180] sm:$0xff] }
  0x40   : > { %1339 = vadd.xlane.f32.xlu1 %v306_v8  ;;  %1337 = vadd.xlane.f32.xlu0 %v305_v9  ;;  %v348_v50 = vld [vmem:[%s10301_s19 + $0x198] sm:$0xff]  ;;  %v347_v51 = vld [vmem:[%s10301_s19 + $0x190] sm:$0xff]  ;;  %v350_v52 = vld [vmem:[%s10301_s19 + $0x1a8] sm:$0xff]  ;;  %v10379_v8 = vshrl.u32 %v4401_v2, 7  ;;  %v4421_v9 = vadd.s32 4294967272, %v10375_v5  ;;  %v4484_v2 = vadd.s32 4294967200, %v10375_v5 }
  0x41   : > { %v349_v53 = vld [vmem:[%s10301_s19 + $0x1a0] sm:$0xff]  ;;  %v352_v54 = vld [vmem:[%s10301_s19 + $0x1b8] sm:$0xff]  ;;  %v351_v55 = vld [vmem:[%s10301_s19 + $0x1b0] sm:$0xff] }
  0x42   : > { %v354_v56 = vld [vmem:[%s10301_s19 + $0x1c8] sm:$0xff]  ;;  %v353_v57 = vld [vmem:[%s10301_s19 + $0x1c0] sm:$0xff]  ;;  %v356_v58 = vld [vmem:[%s10301_s19 + $0x1d8] sm:$0xff] }
  0x43   : > { %v355_v59 = vld [vmem:[%s10301_s19 + $0x1d0] sm:$0xff]  ;;  %v358_v60 = vld [vmem:[%s10301_s19 + $0x1e8] sm:$0xff]  ;;  %v357_v61 = vld [vmem:[%s10301_s19 + $0x1e0] sm:$0xff] }
  0x44   : > { %1343 = vadd.xlane.f32.xlu1 %v308_v10  ;;  %1341 = vadd.xlane.f32.xlu0 %v307_v11  ;;  %v360_v62 = vld [vmem:[%s10301_s19 + $0x1f8] sm:$0xff]  ;;  %v359_v63 = vld [vmem:[%s10301_s19 + $0x1f0] sm:$0xff]  ;;  %v362_v0 = vld [vmem:[%s10301_s19 + $0x208] sm:$0xff]  ;;  %v4407_v10 = vadd.s32 4294967288, %v10375_v5  ;;  %v4414_v11 = vadd.s32 4294967280, %v10375_v5 }
  0x45   : > { %v361_v1 = vld [vmem:[%s10301_s19 + $0x200] sm:$0xff]  ;;  %v364_v3 = vld [vmem:[%s10301_s19 + $0x218] sm:$0xff]  ;;  %v363_v4 = vld [vmem:[%s10301_s19 + $0x210] sm:$0xff] }
  0x46   : > { %v366_v6 = vld [vmem:[%s10301_s19 + $0x228] sm:$0xff]  ;;  %v365_v7 = vld [vmem:[%s10301_s19 + $0x220] sm:$0xff] }
  0x48   : > { %1347 = vadd.xlane.f32.xlu1 %v310_v12  ;;  %1345 = vadd.xlane.f32.xlu0 %v309_v13 }
  0x4c   : > { %1351 = vadd.xlane.f32.xlu1 %v312_v14  ;;  %1349 = vadd.xlane.f32.xlu0 %v311_v15  ;;  %v368_v14 = vld [vmem:[%s10301_s19 + $0x238] sm:$0xff]  ;;  %v367_v15 = vld [vmem:[%s10301_s19 + $0x230] sm:$0xff] }
  0x50   : > { %1355 = vadd.xlane.f32.xlu1 %v314_v16  ;;  %1353 = vadd.xlane.f32.xlu0 %v313_v17  ;;  %v4435_v16 = vadd.s32 4294967256, %v10375_v5  ;;  %v4428_v17 = vadd.s32 4294967264, %v10375_v5 }
  0x54   : > { %1359 = vadd.xlane.f32.xlu1 %v316_v18  ;;  %1357 = vadd.xlane.f32.xlu0 %v315_v19  ;;  %v10390_v18 = vsub.s32 %v10375_v5, %v10379_v8  ;;  %v10393_v19 = vsub.s32 %v4421_v9, %v10379_v8 }
  0x58   : > { %1363 = vadd.xlane.f32.xlu1 %v318_v20  ;;  %1361 = vadd.xlane.f32.xlu0 %v317_v21  ;;  %v10396_v20 = vsub.s32 %v4407_v10, %v10379_v8  ;;  %v10399_v21 = vsub.s32 %v4414_v11, %v10379_v8 }
  0x5c   : > { %1367 = vadd.xlane.f32.xlu1 %v320_v22  ;;  %1365 = vadd.xlane.f32.xlu0 %v319_v23 }
  0x60   : > { %1371 = vadd.xlane.f32.xlu1 %v322_v24  ;;  %1369 = vadd.xlane.f32.xlu0 %v321_v25  ;;  %v370_v24 = vld [vmem:[%s10301_s19 + $0x248] sm:$0xff]  ;;  %v369_v25 = vld [vmem:[%s10301_s19 + $0x240] sm:$0xff] }
  0x64   : > { %1375 = vadd.xlane.f32.xlu1 %v324_v26  ;;  %1373 = vadd.xlane.f32.xlu0 %v323_v27  ;;  %v10404_v26 = vsub.s32 %v4435_v16, %v10379_v8  ;;  %v10407_v27 = vsub.s32 %v4428_v17, %v10379_v8  ;;  %v10466_v16 = vsub.s32 %v4484_v2, %v10379_v8  ;;  %v388_v2 = vld [vmem:[%s10301_s19 + $0x2d8] sm:$0xff] }
  0x68   : > { %1379 = vadd.xlane.f32.xlu1 %v326_v28  ;;  %1377 = vadd.xlane.f32.xlu0 %v325_v29  ;;  %v4442_v28 = vadd.s32 4294967248, %v10375_v5 }
  0x6c   : > { %1383 = vadd.xlane.f32.xlu1 %v328_v30  ;;  %1381 = vadd.xlane.f32.xlu0 %v327_v31 }
  0x70   : > { %1387 = vadd.xlane.f32.xlu1 %v330_v32  ;;  %1385 = vadd.xlane.f32.xlu0 %v329_v33  ;;  %v4449_v32 = vadd.s32 4294967240, %v10375_v5 }
  0x74   : > { %1391 = vadd.xlane.f32.xlu1 %v332_v34  ;;  %1389 = vadd.xlane.f32.xlu0 %v331_v35 }
  0x78   : > { %1395 = vadd.xlane.f32.xlu1 %v334_v36  ;;  %1393 = vadd.xlane.f32.xlu0 %v333_v37 }
  0x7c   : > { %1399 = vadd.xlane.f32.xlu1 %v336_v38  ;;  %1397 = vadd.xlane.f32.xlu0 %v335_v39  ;;  %v372_v38 = vld [vmem:[%s10301_s19 + $0x258] sm:$0xff]  ;;  %v371_v39 = vld [vmem:[%s10301_s19 + $0x250] sm:$0xff] }
  0x80   : > { %1403 = vadd.xlane.f32.xlu1 %v338_v40  ;;  %1401 = vadd.xlane.f32.xlu0 %v337_v41  ;;  %v10420_v40 = vsub.s32 %v4442_v28, %v10379_v8  ;;  %v4463_v41 = vadd.s32 4294967224, %v10375_v5 }
  0x84   : > { %1407 = vadd.xlane.f32.xlu1 %v340_v42  ;;  %1405 = vadd.xlane.f32.xlu0 %v339_v43  ;;  %v4456_v42 = vadd.s32 4294967232, %v10375_v5 }
  0x88   : > { %1411 = vadd.xlane.f32.xlu1 %v342_v44  ;;  %1409 = vadd.xlane.f32.xlu0 %v341_v45 }
  0x8c   : > { %1415 = vadd.xlane.f32.xlu1 %v344_v46  ;;  %1413 = vadd.xlane.f32.xlu0 %v343_v47  ;;  %v10428_v46 = vsub.s32 %v4449_v32, %v10379_v8  ;;  %v379_v32 = vld [vmem:[%s10301_s19 + $0x290] sm:$0xff] }
  0x90   : > { %1419 = vadd.xlane.f32.xlu1 %v346_v48  ;;  %1417 = vadd.xlane.f32.xlu0 %v345_v49 }
  0x94   : > { %1423 = vadd.xlane.f32.xlu1 %v348_v50  ;;  %1421 = vadd.xlane.f32.xlu0 %v347_v51  ;;  %v374_v51 = vld [vmem:[%s10301_s19 + $0x268] sm:$0xff] }
  0x98   : > { %1427 = vadd.xlane.f32.xlu1 %v350_v52  ;;  %1425 = vadd.xlane.f32.xlu0 %v349_v53  ;;  %v373_v52 = vld [vmem:[%s10301_s19 + $0x260] sm:$0xff]  ;;  %v10435_v53 = vsub.s32 %v4463_v41, %v10379_v8  ;;  %v382_v41 = vld [vmem:[%s10301_s19 + $0x2a8] sm:$0xff] }
  0x9c   : > { %1431 = vadd.xlane.f32.xlu1 %v352_v54  ;;  %1429 = vadd.xlane.f32.xlu0 %v351_v55  ;;  %v10438_v54 = vsub.s32 %v4456_v42, %v10379_v8  ;;  %v381_v42 = vld [vmem:[%s10301_s19 + $0x2a0] sm:$0xff] }
  0xa0   : > { %1435 = vadd.xlane.f32.xlu1 %v354_v56  ;;  %1433 = vadd.xlane.f32.xlu0 %v353_v57  ;;  %v4477_v57 = vadd.s32 4294967208, %v10375_v5 }
  0xa4   : > { %1439 = vadd.xlane.f32.xlu1 %v356_v58  ;;  %1437 = vadd.xlane.f32.xlu0 %v355_v59  ;;  %v4470_v58 = vadd.s32 4294967216, %v10375_v5 }
  0xa8   : > { %1443 = vadd.xlane.f32.xlu1 %v358_v60  ;;  %1441 = vadd.xlane.f32.xlu0 %v357_v61 }
  0xac   : > { %1447 = vadd.xlane.f32.xlu1 %v360_v62  ;;  %1445 = vadd.xlane.f32.xlu0 %v359_v63  ;;  %v376_v63 = vld [vmem:[%s10301_s19 + $0x278] sm:$0xff] }
  0xb0   : > { %1451 = vadd.xlane.f32.xlu1 %v362_v0  ;;  %1449 = vadd.xlane.f32.xlu0 %v361_v1  ;;  %v375_v0 = vld [vmem:[%s10301_s19 + $0x270] sm:$0xff]  ;;  %v4491_v1 = vadd.s32 4294967192, %v10375_v5 }
  0xb4   : > { %1455 = vadd.xlane.f32.xlu1 %v364_v3  ;;  %1453 = vadd.xlane.f32.xlu0 %v363_v4 }
  0xb8   : > { %1459 = vadd.xlane.f32.xlu1 %v366_v6  ;;  %1457 = vadd.xlane.f32.xlu0 %v365_v7  ;;  %v10453_v6 = vsub.s32 %v4477_v57, %v10379_v8  ;;  %v10456_v7 = vsub.s32 %v4470_v58, %v10379_v8  ;;  %v386_v58 = vld [vmem:[%s10301_s19 + $0x2c8] sm:$0xff] }
  0xb9   : > { %v1326_v12 = vpop.xlane.xlu1 %1325  ;;  %v1322_v13 = vpop.xlane.xlu0 %1321 }
  0xba   : > { %v4406_v29 = vrot.slane %v1322_v13, %v10390_v18  ;;  %v4418_v33 = vrot.slane %v1326_v12, %v10399_v21  ;;  %v378_v13 = vld [vmem:[%s10301_s19 + $0x288] sm:$0xff] }
  0xbc   : > { %1463 = vadd.xlane.f32.xlu1 %v368_v14  ;;  %1461 = vadd.xlane.f32.xlu0 %v367_v15  ;;  %v377_v14 = vld [vmem:[%s10301_s19 + $0x280] sm:$0xff]  ;;  %v10463_v15 = vsub.s32 %v4491_v1, %v10379_v8 }
  0xbd   : > { %v1328_v22 = vpop.xlane.xlu1 %1327  ;;  %v1324_v23 = vpop.xlane.xlu0 %1323 }
  0xbe   : > { %v4425_v30 = vrot.slane %v1328_v22, %v10393_v19  ;;  %v4411_v31 = vrot.slane %v1324_v23, %v10396_v20  ;;  %v4505_v23 = vadd.s32 4294967176, %v10375_v5 }
  0xc0   : > { %v4413_v34 = vsel %vm4412_vm0, %v4411_v31, %v4406_v29  ;;  %1467 = vadd.xlane.f32.xlu1 %v370_v24  ;;  %1465 = vadd.xlane.f32.xlu0 %v369_v25  ;;  %v4498_v24 = vadd.s32 4294967184, %v10375_v5  ;;  %v380_v31 = vld [vmem:[%s10301_s19 + $0x298] sm:$0xff]  ;;  %v10479_v5 = vsub.s32 %v4505_v23, %v10379_v8 }
  0xc1   : > { %v4420_v35 = vsel %vm4419_vm1, %v4418_v33, %v4413_v34  ;;  %v1332_v36 = vpop.xlane.xlu1 %1331  ;;  %v1330_v37 = vpop.xlane.xlu0 %1329 }
  0xc2   : > { %v4439_v43 = vrot.slane %v1332_v36, %v10404_v26  ;;  %v4427_v44 = vsel %vm4426_vm2, %v4425_v30, %v4420_v35  ;;  %v4432_v45 = vrot.slane %v1330_v37, %v10407_v27  ;;  %v10482_v35 = vsub.s32 %v4498_v24, %v10379_v8 }
  0xc4   : > { %v4434_v47 = vsel %vm4433_vm3, %v4432_v45, %v4427_v44  ;;  %1471 = vadd.xlane.f32.xlu1 %v372_v38  ;;  %1469 = vadd.xlane.f32.xlu0 %v371_v39 }
  0xc5   : > { %v1336_v48 = vpop.xlane.xlu1 %1335  ;;  %v4441_v49 = vsel %vm4440_vm4, %v4439_v43, %v4434_v47  ;;  %v1334_v50 = vpop.xlane.xlu0 %1333 }
  0xc6   : > { %v4453_v55 = vrot.slane %v1336_v48, %v10428_v46  ;;  %v4446_v56 = vrot.slane %v1334_v50, %v10420_v40  ;;  %v383_v50 = vld [vmem:[%s10301_s19 + $0x2b0] sm:$0xff] }
  0xc8   : > { %v4448_v59 = vsel %vm4447_vm5, %v4446_v56, %v4441_v49  ;;  %1475 = vadd.xlane.f32.xlu1 %v374_v51  ;;  %1473 = vadd.xlane.f32.xlu0 %v373_v52  ;;  %v384_v49 = vld [vmem:[%s10301_s19 + $0x2b8] sm:$0xff] }
  0xc9   : > { %v1340_v60 = vpop.xlane.xlu1 %1339  ;;  %v4455_v61 = vsel %vm4454_vm6, %v4453_v55, %v4448_v59  ;;  %v1338_v62 = vpop.xlane.xlu0 %1337  ;;  %v385_v59 = vld [vmem:[%s10301_s19 + $0x2c0] sm:$0xff] }
  0xca   : > { %v4467_v3 = vrot.slane %v1340_v60, %v10435_v53  ;;  %v4460_v4 = vrot.slane %v1338_v62, %v10438_v54 }
  0xcc   : > { %v4462_v9 = vsel %vm4461_vm7, %v4460_v4, %v4455_v61  ;;  %1479 = vadd.xlane.f32.xlu1 %v376_v63  ;;  %1477 = vadd.xlane.f32.xlu0 %v375_v0 }
  0xcd   : > { %v1344_v10 = vpop.xlane.xlu1 %1343  ;;  %v4469_v11 = vsel %vm4468_vm8, %v4467_v3, %v4462_v9  ;;  %v1342_v12 = vpop.xlane.xlu0 %1341  ;;  %v387_v3 = vld [vmem:[%s10301_s19 + $0x2d0] sm:$0xff] }
  0xce   : > { %v4481_v17 = vrot.slane %v1344_v10, %v10453_v6  ;;  %v4474_v22 = vrot.slane %v1342_v12, %v10456_v7 }
  0xd0   : > { %v4476_v25 = vsel %vm4475_vm9, %v4474_v22, %v4469_v11  ;;  %1483 = vadd.xlane.f32.xlu1 %v378_v13  ;;  %1481 = vadd.xlane.f32.xlu0 %v377_v14  ;;  %v390_v14 = vld [vmem:[%s10301_s19 + $0x2e8] sm:$0xff] }
  0xd1   : > { %v1348_v28 = vpop.xlane.xlu1 %1347  ;;  %v4483_v29 = vsel %vm4482_vm10, %v4481_v17, %v4476_v25  ;;  %v1346_v30 = vpop.xlane.xlu0 %1345  ;;  %v389_v17 = vld [vmem:[%s10301_s19 + $0x2e0] sm:$0xff] }
  0xd2   : > { %v4495_v33 = vrot.slane %v1348_v28, %v10463_v15  ;;  %v4488_v34 = vrot.slane %v1346_v30, %v10466_v16  ;;  %v392_v30 = vld [vmem:[%s10301_s19 + $0x2f8] sm:$0xff] }
  0xd4   : > { %v4490_v36 = vsel %vm14380_vm11, %v4488_v34, %v4483_v29  ;;  %1487 = vadd.xlane.f32.xlu1 %v380_v31  ;;  %1485 = vadd.xlane.f32.xlu0 %v379_v32  ;;  %v391_v31 = vld [vmem:[%s10301_s19 + $0x2f0] sm:$0xff] }
  0xd5   : > { %v1352_v37 = vpop.xlane.xlu1 %1351  ;;  %v4497_v38 = vsel %vm4496_vm12, %v4495_v33, %v4490_v36  ;;  %v1350_v39 = vpop.xlane.xlu0 %1349 }
  0xd6   : > { %v4509_v43 = vrot.slane %v1352_v37, %v10479_v5  ;;  %v4502_v44 = vrot.slane %v1350_v39, %v10482_v35  ;;  %v394_v39 = vld [vmem:[%s10301_s19 + $0x308] sm:$0xff] }
  0xd8   : > { %v4504_v8 = vsel %vm4503_vm13, %v4502_v44, %v4497_v38  ;;  %1491 = vadd.xlane.f32.xlu1 %v382_v41  ;;  %1489 = vadd.xlane.f32.xlu0 %v381_v42  ;;  %v393_v41 = vld [vmem:[%s10301_s19 + $0x300] sm:$0xff] }
  0xd9   : > { %v10492_v45 = vsel %vm4510_vm14, %v4509_v43, %v4504_v8  ;;  %v1356_v47 = vpop.xlane.xlu1 %1355  ;;  %v1354_v48 = vpop.xlane.xlu0 %1353 }
  0xda   : > { %v4519_v51 = vrot.slane %v1356_v47, %v10396_v20  ;;  %v4515_v52 = vrot.slane %v1354_v48, %v10390_v18 }
  0xdc   : > { %v4520_v55 = vsel %vm4412_vm0, %v4519_v51, %v4515_v52  ;;  %1495 = vadd.xlane.f32.xlu1 %v384_v49  ;;  %1493 = vadd.xlane.f32.xlu0 %v383_v50  ;;  %v396_v49 = vld [vmem:[%s10301_s19 + $0x318] sm:$0xff]  ;;  %v395_v50 = vld [vmem:[%s10301_s19 + $0x310] sm:$0xff] }
  0xdd   : > { %v1360_v56 = vpop.xlane.xlu1 %1359  ;;  %v1358_v57 = vpop.xlane.xlu0 %1357 }
  0xde   : > { %v4529_v60 = vrot.slane %v1360_v56, %v10393_v19  ;;  %v4524_v61 = vrot.slane %v1358_v57, %v10399_v21 }
  0xe0   : > { %v4525_v62 = vsel %vm4419_vm1, %v4524_v61, %v4520_v55  ;;  %1499 = vadd.xlane.f32.xlu1 %v386_v58  ;;  %1497 = vadd.xlane.f32.xlu0 %v385_v59  ;;  %v398_v59 = vld [vmem:[%s10301_s19 + $0x328] sm:$0xff] }
  0xe1   : > { %v1364_v63 = vpop.xlane.xlu1 %1363  ;;  %v4530_v0 = vsel %vm4426_vm2, %v4529_v60, %v4525_v62  ;;  %v1362_v1 = vpop.xlane.xlu0 %1361  ;;  %v397_v60 = vld [vmem:[%s10301_s19 + $0x320] sm:$0xff] }
  0xe2   : > { %v4539_v4 = vrot.slane %v1364_v63, %v10404_v26  ;;  %v4534_v9 = vrot.slane %v1362_v1, %v10407_v27 }
  0xe4   : > { %v4535_v10 = vsel %vm4433_vm3, %v4534_v9, %v4530_v0  ;;  %1503 = vadd.xlane.f32.xlu1 %v388_v2  ;;  %1501 = vadd.xlane.f32.xlu0 %v387_v3  ;;  %v400_v3 = vld [vmem:[%s10301_s19 + $0x338] sm:$0xff] }
  0xe5   : > { %v1368_v11 = vpop.xlane.xlu1 %1367  ;;  %v4540_v12 = vsel %vm4440_vm4, %v4539_v4, %v4535_v10  ;;  %v1366_v13 = vpop.xlane.xlu0 %1365  ;;  %v399_v4 = vld [vmem:[%s10301_s19 + $0x330] sm:$0xff] }
  0xe6   : > { %v4549_v22 = vrot.slane %v1368_v11, %v10428_v46  ;;  %v4544_v23 = vrot.slane %v1366_v13, %v10420_v40 }
  0xe8   : > { %v4545_v24 = vsel %vm4447_vm5, %v4544_v23, %v4540_v12  ;;  %1507 = vadd.xlane.f32.xlu1 %v390_v14  ;;  %1505 = vadd.xlane.f32.xlu0 %v389_v17  ;;  %v402_v17 = vld [vmem:[%s10301_s19 + $0x348] sm:$0xff] }
  0xe9   : > { %v1372_v25 = vpop.xlane.xlu1 %1371  ;;  %v4550_v28 = vsel %vm4454_vm6, %v4549_v22, %v4545_v24  ;;  %v1370_v29 = vpop.xlane.xlu0 %1369  ;;  %v401_v22 = vld [vmem:[%s10301_s19 + $0x340] sm:$0xff] }
  0xea   : > { %v4559_v32 = vrot.slane %v1372_v25, %v10435_v53  ;;  %v4554_v33 = vrot.slane %v1370_v29, %v10438_v54 }
  0xec   : > { %v4555_v34 = vsel %vm4461_vm7, %v4554_v33, %v4550_v28  ;;  %1511 = vadd.xlane.f32.xlu1 %v392_v30  ;;  %1509 = vadd.xlane.f32.xlu0 %v391_v31  ;;  %v404_v30 = vld [vmem:[%s10301_s19 + $0x358] sm:$0xff]  ;;  %v403_v31 = vld [vmem:[%s10301_s19 + $0x350] sm:$0xff] }
  0xed   : > { %v1376_v36 = vpop.xlane.xlu1 %1375  ;;  %v4560_v37 = vsel %vm4468_vm8, %v4559_v32, %v4555_v34  ;;  %v1374_v38 = vpop.xlane.xlu0 %1373 }
  0xee   : > { %v4569_v42 = vrot.slane %v1376_v36, %v10453_v6  ;;  %v4564_v43 = vrot.slane %v1374_v38, %v10456_v7 }
  0xf0   : > { %v4565_v44 = vsel %vm4475_vm9, %v4564_v43, %v4560_v37  ;;  %1515 = vadd.xlane.f32.xlu1 %v394_v39  ;;  %1513 = vadd.xlane.f32.xlu0 %v393_v41  ;;  %v406_v39 = vld [vmem:[%s10301_s19 + $0x368] sm:$0xff]  ;;  %v405_v41 = vld [vmem:[%s10301_s19 + $0x360] sm:$0xff] }
  0xf1   : > { %v1380_v8 = vpop.xlane.xlu1 %1379  ;;  %v4570_v47 = vsel %vm4482_vm10, %v4569_v42, %v4565_v44  ;;  %v1378_v48 = vpop.xlane.xlu0 %1377 }
  0xf2   : > { %v4579_v51 = vrot.slane %v1380_v8, %v10463_v15  ;;  %v4574_v52 = vrot.slane %v1378_v48, %v10466_v16 }
  0xf4   : > { %v4575_v55 = vsel %vm14380_vm11, %v4574_v52, %v4570_v47  ;;  %1519 = vadd.xlane.f32.xlu1 %v396_v49  ;;  %1517 = vadd.xlane.f32.xlu0 %v395_v50  ;;  %v408_v49 = vld [vmem:[%s10301_s19 + $0x378] sm:$0xff]  ;;  %v407_v50 = vld [vmem:[%s10301_s19 + $0x370] sm:$0xff] }
  0xf5   : > { %v1384_v56 = vpop.xlane.xlu1 %1383  ;;  %v4580_v57 = vsel %vm4496_vm12, %v4579_v51, %v4575_v55  ;;  %v1382_v58 = vpop.xlane.xlu0 %1381 }
  0xf6   : > { %v4589_v61 = vrot.slane %v1384_v56, %v10479_v5  ;;  %v4584_v62 = vrot.slane %v1382_v58, %v10482_v35 }
  0xf8   : > { %v4585_v63 = vsel %vm4503_vm13, %v4584_v62, %v4580_v57  ;;  %1523 = vadd.xlane.f32.xlu1 %v398_v59  ;;  %1521 = vadd.xlane.f32.xlu0 %v397_v60  ;;  %v410_v59 = vld [vmem:[%s10301_s19 + $0x388] sm:$0xff]  ;;  %v409_v60 = vld [vmem:[%s10301_s19 + $0x380] sm:$0xff] }
  0xf9   : > { %v4590_v0 = vsel %vm4510_vm14, %v4589_v61, %v4585_v63  ;;  %v1388_v1 = vpop.xlane.xlu1 %1387  ;;  %v1386_v2 = vpop.xlane.xlu0 %1385 }
  0xfa   : > { %v10545_v9 = vsel %vm14375_vm15, %v4590_v0, %v10492_v45  ;;  %v4598_v10 = vrot.slane %v1388_v1, %v10396_v20  ;;  %v4594_v11 = vrot.slane %v1386_v2, %v10390_v18  ;;  %vm14376_vm15 = vcmask 1042434  }
  0xfc   : > { %v4599_v12 = vsel %vm4412_vm0, %v4598_v10, %v4594_v11  ;;  %1527 = vadd.xlane.f32.xlu1 %v400_v3  ;;  %1525 = vadd.xlane.f32.xlu0 %v399_v4  ;;  %v412_v3 = vld [vmem:[%s10301_s19 + $0x398] sm:$0xff]  ;;  %v411_v4 = vld [vmem:[%s10301_s19 + $0x390] sm:$0xff] }
  0xfd   : > { %v1392_v13 = vpop.xlane.xlu1 %1391  ;;  %v1390_v14 = vpop.xlane.xlu0 %1389 }
  0xfe   : > { %v4608_v23 = vrot.slane %v1392_v13, %v10393_v19  ;;  %v4603_v24 = vrot.slane %v1390_v14, %v10399_v21 }
 0x100   : > { %v4604_v45 = vsel %vm4419_vm1, %v4603_v24, %v4599_v12  ;;  %1531 = vadd.xlane.f32.xlu1 %v402_v17  ;;  %1529 = vadd.xlane.f32.xlu0 %v401_v22  ;;  %v414_v22 = vld [vmem:[%s10301_s19 + $0x3a8] sm:$0xff] }
 0x101   : > { %v1396_v25 = vpop.xlane.xlu1 %1395  ;;  %v4609_v28 = vsel %vm4426_vm2, %v4608_v23, %v4604_v45  ;;  %v1394_v29 = vpop.xlane.xlu0 %1393  ;;  %v413_v23 = vld [vmem:[%s10301_s19 + $0x3a0] sm:$0xff] }
 0x102   : > { %v4618_v32 = vrot.slane %v1396_v25, %v10404_v26  ;;  %v4613_v33 = vrot.slane %v1394_v29, %v10407_v27 }
 0x104   : > { %v4614_v34 = vsel %vm4433_vm3, %v4613_v33, %v4609_v28  ;;  %1535 = vadd.xlane.f32.xlu1 %v404_v30  ;;  %1533 = vadd.xlane.f32.xlu0 %v403_v31  ;;  %v416_v31 = vld [vmem:[%s10301_s19 + $0x3b8] sm:$0xff] }
 0x105   : > { %v1400_v36 = vpop.xlane.xlu1 %1399  ;;  %v4619_v37 = vsel %vm4440_vm4, %v4618_v32, %v4614_v34  ;;  %v1398_v38 = vpop.xlane.xlu0 %1397  ;;  %v415_v32 = vld [vmem:[%s10301_s19 + $0x3b0] sm:$0xff] }
 0x106   : > { %v4628_v42 = vrot.slane %v1400_v36, %v10428_v46  ;;  %v4623_v43 = vrot.slane %v1398_v38, %v10420_v40 }
 0x108   : > { %v4624_v44 = vsel %vm4447_vm5, %v4623_v43, %v4619_v37  ;;  %1539 = vadd.xlane.f32.xlu1 %v406_v39  ;;  %1537 = vadd.xlane.f32.xlu0 %v405_v41  ;;  %v418_v41 = vld [vmem:[%s10301_s19 + $0x3c8] sm:$0xff] }
 0x109   : > { %v1404_v8 = vpop.xlane.xlu1 %1403  ;;  %v4629_v47 = vsel %vm4454_vm6, %v4628_v42, %v4624_v44  ;;  %v1402_v48 = vpop.xlane.xlu0 %1401  ;;  %v417_v42 = vld [vmem:[%s10301_s19 + $0x3c0] sm:$0xff] }
 0x10a   : > { %v4638_v51 = vrot.slane %v1404_v8, %v10435_v53  ;;  %v4633_v52 = vrot.slane %v1402_v48, %v10438_v54 }
 0x10c   : > { %v4634_v55 = vsel %vm4461_vm7, %v4633_v52, %v4629_v47  ;;  %1543 = vadd.xlane.f32.xlu1 %v408_v49  ;;  %1541 = vadd.xlane.f32.xlu0 %v407_v50  ;;  %v420_v49 = vld [vmem:[%s10301_s19 + $0x3d8] sm:$0xff]  ;;  %v419_v50 = vld [vmem:[%s10301_s19 + $0x3d0] sm:$0xff] }
 0x10d   : > { %v1408_v56 = vpop.xlane.xlu1 %1407  ;;  %v4639_v57 = vsel %vm4468_vm8, %v4638_v51, %v4634_v55  ;;  %v1406_v58 = vpop.xlane.xlu0 %1405 }
 0x10e   : > { %v4648_v61 = vrot.slane %v1408_v56, %v10453_v6  ;;  %v4643_v62 = vrot.slane %v1406_v58, %v10456_v7 }
 0x110   : > { %v4644_v63 = vsel %vm4475_vm9, %v4643_v62, %v4639_v57  ;;  %1547 = vadd.xlane.f32.xlu1 %v410_v59  ;;  %1545 = vadd.xlane.f32.xlu0 %v409_v60  ;;  %v422_v59 = vld [vmem:[%s10301_s19 + $0x3e8] sm:$0xff]  ;;  %v421_v60 = vld [vmem:[%s10301_s19 + $0x3e0] sm:$0xff] }
 0x111   : > { %v1412_v0 = vpop.xlane.xlu1 %1411  ;;  %v4649_v1 = vsel %vm4482_vm10, %v4648_v61, %v4644_v63  ;;  %v1410_v2 = vpop.xlane.xlu0 %1409 }
 0x112   : > { %v4658_v10 = vrot.slane %v1412_v0, %v10463_v15  ;;  %v4653_v11 = vrot.slane %v1410_v2, %v10466_v16 }
 0x114   : > { %v4654_v12 = vsel %vm14380_vm11, %v4653_v11, %v4649_v1  ;;  %1551 = vadd.xlane.f32.xlu1 %v412_v3  ;;  %1549 = vadd.xlane.f32.xlu0 %v411_v4  ;;  %v424_v3 = vld [vmem:[%s10301_s19 + $0x3f8] sm:$0xff]  ;;  %v423_v4 = vld [vmem:[%s10301_s19 + $0x3f0] sm:$0xff] }
 0x115   : > { %v1416_v13 = vpop.xlane.xlu1 %1415  ;;  %v4659_v14 = vsel %vm4496_vm12, %v4658_v10, %v4654_v12  ;;  %v1414_v17 = vpop.xlane.xlu0 %1413 }
 0x116   : > { %v4668_v24 = vrot.slane %v1416_v13, %v10479_v5  ;;  %v4663_v45 = vrot.slane %v1414_v17, %v10482_v35 }
 0x118   : > { %v4664_v25 = vsel %vm4503_vm13, %v4663_v45, %v4659_v14  ;;  %1555 = vadd.xlane.f32.xlu1 %v414_v22  ;;  %1553 = vadd.xlane.f32.xlu0 %v413_v23  ;;  %v426_v22 = vld [vmem:[%s10301_s19 + $0x408] sm:$0xff]  ;;  %v425_v23 = vld [vmem:[%s10301_s19 + $0x400] sm:$0xff] }
 0x119   : > { %v4669_v28 = vsel %vm4510_vm14, %v4668_v24, %v4664_v25  ;;  %v1420_v29 = vpop.xlane.xlu1 %1419  ;;  %v1418_v30 = vpop.xlane.xlu0 %1417 }
 0x11a   : > { %v10596_v33 = vsel %vm14376_vm15, %v4669_v28, %v10545_v9  ;;  %v4677_v34 = vrot.slane %v1420_v29, %v10396_v20  ;;  %v4673_v36 = vrot.slane %v1418_v30, %v10390_v18  ;;  %vm14377_vm15 = vcmask 1043459  }
 0x11c   : > { %v4678_v37 = vsel %vm4412_vm0, %v4677_v34, %v4673_v36  ;;  %1559 = vadd.xlane.f32.xlu1 %v416_v31  ;;  %1557 = vadd.xlane.f32.xlu0 %v415_v32  ;;  %v428_v31 = vld [vmem:[%s10301_s19 + $0x418] sm:$0xff]  ;;  %v427_v32 = vld [vmem:[%s10301_s19 + $0x410] sm:$0xff] }
 0x11d   : > { %v1424_v38 = vpop.xlane.xlu1 %1423  ;;  %v1422_v39 = vpop.xlane.xlu0 %1421 }
 0x11e   : > { %v4687_v43 = vrot.slane %v1424_v38, %v10393_v19  ;;  %v4682_v44 = vrot.slane %v1422_v39, %v10399_v21 }
 0x120   : > { %v4683_v9 = vsel %vm4419_vm1, %v4682_v44, %v4678_v37  ;;  %1563 = vadd.xlane.f32.xlu1 %v418_v41  ;;  %1561 = vadd.xlane.f32.xlu0 %v417_v42  ;;  %v430_v42 = vld [vmem:[%s10301_s19 + $0x428] sm:$0xff] }
 0x121   : > { %v1428_v8 = vpop.xlane.xlu1 %1427  ;;  %v4688_v47 = vsel %vm4426_vm2, %v4687_v43, %v4683_v9  ;;  %v1426_v48 = vpop.xlane.xlu0 %1425  ;;  %v429_v43 = vld [vmem:[%s10301_s19 + $0x420] sm:$0xff] }
 0x122   : > { %v4697_v51 = vrot.slane %v1428_v8, %v10404_v26  ;;  %v4692_v52 = vrot.slane %v1426_v48, %v10407_v27 }
 0x124   : > { %v4693_v55 = vsel %vm4433_vm3, %v4692_v52, %v4688_v47  ;;  %1567 = vadd.xlane.f32.xlu1 %v420_v49  ;;  %1565 = vadd.xlane.f32.xlu0 %v419_v50  ;;  %v432_v50 = vld [vmem:[%s10301_s19 + $0x438] sm:$0xff] }
 0x125   : > { %v1432_v56 = vpop.xlane.xlu1 %1431  ;;  %v4698_v57 = vsel %vm4440_vm4, %v4697_v51, %v4693_v55  ;;  %v1430_v58 = vpop.xlane.xlu0 %1429  ;;  %v431_v51 = vld [vmem:[%s10301_s19 + $0x430] sm:$0xff] }
 0x126   : > { %v4707_v61 = vrot.slane %v1432_v56, %v10428_v46  ;;  %v4702_v62 = vrot.slane %v1430_v58, %v10420_v40 }
 0x128   : > { %v4703_v63 = vsel %vm4447_vm5, %v4702_v62, %v4698_v57  ;;  %1571 = vadd.xlane.f32.xlu1 %v422_v59  ;;  %1569 = vadd.xlane.f32.xlu0 %v421_v60  ;;  %v434_v60 = vld [vmem:[%s10301_s19 + $0x448] sm:$0xff] }
 0x129   : > { %v1436_v0 = vpop.xlane.xlu1 %1435  ;;  %v4708_v1 = vsel %vm4454_vm6, %v4707_v61, %v4703_v63  ;;  %v1434_v2 = vpop.xlane.xlu0 %1433  ;;  %v433_v61 = vld [vmem:[%s10301_s19 + $0x440] sm:$0xff] }
 0x12a   : > { %v4717_v10 = vrot.slane %v1436_v0, %v10435_v53  ;;  %v4712_v11 = vrot.slane %v1434_v2, %v10438_v54 }
 0x12c   : > { %v4713_v12 = vsel %vm4461_vm7, %v4712_v11, %v4708_v1  ;;  %1575 = vadd.xlane.f32.xlu1 %v424_v3  ;;  %1573 = vadd.xlane.f32.xlu0 %v423_v4  ;;  %v436_v3 = vld [vmem:[%s10301_s19 + $0x458] sm:$0xff]  ;;  %v435_v4 = vld [vmem:[%s10301_s19 + $0x450] sm:$0xff] }
 0x12d   : > { %v1440_v13 = vpop.xlane.xlu1 %1439  ;;  %v4718_v14 = vsel %vm4468_vm8, %v4717_v10, %v4713_v12  ;;  %v1438_v17 = vpop.xlane.xlu0 %1437 }
 0x12e   : > { %v4727_v24 = vrot.slane %v1440_v13, %v10453_v6  ;;  %v4722_v45 = vrot.slane %v1438_v17, %v10456_v7 }
 0x130   : > { %v4723_v25 = vsel %vm4475_vm9, %v4722_v45, %v4718_v14  ;;  %1579 = vadd.xlane.f32.xlu1 %v426_v22  ;;  %1577 = vadd.xlane.f32.xlu0 %v425_v23  ;;  %v438_v22 = vld [vmem:[%s10301_s19 + $0x468] sm:$0xff]  ;;  %v437_v23 = vld [vmem:[%s10301_s19 + $0x460] sm:$0xff] }
 0x131   : > { %v1444_v28 = vpop.xlane.xlu1 %1443  ;;  %v4728_v29 = vsel %vm4482_vm10, %v4727_v24, %v4723_v25  ;;  %v1442_v30 = vpop.xlane.xlu0 %1441 }
 0x132   : > { %v4737_v34 = vrot.slane %v1444_v28, %v10463_v15  ;;  %v4732_v36 = vrot.slane %v1442_v30, %v10466_v16 }
 0x134   : > { %v4733_v37 = vsel %vm14380_vm11, %v4732_v36, %v4728_v29  ;;  %1583 = vadd.xlane.f32.xlu1 %v428_v31  ;;  %1581 = vadd.xlane.f32.xlu0 %v427_v32  ;;  %v440_v31 = vld [vmem:[%s10301_s19 + $0x478] sm:$0xff]  ;;  %v439_v32 = vld [vmem:[%s10301_s19 + $0x470] sm:$0xff] }
 0x135   : > { %v1448_v38 = vpop.xlane.xlu1 %1447  ;;  %v4738_v39 = vsel %vm4496_vm12, %v4737_v34, %v4733_v37  ;;  %v1446_v41 = vpop.xlane.xlu0 %1445 }
 0x136   : > { %v4747_v44 = vrot.slane %v1448_v38, %v10479_v5  ;;  %v4742_v9 = vrot.slane %v1446_v41, %v10482_v35 }
 0x138   : > { %v4743_v8 = vsel %vm4503_vm13, %v4742_v9, %v4738_v39  ;;  %1587 = vadd.xlane.f32.xlu1 %v430_v42  ;;  %1585 = vadd.xlane.f32.xlu0 %v429_v43  ;;  %v442_v42 = vld [vmem:[%s10301_s19 + $0x488] sm:$0xff]  ;;  %v441_v43 = vld [vmem:[%s10301_s19 + $0x480] sm:$0xff] }
 0x139   : > { %v4748_v47 = vsel %vm4510_vm14, %v4747_v44, %v4743_v8  ;;  %v1452_v48 = vpop.xlane.xlu1 %1451  ;;  %v1450_v49 = vpop.xlane.xlu0 %1449 }
 0x13a   : > { %v4756_v52 = vrot.slane %v1452_v48, %v10396_v20  ;;  %v4752_v55 = vrot.slane %v1450_v49, %v10390_v18  ;;  %v10649_v56 = vsel %vm14377_vm15, %v4748_v47, %v10596_v33  ;;  %vm14378_vm15 = vcmask 1044484  }
 0x13c   : > { %v4757_v57 = vsel %vm4412_vm0, %v4756_v52, %v4752_v55  ;;  %1591 = vadd.xlane.f32.xlu1 %v432_v50  ;;  %1589 = vadd.xlane.f32.xlu0 %v431_v51  ;;  %v444_v50 = vld [vmem:[%s10301_s19 + $0x498] sm:$0xff]  ;;  %v443_v51 = vld [vmem:[%s10301_s19 + $0x490] sm:$0xff] }
 0x13d   : > { %v1456_v58 = vpop.xlane.xlu1 %1455  ;;  %v1454_v59 = vpop.xlane.xlu0 %1453 }
 0x13e   : > { %v4766_v62 = vrot.slane %v1456_v58, %v10393_v19  ;;  %v4761_v63 = vrot.slane %v1454_v59, %v10399_v21 }
 0x140   : > { %v4762_v0 = vsel %vm4419_vm1, %v4761_v63, %v4757_v57  ;;  %1595 = vadd.xlane.f32.xlu1 %v434_v60  ;;  %1593 = vadd.xlane.f32.xlu0 %v433_v61  ;;  %v446_v61 = vld [vmem:[%s10301_s19 + $0x4a8] sm:$0xff] }
 0x141   : > { %v1460_v33 = vpop.xlane.xlu1 %1459  ;;  %v4767_v1 = vsel %vm4426_vm2, %v4766_v62, %v4762_v0  ;;  %v1458_v2 = vpop.xlane.xlu0 %1457  ;;  %v445_v62 = vld [vmem:[%s10301_s19 + $0x4a0] sm:$0xff] }
 0x142   : > { %v4776_v10 = vrot.slane %v1460_v33, %v10404_v26  ;;  %v4771_v11 = vrot.slane %v1458_v2, %v10407_v27 }
 0x144   : > { %v4772_v12 = vsel %vm4433_vm3, %v4771_v11, %v4767_v1  ;;  %1599 = vadd.xlane.f32.xlu1 %v436_v3  ;;  %1597 = vadd.xlane.f32.xlu0 %v435_v4  ;;  %v448_v4 = vld [vmem:[%s10301_s19 + $0x4b8] sm:$0xff] }
 0x145   : > { %v1464_v13 = vpop.xlane.xlu1 %1463  ;;  %v4777_v14 = vsel %vm4440_vm4, %v4776_v10, %v4772_v12  ;;  %v1462_v17 = vpop.xlane.xlu0 %1461  ;;  %v447_v10 = vld [vmem:[%s10301_s19 + $0x4b0] sm:$0xff] }
 0x146   : > { %v4786_v24 = vrot.slane %v1464_v13, %v10428_v46  ;;  %v4781_v45 = vrot.slane %v1462_v17, %v10420_v40 }
 0x148   : > { %v4782_v25 = vsel %vm4447_vm5, %v4781_v45, %v4777_v14  ;;  %1603 = vadd.xlane.f32.xlu1 %v438_v22  ;;  %1601 = vadd.xlane.f32.xlu0 %v437_v23  ;;  %v450_v23 = vld [vmem:[%s10301_s19 + $0x4c8] sm:$0xff] }
 0x149   : > { %v1468_v28 = vpop.xlane.xlu1 %1467  ;;  %v4787_v29 = vsel %vm4454_vm6, %v4786_v24, %v4782_v25  ;;  %v1466_v30 = vpop.xlane.xlu0 %1465  ;;  %v449_v24 = vld [vmem:[%s10301_s19 + $0x4c0] sm:$0xff] }
 0x14a   : > { %v4796_v34 = vrot.slane %v1468_v28, %v10435_v53  ;;  %v4791_v36 = vrot.slane %v1466_v30, %v10438_v54 }
 0x14c   : > { %v4792_v37 = vsel %vm4461_vm7, %v4791_v36, %v4787_v29  ;;  %1607 = vadd.xlane.f32.xlu1 %v440_v31  ;;  %1605 = vadd.xlane.f32.xlu0 %v439_v32  ;;  %v452_v31 = vld [vmem:[%s10301_s19 + $0x4d8] sm:$0xff]  ;;  %v451_v32 = vld [vmem:[%s10301_s19 + $0x4d0] sm:$0xff] }
 0x14d   : > { %v1472_v38 = vpop.xlane.xlu1 %1471  ;;  %v4797_v39 = vsel %vm4468_vm8, %v4796_v34, %v4792_v37  ;;  %v1470_v41 = vpop.xlane.xlu0 %1469 }
 0x14e   : > { %v4806_v44 = vrot.slane %v1472_v38, %v10453_v6  ;;  %v4801_v9 = vrot.slane %v1470_v41, %v10456_v7 }
 0x150   : > { %v4802_v8 = vsel %vm4475_vm9, %v4801_v9, %v4797_v39  ;;  %1611 = vadd.xlane.f32.xlu1 %v442_v42  ;;  %1609 = vadd.xlane.f32.xlu0 %v441_v43  ;;  %v454_v42 = vld [vmem:[%s10301_s19 + $0x4e8] sm:$0xff]  ;;  %v453_v43 = vld [vmem:[%s10301_s19 + $0x4e0] sm:$0xff] }
 0x151   : > { %v1476_v47 = vpop.xlane.xlu1 %1475  ;;  %v4807_v48 = vsel %vm4482_vm10, %v4806_v44, %v4802_v8  ;;  %v1474_v49 = vpop.xlane.xlu0 %1473 }
 0x152   : > { %v4816_v52 = vrot.slane %v1476_v47, %v10463_v15  ;;  %v4811_v55 = vrot.slane %v1474_v49, %v10466_v16 }
 0x154   : > { %v4812_v57 = vsel %vm14380_vm11, %v4811_v55, %v4807_v48  ;;  %1615 = vadd.xlane.f32.xlu1 %v444_v50  ;;  %1613 = vadd.xlane.f32.xlu0 %v443_v51  ;;  %v456_v50 = vld [vmem:[%s10301_s19 + $0x4f8] sm:$0xff]  ;;  %v455_v51 = vld [vmem:[%s10301_s19 + $0x4f0] sm:$0xff] }
 0x155   : > { %v1480_v58 = vpop.xlane.xlu1 %1479  ;;  %v4817_v59 = vsel %vm4496_vm12, %v4816_v52, %v4812_v57  ;;  %v1478_v60 = vpop.xlane.xlu0 %1477 }
 0x156   : > { %v4826_v63 = vrot.slane %v1480_v58, %v10479_v5  ;;  %v4821_v0 = vrot.slane %v1478_v60, %v10482_v35 }
 0x158   : > { %v4822_v33 = vsel %vm4503_vm13, %v4821_v0, %v4817_v59  ;;  %1619 = vadd.xlane.f32.xlu1 %v446_v61  ;;  %1617 = vadd.xlane.f32.xlu0 %v445_v62  ;;  %v458_v61 = vld [vmem:[%s10301_s19 + $0x508] sm:$0xff]  ;;  %v457_v62 = vld [vmem:[%s10301_s19 + $0x500] sm:$0xff] }
 0x159   : > { %v4827_v1 = vsel %vm4510_vm14, %v4826_v63, %v4822_v33  ;;  %v1484_v2 = vpop.xlane.xlu1 %1483  ;;  %v1482_v3 = vpop.xlane.xlu0 %1481 }
 0x15a   : > { %v4835_v11 = vrot.slane %v1484_v2, %v10396_v20  ;;  %v4831_v12 = vrot.slane %v1482_v3, %v10390_v18  ;;  %v10700_v13 = vsel %vm14378_vm15, %v4827_v1, %v10649_v56  ;;  %vm14379_vm15 = vcmask 1045509  }
 0x15c   : > { %v4836_v14 = vsel %vm4412_vm0, %v4835_v11, %v4831_v12  ;;  %1623 = vadd.xlane.f32.xlu1 %v448_v4  ;;  %1621 = vadd.xlane.f32.xlu0 %v447_v10  ;;  %v460_v4 = vld [vmem:[%s10301_s19 + $0x518] sm:$0xff]  ;;  %v459_v10 = vld [vmem:[%s10301_s19 + $0x510] sm:$0xff] }
 0x15d   : > { %v1488_v17 = vpop.xlane.xlu1 %1487  ;;  %v1486_v22 = vpop.xlane.xlu0 %1485 }
 0x15e   : > { %v4845_v45 = vrot.slane %v1488_v17, %v10393_v19  ;;  %v4840_v25 = vrot.slane %v1486_v22, %v10399_v21 }
 0x160   : > { %v4841_v28 = vsel %vm4419_vm1, %v4840_v25, %v4836_v14  ;;  %1627 = vadd.xlane.f32.xlu1 %v450_v23  ;;  %1625 = vadd.xlane.f32.xlu0 %v449_v24  ;;  %v462_v24 = vld [vmem:[%s10301_s19 + $0x528] sm:$0xff] }
 0x161   : > { %v1492_v56 = vpop.xlane.xlu1 %1491  ;;  %v4846_v29 = vsel %vm4426_vm2, %v4845_v45, %v4841_v28  ;;  %v1490_v30 = vpop.xlane.xlu0 %1489  ;;  %v461_v45 = vld [vmem:[%s10301_s19 + $0x520] sm:$0xff] }
 0x162   : > { %v4855_v34 = vrot.slane %v1492_v56, %v10404_v26  ;;  %v4850_v36 = vrot.slane %v1490_v30, %v10407_v27 }
 0x164   : > { %v4851_v37 = vsel %vm4433_vm3, %v4850_v36, %v4846_v29  ;;  %1631 = vadd.xlane.f32.xlu1 %v452_v31  ;;  %1629 = vadd.xlane.f32.xlu0 %v451_v32  ;;  %v464_v31 = vld [vmem:[%s10301_s19 + $0x538] sm:$0xff]  ;;  %v463_v32 = vld [vmem:[%s10301_s19 + $0x530] sm:$0xff] }
 0x165   : > { %v1496_v38 = vpop.xlane.xlu1 %1495  ;;  %v4856_v39 = vsel %vm4440_vm4, %v4855_v34, %v4851_v37  ;;  %v1494_v41 = vpop.xlane.xlu0 %1493 }
 0x166   : > { %v4865_v44 = vrot.slane %v1496_v38, %v10428_v46  ;;  %v4860_v9 = vrot.slane %v1494_v41, %v10420_v40  ;;  %v465_v41 = vld [vmem:[%s10301_s19 + $0x540] sm:$0xff] }
 0x168   : > { %v4861_v8 = vsel %vm4447_vm5, %v4860_v9, %v4856_v39  ;;  %1635 = vadd.xlane.f32.xlu1 %v454_v42  ;;  %1633 = vadd.xlane.f32.xlu0 %v453_v43  ;;  %v466_v39 = vld [vmem:[%s10301_s19 + $0x548] sm:$0xff]  ;;  %v467_v9 = vld [vmem:[%s10301_s19 + $0x550] sm:$0xff] }
 0x169   : > { %v1500_v47 = vpop.xlane.xlu1 %1499  ;;  %v4866_v48 = vsel %vm4454_vm6, %v4865_v44, %v4861_v8  ;;  %v1498_v49 = vpop.xlane.xlu0 %1497  ;;  %v468_v44 = vld [vmem:[%s10301_s19 + $0x558] sm:$0xff] }
 0x16a   : > { %v4875_v52 = vrot.slane %v1500_v47, %v10435_v53  ;;  %v4870_v55 = vrot.slane %v1498_v49, %v10438_v54  ;;  %v470_v47 = vld [vmem:[%s10301_s19 + $0x568] sm:$0xff] }
 0x16c   : > { %v4871_v57 = vsel %vm4461_vm7, %v4870_v55, %v4866_v48  ;;  %1639 = vadd.xlane.f32.xlu1 %v456_v50  ;;  %1637 = vadd.xlane.f32.xlu0 %v455_v51  ;;  %v469_v48 = vld [vmem:[%s10301_s19 + $0x560] sm:$0xff]  ;;  %v472_v51 = vld [vmem:[%s10301_s19 + $0x578] sm:$0xff] }
 0x16d   : > { %v1504_v58 = vpop.xlane.xlu1 %1503  ;;  %v4876_v59 = vsel %vm4468_vm8, %v4875_v52, %v4871_v57  ;;  %v1502_v60 = vpop.xlane.xlu0 %1501  ;;  %v471_v52 = vld [vmem:[%s10301_s19 + $0x570] sm:$0xff] }
 0x16e   : > { %v4885_v63 = vrot.slane %v1504_v58, %v10453_v6  ;;  %v4880_v0 = vrot.slane %v1502_v60, %v10456_v7  ;;  %v474_v58 = vld [vmem:[%s10301_s19 + $0x588] sm:$0xff] }
 0x170   : > { %v4881_v33 = vsel %vm4475_vm9, %v4880_v0, %v4876_v59  ;;  %1643 = vadd.xlane.f32.xlu1 %v458_v61  ;;  %1641 = vadd.xlane.f32.xlu0 %v457_v62  ;;  %v473_v59 = vld [vmem:[%s10301_s19 + $0x580] sm:$0xff]  ;;  %v476_v62 = vld [vmem:[%s10301_s19 + $0x598] sm:$0xff] }
 0x171   : > { %v1508_v1 = vpop.xlane.xlu1 %1507  ;;  %v4886_v2 = vsel %vm4482_vm10, %v4885_v63, %v4881_v33  ;;  %v1506_v3 = vpop.xlane.xlu0 %1505  ;;  %v475_v63 = vld [vmem:[%s10301_s19 + $0x590] sm:$0xff] }
 0x172   : > { %v4895_v11 = vrot.slane %v1508_v1, %v10463_v15  ;;  %v4890_v12 = vrot.slane %v1506_v3, %v10466_v16  ;;  %v478_v1 = vld [vmem:[%s10301_s19 + $0x5a8] sm:$0xff] }
 0x174   : > { %v4891_v14 = vsel %vm14380_vm11, %v4890_v12, %v4886_v2  ;;  %1647 = vadd.xlane.f32.xlu1 %v460_v4  ;;  %1645 = vadd.xlane.f32.xlu0 %v459_v10  ;;  %v477_v2 = vld [vmem:[%s10301_s19 + $0x5a0] sm:$0xff] }
 0x175   : > { %v1512_v17 = vpop.xlane.xlu1 %1511  ;;  %v4896_v22 = vsel %vm4496_vm12, %v4895_v11, %v4891_v14  ;;  %v1510_v23 = vpop.xlane.xlu0 %1509  ;;  %v480_v14 = vld [vmem:[%s10301_s19 + $0x5b8] sm:$0xff] }
 0x176   : > { %v4905_v25 = vrot.slane %v1512_v17, %v10479_v5  ;;  %v4900_v28 = vrot.slane %v1510_v23, %v10482_v35  ;;  %v479_v17 = vld [vmem:[%s10301_s19 + $0x5b0] sm:$0xff] }
 0x178   : > { %v4901_v56 = vsel %vm4503_vm13, %v4900_v28, %v4896_v22  ;;  %1651 = vadd.xlane.f32.xlu1 %v462_v24  ;;  %1649 = vadd.xlane.f32.xlu0 %v461_v45 }
 0x179   : > { %v1516_v29 = vpop.xlane.xlu1 %1515  ;;  %v1514_v30 = vpop.xlane.xlu0 %1513  ;;  %v4906_v34 = vsel %vm4510_vm14, %v4905_v25, %v4901_v56 }
 0x17a   : > { %v10749_v36 = vsel %vm14379_vm15, %v4906_v34, %v10700_v13  ;;  %v4914_v3 = vrot.slane %v1516_v29, %v10396_v20  ;;  %v4910_v4 = vrot.slane %v1514_v30, %v10390_v18  ;;  %v482_v30 = vld [vmem:[%s10301_s19 + $0x5c8] sm:$0xff]  ;;  %vm9499_vm15 = vcmask 1046534  }
 0x17c   : > { %1655 = vadd.xlane.f32.xlu1 %v464_v31  ;;  %1653 = vadd.xlane.f32.xlu0 %v463_v32  ;;  %v4915_v22 = vsel %vm4412_vm0, %v4914_v3, %v4910_v4  ;;  %v481_v31 = vld [vmem:[%s10301_s19 + $0x5c0] sm:$0xff]  ;;  %v486_v3 = vld [vmem:[%s10301_s19 + $0x5e8] sm:$0xff] }
 0x17d   : > { %v10751_v37 = vpop.xlane.xlu1 %1519  ;;  %v1518_v38 = vpop.xlane.xlu0 %1517  ;;  %v485_v4 = vld [vmem:[%s10301_s19 + $0x5e0] sm:$0xff] }
 0x17e   : > { %v4919_v10 = vrot.slane %v1518_v38, %v10399_v21  ;;  %v4924_v23 = vrot.slane %v10751_v37, %v10393_v19 }
 0x180   : > { %1659 = vadd.xlane.f32.xlu1 %v466_v39  ;;  %1657 = vadd.xlane.f32.xlu0 %v465_v41  ;;  %v4920_v24 = vsel %vm4419_vm1, %v4919_v10, %v4915_v22 }
 0x181   : > { %v10755_v42 = vpop.xlane.xlu1 %1523  ;;  %v1522_v43 = vpop.xlane.xlu0 %1521  ;;  %v4925_v34 = vsel %vm4426_vm2, %v4924_v23, %v4920_v24 }
 0x182   : > { %v4929_v45 = vrot.slane %v1522_v43, %v10407_v27  ;;  %v4934_v32 = vrot.slane %v10755_v42, %v10404_v26 }
 0x184   : > { %1663 = vadd.xlane.f32.xlu1 %v468_v44  ;;  %1661 = vadd.xlane.f32.xlu0 %v467_v9  ;;  %v4930_v38 = vsel %vm4433_vm3, %v4929_v45, %v4925_v34  ;;  %v488_v45 = vld [vmem:[%s10301_s19 + $0x5f8] sm:$0xff] }
 0x185   : > { %v10759_v13 = vpop.xlane.xlu1 %1527  ;;  %v10761_v8 = vpop.xlane.xlu0 %1525 }
 0x186   : > { %v4939_v39 = vrot.slane %v10761_v8, %v10420_v40 }
 0x188   : > { %1667 = vadd.xlane.f32.xlu1 %v470_v47  ;;  %1665 = vadd.xlane.f32.xlu0 %v469_v48  ;;  %v484_v47 = vld [vmem:[%s10301_s19 + $0x5d8] sm:$0xff]  ;;  %v483_v48 = vld [vmem:[%s10301_s19 + $0x5d0] sm:$0xff] }
 0x189   : > { %v10765_v49 = vpop.xlane.xlu1 %1531  ;;  %v10767_v50 = vpop.xlane.xlu0 %1529 }
 0x18a   : > { %v4954_v10 = vrot.slane %v10765_v49, %v10435_v53 }
 0x18c   : > { %1671 = vadd.xlane.f32.xlu1 %v472_v51  ;;  %1669 = vadd.xlane.f32.xlu0 %v471_v52  ;;  %v4944_v51 = vrot.slane %v10759_v13, %v10428_v46  ;;  %v4935_v52 = vsel %vm4440_vm4, %v4934_v32, %v4930_v38  ;;  %v490_v38 = vld [vmem:[%s10301_s19 + $0x608] sm:$0xff] }
 0x18d   : > { %v10771_v55 = vpop.xlane.xlu1 %1535  ;;  %v10773_v57 = vpop.xlane.xlu0 %1533 }
 0x190   : > { %1675 = vadd.xlane.f32.xlu1 %v474_v58  ;;  %1673 = vadd.xlane.f32.xlu0 %v473_v59  ;;  %v4940_v58 = vsel %vm4447_vm5, %v4939_v39, %v4935_v52  ;;  %v4949_v59 = vrot.slane %v10767_v50, %v10438_v54  ;;  %v489_v39 = vld [vmem:[%s10301_s19 + $0x600] sm:$0xff]  ;;  %v492_v52 = vld [vmem:[%s10301_s19 + $0x618] sm:$0xff] }
 0x191   : > { %v10777_v60 = vpop.xlane.xlu1 %1539  ;;  %v10779_v61 = vpop.xlane.xlu0 %1537  ;;  %v4945_v50 = vsel %vm4454_vm6, %v4944_v51, %v4940_v58 }
 0x194   : > { %1679 = vadd.xlane.f32.xlu1 %v476_v62  ;;  %1677 = vadd.xlane.f32.xlu0 %v475_v63 }
 0x195   : > { %v10783_v0 = vpop.xlane.xlu1 %1543  ;;  %v10785_v33 = vpop.xlane.xlu0 %1541 }
 0x196   : > { %v4984_v58 = vrot.slane %v10783_v0, %v10479_v5  ;;  %v493_v0 = vld [vmem:[%s10301_s19 + $0x620] sm:$0xff] }
 0x198   : > { %1683 = vadd.xlane.f32.xlu1 %v478_v1  ;;  %1681 = vadd.xlane.f32.xlu0 %v477_v2 }
 0x199   : > { %v1548_v11 = vpop.xlane.xlu1 %1547  ;;  %v1546_v12 = vpop.xlane.xlu0 %1545 }
 0x19a   : > { %v4993_v25 = vrot.slane %v1548_v11, %v10396_v20  ;;  %v4989_v28 = vrot.slane %v1546_v12, %v10390_v18  ;;  %v4950_v12 = vsel %vm4461_vm7, %v4949_v59, %v4945_v50 }
 0x19c   : > { %1687 = vadd.xlane.f32.xlu1 %v480_v14  ;;  %1685 = vadd.xlane.f32.xlu0 %v479_v17  ;;  %v4994_v41 = vsel %vm4412_vm0, %v4993_v25, %v4989_v28  ;;  %v4959_v14 = vrot.slane %v10773_v57, %v10456_v7  ;;  %v487_v25 = vld [vmem:[%s10301_s19 + $0x5f0] sm:$0xff]  ;;  %v4964_v28 = vrot.slane %v10771_v55, %v10453_v6 }
 0x19d   : > { %v1552_v56 = vpop.xlane.xlu1 %1551  ;;  %v1550_v29 = vpop.xlane.xlu0 %1549  ;;  %v4955_v57 = vsel %vm4468_vm8, %v4954_v10, %v4950_v12 }
 0x19e   : > { %v4998_v37 = vrot.slane %v1550_v29, %v10399_v21  ;;  %v5003_v43 = vrot.slane %v1552_v56, %v10393_v19  ;;  %v4960_v29 = vsel %vm4475_vm9, %v4959_v14, %v4955_v57  ;;  %v3369_v14 = vld [vmem:[%s10884_s14] sm:$0xff] }
 0x1a0   : > { %v4999_v44 = vsel %vm4419_vm1, %v4998_v37, %v4994_v41  ;;  %1691 = vadd.xlane.f32.xlu1 %v482_v30  ;;  %1689 = vadd.xlane.f32.xlu0 %v481_v31  ;;  %v4969_v30 = vrot.slane %v10779_v61, %v10466_v16  ;;  %v4974_v41 = vrot.slane %v10777_v60, %v10463_v15 }
 0x1a1   : > { %v1556_v9 = vpop.xlane.xlu1 %1555  ;;  %v1554_v42 = vpop.xlane.xlu0 %1553  ;;  %v5004_v63 = vsel %vm4426_vm2, %v5003_v43, %v4999_v44  ;;  %v4965_v43 = vsel %vm4482_vm10, %v4964_v28, %v4960_v29 }
 0x1a2   : > { %v5008_v8 = vrot.slane %v1554_v42, %v10407_v27  ;;  %v5013_v62 = vrot.slane %v1556_v9, %v10404_v26  ;;  %v4970_v44 = vsel %vm14380_vm11, %v4969_v30, %v4965_v43  ;;  %v4979_v9 = vrot.slane %v10785_v33, %v10482_v35 }
 0x1a3   : > { %v4975_v33 = vsel %vm4496_vm12, %v4974_v41, %v4970_v44  ;;  %v499_v44 = vld [vmem:[%s10301_s19 + $0x650] sm:$0xff] }
 0x1a4   : > { %v5009_v1 = vsel %vm4433_vm3, %v5008_v8, %v5004_v63  ;;  %1695 = vadd.xlane.f32.xlu1 %v484_v47  ;;  %1693 = vadd.xlane.f32.xlu0 %v483_v48  ;;  %v491_v8 = vld [vmem:[%s10301_s19 + $0x610] sm:$0xff] }
 0x1a5   : > { %v1560_v2 = vpop.xlane.xlu1 %1559  ;;  %v1558_v13 = vpop.xlane.xlu0 %1557  ;;  %v5014_v22 = vsel %vm4440_vm4, %v5013_v62, %v5009_v1  ;;  %v4980_v62 = vsel %vm4503_vm13, %v4979_v9, %v4975_v33 }
 0x1a6   : > { %v5018_v11 = vrot.slane %v1558_v13, %v10420_v40  ;;  %v5023_v17 = vrot.slane %v1560_v2, %v10428_v46 }
 0x1a8   : > { %v5019_v23 = vsel %vm4447_vm5, %v5018_v11, %v5014_v22  ;;  %1699 = vadd.xlane.f32.xlu1 %v486_v3  ;;  %1697 = vadd.xlane.f32.xlu0 %v485_v4  ;;  %v494_v4 = vld [vmem:[%s10301_s19 + $0x628] sm:$0xff]  ;;  %v4985_v11 = vsel %vm4510_vm14, %v4984_v58, %v4980_v62 }
 0x1a9   : > { %v1564_v49 = vpop.xlane.xlu1 %1563  ;;  %v1562_v24 = vpop.xlane.xlu0 %1561  ;;  %v5024_v32 = vsel %vm4454_vm6, %v5023_v17, %v5019_v23 }
 0x1aa   : > { %v5028_v56 = vrot.slane %v1562_v24, %v10438_v54  ;;  %v5033_v31 = vrot.slane %v1564_v49, %v10435_v53  ;;  %v496_v49 = vld [vmem:[%s10301_s19 + $0x638] sm:$0xff]  ;;  %v495_v24 = vld [vmem:[%s10301_s19 + $0x630] sm:$0xff] }
 0x1ac   : > { %v5029_v34 = vsel %vm4461_vm7, %v5028_v56, %v5024_v32  ;;  %1703 = vadd.xlane.f32.xlu1 %v488_v45  ;;  %1701 = vadd.xlane.f32.xlu0 %v487_v25  ;;  %v9500_v25 = vsel %vm9499_vm15, %v4985_v11, %v10749_v36 }
 0x1ad   : > { %v1568_v37 = vpop.xlane.xlu1 %1567  ;;  %v1566_v55 = vpop.xlane.xlu0 %1565  ;;  %v5034_v47 = vsel %vm4468_vm8, %v5033_v31, %v5029_v34  ;;  %v498_v34 = vld [vmem:[%s10301_s19 + $0x648] sm:$0xff] }
 0x1ae   : > { %v5038_v61 = vrot.slane %v1566_v55, %v10456_v7  ;;  %v5043_v42 = vrot.slane %v1568_v37, %v10453_v6  ;;  %v497_v37 = vld [vmem:[%s10301_s19 + $0x640] sm:$0xff] }
 0x1b0   : > { %v5039_v48 = vsel %vm4475_vm9, %v5038_v61, %v5034_v47  ;;  %1707 = vadd.xlane.f32.xlu1 %v490_v38  ;;  %1705 = vadd.xlane.f32.xlu0 %v489_v39  ;;  %v500_v61 = vld [vmem:[%s10301_s19 + $0x658] sm:$0xff] }
 0x1b1   : > { %v1572_v60 = vpop.xlane.xlu1 %1571  ;;  %v1570_v51 = vpop.xlane.xlu0 %1569  ;;  %v5044_v1 = vsel %vm4482_vm10, %v5043_v42, %v5039_v48 }
 0x1b2   : > { %v5048_v59 = vrot.slane %v1570_v51, %v10466_v16  ;;  %v5053_v63 = vrot.slane %v1572_v60, %v10463_v15 }
 0x1b4   : > { %v5049_v2 = vsel %vm14380_vm11, %v5048_v59, %v5044_v1  ;;  %1711 = vadd.xlane.f32.xlu1 %v492_v52  ;;  %1709 = vadd.xlane.f32.xlu0 %v491_v8  ;;  %vm14381_vm11 = vcmask 1047559   ;;  %v502_v52 = vld [vmem:[%s10301_s19 + $0x668] sm:$0xff]  ;;  %v501_v8 = vld [vmem:[%s10301_s19 + $0x660] sm:$0xff] }
 0x1b5   : > { %v1576_v13 = vpop.xlane.xlu1 %1575  ;;  %v1574_v3 = vpop.xlane.xlu0 %1573  ;;  %v5054_v12 = vsel %vm4496_vm12, %v5053_v63, %v5049_v2  ;;  %v504_v2 = vld [vmem:[%s10301_s19 + $0x678] sm:$0xff] }
 0x1b6   : > { %v5063_v10 = vrot.slane %v1576_v13, %v10479_v5  ;;  %v5058_v50 = vrot.slane %v1574_v3, %v10482_v35  ;;  %v503_v13 = vld [vmem:[%s10301_s19 + $0x670] sm:$0xff] }
 0x1b8   : > { %1715 = vadd.xlane.f32.xlu1 %v494_v4  ;;  %1713 = vadd.xlane.f32.xlu0 %v493_v0  ;;  %v5059_v17 = vsel %vm4503_vm13, %v5058_v50, %v5054_v12  ;;  %v506_v12 = vld [vmem:[%s10301_s19 + $0x688] sm:$0xff] }
 0x1b9   : > { %v1580_v22 = vpop.xlane.xlu1 %1579  ;;  %v1578_v23 = vpop.xlane.xlu0 %1577  ;;  %v5064_v45 = vsel %vm4510_vm14, %v5063_v10, %v5059_v17 }
 0x1ba   : > { %v5072_v28 = vrot.slane %v1580_v22, %v10396_v20  ;;  %v5068_v57 = vrot.slane %v1578_v23, %v10390_v18  ;;  %v9502_v56 = vsel %vm14381_vm11, %v5064_v45, %v9500_v25  ;;  %v508_v25 = vld [vmem:[%s10301_s19 + $0x698] sm:$0xff]  ;;  %vm14386_vm11 = vcmask 851712  }
 0x1bb   : > { %v9560_v29 = vmul.f32 %v9502_v56, %v3369_v14  ;;  %v505_v14 = vld [vmem:[%s10301_s19 + $0x680] sm:$0xff] }
 0x1bc   : > { %v5073_v30 = vsel %vm4412_vm0, %v5072_v28, %v5068_v57  ;;  %1719 = vadd.xlane.f32.xlu1 %v496_v49  ;;  %1717 = vadd.xlane.f32.xlu0 %v495_v24  ;;  %v507_v28 = vld [vmem:[%s10301_s19 + $0x690] sm:$0xff] }
 0x1bd   : > { %v1584_v31 = vpop.xlane.xlu1 %1583  ;;  %10019 = vmatprep.mubr.f32.mxu0 %v9560_v29  ;;  %v1582_v32 = vpop.xlane.xlu0 %1581 }
 0x1be   : > { %v5082_v36 = vrot.slane %v1584_v31, %v10393_v19  ;;  %v5077_v55 = vrot.slane %v1582_v32, %v10399_v21 }
 0x1c0   : > { %v5078_v38 = vsel %vm4419_vm1, %v5077_v55, %v5073_v30  ;;  %1723 = vadd.xlane.f32.xlu1 %v498_v34  ;;  %1721 = vadd.xlane.f32.xlu0 %v497_v37  ;;  %v510_v34 = vld [vmem:[%s10301_s19 + $0x6a8] sm:$0xff]  ;;  %v509_v37 = vld [vmem:[%s10301_s19 + $0x6a0] sm:$0xff] }
 0x1c1   : > { %v1588_v39 = vpop.xlane.xlu1 %1587  ;;  %v5083_v41 = vsel %vm4426_vm2, %v5082_v36, %v5078_v38  ;;  %v1586_v43 = vpop.xlane.xlu0 %1585 }
 0x1c2   : > { %v5092_v9 = vrot.slane %v1588_v39, %v10404_v26  ;;  %v5087_v42 = vrot.slane %v1586_v43, %v10407_v27 }
 0x1c4   : > { %v5088_v47 = vsel %vm4433_vm3, %v5087_v42, %v5083_v41  ;;  %1727 = vadd.xlane.f32.xlu1 %v500_v61  ;;  %1725 = vadd.xlane.f32.xlu0 %v499_v44  ;;  %v512_v61 = vld [vmem:[%s10301_s19 + $0x6b8] sm:$0xff]  ;;  %v511_v44 = vld [vmem:[%s10301_s19 + $0x6b0] sm:$0xff] }
 0x1c5   : > { %v1592_v48 = vpop.xlane.xlu1 %1591  ;;  %v5093_v60 = vsel %vm4440_vm4, %v5092_v9, %v5088_v47  ;;  %v1590_v51 = vpop.xlane.xlu0 %1589 }
 0x1c6   : > { %v5102_v58 = vrot.slane %v1592_v48, %v10428_v46  ;;  %v5097_v33 = vrot.slane %v1590_v51, %v10420_v40  ;;  %v514_v51 = vld [vmem:[%s10301_s19 + $0x6c8] sm:$0xff] }
 0x1c8   : > { %v5098_v59 = vsel %vm4447_vm5, %v5097_v33, %v5093_v60  ;;  %1731 = vadd.xlane.f32.xlu1 %v502_v52  ;;  %1729 = vadd.xlane.f32.xlu0 %v501_v8  ;;  %v513_v52 = vld [vmem:[%s10301_s19 + $0x6c0] sm:$0xff] }
 0x1c9   : > { %v1596_v62 = vpop.xlane.xlu1 %1595  ;;  %v5103_v63 = vsel %vm4454_vm6, %v5102_v58, %v5098_v59  ;;  %v1594_v1 = vpop.xlane.xlu0 %1593 }
 0x1ca   : > { %v5112_v3 = vrot.slane %v1596_v62, %v10435_v53  ;;  %v5107_v4 = vrot.slane %v1594_v1, %v10438_v54  ;;  %v516_v1 = vld [vmem:[%s10301_s19 + $0x6d8] sm:$0xff] }
 0x1cc   : > { %v5108_v0 = vsel %vm4461_vm7, %v5107_v4, %v5103_v63  ;;  %1735 = vadd.xlane.f32.xlu1 %v504_v2  ;;  %1733 = vadd.xlane.f32.xlu0 %v503_v13  ;;  %v515_v2 = vld [vmem:[%s10301_s19 + $0x6d0] sm:$0xff] }
 0x1cd   : > { %v1600_v10 = vpop.xlane.xlu1 %1599  ;;  %v5113_v50 = vsel %vm4468_vm8, %v5112_v3, %v5108_v0  ;;  %v1598_v11 = vpop.xlane.xlu0 %1597 }
 0x1ce   : > { %v5122_v17 = vrot.slane %v1600_v10, %v10453_v6  ;;  %v5117_v22 = vrot.slane %v1598_v11, %v10456_v7  ;;  %v518_v11 = vld [vmem:[%s10301_s19 + $0x6e8] sm:$0xff] }
 0x1d0   : > { %v5118_v23 = vsel %vm4475_vm9, %v5117_v22, %v5113_v50  ;;  %1739 = vadd.xlane.f32.xlu1 %v506_v12  ;;  %1737 = vadd.xlane.f32.xlu0 %v505_v14  ;;  %v517_v12 = vld [vmem:[%s10301_s19 + $0x6e0] sm:$0xff] }
 0x1d1   : > { %v1604_v49 = vpop.xlane.xlu1 %1603  ;;  %v5123_v24 = vsel %vm4482_vm10, %v5122_v17, %v5118_v23  ;;  %v1602_v45 = vpop.xlane.xlu0 %1601 }
 0x1d2   : > { %v5132_v57 = vrot.slane %v1604_v49, %v10463_v15  ;;  %v5127_v56 = vrot.slane %v1602_v45, %v10466_v16  ;;  %v520_v45 = vld [vmem:[%s10301_s19 + $0x6f8] sm:$0xff] }
 0x1d4   : > { %v5128_v29 = vsel %vm14386_vm11, %v5127_v56, %v5123_v24  ;;  %1743 = vadd.xlane.f32.xlu1 %v508_v25  ;;  %1741 = vadd.xlane.f32.xlu0 %v507_v28  ;;  %v519_v25 = vld [vmem:[%s10301_s19 + $0x6f0] sm:$0xff] }
 0x1d5   : > { %v1608_v30 = vpop.xlane.xlu1 %1607  ;;  %v5133_v31 = vsel %vm4496_vm12, %v5132_v57, %v5128_v29  ;;  %v1606_v32 = vpop.xlane.xlu0 %1605 }
 0x1d6   : > { %v5142_v36 = vrot.slane %v1608_v30, %v10479_v5  ;;  %v5137_v55 = vrot.slane %v1606_v32, %v10482_v35  ;;  %v522_v32 = vld [vmem:[%s10301_s19 + $0x708] sm:$0xff] }
 0x1d8   : > { %v5138_v38 = vsel %vm4503_vm13, %v5137_v55, %v5133_v31  ;;  %1747 = vadd.xlane.f32.xlu1 %v510_v34  ;;  %1745 = vadd.xlane.f32.xlu0 %v509_v37  ;;  %v521_v34 = vld [vmem:[%s10301_s19 + $0x700] sm:$0xff] }
 0x1d9   : > { %v10943_v39 = vsel %vm4510_vm14, %v5142_v36, %v5138_v38  ;;  %v1612_v41 = vpop.xlane.xlu1 %1611  ;;  %v1610_v43 = vpop.xlane.xlu0 %1609 }
 0x1da   : > { %v5151_v9 = vrot.slane %v1612_v41, %v10396_v20  ;;  %v5147_v42 = vrot.slane %v1610_v43, %v10390_v18 }
 0x1dc   : > { %v5152_v47 = vsel %vm4412_vm0, %v5151_v9, %v5147_v42  ;;  %1751 = vadd.xlane.f32.xlu1 %v512_v61  ;;  %1749 = vadd.xlane.f32.xlu0 %v511_v44  ;;  %v524_v61 = vld [vmem:[%s10301_s19 + $0x718] sm:$0xff]  ;;  %v523_v44 = vld [vmem:[%s10301_s19 + $0x710] sm:$0xff] }
 0x1dd   : > { %v1616_v48 = vpop.xlane.xlu1 %1615  ;;  %v1614_v60 = vpop.xlane.xlu0 %1613 }
 0x1de   : > { %v5161_v8 = vrot.slane %v1616_v48, %v10393_v19  ;;  %v5156_v58 = vrot.slane %v1614_v60, %v10399_v21 }
 0x1e0   : > { %v5157_v33 = vsel %vm4419_vm1, %v5156_v58, %v5152_v47  ;;  %1755 = vadd.xlane.f32.xlu1 %v514_v51  ;;  %1753 = vadd.xlane.f32.xlu0 %v513_v52  ;;  %v526_v52 = vld [vmem:[%s10301_s19 + $0x728] sm:$0xff] }
 0x1e1   : > { %v1620_v59 = vpop.xlane.xlu1 %1619  ;;  %v5162_v62 = vsel %vm4426_vm2, %v5161_v8, %v5157_v33  ;;  %v1618_v63 = vpop.xlane.xlu0 %1617  ;;  %v525_v8 = vld [vmem:[%s10301_s19 + $0x720] sm:$0xff] }
 0x1e2   : > { %v5171_v13 = vrot.slane %v1620_v59, %v10404_v26  ;;  %v5166_v3 = vrot.slane %v1618_v63, %v10407_v27 }
 0x1e4   : > { %v5167_v4 = vsel %vm4433_vm3, %v5166_v3, %v5162_v62  ;;  %1759 = vadd.xlane.f32.xlu1 %v516_v1  ;;  %1757 = vadd.xlane.f32.xlu0 %v515_v2  ;;  %v528_v2 = vld [vmem:[%s10301_s19 + $0x738] sm:$0xff] }
 0x1e5   : > { %v1624_v0 = vpop.xlane.xlu1 %1623  ;;  %v5172_v10 = vsel %vm4440_vm4, %v5171_v13, %v5167_v4  ;;  %v1622_v50 = vpop.xlane.xlu0 %1621  ;;  %v527_v13 = vld [vmem:[%s10301_s19 + $0x730] sm:$0xff] }
 0x1e6   : > { %v5181_v14 = vrot.slane %v1624_v0, %v10428_v46  ;;  %v5176_v17 = vrot.slane %v1622_v50, %v10420_v40 }
 0x1e8   : > { %v5177_v22 = vsel %vm4447_vm5, %v5176_v17, %v5172_v10  ;;  %1763 = vadd.xlane.f32.xlu1 %v518_v11  ;;  %1761 = vadd.xlane.f32.xlu0 %v517_v12  ;;  %v530_v12 = vld [vmem:[%s10301_s19 + $0x748] sm:$0xff] }
 0x1e9   : > { %v1628_v23 = vpop.xlane.xlu1 %1627  ;;  %v5182_v49 = vsel %vm4454_vm6, %v5181_v14, %v5177_v22  ;;  %v1626_v24 = vpop.xlane.xlu0 %1625  ;;  %v529_v14 = vld [vmem:[%s10301_s19 + $0x740] sm:$0xff] }
 0x1ea   : > { %v5191_v28 = vrot.slane %v1628_v23, %v10435_v53  ;;  %v5186_v57 = vrot.slane %v1626_v24, %v10438_v54 }
 0x1ec   : > { %v5187_v56 = vsel %vm4461_vm7, %v5186_v57, %v5182_v49  ;;  %1767 = vadd.xlane.f32.xlu1 %v520_v45  ;;  %1765 = vadd.xlane.f32.xlu0 %v519_v25  ;;  %v532_v45 = vld [vmem:[%s10301_s19 + $0x758] sm:$0xff]  ;;  %v531_v25 = vld [vmem:[%s10301_s19 + $0x750] sm:$0xff] }
 0x1ed   : > { %v1632_v29 = vpop.xlane.xlu1 %1631  ;;  %v5192_v30 = vsel %vm4468_vm8, %v5191_v28, %v5187_v56  ;;  %v1630_v31 = vpop.xlane.xlu0 %1629 }
 0x1ee   : > { %v5201_v37 = vrot.slane %v1632_v29, %v10453_v6  ;;  %v5196_v36 = vrot.slane %v1630_v31, %v10456_v7 }
 0x1f0   : > { %v5197_v55 = vsel %vm4475_vm9, %v5196_v36, %v5192_v30  ;;  %1771 = vadd.xlane.f32.xlu1 %v522_v32  ;;  %1769 = vadd.xlane.f32.xlu0 %v521_v34  ;;  %v534_v32 = vld [vmem:[%s10301_s19 + $0x768] sm:$0xff]  ;;  %v533_v34 = vld [vmem:[%s10301_s19 + $0x760] sm:$0xff] }
 0x1f1   : > { %v1636_v38 = vpop.xlane.xlu1 %1635  ;;  %v5202_v41 = vsel %vm4482_vm10, %v5201_v37, %v5197_v55  ;;  %v1634_v43 = vpop.xlane.xlu0 %1633 }
 0x1f2   : > { %v5211_v9 = vrot.slane %v1636_v38, %v10463_v15  ;;  %v5206_v42 = vrot.slane %v1634_v43, %v10466_v16 }
 0x1f4   : > { %v5207_v47 = vsel %vm14386_vm11, %v5206_v42, %v5202_v41  ;;  %1775 = vadd.xlane.f32.xlu1 %v524_v61  ;;  %1773 = vadd.xlane.f32.xlu0 %v523_v44  ;;  %vm14387_vm11 = vcmask 1041409   ;;  %v536_v61 = vld [vmem:[%s10301_s19 + $0x778] sm:$0xff]  ;;  %v535_v44 = vld [vmem:[%s10301_s19 + $0x770] sm:$0xff] }
 0x1f5   : > { %v1640_v48 = vpop.xlane.xlu1 %1639  ;;  %v5212_v60 = vsel %vm4496_vm12, %v5211_v9, %v5207_v47  ;;  %v1638_v51 = vpop.xlane.xlu0 %1637 }
 0x1f6   : > { %v5221_v58 = vrot.slane %v1640_v48, %v10479_v5  ;;  %v5216_v33 = vrot.slane %v1638_v51, %v10482_v35 }
 0x1f8   : > { %v5217_v59 = vsel %vm4503_vm13, %v5216_v33, %v5212_v60  ;;  %1779 = vadd.xlane.f32.xlu1 %v526_v52  ;;  %1777 = vadd.xlane.f32.xlu0 %v525_v8  ;;  %v538_v52 = vld [vmem:[%s10301_s19 + $0x788] sm:$0xff]  ;;  %v537_v8 = vld [vmem:[%s10301_s19 + $0x780] sm:$0xff] }
 0x1f9   : > { %v5222_v62 = vsel %vm4510_vm14, %v5221_v58, %v5217_v59  ;;  %v1644_v63 = vpop.xlane.xlu1 %1643  ;;  %v1642_v1 = vpop.xlane.xlu0 %1641 }
 0x1fa   : > { %v10996_v3 = vsel %vm14387_vm11, %v5222_v62, %v10943_v39  ;;  %v5230_v4 = vrot.slane %v1644_v63, %v10396_v20  ;;  %v5226_v0 = vrot.slane %v1642_v1, %v10390_v18  ;;  %vm14388_vm11 = vcmask 851712  }
 0x1fc   : > { %v5231_v10 = vsel %vm4412_vm0, %v5230_v4, %v5226_v0  ;;  %1783 = vadd.xlane.f32.xlu1 %v528_v2  ;;  %1781 = vadd.xlane.f32.xlu0 %v527_v13  ;;  %v540_v2 = vld [vmem:[%s10301_s19 + $0x798] sm:$0xff]  ;;  %v539_v13 = vld [vmem:[%s10301_s19 + $0x790] sm:$0xff] }
 0x1fd   : > { %v1648_v50 = vpop.xlane.xlu1 %1647  ;;  %v1646_v11 = vpop.xlane.xlu0 %1645 }
 0x1fe   : > { %v5240_v17 = vrot.slane %v1648_v50, %v10393_v19  ;;  %v5235_v22 = vrot.slane %v1646_v11, %v10399_v21 }
 0x200   : > { %v5236_v39 = vsel %vm4419_vm1, %v5235_v22, %v5231_v10  ;;  %1787 = vadd.xlane.f32.xlu1 %v530_v12  ;;  %1785 = vadd.xlane.f32.xlu0 %v529_v14  ;;  %v542_v14 = vld [vmem:[%s10301_s19 + $0x7a8] sm:$0xff] }
 0x201   : > { %v1652_v23 = vpop.xlane.xlu1 %1651  ;;  %v5241_v49 = vsel %vm4426_vm2, %v5240_v17, %v5236_v39  ;;  %v1650_v24 = vpop.xlane.xlu0 %1649  ;;  %v541_v17 = vld [vmem:[%s10301_s19 + $0x7a0] sm:$0xff] }
 0x202   : > { %v5250_v28 = vrot.slane %v1652_v23, %v10404_v26  ;;  %v5245_v57 = vrot.slane %v1650_v24, %v10407_v27 }
 0x204   : > { %v5246_v56 = vsel %vm4433_vm3, %v5245_v57, %v5241_v49  ;;  %1791 = vadd.xlane.f32.xlu1 %v532_v45  ;;  %1789 = vadd.xlane.f32.xlu0 %v531_v25  ;;  %v544_v25 = vld [vmem:[%s10301_s19 + $0x7b8] sm:$0xff] }
 0x205   : > { %v1656_v29 = vpop.xlane.xlu1 %1655  ;;  %v5251_v30 = vsel %vm4440_vm4, %v5250_v28, %v5246_v56  ;;  %v1654_v31 = vpop.xlane.xlu0 %1653  ;;  %v543_v28 = vld [vmem:[%s10301_s19 + $0x7b0] sm:$0xff] }
 0x206   : > { %v5260_v37 = vrot.slane %v1656_v29, %v10428_v46  ;;  %v5255_v36 = vrot.slane %v1654_v31, %v10420_v40  ;;  %v9583_v31 = vld [vmem:[%s14369_s2 + $0x78] sm:$0xff] }
 0x207   : > { %9987 = vmatprep.subr.mxu0 %v9583_v31 }
 0x208   : > { %v5256_v55 = vsel %vm4447_vm5, %v5255_v36, %v5251_v30  ;;  %1795 = vadd.xlane.f32.xlu1 %v534_v32  ;;  %1793 = vadd.xlane.f32.xlu0 %v533_v34  ;;  %v545_v36 = vld [vmem:[%s10301_s19 + $0x7c0] sm:$0xff] }
 0x209   : > { %v1660_v38 = vpop.xlane.xlu1 %1659  ;;  %v5261_v41 = vsel %vm4454_vm6, %v5260_v37, %v5256_v55  ;;  %v1658_v43 = vpop.xlane.xlu0 %1657  ;;  %v546_v37 = vld [vmem:[%s10301_s19 + $0x7c8] sm:$0xff]  ;;  %9988 = vmatpush3.msra.mxu0 %v9583_v31 }
 0x20a   : > { %v5270_v9 = vrot.slane %v1660_v38, %v10435_v53  ;;  %v5265_v42 = vrot.slane %v1658_v43, %v10438_v54  ;;  %v9582_v38 = vld [vmem:[%s14369_s2 + $0x70] sm:$0xff]  ;;  %v9581_v43 = vld [vmem:[%s14369_s2 + $0x68] sm:$0xff] }
 0x20b   : > { %9989 = vmatprep.subr.mxu0 %v9582_v38 }
 0x20c   : > { %v5266_v47 = vsel %vm4461_vm7, %v5265_v42, %v5261_v41  ;;  %1799 = vadd.xlane.f32.xlu1 %v536_v61  ;;  %1797 = vadd.xlane.f32.xlu0 %v535_v44  ;;  %v548_v42 = vld [vmem:[%s10301_s19 + $0x7d8] sm:$0xff] }
 0x20d   : > { %v1664_v48 = vpop.xlane.xlu1 %1663  ;;  %v5271_v60 = vsel %vm4468_vm8, %v5270_v9, %v5266_v47  ;;  %v1662_v51 = vpop.xlane.xlu0 %1661  ;;  %v547_v47 = vld [vmem:[%s10301_s19 + $0x7d0] sm:$0xff]  ;;  %9990 = vmatpush3.msra.mxu0 %v9582_v38 }
 0x20e   : > { %v5280_v58 = vrot.slane %v1664_v48, %v10453_v6  ;;  %v5275_v33 = vrot.slane %v1662_v51, %v10456_v7  ;;  %9991 = vmatprep.subr.mxu0 %v9581_v43  ;;  %v9580_v51 = vld [vmem:[%s14369_s2 + $0x60] sm:$0xff] }
 0x20f   : > { %9992 = vmatpush3.msra.mxu0 %v9581_v43 }
 0x210   : > { %v5276_v59 = vsel %vm4475_vm9, %v5275_v33, %v5271_v60  ;;  %1803 = vadd.xlane.f32.xlu1 %v538_v52  ;;  %1801 = vadd.xlane.f32.xlu0 %v537_v8  ;;  %v9579_v8 = vld [vmem:[%s14369_s2 + $0x58] sm:$0xff] }
 0x211   : > { %v1668_v62 = vpop.xlane.xlu1 %1667  ;;  %v5281_v63 = vsel %vm4482_vm10, %v5280_v58, %v5276_v59  ;;  %v1666_v1 = vpop.xlane.xlu0 %1665  ;;  %9993 = vmatprep.subr.mxu0 %v9580_v51 }
 0x212   : > { %v5290_v4 = vrot.slane %v1668_v62, %v10463_v15  ;;  %v5285_v0 = vrot.slane %v1666_v1, %v10466_v16  ;;  %v550_v62 = vld [vmem:[%s10301_s19 + $0x7e8] sm:$0xff]  ;;  %9994 = vmatpush3.msra.mxu0 %v9580_v51 }
 0x213   : > { %9995 = vmatprep.subr.mxu0 %v9579_v8 }
 0x214   : > { %v5286_v10 = vsel %vm14388_vm11, %v5285_v0, %v5281_v63  ;;  %1807 = vadd.xlane.f32.xlu1 %v540_v2  ;;  %1805 = vadd.xlane.f32.xlu0 %v539_v13  ;;  %vm14389_vm11 = vcmask 1042434   ;;  %v549_v63 = vld [vmem:[%s10301_s19 + $0x7e0] sm:$0xff]  ;;  %v9578_v13 = vld [vmem:[%s14369_s2 + $0x50] sm:$0xff] }
 0x215   : > { %v1672_v50 = vpop.xlane.xlu1 %1671  ;;  %v5291_v11 = vsel %vm4496_vm12, %v5290_v4, %v5286_v10  ;;  %v1670_v12 = vpop.xlane.xlu0 %1669  ;;  %9996 = vmatpush3.msra.mxu0 %v9579_v8 }
 0x216   : > { %v5300_v22 = vrot.slane %v1672_v50, %v10479_v5  ;;  %v5295_v39 = vrot.slane %v1670_v12, %v10482_v35  ;;  %v551_v12 = vld [vmem:[%s10301_s19 + $0x7f0] sm:$0xff]  ;;  %9997 = vmatprep.subr.mxu0 %v9578_v13 }
 0x217   : > { %9998 = vmatpush3.msra.mxu0 %v9578_v13 }
 0x218   : > { %v5296_v23 = vsel %vm4503_vm13, %v5295_v39, %v5291_v11  ;;  %1811 = vadd.xlane.f32.xlu1 %v542_v14  ;;  %1809 = vadd.xlane.f32.xlu0 %v541_v17  ;;  %v552_v11 = vld [vmem:[%s10301_s19 + $0x7f8] sm:$0xff] }
 0x219   : > { %v5301_v49 = vsel %vm4510_vm14, %v5300_v22, %v5296_v23  ;;  %v1676_v24 = vpop.xlane.xlu1 %1675  ;;  %v1674_v45 = vpop.xlane.xlu0 %1673  ;;  %v9577_v22 = vld [vmem:[%s14369_s2 + $0x48] sm:$0xff]  ;;  %v9576_v23 = vld [vmem:[%s14369_s2 + $0x40] sm:$0xff] }
 0x21a   : > { %v11047_v57 = vsel %vm14389_vm11, %v5301_v49, %v10996_v3  ;;  %v5309_v56 = vrot.slane %v1676_v24, %v10396_v20  ;;  %v5305_v29 = vrot.slane %v1674_v45, %v10390_v18  ;;  %9999 = vmatprep.subr.mxu0 %v9577_v22  ;;  %vm14390_vm11 = vcmask 851712  }
 0x21b   : > { %10000 = vmatpush3.msra.mxu0 %v9577_v22  ;;  %v9569_v22 = vld [vmem:[%s14369_s2 + $0x8] sm:$0xff] }
 0x21c   : > { %v5310_v30 = vsel %vm4412_vm0, %v5309_v56, %v5305_v29  ;;  %1815 = vadd.xlane.f32.xlu1 %v544_v25  ;;  %1813 = vadd.xlane.f32.xlu0 %v543_v28  ;;  %v554_v25 = vld [vmem:[%s10301_s19 + $0x808] sm:$0xff]  ;;  %v553_v28 = vld [vmem:[%s10301_s19 + $0x800] sm:$0xff] }
 0x21d   : > { %v1680_v32 = vpop.xlane.xlu1 %1679  ;;  %v1678_v34 = vpop.xlane.xlu0 %1677  ;;  %10001 = vmatprep.subr.mxu0 %v9576_v23 }
 0x21e   : > { %v5319_v3 = vrot.slane %v1680_v32, %v10393_v19  ;;  %v5314_v55 = vrot.slane %v1678_v34, %v10399_v21  ;;  %10002 = vmatpush3.msra.mxu0 %v9576_v23 }
 0x220   : > { %v5315_v41 = vsel %vm4419_vm1, %v5314_v55, %v5310_v30  ;;  %1819 = vadd.xlane.f32.xlu1 %v546_v37  ;;  %1817 = vadd.xlane.f32.xlu0 %v545_v36  ;;  %v9575_v30 = vld [vmem:[%s14369_s2 + $0x38] sm:$0xff] }
 0x221   : > { %v1684_v61 = vpop.xlane.xlu1 %1683  ;;  %v5320_v44 = vsel %vm4426_vm2, %v5319_v3, %v5315_v41  ;;  %v1682_v9 = vpop.xlane.xlu0 %1681  ;;  %v556_v36 = vld [vmem:[%s10301_s19 + $0x818] sm:$0xff]  ;;  %v555_v3 = vld [vmem:[%s10301_s19 + $0x810] sm:$0xff]  ;;  %10003 = vmatprep.subr.mxu0 %v9575_v30 }
 0x222   : > { %v5329_v48 = vrot.slane %v1684_v61, %v10404_v26  ;;  %v5324_v60 = vrot.slane %v1682_v9, %v10407_v27  ;;  %v9574_v41 = vld [vmem:[%s14369_s2 + $0x30] sm:$0xff]  ;;  %10004 = vmatpush3.msra.mxu0 %v9575_v30  ;;  %v9573_v61 = vld [vmem:[%s14369_s2 + $0x28] sm:$0xff] }
 0x223   : > { %10005 = vmatprep.subr.mxu0 %v9574_v41 }
 0x224   : > { %v5325_v52 = vsel %vm4433_vm3, %v5324_v60, %v5320_v44  ;;  %1823 = vadd.xlane.f32.xlu1 %v548_v42  ;;  %1821 = vadd.xlane.f32.xlu0 %v547_v47  ;;  %v558_v47 = vld [vmem:[%s10301_s19 + $0x828] sm:$0xff] }
 0x225   : > { %v1688_v58 = vpop.xlane.xlu1 %1687  ;;  %v5330_v33 = vsel %vm4440_vm4, %v5329_v48, %v5325_v52  ;;  %v1686_v59 = vpop.xlane.xlu0 %1685  ;;  %v557_v48 = vld [vmem:[%s10301_s19 + $0x820] sm:$0xff]  ;;  %10006 = vmatpush3.msra.mxu0 %v9574_v41 }
 0x226   : > { %v5339_v1 = vrot.slane %v1688_v58, %v10428_v46  ;;  %v5334_v2 = vrot.slane %v1686_v59, %v10420_v40  ;;  %10007 = vmatprep.subr.mxu0 %v9573_v61  ;;  %v9572_v52 = vld [vmem:[%s14369_s2 + $0x20] sm:$0xff] }
 0x227   : > { %10008 = vmatpush3.msra.mxu0 %v9573_v61 }
 0x228   : > { %v5335_v4 = vsel %vm4447_vm5, %v5334_v2, %v5330_v33  ;;  %1827 = vadd.xlane.f32.xlu1 %v550_v62  ;;  %1825 = vadd.xlane.f32.xlu0 %v549_v63  ;;  %v560_v62 = vld [vmem:[%s10301_s19 + $0x838] sm:$0xff]  ;;  %v559_v63 = vld [vmem:[%s10301_s19 + $0x830] sm:$0xff] }
 0x229   : > { %v1692_v0 = vpop.xlane.xlu1 %1691  ;;  %v5340_v10 = vsel %vm4454_vm6, %v5339_v1, %v5335_v4  ;;  %v1690_v50 = vpop.xlane.xlu0 %1689  ;;  %10009 = vmatprep.subr.mxu0 %v9572_v52  ;;  %v9571_v4 = vld [vmem:[%s14369_s2 + $0x18] sm:$0xff] }
 0x22a   : > { %v5349_v14 = vrot.slane %v1692_v0, %v10435_v53  ;;  %v5344_v17 = vrot.slane %v1690_v50, %v10438_v54  ;;  %10010 = vmatpush3.msra.mxu0 %v9572_v52 }
 0x22b   : > { %10011 = vmatprep.subr.mxu0 %v9571_v4 }
 0x22c   : > { %v5345_v39 = vsel %vm4461_vm7, %v5344_v17, %v5340_v10  ;;  %1831 = vadd.xlane.f32.xlu1 %v552_v11  ;;  %1829 = vadd.xlane.f32.xlu0 %v551_v12  ;;  %v9570_v10 = vld [vmem:[%s14369_s2 + $0x10] sm:$0xff]  ;;  %v562_v11 = vld [vmem:[%s10301_s19 + $0x848] sm:$0xff]  ;;  %v561_v12 = vld [vmem:[%s10301_s19 + $0x840] sm:$0xff] }
 0x22d   : > { %v1696_v49 = vpop.xlane.xlu1 %1695  ;;  %v5350_v24 = vsel %vm4468_vm8, %v5349_v14, %v5345_v39  ;;  %v1694_v45 = vpop.xlane.xlu0 %1693  ;;  %10012 = vmatpush3.msra.mxu0 %v9571_v4  ;;  %v572_v4 = vld [vmem:[%s10301_s19 + $0x898] sm:$0xff] }
 0x22e   : > { %v5359_v56 = vrot.slane %v1696_v49, %v10453_v6  ;;  %v5354_v29 = vrot.slane %v1694_v45, %v10456_v7  ;;  %10013 = vmatprep.subr.mxu0 %v9570_v10  ;;  %v564_v45 = vld [vmem:[%s10301_s19 + $0x858] sm:$0xff] }
 0x22f   : > { %10014 = vmatpush3.msra.mxu0 %v9570_v10 }
 0x230   : > { %v5355_v31 = vsel %vm4475_vm9, %v5354_v29, %v5350_v24  ;;  %1835 = vadd.xlane.f32.xlu1 %v554_v25  ;;  %1833 = vadd.xlane.f32.xlu0 %v553_v28  ;;  %v563_v25 = vld [vmem:[%s10301_s19 + $0x850] sm:$0xff]  ;;  %v9568_v29 = vld [vmem:[%s14369_s2] sm:$0xff] }
 0x231   : > { %v1700_v32 = vpop.xlane.xlu1 %1699  ;;  %v5360_v34 = vsel %vm4482_vm10, %v5359_v56, %v5355_v31  ;;  %v1698_v37 = vpop.xlane.xlu0 %1697  ;;  %10015 = vmatprep.subr.mxu0 %v9569_v22 }
 0x232   : > { %v5369_v55 = vrot.slane %v1700_v32, %v10463_v15  ;;  %v5364_v38 = vrot.slane %v1698_v37, %v10466_v16  ;;  %10016 = vmatpush3.msra.mxu0 %v9569_v22  ;;  %v566_v37 = vld [vmem:[%s10301_s19 + $0x868] sm:$0xff]  ;;  %v573_v22 = vld [vmem:[%s10301_s19 + $0x8a0] sm:$0xff] }
 0x233   : > { %10017 = vmatprep.subr.mxu0 %v9568_v29 }
 0x234   : > { %v5365_v43 = vsel %vm14390_vm11, %v5364_v38, %v5360_v34  ;;  %1839 = vadd.xlane.f32.xlu1 %v556_v36  ;;  %1837 = vadd.xlane.f32.xlu0 %v555_v3  ;;  %vm14391_vm11 = vcmask 1043459   ;;  %v565_v36 = vld [vmem:[%s10301_s19 + $0x860] sm:$0xff] }
 0x235   : > { %v1704_v44 = vpop.xlane.xlu1 %1703  ;;  %v5370_v9 = vsel %vm4496_vm12, %v5369_v55, %v5365_v43  ;;  %v1702_v42 = vpop.xlane.xlu0 %1701  ;;  %10018 = vmatpush3.msra.mxu0 %v9568_v29 }
 0x236   : > { %v5379_v60 = vrot.slane %v1704_v44, %v10479_v5  ;;  %v5374_v51 = vrot.slane %v1702_v42, %v10482_v35  ;;  %v568_v44 = vld [vmem:[%s10301_s19 + $0x878] sm:$0xff] }
 0x238   : > { %v5375_v8 = vsel %vm4503_vm13, %v5374_v51, %v5370_v9  ;;  %1843 = vadd.xlane.f32.xlu1 %v558_v47  ;;  %1841 = vadd.xlane.f32.xlu0 %v557_v48  ;;  %v567_v9 = vld [vmem:[%s10301_s19 + $0x870] sm:$0xff] }
 0x239   : > { %v5380_v58 = vsel %vm4510_vm14, %v5379_v60, %v5375_v8  ;;  %v1708_v33 = vpop.xlane.xlu1 %1707  ;;  %v1706_v59 = vpop.xlane.xlu0 %1705  ;;  %v570_v8 = vld [vmem:[%s10301_s19 + $0x888] sm:$0xff] }
 0x23a   : > { %v11134_v1 = vsel %vm14391_vm11, %v5380_v58, %v11047_v57  ;;  %v5388_v2 = vrot.slane %v1708_v33, %v10396_v20  ;;  %v5384_v13 = vrot.slane %v1706_v59, %v10390_v18  ;;  %v569_v58 = vld [vmem:[%s10301_s19 + $0x880] sm:$0xff]  ;;  %vm14392_vm11 = vcmask 851712  }
 0x23c   : > { %v5389_v0 = vsel %vm4412_vm0, %v5388_v2, %v5384_v13  ;;  %1847 = vadd.xlane.f32.xlu1 %v560_v62  ;;  %1845 = vadd.xlane.f32.xlu0 %v559_v63 }
 0x23d   : > { %v1712_v57 = vpop.xlane.xlu1 %1711  ;;  %v1710_v50 = vpop.xlane.xlu0 %1709 }
 0x23e   : > { %v5398_v14 = vrot.slane %v1712_v57, %v10393_v19  ;;  %v5393_v17 = vrot.slane %v1710_v50, %v10399_v21 }
 0x240   : > { %v5394_v39 = vsel %vm4419_vm1, %v5393_v17, %v5389_v0  ;;  %1851 = vadd.xlane.f32.xlu1 %v562_v11  ;;  %1849 = vadd.xlane.f32.xlu0 %v561_v12  ;;  %v571_v0 = vld [vmem:[%s10301_s19 + $0x890] sm:$0xff]  ;;  %v574_v17 = vld [vmem:[%s10301_s19 + $0x8a8] sm:$0xff] }
 0x241   : > { %v1716_v23 = vpop.xlane.xlu1 %1715  ;;  %v5399_v49 = vsel %vm4426_vm2, %v5398_v14, %v5394_v39  ;;  %v1714_v24 = vpop.xlane.xlu0 %1713 }
 0x242   : > { %v5408_v28 = vrot.slane %v1716_v23, %v10404_v26  ;;  %v5403_v56 = vrot.slane %v1714_v24, %v10407_v27 }
 0x244   : > { %v5404_v30 = vsel %vm4433_vm3, %v5403_v56, %v5399_v49  ;;  %1855 = vadd.xlane.f32.xlu1 %v564_v45  ;;  %1853 = vadd.xlane.f32.xlu0 %v563_v25  ;;  %v575_v56 = vld [vmem:[%s10301_s19 + $0x8b0] sm:$0xff] }
 0x245   : > { %v1720_v31 = vpop.xlane.xlu1 %1719  ;;  %v5409_v32 = vsel %vm4440_vm4, %v5408_v28, %v5404_v30  ;;  %v1718_v34 = vpop.xlane.xlu0 %1717  ;;  %v576_v28 = vld [vmem:[%s10301_s19 + $0x8b8] sm:$0xff] }
 0x246   : > { %v5418_v3 = vrot.slane %v1720_v31, %v10428_v46  ;;  %v5413_v55 = vrot.slane %v1718_v34, %v10420_v40 }
 0x248   : > { %v5414_v38 = vsel %vm4447_vm5, %v5413_v55, %v5409_v32  ;;  %1859 = vadd.xlane.f32.xlu1 %v566_v37  ;;  %1857 = vadd.xlane.f32.xlu0 %v565_v36  ;;  %v578_v36 = vld [vmem:[%s10301_s19 + $0x8c8] sm:$0xff] }
 0x249   : > { %v1724_v41 = vpop.xlane.xlu1 %1723  ;;  %v5419_v43 = vsel %vm4454_vm6, %v5418_v3, %v5414_v38  ;;  %v1722_v61 = vpop.xlane.xlu0 %1721  ;;  %v577_v3 = vld [vmem:[%s10301_s19 + $0x8c0] sm:$0xff] }
 0x24a   : > { %v5428_v42 = vrot.slane %v1724_v41, %v10435_v53  ;;  %v5423_v47 = vrot.slane %v1722_v61, %v10438_v54 }
 0x24c   : > { %v5424_v48 = vsel %vm4461_vm7, %v5423_v47, %v5419_v43  ;;  %1863 = vadd.xlane.f32.xlu1 %v568_v44  ;;  %1861 = vadd.xlane.f32.xlu0 %v567_v9  ;;  %v580_v44 = vld [vmem:[%s10301_s19 + $0x8d8] sm:$0xff]  ;;  %v579_v9 = vld [vmem:[%s10301_s19 + $0x8d0] sm:$0xff] }
 0x24d   : > { %v1728_v60 = vpop.xlane.xlu1 %1727  ;;  %v5429_v51 = vsel %vm4468_vm8, %v5428_v42, %v5424_v48  ;;  %v1726_v52 = vpop.xlane.xlu0 %1725 }
 0x24e   : > { %v5438_v33 = vrot.slane %v1728_v60, %v10453_v6  ;;  %v5433_v59 = vrot.slane %v1726_v52, %v10456_v7 }
 0x250   : > { %v5434_v62 = vsel %vm4475_vm9, %v5433_v59, %v5429_v51  ;;  %1867 = vadd.xlane.f32.xlu1 %v570_v8  ;;  %1865 = vadd.xlane.f32.xlu0 %v569_v58  ;;  %v582_v8 = vld [vmem:[%s10301_s19 + $0x8e8] sm:$0xff]  ;;  %v581_v58 = vld [vmem:[%s10301_s19 + $0x8e0] sm:$0xff] }
 0x251   : > { %v1732_v63 = vpop.xlane.xlu1 %1731  ;;  %v5439_v2 = vsel %vm4482_vm10, %v5438_v33, %v5434_v62  ;;  %v1730_v13 = vpop.xlane.xlu0 %1729 }
 0x252   : > { %v5448_v10 = vrot.slane %v1732_v63, %v10463_v15  ;;  %v5443_v57 = vrot.slane %v1730_v13, %v10466_v16 }
 0x254   : > { %v5444_v50 = vsel %vm14392_vm11, %v5443_v57, %v5439_v2  ;;  %1871 = vadd.xlane.f32.xlu1 %v572_v4  ;;  %1869 = vadd.xlane.f32.xlu0 %v571_v0  ;;  %vm14393_vm11 = vcmask 1044484   ;;  %v584_v4 = vld [vmem:[%s10301_s19 + $0x8f8] sm:$0xff]  ;;  %v583_v0 = vld [vmem:[%s10301_s19 + $0x8f0] sm:$0xff] }
 0x255   : > { %v1736_v11 = vpop.xlane.xlu1 %1735  ;;  %v5449_v12 = vsel %vm4496_vm12, %v5448_v10, %v5444_v50  ;;  %v1734_v14 = vpop.xlane.xlu0 %1733 }
 0x256   : > { %v5458_v39 = vrot.slane %v1736_v11, %v10479_v5  ;;  %v5453_v23 = vrot.slane %v1734_v14, %v10482_v35 }
 0x258   : > { %v5454_v49 = vsel %vm4503_vm13, %v5453_v23, %v5449_v12  ;;  %1875 = vadd.xlane.f32.xlu1 %v574_v17  ;;  %1873 = vadd.xlane.f32.xlu0 %v573_v22  ;;  %v586_v17 = vld [vmem:[%s10301_s19 + $0x908] sm:$0xff]  ;;  %v585_v22 = vld [vmem:[%s10301_s19 + $0x900] sm:$0xff] }
 0x259   : > { %v5459_v24 = vsel %vm4510_vm14, %v5458_v39, %v5454_v49  ;;  %v1740_v45 = vpop.xlane.xlu1 %1739  ;;  %v1738_v25 = vpop.xlane.xlu0 %1737 }
 0x25a   : > { %v11197_v29 = vsel %vm14393_vm11, %v5459_v24, %v11134_v1  ;;  %v5467_v30 = vrot.slane %v1740_v45, %v10396_v20  ;;  %v5463_v31 = vrot.slane %v1738_v25, %v10390_v18  ;;  %vm14394_vm11 = vcmask 851712  }
 0x25c   : > { %v5468_v32 = vsel %vm4412_vm0, %v5467_v30, %v5463_v31  ;;  %1879 = vadd.xlane.f32.xlu1 %v576_v28  ;;  %1877 = vadd.xlane.f32.xlu0 %v575_v56  ;;  %v588_v28 = vld [vmem:[%s10301_s19 + $0x918] sm:$0xff]  ;;  %v587_v56 = vld [vmem:[%s10301_s19 + $0x910] sm:$0xff] }
 0x25d   : > { %v1744_v34 = vpop.xlane.xlu1 %1743  ;;  %v1742_v37 = vpop.xlane.xlu0 %1741 }
 0x25e   : > { %v5477_v55 = vrot.slane %v1744_v34, %v10393_v19  ;;  %v5472_v38 = vrot.slane %v1742_v37, %v10399_v21 }
 0x260   : > { %v5473_v1 = vsel %vm4419_vm1, %v5472_v38, %v5468_v32  ;;  %1883 = vadd.xlane.f32.xlu1 %v578_v36  ;;  %1881 = vadd.xlane.f32.xlu0 %v577_v3  ;;  %v590_v3 = vld [vmem:[%s10301_s19 + $0x928] sm:$0xff] }
 0x261   : > { %v1748_v41 = vpop.xlane.xlu1 %1747  ;;  %v5478_v43 = vsel %vm4426_vm2, %v5477_v55, %v5473_v1  ;;  %v1746_v61 = vpop.xlane.xlu0 %1745  ;;  %v589_v55 = vld [vmem:[%s10301_s19 + $0x920] sm:$0xff] }
 0x262   : > { %v5487_v42 = vrot.slane %v1748_v41, %v10404_v26  ;;  %v5482_v47 = vrot.slane %v1746_v61, %v10407_v27 }
 0x264   : > { %v5483_v48 = vsel %vm4433_vm3, %v5482_v47, %v5478_v43  ;;  %1887 = vadd.xlane.f32.xlu1 %v580_v44  ;;  %1885 = vadd.xlane.f32.xlu0 %v579_v9  ;;  %v592_v9 = vld [vmem:[%s10301_s19 + $0x938] sm:$0xff] }
 0x265   : > { %v1752_v60 = vpop.xlane.xlu1 %1751  ;;  %v5488_v51 = vsel %vm4440_vm4, %v5487_v42, %v5483_v48  ;;  %v1750_v52 = vpop.xlane.xlu0 %1749  ;;  %v591_v42 = vld [vmem:[%s10301_s19 + $0x930] sm:$0xff] }
 0x266   : > { %v5497_v33 = vrot.slane %v1752_v60, %v10428_v46  ;;  %v5492_v59 = vrot.slane %v1750_v52, %v10420_v40  ;;  %v593_v52 = vld [vmem:[%s10301_s19 + $0x940] sm:$0xff] }
 0x268   : > { %v5493_v62 = vsel %vm4447_vm5, %v5492_v59, %v5488_v51  ;;  %1891 = vadd.xlane.f32.xlu1 %v582_v8  ;;  %1889 = vadd.xlane.f32.xlu0 %v581_v58  ;;  %v594_v51 = vld [vmem:[%s10301_s19 + $0x948] sm:$0xff]  ;;  %v595_v59 = vld [vmem:[%s10301_s19 + $0x950] sm:$0xff] }
 0x269   : > { %v1756_v63 = vpop.xlane.xlu1 %1755  ;;  %v5498_v2 = vsel %vm4454_vm6, %v5497_v33, %v5493_v62  ;;  %v1754_v13 = vpop.xlane.xlu0 %1753  ;;  %v596_v33 = vld [vmem:[%s10301_s19 + $0x958] sm:$0xff] }
 0x26a   : > { %v5507_v10 = vrot.slane %v1756_v63, %v10435_v53  ;;  %v5502_v57 = vrot.slane %v1754_v13, %v10438_v54  ;;  %v598_v63 = vld [vmem:[%s10301_s19 + $0x968] sm:$0xff] }
 0x26c   : > { %v5503_v50 = vsel %vm4461_vm7, %v5502_v57, %v5498_v2  ;;  %1895 = vadd.xlane.f32.xlu1 %v584_v4  ;;  %1893 = vadd.xlane.f32.xlu0 %v583_v0  ;;  %v597_v2 = vld [vmem:[%s10301_s19 + $0x960] sm:$0xff]  ;;  %v600_v0 = vld [vmem:[%s10301_s19 + $0x978] sm:$0xff] }
 0x26d   : > { %v1760_v11 = vpop.xlane.xlu1 %1759  ;;  %v5508_v12 = vsel %vm4468_vm8, %v5507_v10, %v5503_v50  ;;  %v1758_v14 = vpop.xlane.xlu0 %1757  ;;  %v599_v10 = vld [vmem:[%s10301_s19 + $0x970] sm:$0xff] }
 0x26e   : > { %v5517_v39 = vrot.slane %v1760_v11, %v10453_v6  ;;  %v5512_v23 = vrot.slane %v1758_v14, %v10456_v7  ;;  %v602_v11 = vld [vmem:[%s10301_s19 + $0x988] sm:$0xff] }
 0x270   : > { %v5513_v49 = vsel %vm4475_vm9, %v5512_v23, %v5508_v12  ;;  %1899 = vadd.xlane.f32.xlu1 %v586_v17  ;;  %1897 = vadd.xlane.f32.xlu0 %v585_v22  ;;  %v601_v12 = vld [vmem:[%s10301_s19 + $0x980] sm:$0xff]  ;;  %v604_v22 = vld [vmem:[%s10301_s19 + $0x998] sm:$0xff] }
 0x271   : > { %v1764_v24 = vpop.xlane.xlu1 %1763  ;;  %v5518_v45 = vsel %vm4482_vm10, %v5517_v39, %v5513_v49  ;;  %v1762_v25 = vpop.xlane.xlu0 %1761  ;;  %v603_v39 = vld [vmem:[%s10301_s19 + $0x990] sm:$0xff] }
 0x272   : > { %v5527_v30 = vrot.slane %v1764_v24, %v10463_v15  ;;  %v5522_v31 = vrot.slane %v1762_v25, %v10466_v16  ;;  %v606_v24 = vld [vmem:[%s10301_s19 + $0x9a8] sm:$0xff] }
 0x274   : > { %v5523_v32 = vsel %vm14394_vm11, %v5522_v31, %v5518_v45  ;;  %1903 = vadd.xlane.f32.xlu1 %v588_v28  ;;  %1901 = vadd.xlane.f32.xlu0 %v587_v56  ;;  %vm14395_vm11 = vcmask 1045509   ;;  %v605_v45 = vld [vmem:[%s10301_s19 + $0x9a0] sm:$0xff] }
 0x275   : > { %v1768_v34 = vpop.xlane.xlu1 %1767  ;;  %v5528_v37 = vsel %vm4496_vm12, %v5527_v30, %v5523_v32  ;;  %v1766_v36 = vpop.xlane.xlu0 %1765  ;;  %v608_v32 = vld [vmem:[%s10301_s19 + $0x9b8] sm:$0xff] }
 0x276   : > { %v5537_v38 = vrot.slane %v1768_v34, %v10479_v5  ;;  %v5532_v1 = vrot.slane %v1766_v36, %v10482_v35  ;;  %v607_v34 = vld [vmem:[%s10301_s19 + $0x9b0] sm:$0xff] }
 0x278   : > { %v5533_v41 = vsel %vm4503_vm13, %v5532_v1, %v5528_v37  ;;  %1907 = vadd.xlane.f32.xlu1 %v590_v3  ;;  %1905 = vadd.xlane.f32.xlu0 %v589_v55 }
 0x279   : > { %v5538_v43 = vsel %vm4510_vm14, %v5537_v38, %v5533_v41  ;;  %v1772_v61 = vpop.xlane.xlu1 %1771  ;;  %v1770_v44 = vpop.xlane.xlu0 %1769 }
 0x27a   : > { %v11248_v47 = vsel %vm14395_vm11, %v5538_v43, %v11197_v29  ;;  %v5546_v25 = vrot.slane %v1772_v61, %v10396_v20  ;;  %v5542_v28 = vrot.slane %v1770_v44, %v10390_v18  ;;  %v610_v61 = vld [vmem:[%s10301_s19 + $0x9c8] sm:$0xff]  ;;  %v609_v44 = vld [vmem:[%s10301_s19 + $0x9c0] sm:$0xff]  ;;  %vm14396_vm11 = vcmask 851712  }
 0x27c   : > { %1911 = vadd.xlane.f32.xlu1 %v592_v9  ;;  %1909 = vadd.xlane.f32.xlu0 %v591_v42  ;;  %v5547_v37 = vsel %vm4412_vm0, %v5546_v25, %v5542_v28  ;;  %v614_v25 = vld [vmem:[%s10301_s19 + $0x9e8] sm:$0xff]  ;;  %v613_v28 = vld [vmem:[%s10301_s19 + $0x9e0] sm:$0xff] }
 0x27d   : > { %v11250_v48 = vpop.xlane.xlu1 %1775  ;;  %v1774_v60 = vpop.xlane.xlu0 %1773 }
 0x27e   : > { %v5551_v56 = vrot.slane %v1774_v60, %v10399_v21  ;;  %v5556_v36 = vrot.slane %v11250_v48, %v10393_v19 }
 0x280   : > { %1915 = vadd.xlane.f32.xlu1 %v594_v51  ;;  %1913 = vadd.xlane.f32.xlu0 %v593_v52  ;;  %v5552_v3 = vsel %vm4419_vm1, %v5551_v56, %v5547_v37 }
 0x281   : > { %v11254_v8 = vpop.xlane.xlu1 %1779  ;;  %v1778_v58 = vpop.xlane.xlu0 %1777  ;;  %v5557_v42 = vsel %vm4426_vm2, %v5556_v36, %v5552_v3 }
 0x282   : > { %v5561_v55 = vrot.slane %v1778_v58, %v10407_v27  ;;  %v5566_v9 = vrot.slane %v11254_v8, %v10404_v26 }
 0x284   : > { %1919 = vadd.xlane.f32.xlu1 %v596_v33  ;;  %1917 = vadd.xlane.f32.xlu0 %v595_v59  ;;  %v5562_v60 = vsel %vm4433_vm3, %v5561_v55, %v5557_v42  ;;  %v616_v55 = vld [vmem:[%s10301_s19 + $0x9f8] sm:$0xff] }
 0x285   : > { %v11258_v29 = vpop.xlane.xlu1 %1783  ;;  %v11260_v62 = vpop.xlane.xlu0 %1781 }
 0x286   : > { %v5571_v51 = vrot.slane %v11260_v62, %v10420_v40 }
 0x288   : > { %1923 = vadd.xlane.f32.xlu1 %v598_v63  ;;  %1921 = vadd.xlane.f32.xlu0 %v597_v2  ;;  %v612_v63 = vld [vmem:[%s10301_s19 + $0x9d8] sm:$0xff]  ;;  %v611_v2 = vld [vmem:[%s10301_s19 + $0x9d0] sm:$0xff] }
 0x289   : > { %v11264_v13 = vpop.xlane.xlu1 %1787  ;;  %v11266_v4 = vpop.xlane.xlu0 %1785 }
 0x28a   : > { %v5586_v56 = vrot.slane %v11264_v13, %v10435_v53 }
 0x28c   : > { %1927 = vadd.xlane.f32.xlu1 %v600_v0  ;;  %1925 = vadd.xlane.f32.xlu0 %v599_v10  ;;  %v5576_v0 = vrot.slane %v11258_v29, %v10428_v46  ;;  %v5567_v10 = vsel %vm4440_vm4, %v5566_v9, %v5562_v60  ;;  %v618_v60 = vld [vmem:[%s10301_s19 + $0xa08] sm:$0xff] }
 0x28d   : > { %v11270_v57 = vpop.xlane.xlu1 %1791  ;;  %v11272_v50 = vpop.xlane.xlu0 %1789 }
 0x290   : > { %1931 = vadd.xlane.f32.xlu1 %v602_v11  ;;  %1929 = vadd.xlane.f32.xlu0 %v601_v12  ;;  %v5572_v11 = vsel %vm4447_vm5, %v5571_v51, %v5567_v10  ;;  %v5581_v12 = vrot.slane %v11266_v4, %v10438_v54  ;;  %v617_v51 = vld [vmem:[%s10301_s19 + $0xa00] sm:$0xff]  ;;  %v620_v10 = vld [vmem:[%s10301_s19 + $0xa18] sm:$0xff] }
 0x291   : > { %v11276_v14 = vpop.xlane.xlu1 %1795  ;;  %v11278_v17 = vpop.xlane.xlu0 %1793 }
 0x294   : > { %1935 = vadd.xlane.f32.xlu1 %v604_v22  ;;  %1933 = vadd.xlane.f32.xlu0 %v603_v39 }
 0x295   : > { %v11282_v23 = vpop.xlane.xlu1 %1799  ;;  %v11284_v49 = vpop.xlane.xlu0 %1797 }
 0x298   : > { %1939 = vadd.xlane.f32.xlu1 %v606_v24  ;;  %1937 = vadd.xlane.f32.xlu0 %v605_v45 }
 0x299   : > { %v1804_v30 = vpop.xlane.xlu1 %1803  ;;  %v1802_v31 = vpop.xlane.xlu0 %1801 }
 0x29a   : > { %v5625_v38 = vrot.slane %v1804_v30, %v10396_v20  ;;  %v5621_v1 = vrot.slane %v1802_v31, %v10390_v18  ;;  %v5577_v30 = vsel %vm4454_vm6, %v5576_v0, %v5572_v11  ;;  %v5616_v11 = vrot.slane %v11282_v23, %v10479_v5  ;;  %v622_v23 = vld [vmem:[%s10301_s19 + $0xa28] sm:$0xff] }
 0x29b   : > { %v5582_v31 = vsel %vm4461_vm7, %v5581_v12, %v5577_v30 }
 0x29c   : > { %1943 = vadd.xlane.f32.xlu1 %v608_v32  ;;  %1941 = vadd.xlane.f32.xlu0 %v607_v34  ;;  %v5626_v52 = vsel %vm4412_vm0, %v5625_v38, %v5621_v1  ;;  %v5591_v32 = vrot.slane %v11272_v50, %v10456_v7  ;;  %v615_v38 = vld [vmem:[%s10301_s19 + $0x9f0] sm:$0xff]  ;;  %v5596_v1 = vrot.slane %v11270_v57, %v10453_v6 }
 0x29d   : > { %v1808_v41 = vpop.xlane.xlu1 %1807  ;;  %v1806_v43 = vpop.xlane.xlu0 %1805 }
 0x29e   : > { %v5630_v48 = vrot.slane %v1806_v43, %v10399_v21  ;;  %v5635_v58 = vrot.slane %v1808_v41, %v10393_v19  ;;  %v5587_v41 = vsel %vm4468_vm8, %v5586_v56, %v5582_v31 }
 0x29f   : > { %v5592_v43 = vsel %vm4475_vm9, %v5591_v32, %v5587_v41 }
 0x2a0   : > { %v5631_v33 = vsel %vm4419_vm1, %v5630_v48, %v5626_v52  ;;  %1947 = vadd.xlane.f32.xlu1 %v610_v61  ;;  %1945 = vadd.xlane.f32.xlu0 %v609_v44  ;;  %v5601_v61 = vrot.slane %v11278_v17, %v10466_v16  ;;  %v5606_v52 = vrot.slane %v11276_v14, %v10463_v15 }
 0x2a1   : > { %v1812_v59 = vpop.xlane.xlu1 %1811  ;;  %v1810_v8 = vpop.xlane.xlu0 %1809  ;;  %v5636_v39 = vsel %vm4426_vm2, %v5635_v58, %v5631_v33  ;;  %v5597_v58 = vsel %vm4482_vm10, %v5596_v1, %v5592_v43 }
 0x2a2   : > { %v5640_v62 = vrot.slane %v1810_v8, %v10407_v27  ;;  %v5645_v22 = vrot.slane %v1812_v59, %v10404_v26  ;;  %v5602_v33 = vsel %vm14396_vm11, %v5601_v61, %v5597_v58  ;;  %v5611_v59 = vrot.slane %v11284_v49, %v10482_v35 }
 0x2a3   : > { %v5607_v12 = vsel %vm4496_vm12, %v5606_v52, %v5602_v33  ;;  %v627_v33 = vld [vmem:[%s10301_s19 + $0xa50] sm:$0xff] }
 0x2a4   : > { %v5641_v24 = vsel %vm4433_vm3, %v5640_v62, %v5636_v39  ;;  %1951 = vadd.xlane.f32.xlu1 %v612_v63  ;;  %1949 = vadd.xlane.f32.xlu0 %v611_v2  ;;  %v619_v62 = vld [vmem:[%s10301_s19 + $0xa10] sm:$0xff] }
 0x2a5   : > { %v1816_v45 = vpop.xlane.xlu1 %1815  ;;  %v1814_v29 = vpop.xlane.xlu0 %1813  ;;  %v5646_v37 = vsel %vm4440_vm4, %v5645_v22, %v5641_v24  ;;  %v5612_v22 = vsel %vm4503_vm13, %v5611_v59, %v5607_v12 }
 0x2a6   : > { %v5650_v4 = vrot.slane %v1814_v29, %v10420_v40  ;;  %v5655_v34 = vrot.slane %v1816_v45, %v10428_v46  ;;  %v5617_v56 = vsel %vm4510_vm14, %v5616_v11, %v5612_v22 }
 0x2a8   : > { %v5651_v36 = vsel %vm4447_vm5, %v5650_v4, %v5646_v37  ;;  %1955 = vadd.xlane.f32.xlu1 %v614_v25  ;;  %1953 = vadd.xlane.f32.xlu0 %v613_v28  ;;  %v621_v28 = vld [vmem:[%s10301_s19 + $0xa20] sm:$0xff] }
 0x2a9   : > { %v1820_v3 = vpop.xlane.xlu1 %1819  ;;  %v1818_v13 = vpop.xlane.xlu0 %1817  ;;  %v5656_v9 = vsel %vm4454_vm6, %v5655_v34, %v5651_v36  ;;  %v3370_v34 = vld [vmem:[%s10884_s14 + $0x8] sm:$0xff] }
 0x2aa   : > { %v5660_v50 = vrot.slane %v1818_v13, %v10438_v54  ;;  %v5665_v44 = vrot.slane %v1820_v3, %v10435_v53  ;;  %v624_v3 = vld [vmem:[%s10301_s19 + $0xa38] sm:$0xff]  ;;  %v623_v13 = vld [vmem:[%s10301_s19 + $0xa30] sm:$0xff] }
 0x2ac   : > { %v5661_v42 = vsel %vm4461_vm7, %v5660_v50, %v5656_v9  ;;  %1959 = vadd.xlane.f32.xlu1 %v616_v55  ;;  %1957 = vadd.xlane.f32.xlu0 %v615_v38  ;;  %v9508_v38 = vsel %vm9499_vm15, %v5617_v56, %v11248_v47 }
 0x2ad   : > { %v1824_v48 = vpop.xlane.xlu1 %1823  ;;  %v1822_v57 = vpop.xlane.xlu0 %1821  ;;  %v5666_v63 = vsel %vm4468_vm8, %v5665_v44, %v5661_v42  ;;  %v626_v42 = vld [vmem:[%s10301_s19 + $0xa48] sm:$0xff] }
 0x2ae   : > { %v5670_v17 = vrot.slane %v1822_v57, %v10456_v7  ;;  %v5675_v8 = vrot.slane %v1824_v48, %v10453_v6  ;;  %v625_v48 = vld [vmem:[%s10301_s19 + $0xa40] sm:$0xff] }
 0x2b0   : > { %v5671_v2 = vsel %vm4475_vm9, %v5670_v17, %v5666_v63  ;;  %1963 = vadd.xlane.f32.xlu1 %v618_v60  ;;  %1961 = vadd.xlane.f32.xlu0 %v617_v51  ;;  %v628_v17 = vld [vmem:[%s10301_s19 + $0xa58] sm:$0xff] }
 0x2b1   : > { %v1828_v0 = vpop.xlane.xlu1 %1827  ;;  %v1826_v14 = vpop.xlane.xlu0 %1825  ;;  %v5676_v24 = vsel %vm4482_vm10, %v5675_v8, %v5671_v2 }
 0x2b2   : > { %v5680_v49 = vrot.slane %v1826_v14, %v10466_v16  ;;  %v5685_v39 = vrot.slane %v1828_v0, %v10463_v15 }
 0x2b4   : > { %v5681_v45 = vsel %vm14396_vm11, %v5680_v49, %v5676_v24  ;;  %1967 = vadd.xlane.f32.xlu1 %v620_v10  ;;  %1965 = vadd.xlane.f32.xlu0 %v619_v62  ;;  %vm14397_vm11 = vcmask 1047559   ;;  %v630_v10 = vld [vmem:[%s10301_s19 + $0xa68] sm:$0xff]  ;;  %v629_v62 = vld [vmem:[%s10301_s19 + $0xa60] sm:$0xff] }
 0x2b5   : > { %v1832_v29 = vpop.xlane.xlu1 %1831  ;;  %v1830_v25 = vpop.xlane.xlu0 %1829  ;;  %v5686_v31 = vsel %vm4496_vm12, %v5685_v39, %v5681_v45  ;;  %v632_v45 = vld [vmem:[%s10301_s19 + $0xa78] sm:$0xff] }
 0x2b6   : > { %v5695_v30 = vrot.slane %v1832_v29, %v10479_v5  ;;  %v5690_v4 = vrot.slane %v1830_v25, %v10482_v35  ;;  %v631_v29 = vld [vmem:[%s10301_s19 + $0xa70] sm:$0xff] }
 0x2b8   : > { %v5691_v32 = vsel %vm4503_vm13, %v5690_v4, %v5686_v31  ;;  %1971 = vadd.xlane.f32.xlu1 %v622_v23  ;;  %1969 = vadd.xlane.f32.xlu0 %v621_v28  ;;  %v634_v31 = vld [vmem:[%s10301_s19 + $0xa88] sm:$0xff] }
 0x2b9   : > { %v1836_v37 = vpop.xlane.xlu1 %1835  ;;  %v1834_v36 = vpop.xlane.xlu0 %1833  ;;  %v5696_v55 = vsel %vm4510_vm14, %v5695_v30, %v5691_v32  ;;  %v633_v32 = vld [vmem:[%s10301_s19 + $0xa80] sm:$0xff] }
 0x2ba   : > { %v5704_v1 = vrot.slane %v1836_v37, %v10396_v20  ;;  %v5700_v41 = vrot.slane %v1834_v36, %v10390_v18  ;;  %v9509_v50 = vsel %vm14397_vm11, %v5696_v55, %v9508_v38  ;;  %v636_v38 = vld [vmem:[%s10301_s19 + $0xa98] sm:$0xff]  ;;  %vm14398_vm11 = vcmask 851712  }
 0x2bb   : > { %v9561_v43 = vmul.f32 %v9509_v50, %v3370_v34 }
 0x2bc   : > { %v5705_v61 = vsel %vm4412_vm0, %v5704_v1, %v5700_v41  ;;  %1975 = vadd.xlane.f32.xlu1 %v624_v3  ;;  %1973 = vadd.xlane.f32.xlu0 %v623_v13  ;;  %v635_v1 = vld [vmem:[%s10301_s19 + $0xa90] sm:$0xff] }
 0x2bd   : > { %v1840_v44 = vpop.xlane.xlu1 %1839  ;;  %10020 = vmatmul.mubr.f32.vlgmr.msra.gmra.mxu0 %v9561_v43  ;;  %v1838_v9 = vpop.xlane.xlu0 %1837 }
 0x2be   : > { %v5714_v47 = vrot.slane %v1840_v44, %v10393_v19  ;;  %v5709_v57 = vrot.slane %v1838_v9, %v10399_v21 }
 0x2c0   : > { %v5710_v60 = vsel %vm4419_vm1, %v5709_v57, %v5705_v61  ;;  %1979 = vadd.xlane.f32.xlu1 %v626_v42  ;;  %1977 = vadd.xlane.f32.xlu0 %v625_v48  ;;  %v638_v42 = vld [vmem:[%s10301_s19 + $0xaa8] sm:$0xff]  ;;  %v637_v48 = vld [vmem:[%s10301_s19 + $0xaa0] sm:$0xff] }
 0x2c1   : > { %v1844_v51 = vpop.xlane.xlu1 %1843  ;;  %v5715_v52 = vsel %vm4426_vm2, %v5714_v47, %v5710_v60  ;;  %v1842_v58 = vpop.xlane.xlu0 %1841 }
 0x2c2   : > { %v5724_v59 = vrot.slane %v1844_v51, %v10404_v26  ;;  %v5719_v8 = vrot.slane %v1842_v58, %v10407_v27 }
 0x2c4   : > { %v5720_v63 = vsel %vm4433_vm3, %v5719_v8, %v5715_v52  ;;  %1983 = vadd.xlane.f32.xlu1 %v628_v17  ;;  %1981 = vadd.xlane.f32.xlu0 %v627_v33  ;;  %v640_v17 = vld [vmem:[%s10301_s19 + $0xab8] sm:$0xff]  ;;  %v639_v33 = vld [vmem:[%s10301_s19 + $0xab0] sm:$0xff] }
 0x2c5   : > { %v1848_v2 = vpop.xlane.xlu1 %1847  ;;  %v5725_v0 = vsel %vm4440_vm4, %v5724_v59, %v5720_v63  ;;  %v1846_v14 = vpop.xlane.xlu0 %1845 }
 0x2c6   : > { %v5734_v11 = vrot.slane %v1848_v2, %v10428_v46  ;;  %v5729_v12 = vrot.slane %v1846_v14, %v10420_v40  ;;  %v642_v14 = vld [vmem:[%s10301_s19 + $0xac8] sm:$0xff] }
 0x2c8   : > { %v5730_v49 = vsel %vm4447_vm5, %v5729_v12, %v5725_v0  ;;  %1987 = vadd.xlane.f32.xlu1 %v630_v10  ;;  %1985 = vadd.xlane.f32.xlu0 %v629_v62  ;;  %v641_v10 = vld [vmem:[%s10301_s19 + $0xac0] sm:$0xff] }
 0x2c9   : > { %v1852_v22 = vpop.xlane.xlu1 %1851  ;;  %v5735_v39 = vsel %vm4454_vm6, %v5734_v11, %v5730_v49  ;;  %v1850_v24 = vpop.xlane.xlu0 %1849 }
 0x2ca   : > { %v5744_v25 = vrot.slane %v1852_v22, %v10435_v53  ;;  %v5739_v23 = vrot.slane %v1850_v24, %v10438_v54  ;;  %v644_v24 = vld [vmem:[%s10301_s19 + $0xad8] sm:$0xff] }
 0x2cc   : > { %v5740_v28 = vsel %vm4461_vm7, %v5739_v23, %v5735_v39  ;;  %1991 = vadd.xlane.f32.xlu1 %v632_v45  ;;  %1989 = vadd.xlane.f32.xlu0 %v631_v29  ;;  %v643_v45 = vld [vmem:[%s10301_s19 + $0xad0] sm:$0xff] }
 0x2cd   : > { %v1856_v56 = vpop.xlane.xlu1 %1855  ;;  %v5745_v30 = vsel %vm4468_vm8, %v5744_v25, %v5740_v28  ;;  %v1854_v4 = vpop.xlane.xlu0 %1853  ;;  %v9719_v28 = vld [vmem:[%s14371_s4 + $0x78] sm:$0xff] }
 0x2ce   : > { %v5754_v34 = vrot.slane %v1856_v56, %v10453_v6  ;;  %v5749_v37 = vrot.slane %v1854_v4, %v10456_v7  ;;  %10031 = vmatprep.subr.mxu1 %v9719_v28 }
 0x2cf   : > { %10032 = vmatpush3.msra.mxu1 %v9719_v28  ;;  %v9711_v28 = vld [vmem:[%s14371_s4 + $0x38] sm:$0xff] }
 0x2d0   : > { %v5750_v36 = vsel %vm4475_vm9, %v5749_v37, %v5745_v30  ;;  %1995 = vadd.xlane.f32.xlu1 %v634_v31  ;;  %1993 = vadd.xlane.f32.xlu0 %v633_v32  ;;  %v646_v31 = vld [vmem:[%s10301_s19 + $0xae8] sm:$0xff]  ;;  %v645_v32 = vld [vmem:[%s10301_s19 + $0xae0] sm:$0xff] }
 0x2d1   : > { %v1860_v3 = vpop.xlane.xlu1 %1859  ;;  %v5755_v13 = vsel %vm4482_vm10, %v5754_v34, %v5750_v36  ;;  %v1858_v55 = vpop.xlane.xlu0 %1857  ;;  %v9718_v36 = vld [vmem:[%s14371_s4 + $0x70] sm:$0xff] }
 0x2d2   : > { %v5764_v41 = vrot.slane %v1860_v3, %v10463_v15  ;;  %v5759_v50 = vrot.slane %v1858_v55, %v10466_v16  ;;  %10033 = vmatprep.subr.mxu1 %v9718_v36 }
 0x2d3   : > { %10034 = vmatpush3.msra.mxu1 %v9718_v36 }
 0x2d4   : > { %v5760_v43 = vsel %vm14398_vm11, %v5759_v50, %v5755_v13  ;;  %1999 = vadd.xlane.f32.xlu1 %v636_v38  ;;  %1997 = vadd.xlane.f32.xlu0 %v635_v1  ;;  %v9717_v13 = vld [vmem:[%s14371_s4 + $0x68] sm:$0xff]  ;;  %v647_v50 = vld [vmem:[%s10301_s19 + $0xaf0] sm:$0xff] }
 0x2d5   : > { %v1864_v61 = vpop.xlane.xlu1 %1863  ;;  %v5765_v44 = vsel %vm4496_vm12, %v5764_v41, %v5760_v43  ;;  %v1862_v9 = vpop.xlane.xlu0 %1861  ;;  %v648_v41 = vld [vmem:[%s10301_s19 + $0xaf8] sm:$0xff]  ;;  %10035 = vmatprep.subr.mxu1 %v9717_v13 }
 0x2d6   : > { %v5774_v47 = vrot.slane %v1864_v61, %v10479_v5  ;;  %v5769_v57 = vrot.slane %v1862_v9, %v10482_v35  ;;  %10036 = vmatpush3.msra.mxu1 %v9717_v13  ;;  %v9710_v13 = vld [vmem:[%s14371_s4 + $0x30] sm:$0xff] }
 0x2d8   : > { %v5770_v60 = vsel %vm4503_vm13, %v5769_v57, %v5765_v44  ;;  %2003 = vadd.xlane.f32.xlu1 %v638_v42  ;;  %2001 = vadd.xlane.f32.xlu0 %v637_v48  ;;  %v9716_v44 = vld [vmem:[%s14371_s4 + $0x60] sm:$0xff]  ;;  %v9715_v42 = vld [vmem:[%s14371_s4 + $0x58] sm:$0xff] }
 0x2d9   : > { %v11429_v51 = vsel %vm4510_vm14, %v5774_v47, %v5770_v60  ;;  %v1868_v52 = vpop.xlane.xlu1 %1867  ;;  %v1866_v58 = vpop.xlane.xlu0 %1865  ;;  %v650_v60 = vld [vmem:[%s10301_s19 + $0xb08] sm:$0xff]  ;;  %10037 = vmatprep.subr.mxu1 %v9716_v44 }
 0x2da   : > { %v5783_v59 = vrot.slane %v1868_v52, %v10396_v20  ;;  %v5779_v8 = vrot.slane %v1866_v58, %v10390_v18  ;;  %v649_v52 = vld [vmem:[%s10301_s19 + $0xb00] sm:$0xff]  ;;  %10038 = vmatpush3.msra.mxu1 %v9716_v44 }
 0x2db   : > { %10039 = vmatprep.subr.mxu1 %v9715_v42  ;;  %v9708_v44 = vld [vmem:[%s14371_s4 + $0x20] sm:$0xff] }
 0x2dc   : > { %v5784_v63 = vsel %vm4412_vm0, %v5783_v59, %v5779_v8  ;;  %2007 = vadd.xlane.f32.xlu1 %v640_v17  ;;  %2005 = vadd.xlane.f32.xlu0 %v639_v33  ;;  %v9714_v33 = vld [vmem:[%s14371_s4 + $0x50] sm:$0xff] }
 0x2dd   : > { %v1872_v2 = vpop.xlane.xlu1 %1871  ;;  %v1870_v0 = vpop.xlane.xlu0 %1869  ;;  %10040 = vmatpush3.msra.mxu1 %v9715_v42 }
 0x2de   : > { %v5793_v62 = vrot.slane %v1872_v2, %v10393_v19  ;;  %v5788_v11 = vrot.slane %v1870_v0, %v10399_v21  ;;  %v652_v0 = vld [vmem:[%s10301_s19 + $0xb18] sm:$0xff]  ;;  %10041 = vmatprep.subr.mxu1 %v9714_v33 }
 0x2df   : > { %10042 = vmatpush3.msra.mxu1 %v9714_v33 }
 0x2e0   : > { %v5789_v12 = vsel %vm4419_vm1, %v5788_v11, %v5784_v63  ;;  %2011 = vadd.xlane.f32.xlu1 %v642_v14  ;;  %2009 = vadd.xlane.f32.xlu0 %v641_v10  ;;  %v651_v14 = vld [vmem:[%s10301_s19 + $0xb10] sm:$0xff]  ;;  %v9713_v11 = vld [vmem:[%s14371_s4 + $0x48] sm:$0xff] }
 0x2e1   : > { %v1876_v49 = vpop.xlane.xlu1 %1875  ;;  %v5794_v22 = vsel %vm4426_vm2, %v5793_v62, %v5789_v12  ;;  %v1874_v39 = vpop.xlane.xlu0 %1873  ;;  %10043 = vmatprep.subr.mxu1 %v9713_v11 }
 0x2e2   : > { %v5803_v29 = vrot.slane %v1876_v49, %v10404_v26  ;;  %v5798_v25 = vrot.slane %v1874_v39, %v10407_v27  ;;  %v9712_v49 = vld [vmem:[%s14371_s4 + $0x40] sm:$0xff]  ;;  %10044 = vmatpush3.msra.mxu1 %v9713_v11  ;;  %v9705_v11 = vld [vmem:[%s14371_s4 + $0x8] sm:$0xff] }
 0x2e3   : > { %10045 = vmatprep.subr.mxu1 %v9712_v49 }
 0x2e4   : > { %v5799_v23 = vsel %vm4433_vm3, %v5798_v25, %v5794_v22  ;;  %2015 = vadd.xlane.f32.xlu1 %v644_v24  ;;  %2013 = vadd.xlane.f32.xlu0 %v643_v45  ;;  %v654_v45 = vld [vmem:[%s10301_s19 + $0xb28] sm:$0xff] }
 0x2e5   : > { %v1880_v56 = vpop.xlane.xlu1 %1879  ;;  %v5804_v30 = vsel %vm4440_vm4, %v5803_v29, %v5799_v23  ;;  %v1878_v4 = vpop.xlane.xlu0 %1877  ;;  %v653_v29 = vld [vmem:[%s10301_s19 + $0xb20] sm:$0xff]  ;;  %10046 = vmatpush3.msra.mxu1 %v9712_v49 }
 0x2e6   : > { %v5813_v34 = vrot.slane %v1880_v56, %v10428_v46  ;;  %v5808_v37 = vrot.slane %v1878_v4, %v10420_v40  ;;  %10047 = vmatprep.subr.mxu1 %v9711_v28 }
 0x2e7   : > { %10048 = vmatpush3.msra.mxu1 %v9711_v28 }
 0x2e8   : > { %v5809_v3 = vsel %vm4447_vm5, %v5808_v37, %v5804_v30  ;;  %2019 = vadd.xlane.f32.xlu1 %v646_v31  ;;  %2017 = vadd.xlane.f32.xlu0 %v645_v32  ;;  %v656_v32 = vld [vmem:[%s10301_s19 + $0xb38] sm:$0xff] }
 0x2e9   : > { %v1884_v55 = vpop.xlane.xlu1 %1883  ;;  %v5814_v38 = vsel %vm4454_vm6, %v5813_v34, %v5809_v3  ;;  %v1882_v1 = vpop.xlane.xlu0 %1881  ;;  %v655_v34 = vld [vmem:[%s10301_s19 + $0xb30] sm:$0xff]  ;;  %10049 = vmatprep.subr.mxu1 %v9710_v13 }
 0x2ea   : > { %v5823_v43 = vrot.slane %v1884_v55, %v10435_v53  ;;  %v5818_v61 = vrot.slane %v1882_v1, %v10438_v54  ;;  %10050 = vmatpush3.msra.mxu1 %v9710_v13 }
 0x2ec   : > { %v5819_v9 = vsel %vm4461_vm7, %v5818_v61, %v5814_v38  ;;  %2023 = vadd.xlane.f32.xlu1 %v648_v41  ;;  %2021 = vadd.xlane.f32.xlu0 %v647_v50  ;;  %v9709_v38 = vld [vmem:[%s14371_s4 + $0x28] sm:$0xff]  ;;  %v657_v50 = vld [vmem:[%s10301_s19 + $0xb40] sm:$0xff] }
 0x2ed   : > { %v1888_v48 = vpop.xlane.xlu1 %1887  ;;  %v5824_v47 = vsel %vm4468_vm8, %v5823_v43, %v5819_v9  ;;  %v1886_v57 = vpop.xlane.xlu0 %1885  ;;  %v658_v41 = vld [vmem:[%s10301_s19 + $0xb48] sm:$0xff]  ;;  %10051 = vmatprep.subr.mxu1 %v9709_v38 }
 0x2ee   : > { %v5833_v58 = vrot.slane %v1888_v48, %v10453_v6  ;;  %v5828_v17 = vrot.slane %v1886_v57, %v10456_v7  ;;  %v660_v57 = vld [vmem:[%s10301_s19 + $0xb58] sm:$0xff]  ;;  %10052 = vmatpush3.msra.mxu1 %v9709_v38 }
 0x2ef   : > { %10053 = vmatprep.subr.mxu1 %v9708_v44 }
 0x2f0   : > { %v5829_v59 = vsel %vm4475_vm9, %v5828_v17, %v5824_v47  ;;  %2027 = vadd.xlane.f32.xlu1 %v650_v60  ;;  %2025 = vadd.xlane.f32.xlu0 %v649_v52  ;;  %v659_v60 = vld [vmem:[%s10301_s19 + $0xb50] sm:$0xff]  ;;  %v9707_v17 = vld [vmem:[%s14371_s4 + $0x18] sm:$0xff] }
 0x2f1   : > { %v1892_v8 = vpop.xlane.xlu1 %1891  ;;  %v5834_v63 = vsel %vm4482_vm10, %v5833_v58, %v5829_v59  ;;  %v1890_v2 = vpop.xlane.xlu0 %1889  ;;  %10054 = vmatpush3.msra.mxu1 %v9708_v44  ;;  %v9706_v59 = vld [vmem:[%s14371_s4 + $0x10] sm:$0xff] }
 0x2f2   : > { %v5843_v10 = vrot.slane %v1892_v8, %v10463_v15  ;;  %v5838_v62 = vrot.slane %v1890_v2, %v10466_v16  ;;  %10055 = vmatprep.subr.mxu1 %v9707_v17 }
 0x2f3   : > { %10056 = vmatpush3.msra.mxu1 %v9707_v17 }
 0x2f4   : > { %v5839_v12 = vsel %vm14398_vm11, %v5838_v62, %v5834_v63  ;;  %2031 = vadd.xlane.f32.xlu1 %v652_v0  ;;  %2029 = vadd.xlane.f32.xlu0 %v651_v14  ;;  %vm14399_vm11 = vcmask 1041409   ;;  %v662_v0 = vld [vmem:[%s10301_s19 + $0xb68] sm:$0xff]  ;;  %v661_v14 = vld [vmem:[%s10301_s19 + $0xb60] sm:$0xff] }
 0x2f5   : > { %v1896_v22 = vpop.xlane.xlu1 %1895  ;;  %v5844_v39 = vsel %vm4496_vm12, %v5843_v10, %v5839_v12  ;;  %v1894_v24 = vpop.xlane.xlu0 %1893  ;;  %10057 = vmatprep.subr.mxu1 %v9706_v59 }
 0x2f6   : > { %v5853_v25 = vrot.slane %v1896_v22, %v10479_v5  ;;  %v5848_v23 = vrot.slane %v1894_v24, %v10482_v35  ;;  %v664_v24 = vld [vmem:[%s10301_s19 + $0xb78] sm:$0xff]  ;;  %10058 = vmatpush3.msra.mxu1 %v9706_v59  ;;  %v671_v59 = vld [vmem:[%s10301_s19 + $0xbb0] sm:$0xff] }
 0x2f7   : > { %10059 = vmatprep.subr.mxu1 %v9705_v11 }
 0x2f8   : > { %v5849_v56 = vsel %vm4503_vm13, %v5848_v23, %v5844_v39  ;;  %2035 = vadd.xlane.f32.xlu1 %v654_v45  ;;  %2033 = vadd.xlane.f32.xlu0 %v653_v29  ;;  %v663_v45 = vld [vmem:[%s10301_s19 + $0xb70] sm:$0xff]  ;;  %v9704_v23 = vld [vmem:[%s14371_s4] sm:$0xff] }
 0x2f9   : > { %v5854_v30 = vsel %vm4510_vm14, %v5853_v25, %v5849_v56  ;;  %v1900_v4 = vpop.xlane.xlu1 %1899  ;;  %v1898_v31 = vpop.xlane.xlu0 %1897  ;;  %10060 = vmatpush3.msra.mxu1 %v9705_v11  ;;  %v673_v11 = vld [vmem:[%s10301_s19 + $0xbc0] sm:$0xff] }
 0x2fa   : > { %v11509_v37 = vsel %vm14399_vm11, %v5854_v30, %v11429_v51  ;;  %v5862_v36 = vrot.slane %v1900_v4, %v10396_v20  ;;  %v5858_v3 = vrot.slane %v1898_v31, %v10390_v18  ;;  %v666_v31 = vld [vmem:[%s10301_s19 + $0xb88] sm:$0xff]  ;;  %10061 = vmatprep.subr.mxu1 %v9704_v23  ;;  %vm14400_vm11 = vcmask 851712  }
 0x2fb   : > { %10062 = vmatpush3.msra.mxu1 %v9704_v23 }
 0x2fc   : > { %v5863_v55 = vsel %vm4412_vm0, %v5862_v36, %v5858_v3  ;;  %2039 = vadd.xlane.f32.xlu1 %v656_v32  ;;  %2037 = vadd.xlane.f32.xlu0 %v655_v34  ;;  %v665_v32 = vld [vmem:[%s10301_s19 + $0xb80] sm:$0xff] }
 0x2fd   : > { %v1904_v51 = vpop.xlane.xlu1 %1903  ;;  %v1902_v1 = vpop.xlane.xlu0 %1901 }
 0x2fe   : > { %v5872_v43 = vrot.slane %v1904_v51, %v10393_v19  ;;  %v5867_v61 = vrot.slane %v1902_v1, %v10399_v21  ;;  %v668_v51 = vld [vmem:[%s10301_s19 + $0xb98] sm:$0xff]  ;;  %v667_v1 = vld [vmem:[%s10301_s19 + $0xb90] sm:$0xff] }
 0x300   : > { %v5868_v9 = vsel %vm4419_vm1, %v5867_v61, %v5863_v55  ;;  %2043 = vadd.xlane.f32.xlu1 %v658_v41  ;;  %2041 = vadd.xlane.f32.xlu0 %v657_v50 }
 0x301   : > { %v1908_v42 = vpop.xlane.xlu1 %1907  ;;  %v5873_v48 = vsel %vm4426_vm2, %v5872_v43, %v5868_v9  ;;  %v1906_v47 = vpop.xlane.xlu0 %1905 }
 0x302   : > { %v5882_v52 = vrot.slane %v1908_v42, %v10404_v26  ;;  %v5877_v58 = vrot.slane %v1906_v47, %v10407_v27  ;;  %v670_v42 = vld [vmem:[%s10301_s19 + $0xba8] sm:$0xff] }
 0x304   : > { %v5878_v33 = vsel %vm4433_vm3, %v5877_v58, %v5873_v48  ;;  %2047 = vadd.xlane.f32.xlu1 %v660_v57  ;;  %2045 = vadd.xlane.f32.xlu0 %v659_v60  ;;  %v669_v48 = vld [vmem:[%s10301_s19 + $0xba0] sm:$0xff] }
 0x305   : > { %v1912_v8 = vpop.xlane.xlu1 %1911  ;;  %v5883_v63 = vsel %vm4440_vm4, %v5882_v52, %v5878_v33  ;;  %v1910_v2 = vpop.xlane.xlu0 %1909  ;;  %v672_v33 = vld [vmem:[%s10301_s19 + $0xbb8] sm:$0xff] }
 0x306   : > { %v5892_v10 = vrot.slane %v1912_v8, %v10428_v46  ;;  %v5887_v62 = vrot.slane %v1910_v2, %v10420_v40 }
 0x308   : > { %v5888_v12 = vsel %vm4447_vm5, %v5887_v62, %v5883_v63  ;;  %2051 = vadd.xlane.f32.xlu1 %v662_v0  ;;  %2049 = vadd.xlane.f32.xlu0 %v661_v14  ;;  %v674_v62 = vld [vmem:[%s10301_s19 + $0xbc8] sm:$0xff] }
 0x309   : > { %v1916_v49 = vpop.xlane.xlu1 %1915  ;;  %v5893_v22 = vsel %vm4454_vm6, %v5892_v10, %v5888_v12  ;;  %v1914_v39 = vpop.xlane.xlu0 %1913 }
 0x30a   : > { %v5902_v29 = vrot.slane %v1916_v49, %v10435_v53  ;;  %v5897_v25 = vrot.slane %v1914_v39, %v10438_v54 }
 0x30c   : > { %v5898_v28 = vsel %vm4461_vm7, %v5897_v25, %v5893_v22  ;;  %2055 = vadd.xlane.f32.xlu1 %v664_v24  ;;  %2053 = vadd.xlane.f32.xlu0 %v663_v45  ;;  %v676_v45 = vld [vmem:[%s10301_s19 + $0xbd8] sm:$0xff] }
 0x30d   : > { %v1920_v56 = vpop.xlane.xlu1 %1919  ;;  %v5903_v30 = vsel %vm4468_vm8, %v5902_v29, %v5898_v28  ;;  %v1918_v4 = vpop.xlane.xlu0 %1917  ;;  %v675_v29 = vld [vmem:[%s10301_s19 + $0xbd0] sm:$0xff] }
 0x30e   : > { %v5912_v34 = vrot.slane %v1920_v56, %v10453_v6  ;;  %v5907_v36 = vrot.slane %v1918_v4, %v10456_v7 }
 0x310   : > { %v5908_v3 = vsel %vm4475_vm9, %v5907_v36, %v5903_v30  ;;  %2059 = vadd.xlane.f32.xlu1 %v666_v31  ;;  %2057 = vadd.xlane.f32.xlu0 %v665_v32  ;;  %v678_v31 = vld [vmem:[%s10301_s19 + $0xbe8] sm:$0xff]  ;;  %v677_v32 = vld [vmem:[%s10301_s19 + $0xbe0] sm:$0xff] }
 0x311   : > { %v1924_v13 = vpop.xlane.xlu1 %1923  ;;  %v5913_v55 = vsel %vm4482_vm10, %v5912_v34, %v5908_v3  ;;  %v1922_v38 = vpop.xlane.xlu0 %1921 }
 0x312   : > { %v5922_v41 = vrot.slane %v1924_v13, %v10463_v15  ;;  %v5917_v50 = vrot.slane %v1922_v38, %v10466_v16 }
 0x314   : > { %v5918_v43 = vsel %vm14400_vm11, %v5917_v50, %v5913_v55  ;;  %2063 = vadd.xlane.f32.xlu1 %v668_v51  ;;  %2061 = vadd.xlane.f32.xlu0 %v667_v1  ;;  %vm14401_vm11 = vcmask 1042434   ;;  %v680_v51 = vld [vmem:[%s10301_s19 + $0xbf8] sm:$0xff]  ;;  %v679_v1 = vld [vmem:[%s10301_s19 + $0xbf0] sm:$0xff] }
 0x315   : > { %v1928_v61 = vpop.xlane.xlu1 %1927  ;;  %v5923_v44 = vsel %vm4496_vm12, %v5922_v41, %v5918_v43  ;;  %v1926_v9 = vpop.xlane.xlu0 %1925 }
 0x316   : > { %v5932_v47 = vrot.slane %v1928_v61, %v10479_v5  ;;  %v5927_v57 = vrot.slane %v1926_v9, %v10482_v35 }
 0x318   : > { %v5928_v60 = vsel %vm4503_vm13, %v5927_v57, %v5923_v44  ;;  %2067 = vadd.xlane.f32.xlu1 %v670_v42  ;;  %2065 = vadd.xlane.f32.xlu0 %v669_v48  ;;  %v682_v42 = vld [vmem:[%s10301_s19 + $0xc08] sm:$0xff]  ;;  %v681_v48 = vld [vmem:[%s10301_s19 + $0xc00] sm:$0xff] }
 0x319   : > { %v5933_v52 = vsel %vm4510_vm14, %v5932_v47, %v5928_v60  ;;  %v1932_v58 = vpop.xlane.xlu1 %1931  ;;  %v1930_v17 = vpop.xlane.xlu0 %1929 }
 0x31a   : > { %v11581_v8 = vsel %vm14401_vm11, %v5933_v52, %v11509_v37  ;;  %v5941_v63 = vrot.slane %v1932_v58, %v10396_v20  ;;  %v5937_v2 = vrot.slane %v1930_v17, %v10390_v18  ;;  %vm14402_vm11 = vcmask 851712  }
 0x31c   : > { %v5942_v0 = vsel %vm4412_vm0, %v5941_v63, %v5937_v2  ;;  %2071 = vadd.xlane.f32.xlu1 %v672_v33  ;;  %2069 = vadd.xlane.f32.xlu0 %v671_v59  ;;  %v684_v33 = vld [vmem:[%s10301_s19 + $0xc18] sm:$0xff]  ;;  %v683_v59 = vld [vmem:[%s10301_s19 + $0xc10] sm:$0xff] }
 0x31d   : > { %v1936_v14 = vpop.xlane.xlu1 %1935  ;;  %v1934_v10 = vpop.xlane.xlu0 %1933 }
 0x31e   : > { %v5951_v12 = vrot.slane %v1936_v14, %v10393_v19  ;;  %v5946_v49 = vrot.slane %v1934_v10, %v10399_v21 }
 0x320   : > { %v5947_v37 = vsel %vm4419_vm1, %v5946_v49, %v5942_v0  ;;  %2075 = vadd.xlane.f32.xlu1 %v674_v62  ;;  %2073 = vadd.xlane.f32.xlu0 %v673_v11  ;;  %v686_v11 = vld [vmem:[%s10301_s19 + $0xc28] sm:$0xff] }
 0x321   : > { %v1940_v22 = vpop.xlane.xlu1 %1939  ;;  %v5952_v39 = vsel %vm4426_vm2, %v5951_v12, %v5947_v37  ;;  %v1938_v24 = vpop.xlane.xlu0 %1937  ;;  %v685_v12 = vld [vmem:[%s10301_s19 + $0xc20] sm:$0xff] }
 0x322   : > { %v5961_v25 = vrot.slane %v1940_v22, %v10404_v26  ;;  %v5956_v23 = vrot.slane %v1938_v24, %v10407_v27 }
 0x324   : > { %v5957_v28 = vsel %vm4433_vm3, %v5956_v23, %v5952_v39  ;;  %2079 = vadd.xlane.f32.xlu1 %v676_v45  ;;  %2077 = vadd.xlane.f32.xlu0 %v675_v29  ;;  %v688_v29 = vld [vmem:[%s10301_s19 + $0xc38] sm:$0xff] }
 0x325   : > { %v1944_v56 = vpop.xlane.xlu1 %1943  ;;  %v5962_v30 = vsel %vm4440_vm4, %v5961_v25, %v5957_v28  ;;  %v1942_v4 = vpop.xlane.xlu0 %1941  ;;  %v687_v25 = vld [vmem:[%s10301_s19 + $0xc30] sm:$0xff] }
 0x326   : > { %v5971_v34 = vrot.slane %v1944_v56, %v10428_v46  ;;  %v5966_v36 = vrot.slane %v1942_v4, %v10420_v40 }
 0x328   : > { %v5967_v3 = vsel %vm4447_vm5, %v5966_v36, %v5962_v30  ;;  %2083 = vadd.xlane.f32.xlu1 %v678_v31  ;;  %2081 = vadd.xlane.f32.xlu0 %v677_v32  ;;  %v690_v32 = vld [vmem:[%s10301_s19 + $0xc48] sm:$0xff] }
 0x329   : > { %v1948_v13 = vpop.xlane.xlu1 %1947  ;;  %v5972_v55 = vsel %vm4454_vm6, %v5971_v34, %v5967_v3  ;;  %v1946_v38 = vpop.xlane.xlu0 %1945  ;;  %v689_v34 = vld [vmem:[%s10301_s19 + $0xc40] sm:$0xff] }
 0x32a   : > { %v5981_v41 = vrot.slane %v1948_v13, %v10435_v53  ;;  %v5976_v50 = vrot.slane %v1946_v38, %v10438_v54 }
 0x32c   : > { %v5977_v43 = vsel %vm4461_vm7, %v5976_v50, %v5972_v55  ;;  %2087 = vadd.xlane.f32.xlu1 %v680_v51  ;;  %2085 = vadd.xlane.f32.xlu0 %v679_v1  ;;  %v692_v51 = vld [vmem:[%s10301_s19 + $0xc58] sm:$0xff]  ;;  %v691_v1 = vld [vmem:[%s10301_s19 + $0xc50] sm:$0xff] }
 0x32d   : > { %v1952_v61 = vpop.xlane.xlu1 %1951  ;;  %v5982_v44 = vsel %vm4468_vm8, %v5981_v41, %v5977_v43  ;;  %v1950_v9 = vpop.xlane.xlu0 %1949 }
 0x32e   : > { %v5991_v47 = vrot.slane %v1952_v61, %v10453_v6  ;;  %v5986_v57 = vrot.slane %v1950_v9, %v10456_v7 }
 0x330   : > { %v5987_v60 = vsel %vm4475_vm9, %v5986_v57, %v5982_v44  ;;  %2091 = vadd.xlane.f32.xlu1 %v682_v42  ;;  %2089 = vadd.xlane.f32.xlu0 %v681_v48  ;;  %v694_v42 = vld [vmem:[%s10301_s19 + $0xc68] sm:$0xff]  ;;  %v693_v48 = vld [vmem:[%s10301_s19 + $0xc60] sm:$0xff] }
 0x331   : > { %v1956_v52 = vpop.xlane.xlu1 %1955  ;;  %v5992_v58 = vsel %vm4482_vm10, %v5991_v47, %v5987_v60  ;;  %v1954_v17 = vpop.xlane.xlu0 %1953 }
 0x332   : > { %v6001_v63 = vrot.slane %v1956_v52, %v10463_v15  ;;  %v5996_v2 = vrot.slane %v1954_v17, %v10466_v16 }
 0x334   : > { %v5997_v0 = vsel %vm14402_vm11, %v5996_v2, %v5992_v58  ;;  %2095 = vadd.xlane.f32.xlu1 %v684_v33  ;;  %2093 = vadd.xlane.f32.xlu0 %v683_v59  ;;  %vm14403_vm11 = vcmask 1043459   ;;  %v696_v33 = vld [vmem:[%s10301_s19 + $0xc78] sm:$0xff]  ;;  %v695_v59 = vld [vmem:[%s10301_s19 + $0xc70] sm:$0xff] }
 0x335   : > { %v1960_v14 = vpop.xlane.xlu1 %1959  ;;  %v6002_v10 = vsel %vm4496_vm12, %v6001_v63, %v5997_v0  ;;  %v1958_v62 = vpop.xlane.xlu0 %1957 }
 0x336   : > { %v6011_v49 = vrot.slane %v1960_v14, %v10479_v5  ;;  %v6006_v37 = vrot.slane %v1958_v62, %v10482_v35 }
 0x338   : > { %v6007_v22 = vsel %vm4503_vm13, %v6006_v37, %v6002_v10  ;;  %2099 = vadd.xlane.f32.xlu1 %v686_v11  ;;  %2097 = vadd.xlane.f32.xlu0 %v685_v12  ;;  %v698_v11 = vld [vmem:[%s10301_s19 + $0xc88] sm:$0xff]  ;;  %v697_v12 = vld [vmem:[%s10301_s19 + $0xc80] sm:$0xff] }
 0x339   : > { %v6012_v39 = vsel %vm4510_vm14, %v6011_v49, %v6007_v22  ;;  %v1964_v24 = vpop.xlane.xlu1 %1963  ;;  %v1962_v45 = vpop.xlane.xlu0 %1961 }
 0x33a   : > { %v11632_v23 = vsel %vm14403_vm11, %v6012_v39, %v11581_v8  ;;  %v6020_v28 = vrot.slane %v1964_v24, %v10396_v20  ;;  %v6016_v56 = vrot.slane %v1962_v45, %v10390_v18  ;;  %vm14404_vm11 = vcmask 851712  }
 0x33c   : > { %v6021_v30 = vsel %vm4412_vm0, %v6020_v28, %v6016_v56  ;;  %2103 = vadd.xlane.f32.xlu1 %v688_v29  ;;  %2101 = vadd.xlane.f32.xlu0 %v687_v25  ;;  %v700_v29 = vld [vmem:[%s10301_s19 + $0xc98] sm:$0xff]  ;;  %v699_v25 = vld [vmem:[%s10301_s19 + $0xc90] sm:$0xff] }
 0x33d   : > { %v1968_v4 = vpop.xlane.xlu1 %1967  ;;  %v1966_v31 = vpop.xlane.xlu0 %1965 }
 0x33e   : > { %v6030_v36 = vrot.slane %v1968_v4, %v10393_v19  ;;  %v6025_v3 = vrot.slane %v1966_v31, %v10399_v21 }
 0x340   : > { %v6026_v8 = vsel %vm4419_vm1, %v6025_v3, %v6021_v30  ;;  %2107 = vadd.xlane.f32.xlu1 %v690_v32  ;;  %2105 = vadd.xlane.f32.xlu0 %v689_v34  ;;  %v702_v34 = vld [vmem:[%s10301_s19 + $0xca8] sm:$0xff] }
 0x341   : > { %v1972_v13 = vpop.xlane.xlu1 %1971  ;;  %v6031_v55 = vsel %vm4426_vm2, %v6030_v36, %v6026_v8  ;;  %v1970_v38 = vpop.xlane.xlu0 %1969  ;;  %v701_v36 = vld [vmem:[%s10301_s19 + $0xca0] sm:$0xff] }
 0x342   : > { %v6040_v41 = vrot.slane %v1972_v13, %v10404_v26  ;;  %v6035_v50 = vrot.slane %v1970_v38, %v10407_v27 }
 0x344   : > { %v6036_v43 = vsel %vm4433_vm3, %v6035_v50, %v6031_v55  ;;  %2111 = vadd.xlane.f32.xlu1 %v692_v51  ;;  %2109 = vadd.xlane.f32.xlu0 %v691_v1  ;;  %v704_v1 = vld [vmem:[%s10301_s19 + $0xcb8] sm:$0xff] }
 0x345   : > { %v1976_v61 = vpop.xlane.xlu1 %1975  ;;  %v6041_v44 = vsel %vm4440_vm4, %v6040_v41, %v6036_v43  ;;  %v1974_v9 = vpop.xlane.xlu0 %1973  ;;  %v703_v41 = vld [vmem:[%s10301_s19 + $0xcb0] sm:$0xff] }
 0x346   : > { %v6050_v47 = vrot.slane %v1976_v61, %v10428_v46  ;;  %v6045_v57 = vrot.slane %v1974_v9, %v10420_v40 }
 0x348   : > { %v6046_v60 = vsel %vm4447_vm5, %v6045_v57, %v6041_v44  ;;  %2115 = vadd.xlane.f32.xlu1 %v694_v42  ;;  %2113 = vadd.xlane.f32.xlu0 %v693_v48  ;;  %v706_v48 = vld [vmem:[%s10301_s19 + $0xcc8] sm:$0xff] }
 0x349   : > { %v1980_v52 = vpop.xlane.xlu1 %1979  ;;  %v6051_v58 = vsel %vm4454_vm6, %v6050_v47, %v6046_v60  ;;  %v1978_v17 = vpop.xlane.xlu0 %1977  ;;  %v705_v47 = vld [vmem:[%s10301_s19 + $0xcc0] sm:$0xff] }
 0x34a   : > { %v6060_v63 = vrot.slane %v1980_v52, %v10435_v53  ;;  %v6055_v2 = vrot.slane %v1978_v17, %v10438_v54 }
 0x34c   : > { %v6056_v0 = vsel %vm4461_vm7, %v6055_v2, %v6051_v58  ;;  %2119 = vadd.xlane.f32.xlu1 %v696_v33  ;;  %2117 = vadd.xlane.f32.xlu0 %v695_v59  ;;  %v708_v33 = vld [vmem:[%s10301_s19 + $0xcd8] sm:$0xff]  ;;  %v707_v59 = vld [vmem:[%s10301_s19 + $0xcd0] sm:$0xff] }
 0x34d   : > { %v1984_v14 = vpop.xlane.xlu1 %1983  ;;  %v6061_v10 = vsel %vm4468_vm8, %v6060_v63, %v6056_v0  ;;  %v1982_v62 = vpop.xlane.xlu0 %1981 }
 0x34e   : > { %v6070_v49 = vrot.slane %v1984_v14, %v10453_v6  ;;  %v6065_v37 = vrot.slane %v1982_v62, %v10456_v7 }
 0x350   : > { %v6066_v22 = vsel %vm4475_vm9, %v6065_v37, %v6061_v10  ;;  %2123 = vadd.xlane.f32.xlu1 %v698_v11  ;;  %2121 = vadd.xlane.f32.xlu0 %v697_v12  ;;  %v710_v11 = vld [vmem:[%s10301_s19 + $0xce8] sm:$0xff]  ;;  %v709_v12 = vld [vmem:[%s10301_s19 + $0xce0] sm:$0xff] }
 0x351   : > { %v1988_v39 = vpop.xlane.xlu1 %1987  ;;  %v6071_v24 = vsel %vm4482_vm10, %v6070_v49, %v6066_v22  ;;  %v1986_v45 = vpop.xlane.xlu0 %1985 }
 0x352   : > { %v6080_v28 = vrot.slane %v1988_v39, %v10463_v15  ;;  %v6075_v56 = vrot.slane %v1986_v45, %v10466_v16 }
 0x354   : > { %v6076_v30 = vsel %vm14404_vm11, %v6075_v56, %v6071_v24  ;;  %2127 = vadd.xlane.f32.xlu1 %v700_v29  ;;  %2125 = vadd.xlane.f32.xlu0 %v699_v25  ;;  %vm14405_vm11 = vcmask 1044484   ;;  %v712_v29 = vld [vmem:[%s10301_s19 + $0xcf8] sm:$0xff]  ;;  %v711_v25 = vld [vmem:[%s10301_s19 + $0xcf0] sm:$0xff] }
 0x355   : > { %v1992_v4 = vpop.xlane.xlu1 %1991  ;;  %v6081_v31 = vsel %vm4496_vm12, %v6080_v28, %v6076_v30  ;;  %v1990_v32 = vpop.xlane.xlu0 %1989 }
 0x356   : > { %v6090_v3 = vrot.slane %v1992_v4, %v10479_v5  ;;  %v6085_v8 = vrot.slane %v1990_v32, %v10482_v35 }
 0x358   : > { %v6086_v13 = vsel %vm4503_vm13, %v6085_v8, %v6081_v31  ;;  %2131 = vadd.xlane.f32.xlu1 %v702_v34  ;;  %2129 = vadd.xlane.f32.xlu0 %v701_v36  ;;  %v714_v34 = vld [vmem:[%s10301_s19 + $0xd08] sm:$0xff]  ;;  %v713_v36 = vld [vmem:[%s10301_s19 + $0xd00] sm:$0xff] }
 0x359   : > { %v6091_v55 = vsel %vm4510_vm14, %v6090_v3, %v6086_v13  ;;  %v1996_v38 = vpop.xlane.xlu1 %1995  ;;  %v1994_v51 = vpop.xlane.xlu0 %1993 }
 0x35a   : > { %v11683_v50 = vsel %vm14405_vm11, %v6091_v55, %v11632_v23  ;;  %v6099_v43 = vrot.slane %v1996_v38, %v10396_v20  ;;  %v6095_v61 = vrot.slane %v1994_v51, %v10390_v18  ;;  %vm14406_vm11 = vcmask 851712  }
 0x35c   : > { %v6100_v44 = vsel %vm4412_vm0, %v6099_v43, %v6095_v61  ;;  %2135 = vadd.xlane.f32.xlu1 %v704_v1  ;;  %2133 = vadd.xlane.f32.xlu0 %v703_v41  ;;  %v716_v1 = vld [vmem:[%s10301_s19 + $0xd18] sm:$0xff]  ;;  %v715_v41 = vld [vmem:[%s10301_s19 + $0xd10] sm:$0xff] }
 0x35d   : > { %v2000_v9 = vpop.xlane.xlu1 %1999  ;;  %v1998_v42 = vpop.xlane.xlu0 %1997 }
 0x35e   : > { %v6109_v57 = vrot.slane %v2000_v9, %v10393_v19  ;;  %v6104_v60 = vrot.slane %v1998_v42, %v10399_v21 }
 0x360   : > { %v6105_v23 = vsel %vm4419_vm1, %v6104_v60, %v6100_v44  ;;  %2139 = vadd.xlane.f32.xlu1 %v706_v48  ;;  %2137 = vadd.xlane.f32.xlu0 %v705_v47  ;;  %v718_v47 = vld [vmem:[%s10301_s19 + $0xd28] sm:$0xff] }
 0x361   : > { %v2004_v52 = vpop.xlane.xlu1 %2003  ;;  %v6110_v58 = vsel %vm4426_vm2, %v6109_v57, %v6105_v23  ;;  %v2002_v17 = vpop.xlane.xlu0 %2001  ;;  %v717_v57 = vld [vmem:[%s10301_s19 + $0xd20] sm:$0xff] }
 0x362   : > { %v6119_v63 = vrot.slane %v2004_v52, %v10404_v26  ;;  %v6114_v2 = vrot.slane %v2002_v17, %v10407_v27 }
 0x364   : > { %v6115_v0 = vsel %vm4433_vm3, %v6114_v2, %v6110_v58  ;;  %2143 = vadd.xlane.f32.xlu1 %v708_v33  ;;  %2141 = vadd.xlane.f32.xlu0 %v707_v59  ;;  %v720_v59 = vld [vmem:[%s10301_s19 + $0xd38] sm:$0xff] }
 0x365   : > { %v2008_v14 = vpop.xlane.xlu1 %2007  ;;  %v6120_v10 = vsel %vm4440_vm4, %v6119_v63, %v6115_v0  ;;  %v2006_v62 = vpop.xlane.xlu0 %2005  ;;  %v719_v63 = vld [vmem:[%s10301_s19 + $0xd30] sm:$0xff]  ;;  %v9933_v0 = vld [vmem:[%s14370_s3] ss:$0 sm:$0xff] }
 0x366   : > { %v6129_v49 = vrot.slane %v2008_v14, %v10428_v46  ;;  %v6124_v37 = vrot.slane %v2006_v62, %v10420_v40  ;;  %v722_v62 = vld [vmem:[%s10301_s19 + $0xd48] sm:$0xff] }
 0x368   : > { %v6125_v22 = vsel %vm4447_vm5, %v6124_v37, %v6120_v10  ;;  %2147 = vadd.xlane.f32.xlu1 %v710_v11  ;;  %2145 = vadd.xlane.f32.xlu0 %v709_v12  ;;  %v721_v11 = vld [vmem:[%s10301_s19 + $0xd40] sm:$0xff] }
 0x369   : > { %v2012_v39 = vpop.xlane.xlu1 %2011  ;;  %v6130_v24 = vsel %vm4454_vm6, %v6129_v49, %v6125_v22  ;;  %v2010_v45 = vpop.xlane.xlu0 %2009 }
 0x36a   : > { %v6139_v28 = vrot.slane %v2012_v39, %v10435_v53  ;;  %v6134_v56 = vrot.slane %v2010_v45, %v10438_v54  ;;  %v724_v39 = vld [vmem:[%s10301_s19 + $0xd58] sm:$0xff] }
 0x36c   : > { %v6135_v30 = vsel %vm4461_vm7, %v6134_v56, %v6130_v24  ;;  %2151 = vadd.xlane.f32.xlu1 %v712_v29  ;;  %2149 = vadd.xlane.f32.xlu0 %v711_v25  ;;  %v723_v29 = vld [vmem:[%s10301_s19 + $0xd50] sm:$0xff]  ;;  %v726_v56 = vld [vmem:[%s10301_s19 + $0xd68] sm:$0xff] }
 0x36d   : > { %v2016_v4 = vpop.xlane.xlu1 %2015  ;;  %v6140_v31 = vsel %vm4468_vm8, %v6139_v28, %v6135_v30  ;;  %v2014_v32 = vpop.xlane.xlu0 %2013 }
 0x36e   : > { %v6149_v3 = vrot.slane %v2016_v4, %v10453_v6  ;;  %v6144_v8 = vrot.slane %v2014_v32, %v10456_v7  ;;  %v725_v4 = vld [vmem:[%s10301_s19 + $0xd60] sm:$0xff]  ;;  %v728_v32 = vld [vmem:[%s10301_s19 + $0xd78] sm:$0xff] }
 0x370   : > { %v6145_v13 = vsel %vm4475_vm9, %v6144_v8, %v6140_v31  ;;  %2155 = vadd.xlane.f32.xlu1 %v714_v34  ;;  %2153 = vadd.xlane.f32.xlu0 %v713_v36  ;;  %v727_v36 = vld [vmem:[%s10301_s19 + $0xd70] sm:$0xff]  ;;  %v730_v8 = vld [vmem:[%s10301_s19 + $0xd88] sm:$0xff] }
 0x371   : > { %v2020_v55 = vpop.xlane.xlu1 %2019  ;;  %v6150_v38 = vsel %vm4482_vm10, %v6149_v3, %v6145_v13  ;;  %v2018_v51 = vpop.xlane.xlu0 %2017 }
 0x372   : > { %v6159_v43 = vrot.slane %v2020_v55, %v10463_v15  ;;  %v6154_v61 = vrot.slane %v2018_v51, %v10466_v16  ;;  %v729_v55 = vld [vmem:[%s10301_s19 + $0xd80] sm:$0xff]  ;;  %v732_v51 = vld [vmem:[%s10301_s19 + $0xd98] sm:$0xff] }
 0x374   : > { %v6155_v44 = vsel %vm14406_vm11, %v6154_v61, %v6150_v38  ;;  %2159 = vadd.xlane.f32.xlu1 %v716_v1  ;;  %2157 = vadd.xlane.f32.xlu0 %v715_v41  ;;  %vm14407_vm11 = vcmask 1045509   ;;  %v731_v41 = vld [vmem:[%s10301_s19 + $0xd90] sm:$0xff]  ;;  %v734_v61 = vld [vmem:[%s10301_s19 + $0xda8] sm:$0xff] }
 0x375   : > { %v2024_v9 = vpop.xlane.xlu1 %2023  ;;  %v6160_v42 = vsel %vm4496_vm12, %v6159_v43, %v6155_v44  ;;  %v2022_v48 = vpop.xlane.xlu0 %2021 }
 0x376   : > { %v6169_v60 = vrot.slane %v2024_v9, %v10479_v5  ;;  %v6164_v23 = vrot.slane %v2022_v48, %v10482_v35  ;;  %v733_v9 = vld [vmem:[%s10301_s19 + $0xda0] sm:$0xff] }
 0x378   : > { %v6165_v52 = vsel %vm4503_vm13, %v6164_v23, %v6160_v42  ;;  %2163 = vadd.xlane.f32.xlu1 %v718_v47  ;;  %2161 = vadd.xlane.f32.xlu0 %v717_v57 }
 0x379   : > { %v6170_v58 = vsel %vm4510_vm14, %v6169_v60, %v6165_v52  ;;  %v11730_v17 = vpop.xlane.xlu1 %2027  ;;  %v11732_v33 = vpop.xlane.xlu0 %2025  ;;  %v736_v60 = vld [vmem:[%s10301_s19 + $0xdb8] sm:$0xff]  ;;  %v735_v52 = vld [vmem:[%s10301_s19 + $0xdb0] sm:$0xff] }
 0x37a   : > { %v11738_v2 = vsel %vm14407_vm11, %v6170_v58, %v11683_v50  ;;  %v6178_v42 = vrot.slane %v11730_v17, %v10396_v20  ;;  %v6174_v48 = vrot.slane %v11732_v33, %v10390_v18  ;;  %vm14408_vm11 = vcmask 851712  }
 0x37c   : > { %2167 = vadd.xlane.f32.xlu1 %v720_v59  ;;  %2165 = vadd.xlane.f32.xlu0 %v719_v63  ;;  %v6179_v58 = vsel %vm4412_vm0, %v6178_v42, %v6174_v48  ;;  %v741_v48 = vld [vmem:[%s10301_s19 + $0xde0] sm:$0xff] }
 0x37d   : > { %v11743_v14 = vpop.xlane.xlu1 %2031  ;;  %v10021_v10 = vpop.f32.mrf.mxu0 }
 0x37e   : > { %v2030_v12 = vpop.xlane.xlu0 %2029  ;;  %v9663_v49 = vadd.f32 %v10021_v10, %v9933_v0  ;;  %v6188_v59 = vrot.slane %v11743_v14, %v10393_v19 }
 0x37f   : > { %v9657_v37 = vpop.f32.mrf.mxu0  ;;  %v6183_v47 = vrot.slane %v2030_v12, %v10399_v21  ;;  %v737_v12 = vld [vmem:[%s10301_s19 + $0xdc0] sm:$0xff] }
 0x380   : > { %2171 = vadd.xlane.f32.xlu1 %v722_v62  ;;  %2169 = vadd.xlane.f32.xlu0 %v721_v11  ;;  %v9658_v50 = vadd.f32 %v9933_v0, %v9657_v37  ;;  %v9697_v25 = vmax.f32 %v9663_v49, 0.0  ;;  %v738_v62 = vld [vmem:[%s10301_s19 + $0xdc8] sm:$0xff] }
 0x381   : > { %v11747_v22 = vpop.xlane.xlu1 %2035  ;;  %v6184_v17 = vsel %vm4419_vm1, %v6183_v47, %v6179_v58 }
 0x382   : > { %v2034_v24 = vpop.xlane.xlu0 %2033  ;;  %v9696_v45 = vmax.f32 %v9658_v50, 0.0  ;;  %v6198_v49 = vrot.slane %v11747_v22, %v10404_v26  ;;  %v6189_v14 = vsel %vm4426_vm2, %v6188_v59, %v6184_v17  ;;  %v740_v22 = vld [vmem:[%s10301_s19 + $0xdd8] sm:$0xff] }
 0x383   : > { %v6193_v63 = vrot.slane %v2034_v24, %v10407_v27 }
 0x384   : > { %2175 = vadd.xlane.f32.xlu1 %v724_v39  ;;  %10063 = vmatprep.mubr.f32.mxu1 %v9696_v45 }
 0x385   : > { %2173 = vadd.xlane.f32.xlu0 %v723_v29  ;;  %v11751_v28 = vpop.xlane.xlu1 %2039  ;;  %10064 = vmatmul.mubr.f32.vlgmr.msra.gmra.mxu1 %v9697_v25  ;;  %v6194_v50 = vsel %vm4433_vm3, %v6193_v63, %v6189_v14 }
 0x386   : > { %v11754_v30 = vpop.xlane.xlu0 %2037 }
 0x387   : > { %v6203_v39 = vrot.slane %v11754_v30, %v10420_v40 }
 0x388   : > { %2179 = vadd.xlane.f32.xlu1 %v726_v56 }
 0x389   : > { %2177 = vadd.xlane.f32.xlu0 %v725_v4  ;;  %v11757_v31 = vpop.xlane.xlu1 %2043  ;;  %v739_v4 = vld [vmem:[%s10301_s19 + $0xdd0] sm:$0xff] }
 0x38a   : > { %v11760_v34 = vpop.xlane.xlu0 %2041  ;;  %v6218_v47 = vrot.slane %v11757_v31, %v10435_v53  ;;  %v744_v31 = vld [vmem:[%s10301_s19 + $0xdf8] sm:$0xff] }
 0x38c   : > { %2183 = vadd.xlane.f32.xlu1 %v728_v32  ;;  %v6208_v32 = vrot.slane %v11751_v28, %v10428_v46  ;;  %v742_v28 = vld [vmem:[%s10301_s19 + $0xde8] sm:$0xff] }
 0x38d   : > { %2181 = vadd.xlane.f32.xlu0 %v727_v36  ;;  %v11763_v3 = vpop.xlane.xlu1 %2047  ;;  %v6199_v36 = vsel %vm4440_vm4, %v6198_v49, %v6194_v50 }
 0x38e   : > { %v11766_v13 = vpop.xlane.xlu0 %2045 }
 0x390   : > { %2187 = vadd.xlane.f32.xlu1 %v730_v8  ;;  %v6204_v8 = vsel %vm4447_vm5, %v6203_v39, %v6199_v36  ;;  %v745_v39 = vld [vmem:[%s10301_s19 + $0xe00] sm:$0xff] }
 0x391   : > { %2185 = vadd.xlane.f32.xlu0 %v729_v55  ;;  %v11769_v38 = vpop.xlane.xlu1 %2051  ;;  %v6213_v55 = vrot.slane %v11760_v34, %v10438_v54 }
 0x392   : > { %v11772_v1 = vpop.xlane.xlu0 %2049 }
 0x394   : > { %2191 = vadd.xlane.f32.xlu1 %v732_v51 }
 0x395   : > { %2189 = vadd.xlane.f32.xlu0 %v731_v41  ;;  %v11775_v43 = vpop.xlane.xlu1 %2055 }
 0x396   : > { %v11778_v44 = vpop.xlane.xlu0 %2053 }
 0x398   : > { %2195 = vadd.xlane.f32.xlu1 %v734_v61 }
 0x399   : > { %2193 = vadd.xlane.f32.xlu0 %v733_v9  ;;  %v2060_v57 = vpop.xlane.xlu1 %2059 }
 0x39a   : > { %v2058_v23 = vpop.xlane.xlu0 %2057  ;;  %v6257_v33 = vrot.slane %v2060_v57, %v10396_v20  ;;  %v6209_v57 = vsel %vm4454_vm6, %v6208_v32, %v6204_v8  ;;  %v6248_v8 = vrot.slane %v11775_v43, %v10479_v5 }
 0x39b   : > { %v6253_v0 = vrot.slane %v2058_v23, %v10390_v18  ;;  %v6223_v23 = vrot.slane %v11766_v13, %v10456_v7 }
 0x39c   : > { %2199 = vadd.xlane.f32.xlu1 %v736_v60  ;;  %v6214_v60 = vsel %vm4461_vm7, %v6213_v55, %v6209_v57 }
 0x39d   : > { %2197 = vadd.xlane.f32.xlu0 %v735_v52  ;;  %v2064_v10 = vpop.xlane.xlu1 %2063  ;;  %v6258_v24 = vsel %vm4412_vm0, %v6257_v33, %v6253_v0  ;;  %v743_v33 = vld [vmem:[%s10301_s19 + $0xdf0] sm:$0xff]  ;;  %v6228_v0 = vrot.slane %v11763_v3, %v10453_v6  ;;  %v746_v3 = vld [vmem:[%s10301_s19 + $0xe08] sm:$0xff] }
 0x39e   : > { %v2062_v11 = vpop.xlane.xlu0 %2061  ;;  %v6267_v45 = vrot.slane %v2064_v10, %v10393_v19  ;;  %v6219_v10 = vsel %vm4468_vm8, %v6218_v47, %v6214_v60  ;;  %v749_v47 = vld [vmem:[%s10301_s19 + $0xe20] sm:$0xff] }
 0x39f   : > { %v6262_v37 = vrot.slane %v2062_v11, %v10399_v21  ;;  %v6233_v11 = vrot.slane %v11772_v1, %v10466_v16 }
 0x3a0   : > { %2203 = vadd.xlane.f32.xlu1 %v738_v62  ;;  %v6224_v62 = vsel %vm4475_vm9, %v6223_v23, %v6219_v10 }
 0x3a1   : > { %v6263_v29 = vsel %vm4419_vm1, %v6262_v37, %v6258_v24  ;;  %2201 = vadd.xlane.f32.xlu0 %v737_v12  ;;  %v2068_v25 = vpop.xlane.xlu1 %2067  ;;  %v6238_v24 = vrot.slane %v11769_v38, %v10463_v15  ;;  %v748_v38 = vld [vmem:[%s10301_s19 + $0xe18] sm:$0xff] }
 0x3a2   : > { %v2066_v56 = vpop.xlane.xlu0 %2065  ;;  %v6277_v51 = vrot.slane %v2068_v25, %v10404_v26  ;;  %v6268_v41 = vsel %vm4426_vm2, %v6267_v45, %v6263_v29  ;;  %v6229_v45 = vsel %vm4482_vm10, %v6228_v0, %v6224_v62  ;;  %v6243_v25 = vrot.slane %v11778_v44, %v10482_v35 }
 0x3a3   : > { %v6272_v30 = vrot.slane %v2066_v56, %v10407_v27  ;;  %v6234_v29 = vsel %vm14408_vm11, %v6233_v11, %v6229_v45 }
 0x3a4   : > { %2207 = vadd.xlane.f32.xlu1 %v740_v22  ;;  %v6239_v55 = vsel %vm4496_vm12, %v6238_v24, %v6234_v29  ;;  %v756_v24 = vld [vmem:[%s10301_s19 + $0xe58] sm:$0xff] }
 0x3a5   : > { %v6273_v61 = vsel %vm4433_vm3, %v6272_v30, %v6268_v41  ;;  %2205 = vadd.xlane.f32.xlu0 %v739_v4  ;;  %v2072_v9 = vpop.xlane.xlu1 %2071  ;;  %v747_v30 = vld [vmem:[%s10301_s19 + $0xe10] sm:$0xff] }
 0x3a6   : > { %v2070_v42 = vpop.xlane.xlu0 %2069  ;;  %v6287_v52 = vrot.slane %v2072_v9, %v10428_v46  ;;  %v6278_v58 = vsel %vm4440_vm4, %v6277_v51, %v6273_v61  ;;  %v6244_v51 = vsel %vm4503_vm13, %v6243_v25, %v6239_v55  ;;  %v755_v25 = vld [vmem:[%s10301_s19 + $0xe50] sm:$0xff] }
 0x3a7   : > { %v6282_v34 = vrot.slane %v2070_v42, %v10420_v40  ;;  %v750_v42 = vld [vmem:[%s10301_s19 + $0xe28] sm:$0xff]  ;;  %v6249_v57 = vsel %vm4510_vm14, %v6248_v8, %v6244_v51  ;;  %v757_v8 = vld [vmem:[%s10301_s19 + $0xe60] sm:$0xff] }
 0x3a8   : > { %2211 = vadd.xlane.f32.xlu1 %v742_v28  ;;  %v9515_v0 = vsel %vm9499_vm15, %v6249_v57, %v11738_v2  ;;  %v762_v57 = vld [vmem:[%s10301_s19 + $0xe88] sm:$0xff] }
 0x3a9   : > { %v6283_v59 = vsel %vm4447_vm5, %v6282_v34, %v6278_v58  ;;  %2209 = vadd.xlane.f32.xlu0 %v741_v48  ;;  %v2076_v17 = vpop.xlane.xlu1 %2075  ;;  %v752_v58 = vld [vmem:[%s10301_s19 + $0xe38] sm:$0xff] }
 0x3aa   : > { %v2074_v63 = vpop.xlane.xlu0 %2073  ;;  %v6297_v12 = vrot.slane %v2076_v17, %v10435_v53  ;;  %v6288_v49 = vsel %vm4454_vm6, %v6287_v52, %v6283_v59  ;;  %v3371_v59 = vld [vmem:[%s10884_s14 + $0x10] sm:$0xff] }
 0x3ab   : > { %v6292_v13 = vrot.slane %v2074_v63, %v10438_v54  ;;  %v751_v63 = vld [vmem:[%s10301_s19 + $0xe30] sm:$0xff] }
 0x3ac   : > { %2215 = vadd.xlane.f32.xlu1 %v744_v31 }
 0x3ad   : > { %v6293_v14 = vsel %vm4461_vm7, %v6292_v13, %v6288_v49  ;;  %2213 = vadd.xlane.f32.xlu0 %v743_v33  ;;  %v2080_v37 = vpop.xlane.xlu1 %2079  ;;  %v754_v49 = vld [vmem:[%s10301_s19 + $0xe48] sm:$0xff] }
 0x3ae   : > { %v2078_v50 = vpop.xlane.xlu0 %2077  ;;  %v6307_v22 = vrot.slane %v2080_v37, %v10453_v6  ;;  %v6298_v56 = vsel %vm4468_vm8, %v6297_v12, %v6293_v14 }
 0x3af   : > { %v6302_v1 = vrot.slane %v2078_v50, %v10456_v7 }
 0x3b0   : > { %2219 = vadd.xlane.f32.xlu1 %v746_v3  ;;  %v753_v3 = vld [vmem:[%s10301_s19 + $0xe40] sm:$0xff] }
 0x3b1   : > { %v6303_v4 = vsel %vm4475_vm9, %v6302_v1, %v6298_v56  ;;  %2217 = vadd.xlane.f32.xlu0 %v745_v39  ;;  %v2084_v32 = vpop.xlane.xlu1 %2083 }
 0x3b2   : > { %v2082_v36 = vpop.xlane.xlu0 %2081  ;;  %v6317_v41 = vrot.slane %v2084_v32, %v10463_v15  ;;  %v6308_v61 = vsel %vm4482_vm10, %v6307_v22, %v6303_v4  ;;  %v758_v32 = vld [vmem:[%s10301_s19 + $0xe68] sm:$0xff] }
 0x3b3   : > { %v6312_v44 = vrot.slane %v2082_v36, %v10466_v16 }
 0x3b4   : > { %2223 = vadd.xlane.f32.xlu1 %v748_v38 }
 0x3b5   : > { %v6313_v9 = vsel %vm14408_vm11, %v6312_v44, %v6308_v61  ;;  %2221 = vadd.xlane.f32.xlu0 %v747_v30  ;;  %v2088_v28 = vpop.xlane.xlu1 %2087  ;;  %vm14409_vm11 = vcmask 1047559  }
 0x3b6   : > { %v6327_v43 = vrot.slane %v2088_v28, %v10479_v5  ;;  %v2086_v48 = vpop.xlane.xlu0 %2085  ;;  %v6318_v60 = vsel %vm4496_vm12, %v6317_v41, %v6313_v9  ;;  %v760_v41 = vld [vmem:[%s10301_s19 + $0xe78] sm:$0xff] }
 0x3b7   : > { %v6322_v34 = vrot.slane %v2086_v48, %v10482_v35 }
 0x3b8   : > { %2227 = vadd.xlane.f32.xlu1 %v750_v42  ;;  %v759_v42 = vld [vmem:[%s10301_s19 + $0xe70] sm:$0xff] }
 0x3b9   : > { %v6323_v23 = vsel %vm4503_vm13, %v6322_v34, %v6318_v60  ;;  %2225 = vadd.xlane.f32.xlu0 %v749_v47  ;;  %v2092_v52 = vpop.xlane.xlu1 %2091 }
 0x3ba   : > { %v6336_v17 = vrot.slane %v2092_v52, %v10396_v20  ;;  %v2090_v31 = vpop.xlane.xlu0 %2089  ;;  %v6328_v33 = vsel %vm4510_vm14, %v6327_v43, %v6323_v23  ;;  %v761_v52 = vld [vmem:[%s10301_s19 + $0xe80] sm:$0xff] }
 0x3bb   : > { %v6332_v10 = vrot.slane %v2090_v31, %v10390_v18  ;;  %v9516_v13 = vsel %vm14409_vm11, %v6328_v33, %v9515_v0  ;;  %v764_v31 = vld [vmem:[%s10301_s19 + $0xe98] sm:$0xff]  ;;  %vm14410_vm11 = vcmask 851712  }
 0x3bc   : > { %2231 = vadd.xlane.f32.xlu1 %v752_v58  ;;  %v9562_v62 = vmul.f32 %v9516_v13, %v3371_v59 }
 0x3bd   : > { %v6337_v11 = vsel %vm4412_vm0, %v6336_v17, %v6332_v10  ;;  %2229 = vadd.xlane.f32.xlu0 %v751_v63  ;;  %v2096_v12 = vpop.xlane.xlu1 %2095  ;;  %v763_v10 = vld [vmem:[%s10301_s19 + $0xe90] sm:$0xff] }
 0x3be   : > { %v6346_v14 = vrot.slane %v2096_v12, %v10393_v19  ;;  %10022 = vmatprep.mubr.f32.mxu0 %v9562_v62  ;;  %v2094_v37 = vpop.xlane.xlu0 %2093  ;;  %v766_v12 = vld [vmem:[%s10301_s19 + $0xea8] sm:$0xff] }
 0x3bf   : > { %v6341_v2 = vrot.slane %v2094_v37, %v10399_v21 }
 0x3c0   : > { %2235 = vadd.xlane.f32.xlu1 %v754_v49 }
 0x3c1   : > { %v6342_v50 = vsel %vm4419_vm1, %v6341_v2, %v6337_v11  ;;  %2233 = vadd.xlane.f32.xlu0 %v753_v3  ;;  %v2100_v39 = vpop.xlane.xlu1 %2099  ;;  %v765_v3 = vld [vmem:[%s10301_s19 + $0xea0] sm:$0xff] }
 0x3c2   : > { %v6356_v45 = vrot.slane %v2100_v39, %v10404_v26  ;;  %v6347_v1 = vsel %vm4426_vm2, %v6346_v14, %v6342_v50  ;;  %v2098_v29 = vpop.xlane.xlu0 %2097 }
 0x3c3   : > { %v6351_v22 = vrot.slane %v2098_v29, %v10407_v27 }
 0x3c4   : > { %2239 = vadd.xlane.f32.xlu1 %v756_v24  ;;  %v768_v24 = vld [vmem:[%s10301_s19 + $0xeb8] sm:$0xff] }
 0x3c5   : > { %v6352_v56 = vsel %vm4433_vm3, %v6351_v22, %v6347_v1  ;;  %2237 = vadd.xlane.f32.xlu0 %v755_v25  ;;  %v2104_v4 = vpop.xlane.xlu1 %2103  ;;  %v767_v25 = vld [vmem:[%s10301_s19 + $0xeb0] sm:$0xff] }
 0x3c6   : > { %v6366_v38 = vrot.slane %v2104_v4, %v10428_v46  ;;  %v6357_v36 = vsel %vm4440_vm4, %v6356_v45, %v6352_v56  ;;  %v2102_v30 = vpop.xlane.xlu0 %2101 }
 0x3c7   : > { %v6361_v55 = vrot.slane %v2102_v30, %v10420_v40  ;;  %v769_v30 = vld [vmem:[%s10301_s19 + $0xec0] sm:$0xff] }
 0x3c8   : > { %2243 = vadd.xlane.f32.xlu1 %v758_v32  ;;  %v770_v32 = vld [vmem:[%s10301_s19 + $0xec8] sm:$0xff] }
 0x3c9   : > { %v6362_v44 = vsel %vm4447_vm5, %v6361_v55, %v6357_v36  ;;  %2241 = vadd.xlane.f32.xlu0 %v757_v8  ;;  %v2108_v51 = vpop.xlane.xlu1 %2107 }
 0x3ca   : > { %v6376_v61 = vrot.slane %v2108_v51, %v10435_v53  ;;  %v6367_v9 = vsel %vm4454_vm6, %v6366_v38, %v6362_v44  ;;  %v2106_v28 = vpop.xlane.xlu0 %2105  ;;  %v772_v51 = vld [vmem:[%s10301_s19 + $0xed8] sm:$0xff] }
 0x3cb   : > { %v6371_v43 = vrot.slane %v2106_v28, %v10438_v54  ;;  %v771_v28 = vld [vmem:[%s10301_s19 + $0xed0] sm:$0xff] }
 0x3cc   : > { %2247 = vadd.xlane.f32.xlu1 %v760_v41 }
 0x3cd   : > { %v6372_v48 = vsel %vm4461_vm7, %v6371_v43, %v6367_v9  ;;  %2245 = vadd.xlane.f32.xlu0 %v759_v42  ;;  %v2112_v47 = vpop.xlane.xlu1 %2111 }
 0x3ce   : > { %v6386_v34 = vrot.slane %v2112_v47, %v10453_v6  ;;  %v6377_v60 = vsel %vm4468_vm8, %v6376_v61, %v6372_v48  ;;  %v2110_v23 = vpop.xlane.xlu0 %2109  ;;  %v774_v47 = vld [vmem:[%s10301_s19 + $0xee8] sm:$0xff] }
 0x3cf   : > { %v6381_v58 = vrot.slane %v2110_v23, %v10456_v7  ;;  %v773_v23 = vld [vmem:[%s10301_s19 + $0xee0] sm:$0xff] }
 0x3d0   : > { %2251 = vadd.xlane.f32.xlu1 %v762_v57 }
 0x3d1   : > { %v6382_v59 = vsel %vm4475_vm9, %v6381_v58, %v6377_v60  ;;  %2249 = vadd.xlane.f32.xlu0 %v761_v52  ;;  %v2116_v17 = vpop.xlane.xlu1 %2115 }
 0x3d2   : > { %v6396_v63 = vrot.slane %v2116_v17, %v10463_v15  ;;  %v6387_v33 = vsel %vm4482_vm10, %v6386_v34, %v6382_v59  ;;  %v2114_v0 = vpop.xlane.xlu0 %2113  ;;  %v776_v17 = vld [vmem:[%s10301_s19 + $0xef8] sm:$0xff] }
 0x3d3   : > { %v6391_v13 = vrot.slane %v2114_v0, %v10466_v16  ;;  %v775_v0 = vld [vmem:[%s10301_s19 + $0xef0] sm:$0xff] }
 0x3d4   : > { %2255 = vadd.xlane.f32.xlu1 %v764_v31 }
 0x3d5   : > { %v6392_v62 = vsel %vm14410_vm11, %v6391_v13, %v6387_v33  ;;  %2253 = vadd.xlane.f32.xlu0 %v763_v10  ;;  %v2120_v11 = vpop.xlane.xlu1 %2119 }
 0x3d6   : > { %v6406_v49 = vrot.slane %v2120_v11, %v10479_v5  ;;  %v6397_v14 = vsel %vm4496_vm12, %v6396_v63, %v6392_v62  ;;  %v2118_v37 = vpop.xlane.xlu0 %2117  ;;  %v778_v11 = vld [vmem:[%s10301_s19 + $0xf08] sm:$0xff] }
 0x3d7   : > { %v6401_v2 = vrot.slane %v2118_v37, %v10482_v35  ;;  %v777_v37 = vld [vmem:[%s10301_s19 + $0xf00] sm:$0xff] }
 0x3d8   : > { %2259 = vadd.xlane.f32.xlu1 %v766_v12 }
 0x3d9   : > { %v6402_v50 = vsel %vm4503_vm13, %v6401_v2, %v6397_v14  ;;  %2257 = vadd.xlane.f32.xlu0 %v765_v3  ;;  %v2124_v39 = vpop.xlane.xlu1 %2123 }
 0x3da   : > { %v11925_v45 = vsel %vm4510_vm14, %v6406_v49, %v6402_v50  ;;  %v6415_v1 = vrot.slane %v2124_v39, %v10396_v20  ;;  %v2122_v29 = vpop.xlane.xlu0 %2121  ;;  %v780_v39 = vld [vmem:[%s10301_s19 + $0xf18] sm:$0xff] }
 0x3db   : > { %v6411_v22 = vrot.slane %v2122_v29, %v10390_v18 }
 0x3dc   : > { %2263 = vadd.xlane.f32.xlu1 %v768_v24 }
 0x3dd   : > { %v6416_v56 = vsel %vm4412_vm0, %v6415_v1, %v6411_v22  ;;  %2261 = vadd.xlane.f32.xlu0 %v767_v25  ;;  %v2128_v4 = vpop.xlane.xlu1 %2127  ;;  %v779_v25 = vld [vmem:[%s10301_s19 + $0xf10] sm:$0xff] }
 0x3de   : > { %v6425_v38 = vrot.slane %v2128_v4, %v10393_v19  ;;  %v2126_v36 = vpop.xlane.xlu0 %2125 }
 0x3df   : > { %v6420_v8 = vrot.slane %v2126_v36, %v10399_v21 }
 0x3e0   : > { %2267 = vadd.xlane.f32.xlu1 %v770_v32  ;;  %v782_v32 = vld [vmem:[%s10301_s19 + $0xf28] sm:$0xff] }
 0x3e1   : > { %v6421_v55 = vsel %vm4419_vm1, %v6420_v8, %v6416_v56  ;;  %2265 = vadd.xlane.f32.xlu0 %v769_v30  ;;  %v2132_v44 = vpop.xlane.xlu1 %2131  ;;  %v781_v8 = vld [vmem:[%s10301_s19 + $0xf20] sm:$0xff] }
 0x3e2   : > { %v6435_v41 = vrot.slane %v2132_v44, %v10404_v26  ;;  %v6426_v61 = vsel %vm4426_vm2, %v6425_v38, %v6421_v55  ;;  %v2130_v9 = vpop.xlane.xlu0 %2129 }
 0x3e3   : > { %v6430_v42 = vrot.slane %v2130_v9, %v10407_v27 }
 0x3e4   : > { %2271 = vadd.xlane.f32.xlu1 %v772_v51 }
 0x3e5   : > { %v6431_v43 = vsel %vm4433_vm3, %v6430_v42, %v6426_v61  ;;  %2269 = vadd.xlane.f32.xlu0 %v771_v28  ;;  %v2136_v48 = vpop.xlane.xlu1 %2135  ;;  %v783_v42 = vld [vmem:[%s10301_s19 + $0xf30] sm:$0xff] }
 0x3e6   : > { %v6445_v57 = vrot.slane %v2136_v48, %v10428_v46  ;;  %v6436_v34 = vsel %vm4440_vm4, %v6435_v41, %v6431_v43  ;;  %v2134_v60 = vpop.xlane.xlu0 %2133  ;;  %v784_v41 = vld [vmem:[%s10301_s19 + $0xf38] sm:$0xff] }
 0x3e7   : > { %v6440_v52 = vrot.slane %v2134_v60, %v10420_v40 }
 0x3e8   : > { %2275 = vadd.xlane.f32.xlu1 %v774_v47 }
 0x3e9   : > { %v6441_v58 = vsel %vm4447_vm5, %v6440_v52, %v6436_v34  ;;  %2273 = vadd.xlane.f32.xlu0 %v773_v23  ;;  %v2140_v59 = vpop.xlane.xlu1 %2139  ;;  %v786_v34 = vld [vmem:[%s10301_s19 + $0xf48] sm:$0xff]  ;;  %v785_v52 = vld [vmem:[%s10301_s19 + $0xf40] sm:$0xff] }
 0x3ea   : > { %v6455_v31 = vrot.slane %v2140_v59, %v10435_v53  ;;  %v6446_v63 = vsel %vm4454_vm6, %v6445_v57, %v6441_v58  ;;  %v2138_v33 = vpop.xlane.xlu0 %2137 }
 0x3eb   : > { %v6450_v10 = vrot.slane %v2138_v33, %v10438_v54 }
 0x3ec   : > { %2279 = vadd.xlane.f32.xlu1 %v776_v17  ;;  %v788_v17 = vld [vmem:[%s10301_s19 + $0xf58] sm:$0xff] }
 0x3ed   : > { %v6451_v13 = vsel %vm4461_vm7, %v6450_v10, %v6446_v63  ;;  %2277 = vadd.xlane.f32.xlu0 %v775_v0  ;;  %v2144_v62 = vpop.xlane.xlu1 %2143  ;;  %v787_v0 = vld [vmem:[%s10301_s19 + $0xf50] sm:$0xff] }
 0x3ee   : > { %v6465_v12 = vrot.slane %v2144_v62, %v10453_v6  ;;  %v6456_v49 = vsel %vm4468_vm8, %v6455_v31, %v6451_v13  ;;  %v2142_v14 = vpop.xlane.xlu0 %2141 }
 0x3ef   : > { %v6460_v3 = vrot.slane %v2142_v14, %v10456_v7 }
 0x3f0   : > { %2283 = vadd.xlane.f32.xlu1 %v778_v11  ;;  %v790_v11 = vld [vmem:[%s10301_s19 + $0xf68] sm:$0xff] }
 0x3f1   : > { %v6461_v2 = vsel %vm4475_vm9, %v6460_v3, %v6456_v49  ;;  %2281 = vadd.xlane.f32.xlu0 %v777_v37  ;;  %v2148_v50 = vpop.xlane.xlu1 %2147  ;;  %v789_v37 = vld [vmem:[%s10301_s19 + $0xf60] sm:$0xff] }
 0x3f2   : > { %v6475_v24 = vrot.slane %v2148_v50, %v10463_v15  ;;  %v6466_v1 = vsel %vm4482_vm10, %v6465_v12, %v6461_v2  ;;  %v2146_v29 = vpop.xlane.xlu0 %2145 }
 0x3f3   : > { %v6470_v22 = vrot.slane %v2146_v29, %v10466_v16 }
 0x3f4   : > { %2287 = vadd.xlane.f32.xlu1 %v780_v39  ;;  %v792_v39 = vld [vmem:[%s10301_s19 + $0xf78] sm:$0xff] }
 0x3f5   : > { %v6471_v56 = vsel %vm14410_vm11, %v6470_v22, %v6466_v1  ;;  %2285 = vadd.xlane.f32.xlu0 %v779_v25  ;;  %v2152_v4 = vpop.xlane.xlu1 %2151  ;;  %vm14411_vm11 = vcmask 1041409   ;;  %v791_v25 = vld [vmem:[%s10301_s19 + $0xf70] sm:$0xff] }
 0x3f6   : > { %v6485_v38 = vrot.slane %v2152_v4, %v10479_v5  ;;  %v6476_v36 = vsel %vm4496_vm12, %v6475_v24, %v6471_v56  ;;  %v2150_v30 = vpop.xlane.xlu0 %2149 }
 0x3f7   : > { %v6480_v55 = vrot.slane %v2150_v30, %v10482_v35 }
 0x3f8   : > { %2291 = vadd.xlane.f32.xlu1 %v782_v32  ;;  %v794_v32 = vld [vmem:[%s10301_s19 + $0xf88] sm:$0xff] }
 0x3f9   : > { %v6481_v44 = vsel %vm4503_vm13, %v6480_v55, %v6476_v36  ;;  %2289 = vadd.xlane.f32.xlu0 %v781_v8  ;;  %v2156_v51 = vpop.xlane.xlu1 %2155  ;;  %v793_v8 = vld [vmem:[%s10301_s19 + $0xf80] sm:$0xff] }
 0x3fa   : > { %v6486_v61 = vsel %vm4510_vm14, %v6485_v38, %v6481_v44  ;;  %v6494_v9 = vrot.slane %v2156_v51, %v10396_v20  ;;  %v2154_v28 = vpop.xlane.xlu0 %2153 }
 0x3fb   : > { %v11978_v43 = vsel %vm14411_vm11, %v6486_v61, %v11925_v45  ;;  %v6490_v48 = vrot.slane %v2154_v28, %v10390_v18  ;;  %vm14412_vm11 = vcmask 851712  }
 0x3fc   : > { %2295 = vadd.xlane.f32.xlu1 %v784_v41  ;;  %v796_v41 = vld [vmem:[%s10301_s19 + $0xf98] sm:$0xff] }
 0x3fd   : > { %v6495_v47 = vsel %vm4412_vm0, %v6494_v9, %v6490_v48  ;;  %2293 = vadd.xlane.f32.xlu0 %v783_v42  ;;  %v2160_v57 = vpop.xlane.xlu1 %2159  ;;  %v795_v42 = vld [vmem:[%s10301_s19 + $0xf90] sm:$0xff] }
 0x3fe   : > { %v6504_v60 = vrot.slane %v2160_v57, %v10393_v19  ;;  %v2158_v23 = vpop.xlane.xlu0 %2157 }
 0x3ff   : > { %v6499_v58 = vrot.slane %v2158_v23, %v10399_v21 }
 0x400   : > { %2299 = vadd.xlane.f32.xlu1 %v786_v34  ;;  %v798_v34 = vld [vmem:[%s10301_s19 + $0xfa8] sm:$0xff] }
 0x401   : > { %v6500_v45 = vsel %vm4419_vm1, %v6499_v58, %v6495_v47  ;;  %2297 = vadd.xlane.f32.xlu0 %v785_v52  ;;  %v2164_v59 = vpop.xlane.xlu1 %2163  ;;  %v797_v58 = vld [vmem:[%s10301_s19 + $0xfa0] sm:$0xff] }
 0x402   : > { %v6514_v31 = vrot.slane %v2164_v59, %v10404_v26  ;;  %v6505_v63 = vsel %vm4426_vm2, %v6504_v60, %v6500_v45  ;;  %v2162_v33 = vpop.xlane.xlu0 %2161 }
 0x403   : > { %v6509_v10 = vrot.slane %v2162_v33, %v10407_v27 }
 0x404   : > { %2303 = vadd.xlane.f32.xlu1 %v788_v17 }
 0x405   : > { %v6510_v13 = vsel %vm4433_vm3, %v6509_v10, %v6505_v63  ;;  %2301 = vadd.xlane.f32.xlu0 %v787_v0  ;;  %v2168_v62 = vpop.xlane.xlu1 %2167  ;;  %v799_v10 = vld [vmem:[%s10301_s19 + $0xfb0] sm:$0xff] }
 0x406   : > { %v6524_v12 = vrot.slane %v2168_v62, %v10428_v46  ;;  %v6515_v49 = vsel %vm4440_vm4, %v6514_v31, %v6510_v13  ;;  %v2166_v14 = vpop.xlane.xlu0 %2165  ;;  %v800_v31 = vld [vmem:[%s10301_s19 + $0xfb8] sm:$0xff] }
 0x407   : > { %v6519_v3 = vrot.slane %v2166_v14, %v10420_v40 }
 0x408   : > { %2307 = vadd.xlane.f32.xlu1 %v790_v11 }
 0x409   : > { %v6520_v2 = vsel %vm4447_vm5, %v6519_v3, %v6515_v49  ;;  %2305 = vadd.xlane.f32.xlu0 %v789_v37  ;;  %v2172_v50 = vpop.xlane.xlu1 %2171  ;;  %v802_v49 = vld [vmem:[%s10301_s19 + $0xfc8] sm:$0xff]  ;;  %v801_v3 = vld [vmem:[%s10301_s19 + $0xfc0] sm:$0xff] }
 0x40a   : > { %v6534_v24 = vrot.slane %v2172_v50, %v10435_v53  ;;  %v6525_v1 = vsel %vm4454_vm6, %v6524_v12, %v6520_v2  ;;  %v2170_v29 = vpop.xlane.xlu0 %2169 }
 0x40b   : > { %v6529_v22 = vrot.slane %v2170_v29, %v10438_v54 }
 0x40c   : > { %2311 = vadd.xlane.f32.xlu1 %v792_v39  ;;  %v804_v39 = vld [vmem:[%s10301_s19 + $0xfd8] sm:$0xff] }
 0x40d   : > { %v6530_v56 = vsel %vm4461_vm7, %v6529_v22, %v6525_v1  ;;  %2309 = vadd.xlane.f32.xlu0 %v791_v25  ;;  %v2176_v4 = vpop.xlane.xlu1 %2175  ;;  %v803_v25 = vld [vmem:[%s10301_s19 + $0xfd0] sm:$0xff] }
 0x40e   : > { %v6544_v38 = vrot.slane %v2176_v4, %v10453_v6  ;;  %v6535_v36 = vsel %vm4468_vm8, %v6534_v24, %v6530_v56  ;;  %v2174_v30 = vpop.xlane.xlu0 %2173 }
 0x40f   : > { %v6539_v55 = vrot.slane %v2174_v30, %v10456_v7 }
 0x410   : > { %2315 = vadd.xlane.f32.xlu1 %v794_v32  ;;  %v806_v32 = vld [vmem:[%s10301_s19 + $0xfe8] sm:$0xff] }
 0x411   : > { %v6540_v44 = vsel %vm4475_vm9, %v6539_v55, %v6535_v36  ;;  %2313 = vadd.xlane.f32.xlu0 %v793_v8  ;;  %v2180_v51 = vpop.xlane.xlu1 %2179  ;;  %v805_v8 = vld [vmem:[%s10301_s19 + $0xfe0] sm:$0xff] }
 0x412   : > { %v6554_v61 = vrot.slane %v2180_v51, %v10463_v15  ;;  %v6545_v9 = vsel %vm4482_vm10, %v6544_v38, %v6540_v44  ;;  %v2178_v28 = vpop.xlane.xlu0 %2177 }
 0x413   : > { %v6549_v48 = vrot.slane %v2178_v28, %v10466_v16 }
 0x414   : > { %2319 = vadd.xlane.f32.xlu1 %v796_v41  ;;  %v808_v41 = vld [vmem:[%s10301_s19 + $0xff8] sm:$0xff] }
 0x415   : > { %v6550_v47 = vsel %vm14412_vm11, %v6549_v48, %v6545_v9  ;;  %2317 = vadd.xlane.f32.xlu0 %v795_v42  ;;  %v2184_v57 = vpop.xlane.xlu1 %2183  ;;  %vm14413_vm11 = vcmask 1042434   ;;  %v807_v42 = vld [vmem:[%s10301_s19 + $0xff0] sm:$0xff] }
 0x416   : > { %v6564_v60 = vrot.slane %v2184_v57, %v10479_v5  ;;  %v6555_v23 = vsel %vm4496_vm12, %v6554_v61, %v6550_v47  ;;  %v2182_v52 = vpop.xlane.xlu0 %2181 }
 0x417   : > { %v6559_v45 = vrot.slane %v2182_v52, %v10482_v35 }
 0x418   : > { %2323 = vadd.xlane.f32.xlu1 %v798_v34  ;;  %v810_v34 = vld [vmem:[%s10301_s19 + $0x1008] sm:$0xff] }
 0x419   : > { %v6560_v59 = vsel %vm4503_vm13, %v6559_v45, %v6555_v23  ;;  %2321 = vadd.xlane.f32.xlu0 %v797_v58  ;;  %v2188_v17 = vpop.xlane.xlu1 %2187  ;;  %v809_v58 = vld [vmem:[%s10301_s19 + $0x1000] sm:$0xff] }
 0x41a   : > { %v6565_v63 = vsel %vm4510_vm14, %v6564_v60, %v6560_v59  ;;  %v6573_v33 = vrot.slane %v2188_v17, %v10396_v20  ;;  %v2186_v0 = vpop.xlane.xlu0 %2185 }
 0x41b   : > { %v12029_v13 = vsel %vm14413_vm11, %v6565_v63, %v11978_v43  ;;  %v6569_v62 = vrot.slane %v2186_v0, %v10390_v18  ;;  %vm14414_vm11 = vcmask 851712  }
 0x41c   : > { %2327 = vadd.xlane.f32.xlu1 %v800_v31  ;;  %v812_v31 = vld [vmem:[%s10301_s19 + $0x1018] sm:$0xff] }
 0x41d   : > { %v6574_v11 = vsel %vm4412_vm0, %v6573_v33, %v6569_v62  ;;  %2325 = vadd.xlane.f32.xlu0 %v799_v10  ;;  %v2192_v12 = vpop.xlane.xlu1 %2191  ;;  %v811_v10 = vld [vmem:[%s10301_s19 + $0x1010] sm:$0xff] }
 0x41e   : > { %v6583_v14 = vrot.slane %v2192_v12, %v10393_v19  ;;  %v2190_v37 = vpop.xlane.xlu0 %2189 }
 0x41f   : > { %v6578_v2 = vrot.slane %v2190_v37, %v10399_v21 }
 0x420   : > { %2331 = vadd.xlane.f32.xlu1 %v802_v49  ;;  %v814_v49 = vld [vmem:[%s10301_s19 + $0x1028] sm:$0xff] }
 0x421   : > { %v6579_v43 = vsel %vm4419_vm1, %v6578_v2, %v6574_v11  ;;  %2329 = vadd.xlane.f32.xlu0 %v801_v3  ;;  %v2196_v50 = vpop.xlane.xlu1 %2195  ;;  %v813_v2 = vld [vmem:[%s10301_s19 + $0x1020] sm:$0xff] }
 0x422   : > { %v6593_v24 = vrot.slane %v2196_v50, %v10404_v26  ;;  %v6584_v1 = vsel %vm4426_vm2, %v6583_v14, %v6579_v43  ;;  %v2194_v29 = vpop.xlane.xlu0 %2193 }
 0x423   : > { %v6588_v22 = vrot.slane %v2194_v29, %v10407_v27 }
 0x424   : > { %2335 = vadd.xlane.f32.xlu1 %v804_v39 }
 0x425   : > { %v6589_v56 = vsel %vm4433_vm3, %v6588_v22, %v6584_v1  ;;  %2333 = vadd.xlane.f32.xlu0 %v803_v25  ;;  %v2200_v4 = vpop.xlane.xlu1 %2199  ;;  %v815_v22 = vld [vmem:[%s10301_s19 + $0x1030] sm:$0xff] }
 0x426   : > { %v6603_v38 = vrot.slane %v2200_v4, %v10428_v46  ;;  %v6594_v36 = vsel %vm4440_vm4, %v6593_v24, %v6589_v56  ;;  %v2198_v30 = vpop.xlane.xlu0 %2197  ;;  %v816_v24 = vld [vmem:[%s10301_s19 + $0x1038] sm:$0xff] }
 0x427   : > { %v6598_v55 = vrot.slane %v2198_v30, %v10420_v40 }
 0x428   : > { %2339 = vadd.xlane.f32.xlu1 %v806_v32 }
 0x429   : > { %v6599_v44 = vsel %vm4447_vm5, %v6598_v55, %v6594_v36  ;;  %2337 = vadd.xlane.f32.xlu0 %v805_v8  ;;  %v2204_v51 = vpop.xlane.xlu1 %2203  ;;  %v818_v36 = vld [vmem:[%s10301_s19 + $0x1048] sm:$0xff]  ;;  %v817_v55 = vld [vmem:[%s10301_s19 + $0x1040] sm:$0xff] }
 0x42a   : > { %v6613_v61 = vrot.slane %v2204_v51, %v10435_v53  ;;  %v6604_v9 = vsel %vm4454_vm6, %v6603_v38, %v6599_v44  ;;  %v2202_v28 = vpop.xlane.xlu0 %2201 }
 0x42b   : > { %v6608_v48 = vrot.slane %v2202_v28, %v10438_v54 }
 0x42c   : > { %2343 = vadd.xlane.f32.xlu1 %v808_v41  ;;  %v820_v41 = vld [vmem:[%s10301_s19 + $0x1058] sm:$0xff] }
 0x42d   : > { %v6609_v47 = vsel %vm4461_vm7, %v6608_v48, %v6604_v9  ;;  %2341 = vadd.xlane.f32.xlu0 %v807_v42  ;;  %v2208_v57 = vpop.xlane.xlu1 %2207  ;;  %v819_v42 = vld [vmem:[%s10301_s19 + $0x1050] sm:$0xff] }
 0x42e   : > { %v6623_v60 = vrot.slane %v2208_v57, %v10453_v6  ;;  %v6614_v23 = vsel %vm4468_vm8, %v6613_v61, %v6609_v47  ;;  %v2206_v52 = vpop.xlane.xlu0 %2205  ;;  %v9934_v47 = vld [vmem:[%s14372_s5] ss:$0 sm:$0xff] }
 0x42f   : > { %v6618_v45 = vrot.slane %v2206_v52, %v10456_v7 }
 0x430   : > { %2347 = vadd.xlane.f32.xlu1 %v810_v34 }
 0x431   : > { %v6619_v59 = vsel %vm4475_vm9, %v6618_v45, %v6614_v23  ;;  %2345 = vadd.xlane.f32.xlu0 %v809_v58  ;;  %v2212_v17 = vpop.xlane.xlu1 %2211  ;;  %v822_v23 = vld [vmem:[%s10301_s19 + $0x1068] sm:$0xff] }
 0x432   : > { %v6633_v63 = vrot.slane %v2212_v17, %v10463_v15  ;;  %v6624_v33 = vsel %vm4482_vm10, %v6623_v60, %v6619_v59  ;;  %v2210_v0 = vpop.xlane.xlu0 %2209  ;;  %v821_v17 = vld [vmem:[%s10301_s19 + $0x1060] sm:$0xff] }
 0x433   : > { %v6628_v62 = vrot.slane %v2210_v0, %v10466_v16 }
 0x434   : > { %2351 = vadd.xlane.f32.xlu1 %v812_v31 }
 0x435   : > { %v6629_v11 = vsel %vm14414_vm11, %v6628_v62, %v6624_v33  ;;  %2349 = vadd.xlane.f32.xlu0 %v811_v10  ;;  %v2216_v12 = vpop.xlane.xlu1 %2215  ;;  %vm14415_vm11 = vcmask 1043459   ;;  %v824_v62 = vld [vmem:[%s10301_s19 + $0x1078] sm:$0xff] }
 0x436   : > { %v6643_v14 = vrot.slane %v2216_v12, %v10479_v5  ;;  %v6634_v37 = vsel %vm4496_vm12, %v6633_v63, %v6629_v11  ;;  %v2214_v3 = vpop.xlane.xlu0 %2213 }
 0x437   : > { %v6638_v43 = vrot.slane %v2214_v3, %v10482_v35 }
 0x438   : > { %2355 = vadd.xlane.f32.xlu1 %v814_v49 }
 0x439   : > { %v6639_v50 = vsel %vm4503_vm13, %v6638_v43, %v6634_v37  ;;  %2353 = vadd.xlane.f32.xlu0 %v813_v2  ;;  %v2220_v39 = vpop.xlane.xlu1 %2219  ;;  %v826_v43 = vld [vmem:[%s10301_s19 + $0x1088] sm:$0xff] }
 0x43a   : > { %v6644_v1 = vsel %vm4510_vm14, %v6643_v14, %v6639_v50  ;;  %v6652_v29 = vrot.slane %v2220_v39, %v10396_v20  ;;  %v2218_v25 = vpop.xlane.xlu0 %2217  ;;  %v823_v14 = vld [vmem:[%s10301_s19 + $0x1070] sm:$0xff] }
 0x43b   : > { %v12080_v56 = vsel %vm14415_vm11, %v6644_v1, %v12029_v13  ;;  %v6648_v4 = vrot.slane %v2218_v25, %v10390_v18  ;;  %v825_v1 = vld [vmem:[%s10301_s19 + $0x1080] sm:$0xff]  ;;  %vm14416_vm11 = vcmask 851712  }
 0x43c   : > { %2359 = vadd.xlane.f32.xlu1 %v816_v24 }
 0x43d   : > { %v6653_v32 = vsel %vm4412_vm0, %v6652_v29, %v6648_v4  ;;  %2357 = vadd.xlane.f32.xlu0 %v815_v22  ;;  %v2224_v38 = vpop.xlane.xlu1 %2223  ;;  %v828_v4 = vld [vmem:[%s10301_s19 + $0x1098] sm:$0xff] }
 0x43e   : > { %v6662_v30 = vrot.slane %v2224_v38, %v10393_v19  ;;  %v2222_v8 = vpop.xlane.xlu0 %2221 }
 0x43f   : > { %v6657_v44 = vrot.slane %v2222_v8, %v10399_v21 }
 0x440   : > { %2363 = vadd.xlane.f32.xlu1 %v818_v36 }
 0x441   : > { %v6658_v13 = vsel %vm4419_vm1, %v6657_v44, %v6653_v32  ;;  %2361 = vadd.xlane.f32.xlu0 %v817_v55  ;;  %v2228_v51 = vpop.xlane.xlu1 %2227 }
 0x442   : > { %v6672_v61 = vrot.slane %v2228_v51, %v10404_v26  ;;  %v6663_v9 = vsel %vm4426_vm2, %v6662_v30, %v6658_v13  ;;  %v2226_v28 = vpop.xlane.xlu0 %2225  ;;  %v827_v30 = vld [vmem:[%s10301_s19 + $0x1090] sm:$0xff]  ;;  %v830_v13 = vld [vmem:[%s10301_s19 + $0x10a8] sm:$0xff] }
 0x443   : > { %v6667_v48 = vrot.slane %v2226_v28, %v10407_v27 }
 0x444   : > { %2367 = vadd.xlane.f32.xlu1 %v820_v41 }
 0x445   : > { %v6668_v57 = vsel %vm4433_vm3, %v6667_v48, %v6663_v9  ;;  %2365 = vadd.xlane.f32.xlu0 %v819_v42  ;;  %v2232_v34 = vpop.xlane.xlu1 %2231  ;;  %v10065_v60 = vpop.f32.mrf.mxu1  ;;  %v829_v9 = vld [vmem:[%s10301_s19 + $0x10a0] sm:$0xff] }
 0x446   : > { %v6682_v52 = vrot.slane %v2232_v34, %v10428_v46  ;;  %v9799_v58 = vadd.f32 %v10065_v60, %v9934_v47  ;;  %v6673_v45 = vsel %vm4440_vm4, %v6672_v61, %v6668_v57  ;;  %v2230_v59 = vpop.xlane.xlu0 %2229 }
 0x447   : > { %v6677_v31 = vrot.slane %v2230_v59, %v10420_v40  ;;  %v9793_v63 = vpop.f32.mrf.mxu1 }
 0x448   : > { %9833 = vst [vmem:[%s12102_s7 + $0x8] sm:$0xff] %v9799_v58  ;;  %v9794_v33 = vadd.f32 %v9934_v47, %v9793_v63  ;;  %2371 = vadd.xlane.f32.xlu1 %v822_v23  ;;  %v832_v47 = vld [vmem:[%s10301_s19 + $0x10b8] sm:$0xff]  ;;  %v831_v23 = vld [vmem:[%s10301_s19 + $0x10b0] sm:$0xff] }
 0x449   : > { %v6678_v0 = vsel %vm4447_vm5, %v6677_v31, %v6673_v45  ;;  %2369 = vadd.xlane.f32.xlu0 %v821_v17  ;;  %v2236_v10 = vpop.xlane.xlu1 %2235  ;;  %v834_v17 = vld [vmem:[%s10301_s19 + $0x10c8] sm:$0xff] }
 0x44a   : > { %9832 = vst [vmem:[%s12102_s7] sm:$0xff] %v9794_v33  ;;  %v6692_v11 = vrot.slane %v2236_v10, %v10435_v53  ;;  %v6683_v12 = vsel %vm4454_vm6, %v6682_v52, %v6678_v0  ;;  %v2234_v49 = vpop.xlane.xlu0 %2233  ;;  %v833_v33 = vld [vmem:[%s10301_s19 + $0x10c0] sm:$0xff] }
 0x44b   : > { %v6687_v37 = vrot.slane %v2234_v49, %v10438_v54 }
 0x44c   : > { %2375 = vadd.xlane.f32.xlu1 %v824_v62  ;;  %v836_v62 = vld [vmem:[%s10301_s19 + $0x10d8] sm:$0xff] }
 0x44d   : > { %v6688_v3 = vsel %vm4461_vm7, %v6687_v37, %v6683_v12  ;;  %2373 = vadd.xlane.f32.xlu0 %v823_v14  ;;  %v2240_v2 = vpop.xlane.xlu1 %2239  ;;  %v835_v14 = vld [vmem:[%s10301_s19 + $0x10d0] sm:$0xff] }
 0x44e   : > { %v6702_v50 = vrot.slane %v2240_v2, %v10453_v6  ;;  %v6693_v39 = vsel %vm4468_vm8, %v6692_v11, %v6688_v3  ;;  %v2238_v24 = vpop.xlane.xlu0 %2237 }
 0x44f   : > { %v6697_v29 = vrot.slane %v2238_v24, %v10456_v7 }
 0x450   : > { %2379 = vadd.xlane.f32.xlu1 %v826_v43  ;;  %v838_v43 = vld [vmem:[%s10301_s19 + $0x10e8] sm:$0xff] }
 0x451   : > { %v6698_v25 = vsel %vm4475_vm9, %v6697_v29, %v6693_v39  ;;  %2377 = vadd.xlane.f32.xlu0 %v825_v1  ;;  %v2244_v22 = vpop.xlane.xlu1 %2243  ;;  %v837_v1 = vld [vmem:[%s10301_s19 + $0x10e0] sm:$0xff] }
 0x452   : > { %v6712_v32 = vrot.slane %v2244_v22, %v10463_v15  ;;  %v6703_v38 = vsel %vm4482_vm10, %v6702_v50, %v6698_v25  ;;  %v2242_v36 = vpop.xlane.xlu0 %2241 }
 0x453   : > { %v6707_v8 = vrot.slane %v2242_v36, %v10466_v16 }
 0x454   : > { %2383 = vadd.xlane.f32.xlu1 %v828_v4  ;;  %v840_v4 = vld [vmem:[%s10301_s19 + $0x10f8] sm:$0xff] }
 0x455   : > { %v6708_v55 = vsel %vm14416_vm11, %v6707_v8, %v6703_v38  ;;  %2381 = vadd.xlane.f32.xlu0 %v827_v30  ;;  %v2248_v44 = vpop.xlane.xlu1 %2247  ;;  %vm14417_vm11 = vcmask 1044484   ;;  %v839_v30 = vld [vmem:[%s10301_s19 + $0x10f0] sm:$0xff] }
 0x456   : > { %v6722_v51 = vrot.slane %v2248_v44, %v10479_v5  ;;  %v6713_v41 = vsel %vm4496_vm12, %v6712_v32, %v6708_v55  ;;  %v2246_v61 = vpop.xlane.xlu0 %2245 }
 0x457   : > { %v6717_v28 = vrot.slane %v2246_v61, %v10482_v35 }
 0x458   : > { %2387 = vadd.xlane.f32.xlu1 %v830_v13  ;;  %v842_v13 = vld [vmem:[%s10301_s19 + $0x1108] sm:$0xff] }
 0x459   : > { %v6718_v42 = vsel %vm4503_vm13, %v6717_v28, %v6713_v41  ;;  %2385 = vadd.xlane.f32.xlu0 %v829_v9  ;;  %v2252_v48 = vpop.xlane.xlu1 %2251  ;;  %v841_v9 = vld [vmem:[%s10301_s19 + $0x1100] sm:$0xff] }
 0x45a   : > { %v6723_v57 = vsel %vm4510_vm14, %v6722_v51, %v6718_v42  ;;  %v6731_v34 = vrot.slane %v2252_v48, %v10396_v20  ;;  %v2250_v60 = vpop.xlane.xlu0 %2249 }
 0x45b   : > { %v12143_v52 = vsel %vm14417_vm11, %v6723_v57, %v12080_v56  ;;  %v6727_v58 = vrot.slane %v2250_v60, %v10390_v18  ;;  %vm14418_vm11 = vcmask 851712  }
 0x45c   : > { %2391 = vadd.xlane.f32.xlu1 %v832_v47  ;;  %v844_v47 = vld [vmem:[%s10301_s19 + $0x1118] sm:$0xff] }
 0x45d   : > { %v6732_v45 = vsel %vm4412_vm0, %v6731_v34, %v6727_v58  ;;  %2389 = vadd.xlane.f32.xlu0 %v831_v23  ;;  %v2256_v59 = vpop.xlane.xlu1 %2255  ;;  %v843_v23 = vld [vmem:[%s10301_s19 + $0x1110] sm:$0xff] }
 0x45e   : > { %v6741_v31 = vrot.slane %v2256_v59, %v10393_v19  ;;  %v2254_v63 = vpop.xlane.xlu0 %2253 }
 0x45f   : > { %v6736_v0 = vrot.slane %v2254_v63, %v10399_v21 }
 0x460   : > { %2395 = vadd.xlane.f32.xlu1 %v834_v17  ;;  %v846_v17 = vld [vmem:[%s10301_s19 + $0x1128] sm:$0xff] }
 0x461   : > { %v6737_v56 = vsel %vm4419_vm1, %v6736_v0, %v6732_v45  ;;  %2393 = vadd.xlane.f32.xlu0 %v833_v33  ;;  %v2260_v10 = vpop.xlane.xlu1 %2259  ;;  %v845_v0 = vld [vmem:[%s10301_s19 + $0x1120] sm:$0xff] }
 0x462   : > { %v6751_v11 = vrot.slane %v2260_v10, %v10404_v26  ;;  %v6742_v12 = vsel %vm4426_vm2, %v6741_v31, %v6737_v56  ;;  %v2258_v49 = vpop.xlane.xlu0 %2257 }
 0x463   : > { %v6746_v37 = vrot.slane %v2258_v49, %v10407_v27 }
 0x464   : > { %2399 = vadd.xlane.f32.xlu1 %v836_v62 }
 0x465   : > { %v6747_v3 = vsel %vm4433_vm3, %v6746_v37, %v6742_v12  ;;  %2397 = vadd.xlane.f32.xlu0 %v835_v14  ;;  %v2264_v2 = vpop.xlane.xlu1 %2263  ;;  %v847_v14 = vld [vmem:[%s10301_s19 + $0x1130] sm:$0xff] }
 0x466   : > { %v6761_v50 = vrot.slane %v2264_v2, %v10428_v46  ;;  %v6752_v39 = vsel %vm4440_vm4, %v6751_v11, %v6747_v3  ;;  %v2262_v24 = vpop.xlane.xlu0 %2261  ;;  %v848_v11 = vld [vmem:[%s10301_s19 + $0x1138] sm:$0xff]  ;;  %v850_v2 = vld [vmem:[%s10301_s19 + $0x1148] sm:$0xff] }
 0x467   : > { %v6756_v29 = vrot.slane %v2262_v24, %v10420_v40  ;;  %v852_v24 = vld [vmem:[%s10301_s19 + $0x1158] sm:$0xff] }
 0x468   : > { %2403 = vadd.xlane.f32.xlu1 %v838_v43 }
 0x469   : > { %v6757_v25 = vsel %vm4447_vm5, %v6756_v29, %v6752_v39  ;;  %2401 = vadd.xlane.f32.xlu0 %v837_v1  ;;  %v2268_v22 = vpop.xlane.xlu1 %2267  ;;  %v851_v29 = vld [vmem:[%s10301_s19 + $0x1150] sm:$0xff] }
 0x46a   : > { %v6771_v32 = vrot.slane %v2268_v22, %v10435_v53  ;;  %v6762_v38 = vsel %vm4454_vm6, %v6761_v50, %v6757_v25  ;;  %v2266_v36 = vpop.xlane.xlu0 %2265  ;;  %v849_v50 = vld [vmem:[%s10301_s19 + $0x1140] sm:$0xff]  ;;  %v854_v25 = vld [vmem:[%s10301_s19 + $0x1168] sm:$0xff] }
 0x46b   : > { %v6766_v8 = vrot.slane %v2266_v36, %v10438_v54 }
 0x46c   : > { %2407 = vadd.xlane.f32.xlu1 %v840_v4  ;;  %v853_v4 = vld [vmem:[%s10301_s19 + $0x1160] sm:$0xff] }
 0x46d   : > { %v6767_v55 = vsel %vm4461_vm7, %v6766_v8, %v6762_v38  ;;  %2405 = vadd.xlane.f32.xlu0 %v839_v30  ;;  %v2272_v44 = vpop.xlane.xlu1 %2271  ;;  %v856_v38 = vld [vmem:[%s10301_s19 + $0x1178] sm:$0xff]  ;;  %v855_v30 = vld [vmem:[%s10301_s19 + $0x1170] sm:$0xff] }
 0x46e   : > { %v6781_v51 = vrot.slane %v2272_v44, %v10453_v6  ;;  %v6772_v41 = vsel %vm4468_vm8, %v6771_v32, %v6767_v55  ;;  %v2270_v61 = vpop.xlane.xlu0 %2269  ;;  %v858_v55 = vld [vmem:[%s10301_s19 + $0x1188] sm:$0xff] }
 0x46f   : > { %v6776_v28 = vrot.slane %v2270_v61, %v10456_v7 }
 0x470   : > { %2411 = vadd.xlane.f32.xlu1 %v842_v13  ;;  %v857_v13 = vld [vmem:[%s10301_s19 + $0x1180] sm:$0xff] }
 0x471   : > { %v6777_v42 = vsel %vm4475_vm9, %v6776_v28, %v6772_v41  ;;  %2409 = vadd.xlane.f32.xlu0 %v841_v9  ;;  %v2276_v48 = vpop.xlane.xlu1 %2275  ;;  %v860_v41 = vld [vmem:[%s10301_s19 + $0x1198] sm:$0xff]  ;;  %v859_v9 = vld [vmem:[%s10301_s19 + $0x1190] sm:$0xff] }
 0x472   : > { %v6791_v57 = vrot.slane %v2276_v48, %v10463_v15  ;;  %v6782_v34 = vsel %vm4482_vm10, %v6781_v51, %v6777_v42  ;;  %v2274_v60 = vpop.xlane.xlu0 %2273  ;;  %v862_v42 = vld [vmem:[%s10301_s19 + $0x11a8] sm:$0xff] }
 0x473   : > { %v6786_v58 = vrot.slane %v2274_v60, %v10466_v16 }
 0x474   : > { %2415 = vadd.xlane.f32.xlu1 %v844_v47  ;;  %v861_v47 = vld [vmem:[%s10301_s19 + $0x11a0] sm:$0xff] }
 0x475   : > { %v6787_v45 = vsel %vm14418_vm11, %v6786_v58, %v6782_v34  ;;  %2413 = vadd.xlane.f32.xlu0 %v843_v23  ;;  %v2280_v59 = vpop.xlane.xlu1 %2279  ;;  %vm14419_vm11 = vcmask 1045509   ;;  %v864_v58 = vld [vmem:[%s10301_s19 + $0x11b8] sm:$0xff] }
 0x476   : > { %v6801_v31 = vrot.slane %v2280_v59, %v10479_v5  ;;  %v6792_v63 = vsel %vm4496_vm12, %v6791_v57, %v6787_v45  ;;  %v2278_v33 = vpop.xlane.xlu0 %2277  ;;  %v863_v59 = vld [vmem:[%s10301_s19 + $0x11b0] sm:$0xff] }
 0x477   : > { %v6796_v56 = vrot.slane %v2278_v33, %v10482_v35 }
 0x478   : > { %2419 = vadd.xlane.f32.xlu1 %v846_v17 }
 0x479   : > { %v6797_v10 = vsel %vm4503_vm13, %v6796_v56, %v6792_v63  ;;  %2417 = vadd.xlane.f32.xlu0 %v845_v0  ;;  %v2284_v62 = vpop.xlane.xlu1 %2283 }
 0x47a   : > { %v6802_v12 = vsel %vm4510_vm14, %v6801_v31, %v6797_v10  ;;  %v2282_v49 = vpop.xlane.xlu0 %2281  ;;  %v6810_v57 = vrot.slane %v2284_v62, %v10396_v20  ;;  %v866_v62 = vld [vmem:[%s10301_s19 + $0x11c8] sm:$0xff] }
 0x47b   : > { %v12193_v37 = vsel %vm14419_vm11, %v6802_v12, %v12143_v52  ;;  %v6806_v34 = vrot.slane %v2282_v49, %v10390_v18  ;;  %v865_v12 = vld [vmem:[%s10301_s19 + $0x11c0] sm:$0xff]  ;;  %vm14420_vm11 = vcmask 851712  }
 0x47c   : > { %2423 = vadd.xlane.f32.xlu1 %v848_v11 }
 0x47d   : > { %2421 = vadd.xlane.f32.xlu0 %v847_v14  ;;  %v12195_v3 = vpop.xlane.xlu1 %2287  ;;  %v6811_v17 = vsel %vm4412_vm0, %v6810_v57, %v6806_v34  ;;  %v869_v34 = vld [vmem:[%s10301_s19 + $0x11e0] sm:$0xff] }
 0x47e   : > { %v2286_v43 = vpop.xlane.xlu0 %2285  ;;  %v6820_v31 = vrot.slane %v12195_v3, %v10393_v19 }
 0x47f   : > { %v6815_v60 = vrot.slane %v2286_v43, %v10399_v21 }
 0x480   : > { %2427 = vadd.xlane.f32.xlu1 %v850_v2 }
 0x481   : > { %2425 = vadd.xlane.f32.xlu0 %v849_v50  ;;  %v12199_v39 = vpop.xlane.xlu1 %2291  ;;  %v6816_v63 = vsel %vm4419_vm1, %v6815_v60, %v6811_v17 }
 0x482   : > { %v2290_v1 = vpop.xlane.xlu0 %2289  ;;  %v6830_v49 = vrot.slane %v12199_v39, %v10404_v26  ;;  %v6821_v14 = vsel %vm4426_vm2, %v6820_v31, %v6816_v63  ;;  %v868_v39 = vld [vmem:[%s10301_s19 + $0x11d8] sm:$0xff] }
 0x483   : > { %v6825_v33 = vrot.slane %v2290_v1, %v10407_v27 }
 0x484   : > { %2431 = vadd.xlane.f32.xlu1 %v852_v24 }
 0x485   : > { %2429 = vadd.xlane.f32.xlu0 %v851_v29  ;;  %v12203_v52 = vpop.xlane.xlu1 %2295  ;;  %v6826_v2 = vsel %vm4433_vm3, %v6825_v33, %v6821_v14 }
 0x486   : > { %v12206_v22 = vpop.xlane.xlu0 %2293 }
 0x487   : > { %v6835_v43 = vrot.slane %v12206_v22, %v10420_v40 }
 0x488   : > { %2435 = vadd.xlane.f32.xlu1 %v854_v25 }
 0x489   : > { %2433 = vadd.xlane.f32.xlu0 %v853_v4  ;;  %v12209_v32 = vpop.xlane.xlu1 %2299  ;;  %v867_v4 = vld [vmem:[%s10301_s19 + $0x11d0] sm:$0xff] }
 0x48a   : > { %v12212_v36 = vpop.xlane.xlu0 %2297  ;;  %v6850_v60 = vrot.slane %v12209_v32, %v10435_v53  ;;  %v872_v32 = vld [vmem:[%s10301_s19 + $0x11f8] sm:$0xff] }
 0x48c   : > { %2439 = vadd.xlane.f32.xlu1 %v856_v38  ;;  %v6840_v38 = vrot.slane %v12203_v52, %v10428_v46  ;;  %v870_v52 = vld [vmem:[%s10301_s19 + $0x11e8] sm:$0xff] }
 0x48d   : > { %2437 = vadd.xlane.f32.xlu0 %v855_v30  ;;  %v12215_v8 = vpop.xlane.xlu1 %2303  ;;  %v6831_v30 = vsel %vm4440_vm4, %v6830_v49, %v6826_v2 }
 0x48e   : > { %v12218_v44 = vpop.xlane.xlu0 %2301 }
 0x490   : > { %2443 = vadd.xlane.f32.xlu1 %v858_v55  ;;  %v6836_v55 = vsel %vm4447_vm5, %v6835_v43, %v6831_v30  ;;  %v873_v43 = vld [vmem:[%s10301_s19 + $0x1200] sm:$0xff] }
 0x491   : > { %2441 = vadd.xlane.f32.xlu0 %v857_v13  ;;  %v12221_v51 = vpop.xlane.xlu1 %2307  ;;  %v6845_v13 = vrot.slane %v12212_v36, %v10438_v54 }
 0x492   : > { %v12224_v61 = vpop.xlane.xlu0 %2305 }
 0x494   : > { %2447 = vadd.xlane.f32.xlu1 %v860_v41 }
 0x495   : > { %2445 = vadd.xlane.f32.xlu0 %v859_v9  ;;  %v12227_v28 = vpop.xlane.xlu1 %2311 }
 0x496   : > { %v12230_v48 = vpop.xlane.xlu0 %2309 }
 0x498   : > { %2451 = vadd.xlane.f32.xlu1 %v862_v42 }
 0x499   : > { %2449 = vadd.xlane.f32.xlu0 %v861_v47  ;;  %v2316_v23 = vpop.xlane.xlu1 %2315 }
 0x49a   : > { %v2314_v45 = vpop.xlane.xlu0 %2313  ;;  %v6889_v0 = vrot.slane %v2316_v23, %v10396_v20  ;;  %v6841_v23 = vsel %vm4454_vm6, %v6840_v38, %v6836_v55  ;;  %v6880_v55 = vrot.slane %v12227_v28, %v10479_v5 }
 0x49b   : > { %v6885_v56 = vrot.slane %v2314_v45, %v10390_v18  ;;  %v6855_v45 = vrot.slane %v12218_v44, %v10456_v7 }
 0x49c   : > { %2455 = vadd.xlane.f32.xlu1 %v864_v58  ;;  %v6846_v58 = vsel %vm4461_vm7, %v6845_v13, %v6841_v23 }
 0x49d   : > { %2453 = vadd.xlane.f32.xlu0 %v863_v59  ;;  %v2320_v10 = vpop.xlane.xlu1 %2319  ;;  %v6890_v50 = vsel %vm4412_vm0, %v6889_v0, %v6885_v56  ;;  %v871_v0 = vld [vmem:[%s10301_s19 + $0x11f0] sm:$0xff]  ;;  %v6860_v56 = vrot.slane %v12215_v8, %v10453_v6  ;;  %v874_v8 = vld [vmem:[%s10301_s19 + $0x1208] sm:$0xff] }
 0x49e   : > { %v2318_v11 = vpop.xlane.xlu0 %2317  ;;  %v6899_v24 = vrot.slane %v2320_v10, %v10393_v19  ;;  %v6851_v10 = vsel %vm4468_vm8, %v6850_v60, %v6846_v58  ;;  %v877_v60 = vld [vmem:[%s10301_s19 + $0x1220] sm:$0xff] }
 0x49f   : > { %v6894_v3 = vrot.slane %v2318_v11, %v10399_v21  ;;  %v6865_v11 = vrot.slane %v12224_v61, %v10466_v16 }
 0x4a0   : > { %2459 = vadd.xlane.f32.xlu1 %v866_v62  ;;  %v6856_v62 = vsel %vm4475_vm9, %v6855_v45, %v6851_v10 }
 0x4a1   : > { %v6895_v1 = vsel %vm4419_vm1, %v6894_v3, %v6890_v50  ;;  %2457 = vadd.xlane.f32.xlu0 %v865_v12  ;;  %v2324_v29 = vpop.xlane.xlu1 %2323  ;;  %v6870_v50 = vrot.slane %v12221_v51, %v10463_v15  ;;  %v876_v51 = vld [vmem:[%s10301_s19 + $0x1218] sm:$0xff] }
 0x4a2   : > { %v2322_v25 = vpop.xlane.xlu0 %2321  ;;  %v6909_v41 = vrot.slane %v2324_v29, %v10404_v26  ;;  %v6900_v9 = vsel %vm4426_vm2, %v6899_v24, %v6895_v1  ;;  %v6861_v24 = vsel %vm4482_vm10, %v6860_v56, %v6856_v62  ;;  %v6875_v29 = vrot.slane %v12230_v48, %v10482_v35 }
 0x4a3   : > { %v6904_v22 = vrot.slane %v2322_v25, %v10407_v27  ;;  %v6866_v1 = vsel %vm14420_vm11, %v6865_v11, %v6861_v24 }
 0x4a4   : > { %2463 = vadd.xlane.f32.xlu1 %v868_v39  ;;  %v6871_v13 = vsel %vm4496_vm12, %v6870_v50, %v6866_v1  ;;  %v884_v50 = vld [vmem:[%s10301_s19 + $0x1258] sm:$0xff] }
 0x4a5   : > { %v6905_v42 = vsel %vm4433_vm3, %v6904_v22, %v6900_v9  ;;  %2461 = vadd.xlane.f32.xlu0 %v867_v4  ;;  %v2328_v47 = vpop.xlane.xlu1 %2327  ;;  %v875_v22 = vld [vmem:[%s10301_s19 + $0x1210] sm:$0xff] }
 0x4a6   : > { %v2326_v57 = vpop.xlane.xlu0 %2325  ;;  %v6919_v59 = vrot.slane %v2328_v47, %v10428_v46  ;;  %v6910_v17 = vsel %vm4440_vm4, %v6909_v41, %v6905_v42  ;;  %v6876_v41 = vsel %vm4503_vm13, %v6875_v29, %v6871_v13  ;;  %v883_v29 = vld [vmem:[%s10301_s19 + $0x1250] sm:$0xff] }
 0x4a7   : > { %v6914_v36 = vrot.slane %v2326_v57, %v10420_v40  ;;  %v878_v57 = vld [vmem:[%s10301_s19 + $0x1228] sm:$0xff]  ;;  %v6881_v23 = vsel %vm4510_vm14, %v6880_v55, %v6876_v41  ;;  %v885_v55 = vld [vmem:[%s10301_s19 + $0x1260] sm:$0xff] }
 0x4a8   : > { %2467 = vadd.xlane.f32.xlu1 %v870_v52  ;;  %v9522_v56 = vsel %vm9499_vm15, %v6881_v23, %v12193_v37  ;;  %v890_v23 = vld [vmem:[%s10301_s19 + $0x1288] sm:$0xff] }
 0x4a9   : > { %v6915_v31 = vsel %vm4447_vm5, %v6914_v36, %v6910_v17  ;;  %2465 = vadd.xlane.f32.xlu0 %v869_v34  ;;  %v2332_v63 = vpop.xlane.xlu1 %2331  ;;  %v880_v17 = vld [vmem:[%s10301_s19 + $0x1238] sm:$0xff] }
 0x4aa   : > { %v2330_v33 = vpop.xlane.xlu0 %2329  ;;  %v6929_v12 = vrot.slane %v2332_v63, %v10435_v53  ;;  %v6920_v49 = vsel %vm4454_vm6, %v6919_v59, %v6915_v31  ;;  %v3372_v31 = vld [vmem:[%s10884_s14 + $0x18] sm:$0xff] }
 0x4ab   : > { %v6924_v44 = vrot.slane %v2330_v33, %v10438_v54  ;;  %v879_v33 = vld [vmem:[%s10301_s19 + $0x1230] sm:$0xff] }
 0x4ac   : > { %2471 = vadd.xlane.f32.xlu1 %v872_v32 }
 0x4ad   : > { %v6925_v14 = vsel %vm4461_vm7, %v6924_v44, %v6920_v49  ;;  %2469 = vadd.xlane.f32.xlu0 %v871_v0  ;;  %v2336_v3 = vpop.xlane.xlu1 %2335  ;;  %v882_v49 = vld [vmem:[%s10301_s19 + $0x1248] sm:$0xff] }
 0x4ae   : > { %v2334_v2 = vpop.xlane.xlu0 %2333  ;;  %v6939_v39 = vrot.slane %v2336_v3, %v10453_v6  ;;  %v6930_v25 = vsel %vm4468_vm8, %v6929_v12, %v6925_v14 }
 0x4af   : > { %v6934_v61 = vrot.slane %v2334_v2, %v10456_v7 }
 0x4b0   : > { %2475 = vadd.xlane.f32.xlu1 %v874_v8  ;;  %v881_v8 = vld [vmem:[%s10301_s19 + $0x1240] sm:$0xff] }
 0x4b1   : > { %v6935_v4 = vsel %vm4475_vm9, %v6934_v61, %v6930_v25  ;;  %2473 = vadd.xlane.f32.xlu0 %v873_v43  ;;  %v2340_v38 = vpop.xlane.xlu1 %2339 }
 0x4b2   : > { %v2338_v30 = vpop.xlane.xlu0 %2337  ;;  %v6949_v9 = vrot.slane %v2340_v38, %v10463_v15  ;;  %v6940_v42 = vsel %vm4482_vm10, %v6939_v39, %v6935_v4  ;;  %v886_v38 = vld [vmem:[%s10301_s19 + $0x1268] sm:$0xff] }
 0x4b3   : > { %v6944_v48 = vrot.slane %v2338_v30, %v10466_v16 }
 0x4b4   : > { %2479 = vadd.xlane.f32.xlu1 %v876_v51 }
 0x4b5   : > { %v6945_v47 = vsel %vm14420_vm11, %v6944_v48, %v6940_v42  ;;  %2477 = vadd.xlane.f32.xlu0 %v875_v22  ;;  %v2344_v52 = vpop.xlane.xlu1 %2343  ;;  %vm14421_vm11 = vcmask 1047559  }
 0x4b6   : > { %v6959_v28 = vrot.slane %v2344_v52, %v10479_v5  ;;  %v2342_v34 = vpop.xlane.xlu0 %2341  ;;  %v6950_v58 = vsel %vm4496_vm12, %v6949_v9, %v6945_v47  ;;  %v888_v9 = vld [vmem:[%s10301_s19 + $0x1278] sm:$0xff] }
 0x4b7   : > { %v6954_v36 = vrot.slane %v2342_v34, %v10482_v35 }
 0x4b8   : > { %2483 = vadd.xlane.f32.xlu1 %v878_v57  ;;  %v887_v57 = vld [vmem:[%s10301_s19 + $0x1270] sm:$0xff] }
 0x4b9   : > { %v6955_v45 = vsel %vm4503_vm13, %v6954_v36, %v6950_v58  ;;  %2481 = vadd.xlane.f32.xlu0 %v877_v60  ;;  %v2348_v59 = vpop.xlane.xlu1 %2347 }
 0x4ba   : > { %v6968_v63 = vrot.slane %v2348_v59, %v10396_v20  ;;  %v2346_v32 = vpop.xlane.xlu0 %2345  ;;  %v6960_v0 = vsel %vm4510_vm14, %v6959_v28, %v6955_v45  ;;  %v889_v59 = vld [vmem:[%s10301_s19 + $0x1280] sm:$0xff] }
 0x4bb   : > { %v6964_v10 = vrot.slane %v2346_v32, %v10390_v18  ;;  %v9523_v44 = vsel %vm14421_vm11, %v6960_v0, %v9522_v56  ;;  %v892_v32 = vld [vmem:[%s10301_s19 + $0x1298] sm:$0xff]  ;;  %vm14422_vm11 = vcmask 851712  }
 0x4bc   : > { %2487 = vadd.xlane.f32.xlu1 %v880_v17  ;;  %v9563_v62 = vmul.f32 %v9523_v44, %v3372_v31 }
 0x4bd   : > { %v6969_v11 = vsel %vm4412_vm0, %v6968_v63, %v6964_v10  ;;  %2485 = vadd.xlane.f32.xlu0 %v879_v33  ;;  %v2352_v12 = vpop.xlane.xlu1 %2351  ;;  %v891_v10 = vld [vmem:[%s10301_s19 + $0x1290] sm:$0xff] }
 0x4be   : > { %v6978_v14 = vrot.slane %v2352_v12, %v10393_v19  ;;  %10023 = vmatmul.mubr.f32.gmra.mxu0 %v9563_v62  ;;  %v2350_v3 = vpop.xlane.xlu0 %2349  ;;  %v894_v12 = vld [vmem:[%s10301_s19 + $0x12a8] sm:$0xff] }
 0x4bf   : > { %v6973_v37 = vrot.slane %v2350_v3, %v10399_v21 }
 0x4c0   : > { %2491 = vadd.xlane.f32.xlu1 %v882_v49 }
 0x4c1   : > { %v6974_v2 = vsel %vm4419_vm1, %v6973_v37, %v6969_v11  ;;  %2489 = vadd.xlane.f32.xlu0 %v881_v8  ;;  %v2356_v43 = vpop.xlane.xlu1 %2355  ;;  %v893_v8 = vld [vmem:[%s10301_s19 + $0x12a0] sm:$0xff] }
 0x4c2   : > { %v6988_v24 = vrot.slane %v2356_v43, %v10404_v26  ;;  %v6979_v61 = vsel %vm4426_vm2, %v6978_v14, %v6974_v2  ;;  %v2354_v1 = vpop.xlane.xlu0 %2353 }
 0x4c3   : > { %v6983_v39 = vrot.slane %v2354_v1, %v10407_v27 }
 0x4c4   : > { %2495 = vadd.xlane.f32.xlu1 %v884_v50  ;;  %v896_v50 = vld [vmem:[%s10301_s19 + $0x12b8] sm:$0xff] }
 0x4c5   : > { %v6984_v25 = vsel %vm4433_vm3, %v6983_v39, %v6979_v61  ;;  %2493 = vadd.xlane.f32.xlu0 %v883_v29  ;;  %v2360_v4 = vpop.xlane.xlu1 %2359  ;;  %v895_v29 = vld [vmem:[%s10301_s19 + $0x12b0] sm:$0xff] }
 0x4c6   : > { %v6998_v51 = vrot.slane %v2360_v4, %v10428_v46  ;;  %v6989_v30 = vsel %vm4440_vm4, %v6988_v24, %v6984_v25  ;;  %v2358_v22 = vpop.xlane.xlu0 %2357 }
 0x4c7   : > { %v6993_v13 = vrot.slane %v2358_v22, %v10420_v40  ;;  %v897_v22 = vld [vmem:[%s10301_s19 + $0x12c0] sm:$0xff] }
 0x4c8   : > { %2499 = vadd.xlane.f32.xlu1 %v886_v38  ;;  %v898_v38 = vld [vmem:[%s10301_s19 + $0x12c8] sm:$0xff] }
 0x4c9   : > { %v6994_v48 = vsel %vm4447_vm5, %v6993_v13, %v6989_v30  ;;  %2497 = vadd.xlane.f32.xlu0 %v885_v55  ;;  %v2364_v41 = vpop.xlane.xlu1 %2363 }
 0x4ca   : > { %v7008_v42 = vrot.slane %v2364_v41, %v10435_v53  ;;  %v6999_v47 = vsel %vm4454_vm6, %v6998_v51, %v6994_v48  ;;  %v2362_v52 = vpop.xlane.xlu0 %2361  ;;  %v900_v41 = vld [vmem:[%s10301_s19 + $0x12d8] sm:$0xff] }
 0x4cb   : > { %v7003_v28 = vrot.slane %v2362_v52, %v10438_v54  ;;  %v899_v52 = vld [vmem:[%s10301_s19 + $0x12d0] sm:$0xff] }
 0x4cc   : > { %2503 = vadd.xlane.f32.xlu1 %v888_v9 }
 0x4cd   : > { %v7004_v34 = vsel %vm4461_vm7, %v7003_v28, %v6999_v47  ;;  %2501 = vadd.xlane.f32.xlu0 %v887_v57  ;;  %v2368_v60 = vpop.xlane.xlu1 %2367 }
 0x4ce   : > { %v7018_v36 = vrot.slane %v2368_v60, %v10453_v6  ;;  %v7009_v58 = vsel %vm4468_vm8, %v7008_v42, %v7004_v34  ;;  %v2366_v45 = vpop.xlane.xlu0 %2365  ;;  %v902_v60 = vld [vmem:[%s10301_s19 + $0x12e8] sm:$0xff] }
 0x4cf   : > { %v7013_v17 = vrot.slane %v2366_v45, %v10456_v7  ;;  %v901_v45 = vld [vmem:[%s10301_s19 + $0x12e0] sm:$0xff] }
 0x4d0   : > { %2507 = vadd.xlane.f32.xlu1 %v890_v23 }
 0x4d1   : > { %v7014_v31 = vsel %vm4475_vm9, %v7013_v17, %v7009_v58  ;;  %2505 = vadd.xlane.f32.xlu0 %v889_v59  ;;  %v2372_v63 = vpop.xlane.xlu1 %2371 }
 0x4d2   : > { %v7028_v33 = vrot.slane %v2372_v63, %v10463_v15  ;;  %v7019_v0 = vsel %vm4482_vm10, %v7018_v36, %v7014_v31  ;;  %v2370_v56 = vpop.xlane.xlu0 %2369  ;;  %v904_v63 = vld [vmem:[%s10301_s19 + $0x12f8] sm:$0xff] }
 0x4d3   : > { %v7023_v44 = vrot.slane %v2370_v56, %v10466_v16  ;;  %v903_v56 = vld [vmem:[%s10301_s19 + $0x12f0] sm:$0xff] }
 0x4d4   : > { %2511 = vadd.xlane.f32.xlu1 %v892_v32 }
 0x4d5   : > { %v7024_v62 = vsel %vm14422_vm11, %v7023_v44, %v7019_v0  ;;  %2509 = vadd.xlane.f32.xlu0 %v891_v10  ;;  %v2376_v11 = vpop.xlane.xlu1 %2375 }
 0x4d6   : > { %v7038_v49 = vrot.slane %v2376_v11, %v10479_v5  ;;  %v7029_v14 = vsel %vm4496_vm12, %v7028_v33, %v7024_v62  ;;  %v2374_v3 = vpop.xlane.xlu0 %2373  ;;  %v906_v11 = vld [vmem:[%s10301_s19 + $0x1308] sm:$0xff] }
 0x4d7   : > { %v7033_v37 = vrot.slane %v2374_v3, %v10482_v35  ;;  %v905_v3 = vld [vmem:[%s10301_s19 + $0x1300] sm:$0xff] }
 0x4d8   : > { %2515 = vadd.xlane.f32.xlu1 %v894_v12 }
 0x4d9   : > { %v7034_v2 = vsel %vm4503_vm13, %v7033_v37, %v7029_v14  ;;  %2513 = vadd.xlane.f32.xlu0 %v893_v8  ;;  %v2380_v43 = vpop.xlane.xlu1 %2379 }
 0x4da   : > { %v12375_v24 = vsel %vm4510_vm14, %v7038_v49, %v7034_v2  ;;  %v7047_v61 = vrot.slane %v2380_v43, %v10396_v20  ;;  %v2378_v1 = vpop.xlane.xlu0 %2377  ;;  %v908_v43 = vld [vmem:[%s10301_s19 + $0x1318] sm:$0xff] }
 0x4db   : > { %v7043_v39 = vrot.slane %v2378_v1, %v10390_v18 }
 0x4dc   : > { %2519 = vadd.xlane.f32.xlu1 %v896_v50 }
 0x4dd   : > { %v7048_v25 = vsel %vm4412_vm0, %v7047_v61, %v7043_v39  ;;  %2517 = vadd.xlane.f32.xlu0 %v895_v29  ;;  %v2384_v4 = vpop.xlane.xlu1 %2383  ;;  %v907_v29 = vld [vmem:[%s10301_s19 + $0x1310] sm:$0xff] }
 0x4de   : > { %v7057_v51 = vrot.slane %v2384_v4, %v10393_v19  ;;  %v2382_v30 = vpop.xlane.xlu0 %2381 }
 0x4df   : > { %v7052_v55 = vrot.slane %v2382_v30, %v10399_v21 }
 0x4e0   : > { %2523 = vadd.xlane.f32.xlu1 %v898_v38  ;;  %v910_v38 = vld [vmem:[%s10301_s19 + $0x1328] sm:$0xff] }
 0x4e1   : > { %v7053_v13 = vsel %vm4419_vm1, %v7052_v55, %v7048_v25  ;;  %2521 = vadd.xlane.f32.xlu0 %v897_v22  ;;  %v2388_v48 = vpop.xlane.xlu1 %2387  ;;  %v909_v55 = vld [vmem:[%s10301_s19 + $0x1320] sm:$0xff] }
 0x4e2   : > { %v7067_v9 = vrot.slane %v2388_v48, %v10404_v26  ;;  %v7058_v42 = vsel %vm4426_vm2, %v7057_v51, %v7053_v13  ;;  %v2386_v47 = vpop.xlane.xlu0 %2385 }
 0x4e3   : > { %v7062_v57 = vrot.slane %v2386_v47, %v10407_v27 }
 0x4e4   : > { %2527 = vadd.xlane.f32.xlu1 %v900_v41 }
 0x4e5   : > { %v7063_v28 = vsel %vm4433_vm3, %v7062_v57, %v7058_v42  ;;  %2525 = vadd.xlane.f32.xlu0 %v899_v52  ;;  %v2392_v34 = vpop.xlane.xlu1 %2391  ;;  %v911_v57 = vld [vmem:[%s10301_s19 + $0x1330] sm:$0xff] }
 0x4e6   : > { %v7077_v23 = vrot.slane %v2392_v34, %v10428_v46  ;;  %v7068_v36 = vsel %vm4440_vm4, %v7067_v9, %v7063_v28  ;;  %v2390_v58 = vpop.xlane.xlu0 %2389  ;;  %v912_v9 = vld [vmem:[%s10301_s19 + $0x1338] sm:$0xff] }
 0x4e7   : > { %v7072_v59 = vrot.slane %v2390_v58, %v10420_v40 }
 0x4e8   : > { %2531 = vadd.xlane.f32.xlu1 %v902_v60 }
 0x4e9   : > { %v7073_v17 = vsel %vm4447_vm5, %v7072_v59, %v7068_v36  ;;  %2529 = vadd.xlane.f32.xlu0 %v901_v45  ;;  %v2396_v31 = vpop.xlane.xlu1 %2395  ;;  %v914_v36 = vld [vmem:[%s10301_s19 + $0x1348] sm:$0xff]  ;;  %v913_v59 = vld [vmem:[%s10301_s19 + $0x1340] sm:$0xff] }
 0x4ea   : > { %v7087_v32 = vrot.slane %v2396_v31, %v10435_v53  ;;  %v7078_v33 = vsel %vm4454_vm6, %v7077_v23, %v7073_v17  ;;  %v2394_v0 = vpop.xlane.xlu0 %2393 }
 0x4eb   : > { %v7082_v10 = vrot.slane %v2394_v0, %v10438_v54 }
 0x4ec   : > { %2535 = vadd.xlane.f32.xlu1 %v904_v63  ;;  %v916_v63 = vld [vmem:[%s10301_s19 + $0x1358] sm:$0xff] }
 0x4ed   : > { %v7083_v44 = vsel %vm4461_vm7, %v7082_v10, %v7078_v33  ;;  %2533 = vadd.xlane.f32.xlu0 %v903_v56  ;;  %v2400_v62 = vpop.xlane.xlu1 %2399  ;;  %v915_v56 = vld [vmem:[%s10301_s19 + $0x1350] sm:$0xff] }
 0x4ee   : > { %v7097_v12 = vrot.slane %v2400_v62, %v10453_v6  ;;  %v7088_v49 = vsel %vm4468_vm8, %v7087_v32, %v7083_v44  ;;  %v2398_v14 = vpop.xlane.xlu0 %2397 }
 0x4ef   : > { %v7092_v8 = vrot.slane %v2398_v14, %v10456_v7 }
 0x4f0   : > { %2539 = vadd.xlane.f32.xlu1 %v906_v11  ;;  %v918_v11 = vld [vmem:[%s10301_s19 + $0x1368] sm:$0xff] }
 0x4f1   : > { %v7093_v37 = vsel %vm4475_vm9, %v7092_v8, %v7088_v49  ;;  %2537 = vadd.xlane.f32.xlu0 %v905_v3  ;;  %v2404_v2 = vpop.xlane.xlu1 %2403  ;;  %v917_v3 = vld [vmem:[%s10301_s19 + $0x1360] sm:$0xff] }
 0x4f2   : > { %v7107_v50 = vrot.slane %v2404_v2, %v10463_v15  ;;  %v7098_v61 = vsel %vm4482_vm10, %v7097_v12, %v7093_v37  ;;  %v2402_v1 = vpop.xlane.xlu0 %2401 }
 0x4f3   : > { %v7102_v39 = vrot.slane %v2402_v1, %v10466_v16 }
 0x4f4   : > { %2543 = vadd.xlane.f32.xlu1 %v908_v43  ;;  %v920_v43 = vld [vmem:[%s10301_s19 + $0x1378] sm:$0xff] }
 0x4f5   : > { %v7103_v25 = vsel %vm14422_vm11, %v7102_v39, %v7098_v61  ;;  %2541 = vadd.xlane.f32.xlu0 %v907_v29  ;;  %v2408_v4 = vpop.xlane.xlu1 %2407  ;;  %vm14423_vm11 = vcmask 1041409   ;;  %v919_v29 = vld [vmem:[%s10301_s19 + $0x1370] sm:$0xff] }
 0x4f6   : > { %v7117_v51 = vrot.slane %v2408_v4, %v10479_v5  ;;  %v7108_v30 = vsel %vm4496_vm12, %v7107_v50, %v7103_v25  ;;  %v2406_v22 = vpop.xlane.xlu0 %2405 }
 0x4f7   : > { %v7112_v13 = vrot.slane %v2406_v22, %v10482_v35 }
 0x4f8   : > { %2547 = vadd.xlane.f32.xlu1 %v910_v38  ;;  %v922_v38 = vld [vmem:[%s10301_s19 + $0x1388] sm:$0xff] }
 0x4f9   : > { %v7113_v48 = vsel %vm4503_vm13, %v7112_v13, %v7108_v30  ;;  %2545 = vadd.xlane.f32.xlu0 %v909_v55  ;;  %v2412_v41 = vpop.xlane.xlu1 %2411  ;;  %v921_v55 = vld [vmem:[%s10301_s19 + $0x1380] sm:$0xff] }
 0x4fa   : > { %v7118_v42 = vsel %vm4510_vm14, %v7117_v51, %v7113_v48  ;;  %v7126_v47 = vrot.slane %v2412_v41, %v10396_v20  ;;  %v2410_v52 = vpop.xlane.xlu0 %2409 }
 0x4fb   : > { %v12428_v28 = vsel %vm14423_vm11, %v7118_v42, %v12375_v24  ;;  %v7122_v34 = vrot.slane %v2410_v52, %v10390_v18  ;;  %vm14424_vm11 = vcmask 851712  }
 0x4fc   : > { %2551 = vadd.xlane.f32.xlu1 %v912_v9  ;;  %v924_v9 = vld [vmem:[%s10301_s19 + $0x1398] sm:$0xff] }
 0x4fd   : > { %v7127_v60 = vsel %vm4412_vm0, %v7126_v47, %v7122_v34  ;;  %2549 = vadd.xlane.f32.xlu0 %v911_v57  ;;  %v2416_v23 = vpop.xlane.xlu1 %2415  ;;  %v923_v57 = vld [vmem:[%s10301_s19 + $0x1390] sm:$0xff] }
 0x4fe   : > { %v7136_v58 = vrot.slane %v2416_v23, %v10393_v19  ;;  %v2414_v45 = vpop.xlane.xlu0 %2413 }
 0x4ff   : > { %v7131_v17 = vrot.slane %v2414_v45, %v10399_v21 }
 0x500   : > { %2555 = vadd.xlane.f32.xlu1 %v914_v36  ;;  %v926_v36 = vld [vmem:[%s10301_s19 + $0x13a8] sm:$0xff] }
 0x501   : > { %v7132_v24 = vsel %vm4419_vm1, %v7131_v17, %v7127_v60  ;;  %2553 = vadd.xlane.f32.xlu0 %v913_v59  ;;  %v2420_v31 = vpop.xlane.xlu1 %2419  ;;  %v925_v17 = vld [vmem:[%s10301_s19 + $0x13a0] sm:$0xff] }
 0x502   : > { %v7146_v32 = vrot.slane %v2420_v31, %v10404_v26  ;;  %v7137_v33 = vsel %vm4426_vm2, %v7136_v58, %v7132_v24  ;;  %v2418_v0 = vpop.xlane.xlu0 %2417 }
 0x503   : > { %v7141_v10 = vrot.slane %v2418_v0, %v10407_v27 }
 0x504   : > { %2559 = vadd.xlane.f32.xlu1 %v916_v63 }
 0x505   : > { %v7142_v44 = vsel %vm4433_vm3, %v7141_v10, %v7137_v33  ;;  %2557 = vadd.xlane.f32.xlu0 %v915_v56  ;;  %v2424_v62 = vpop.xlane.xlu1 %2423  ;;  %v927_v10 = vld [vmem:[%s10301_s19 + $0x13b0] sm:$0xff] }
 0x506   : > { %v7156_v12 = vrot.slane %v2424_v62, %v10428_v46  ;;  %v7147_v49 = vsel %vm4440_vm4, %v7146_v32, %v7142_v44  ;;  %v2422_v14 = vpop.xlane.xlu0 %2421  ;;  %v928_v32 = vld [vmem:[%s10301_s19 + $0x13b8] sm:$0xff] }
 0x507   : > { %v7151_v8 = vrot.slane %v2422_v14, %v10420_v40 }
 0x508   : > { %2563 = vadd.xlane.f32.xlu1 %v918_v11 }
 0x509   : > { %v7152_v37 = vsel %vm4447_vm5, %v7151_v8, %v7147_v49  ;;  %2561 = vadd.xlane.f32.xlu0 %v917_v3  ;;  %v2428_v2 = vpop.xlane.xlu1 %2427  ;;  %v930_v49 = vld [vmem:[%s10301_s19 + $0x13c8] sm:$0xff]  ;;  %v929_v8 = vld [vmem:[%s10301_s19 + $0x13c0] sm:$0xff] }
 0x50a   : > { %v7166_v50 = vrot.slane %v2428_v2, %v10435_v53  ;;  %v7157_v61 = vsel %vm4454_vm6, %v7156_v12, %v7152_v37  ;;  %v2426_v1 = vpop.xlane.xlu0 %2425 }
 0x50b   : > { %v7161_v39 = vrot.slane %v2426_v1, %v10438_v54 }
 0x50c   : > { %2567 = vadd.xlane.f32.xlu1 %v920_v43  ;;  %v932_v43 = vld [vmem:[%s10301_s19 + $0x13d8] sm:$0xff] }
 0x50d   : > { %v7162_v25 = vsel %vm4461_vm7, %v7161_v39, %v7157_v61  ;;  %2565 = vadd.xlane.f32.xlu0 %v919_v29  ;;  %v2432_v4 = vpop.xlane.xlu1 %2431  ;;  %v931_v29 = vld [vmem:[%s10301_s19 + $0x13d0] sm:$0xff] }
 0x50e   : > { %v7176_v51 = vrot.slane %v2432_v4, %v10453_v6  ;;  %v7167_v30 = vsel %vm4468_vm8, %v7166_v50, %v7162_v25  ;;  %v2430_v22 = vpop.xlane.xlu0 %2429 }
 0x50f   : > { %v7171_v13 = vrot.slane %v2430_v22, %v10456_v7 }
 0x510   : > { %2571 = vadd.xlane.f32.xlu1 %v922_v38  ;;  %v934_v38 = vld [vmem:[%s10301_s19 + $0x13e8] sm:$0xff] }
 0x511   : > { %v7172_v48 = vsel %vm4475_vm9, %v7171_v13, %v7167_v30  ;;  %2569 = vadd.xlane.f32.xlu0 %v921_v55  ;;  %v2436_v41 = vpop.xlane.xlu1 %2435  ;;  %v933_v55 = vld [vmem:[%s10301_s19 + $0x13e0] sm:$0xff] }
 0x512   : > { %v7186_v42 = vrot.slane %v2436_v41, %v10463_v15  ;;  %v7177_v47 = vsel %vm4482_vm10, %v7176_v51, %v7172_v48  ;;  %v2434_v52 = vpop.xlane.xlu0 %2433 }
 0x513   : > { %v7181_v34 = vrot.slane %v2434_v52, %v10466_v16 }
 0x514   : > { %2575 = vadd.xlane.f32.xlu1 %v924_v9  ;;  %v936_v9 = vld [vmem:[%s10301_s19 + $0x13f8] sm:$0xff] }
 0x515   : > { %v7182_v60 = vsel %vm14424_vm11, %v7181_v34, %v7177_v47  ;;  %2573 = vadd.xlane.f32.xlu0 %v923_v57  ;;  %v2440_v23 = vpop.xlane.xlu1 %2439  ;;  %vm14425_vm11 = vcmask 1042434   ;;  %v935_v57 = vld [vmem:[%s10301_s19 + $0x13f0] sm:$0xff] }
 0x516   : > { %v7196_v58 = vrot.slane %v2440_v23, %v10479_v5  ;;  %v7187_v45 = vsel %vm4496_vm12, %v7186_v42, %v7182_v60  ;;  %v2438_v59 = vpop.xlane.xlu0 %2437 }
 0x517   : > { %v7191_v24 = vrot.slane %v2438_v59, %v10482_v35 }
 0x518   : > { %2579 = vadd.xlane.f32.xlu1 %v926_v36  ;;  %v938_v36 = vld [vmem:[%s10301_s19 + $0x1408] sm:$0xff] }
 0x519   : > { %v7192_v31 = vsel %vm4503_vm13, %v7191_v24, %v7187_v45  ;;  %2577 = vadd.xlane.f32.xlu0 %v925_v17  ;;  %v2444_v63 = vpop.xlane.xlu1 %2443  ;;  %v937_v17 = vld [vmem:[%s10301_s19 + $0x1400] sm:$0xff] }
 0x51a   : > { %v7197_v33 = vsel %vm4510_vm14, %v7196_v58, %v7192_v31  ;;  %v7205_v0 = vrot.slane %v2444_v63, %v10396_v20  ;;  %v2442_v56 = vpop.xlane.xlu0 %2441 }
 0x51b   : > { %v12479_v44 = vsel %vm14425_vm11, %v7197_v33, %v12428_v28  ;;  %v7201_v62 = vrot.slane %v2442_v56, %v10390_v18  ;;  %vm14426_vm11 = vcmask 851712  }
 0x51c   : > { %2583 = vadd.xlane.f32.xlu1 %v928_v32  ;;  %v940_v32 = vld [vmem:[%s10301_s19 + $0x1418] sm:$0xff] }
 0x51d   : > { %v7206_v11 = vsel %vm4412_vm0, %v7205_v0, %v7201_v62  ;;  %2581 = vadd.xlane.f32.xlu0 %v927_v10  ;;  %v2448_v12 = vpop.xlane.xlu1 %2447  ;;  %v939_v10 = vld [vmem:[%s10301_s19 + $0x1410] sm:$0xff] }
 0x51e   : > { %v7215_v14 = vrot.slane %v2448_v12, %v10393_v19  ;;  %v2446_v3 = vpop.xlane.xlu0 %2445 }
 0x51f   : > { %v7210_v37 = vrot.slane %v2446_v3, %v10399_v21 }
 0x520   : > { %2587 = vadd.xlane.f32.xlu1 %v930_v49  ;;  %v942_v49 = vld [vmem:[%s10301_s19 + $0x1428] sm:$0xff] }
 0x521   : > { %v7211_v28 = vsel %vm4419_vm1, %v7210_v37, %v7206_v11  ;;  %2585 = vadd.xlane.f32.xlu0 %v929_v8  ;;  %v2452_v2 = vpop.xlane.xlu1 %2451  ;;  %v941_v37 = vld [vmem:[%s10301_s19 + $0x1420] sm:$0xff] }
 0x522   : > { %v7225_v50 = vrot.slane %v2452_v2, %v10404_v26  ;;  %v7216_v61 = vsel %vm4426_vm2, %v7215_v14, %v7211_v28  ;;  %v2450_v1 = vpop.xlane.xlu0 %2449 }
 0x523   : > { %v7220_v39 = vrot.slane %v2450_v1, %v10407_v27 }
 0x524   : > { %2591 = vadd.xlane.f32.xlu1 %v932_v43 }
 0x525   : > { %v7221_v25 = vsel %vm4433_vm3, %v7220_v39, %v7216_v61  ;;  %2589 = vadd.xlane.f32.xlu0 %v931_v29  ;;  %v2456_v4 = vpop.xlane.xlu1 %2455  ;;  %v943_v39 = vld [vmem:[%s10301_s19 + $0x1430] sm:$0xff] }
 0x526   : > { %v7235_v51 = vrot.slane %v2456_v4, %v10428_v46  ;;  %v7226_v30 = vsel %vm4440_vm4, %v7225_v50, %v7221_v25  ;;  %v2454_v22 = vpop.xlane.xlu0 %2453  ;;  %v944_v50 = vld [vmem:[%s10301_s19 + $0x1438] sm:$0xff] }
 0x527   : > { %v7230_v13 = vrot.slane %v2454_v22, %v10420_v40 }
 0x528   : > { %2595 = vadd.xlane.f32.xlu1 %v934_v38 }
 0x529   : > { %v7231_v48 = vsel %vm4447_vm5, %v7230_v13, %v7226_v30  ;;  %2593 = vadd.xlane.f32.xlu0 %v933_v55  ;;  %v2460_v41 = vpop.xlane.xlu1 %2459  ;;  %v946_v30 = vld [vmem:[%s10301_s19 + $0x1448] sm:$0xff]  ;;  %v945_v13 = vld [vmem:[%s10301_s19 + $0x1440] sm:$0xff] }
 0x52a   : > { %v7245_v42 = vrot.slane %v2460_v41, %v10435_v53  ;;  %v7236_v47 = vsel %vm4454_vm6, %v7235_v51, %v7231_v48  ;;  %v2458_v52 = vpop.xlane.xlu0 %2457 }
 0x52b   : > { %v7240_v34 = vrot.slane %v2458_v52, %v10438_v54 }
 0x52c   : > { %2599 = vadd.xlane.f32.xlu1 %v936_v9  ;;  %v948_v9 = vld [vmem:[%s10301_s19 + $0x1458] sm:$0xff] }
 0x52d   : > { %v7241_v60 = vsel %vm4461_vm7, %v7240_v34, %v7236_v47  ;;  %2597 = vadd.xlane.f32.xlu0 %v935_v57  ;;  %v2464_v23 = vpop.xlane.xlu1 %2463  ;;  %v947_v57 = vld [vmem:[%s10301_s19 + $0x1450] sm:$0xff] }
 0x52e   : > { %v7255_v58 = vrot.slane %v2464_v23, %v10453_v6  ;;  %v7246_v45 = vsel %vm4468_vm8, %v7245_v42, %v7241_v60  ;;  %v2462_v59 = vpop.xlane.xlu0 %2461 }
 0x52f   : > { %v7250_v24 = vrot.slane %v2462_v59, %v10456_v7 }
 0x530   : > { %2603 = vadd.xlane.f32.xlu1 %v938_v36  ;;  %v950_v36 = vld [vmem:[%s10301_s19 + $0x1468] sm:$0xff] }
 0x531   : > { %v7251_v31 = vsel %vm4475_vm9, %v7250_v24, %v7246_v45  ;;  %2601 = vadd.xlane.f32.xlu0 %v937_v17  ;;  %v2468_v63 = vpop.xlane.xlu1 %2467  ;;  %v949_v17 = vld [vmem:[%s10301_s19 + $0x1460] sm:$0xff] }
 0x532   : > { %v7265_v33 = vrot.slane %v2468_v63, %v10463_v15  ;;  %v7256_v0 = vsel %vm4482_vm10, %v7255_v58, %v7251_v31  ;;  %v2466_v56 = vpop.xlane.xlu0 %2465 }
 0x533   : > { %v7260_v62 = vrot.slane %v2466_v56, %v10466_v16 }
 0x534   : > { %2607 = vadd.xlane.f32.xlu1 %v940_v32  ;;  %v952_v32 = vld [vmem:[%s10301_s19 + $0x1478] sm:$0xff] }
 0x535   : > { %v7261_v11 = vsel %vm14426_vm11, %v7260_v62, %v7256_v0  ;;  %2605 = vadd.xlane.f32.xlu0 %v939_v10  ;;  %v2472_v12 = vpop.xlane.xlu1 %2471  ;;  %vm14427_vm11 = vcmask 1043459   ;;  %v951_v10 = vld [vmem:[%s10301_s19 + $0x1470] sm:$0xff] }
 0x536   : > { %v7275_v14 = vrot.slane %v2472_v12, %v10479_v5  ;;  %v7266_v3 = vsel %vm4496_vm12, %v7265_v33, %v7261_v11  ;;  %v2470_v8 = vpop.xlane.xlu0 %2469 }
 0x537   : > { %v7270_v28 = vrot.slane %v2470_v8, %v10482_v35 }
 0x538   : > { %2611 = vadd.xlane.f32.xlu1 %v942_v49  ;;  %v954_v49 = vld [vmem:[%s10301_s19 + $0x1488] sm:$0xff] }
 0x539   : > { %v7271_v2 = vsel %vm4503_vm13, %v7270_v28, %v7266_v3  ;;  %2609 = vadd.xlane.f32.xlu0 %v941_v37  ;;  %v2476_v43 = vpop.xlane.xlu1 %2475  ;;  %v953_v37 = vld [vmem:[%s10301_s19 + $0x1480] sm:$0xff] }
 0x53a   : > { %v7276_v61 = vsel %vm4510_vm14, %v7275_v14, %v7271_v2  ;;  %v7284_v1 = vrot.slane %v2476_v43, %v10396_v20  ;;  %v2474_v29 = vpop.xlane.xlu0 %2473 }
 0x53b   : > { %v12530_v25 = vsel %vm14427_vm11, %v7276_v61, %v12479_v44  ;;  %v7280_v4 = vrot.slane %v2474_v29, %v10390_v18  ;;  %vm14428_vm11 = vcmask 851712  }
 0x53c   : > { %2615 = vadd.xlane.f32.xlu1 %v944_v50  ;;  %v956_v50 = vld [vmem:[%s10301_s19 + $0x1498] sm:$0xff] }
 0x53d   : > { %v7285_v38 = vsel %vm4412_vm0, %v7284_v1, %v7280_v4  ;;  %2613 = vadd.xlane.f32.xlu0 %v943_v39  ;;  %v2480_v51 = vpop.xlane.xlu1 %2479  ;;  %v955_v39 = vld [vmem:[%s10301_s19 + $0x1490] sm:$0xff] }
 0x53e   : > { %v7294_v22 = vrot.slane %v2480_v51, %v10393_v19  ;;  %v2478_v55 = vpop.xlane.xlu0 %2477 }
 0x53f   : > { %v7289_v48 = vrot.slane %v2478_v55, %v10399_v21 }
 0x540   : > { %2619 = vadd.xlane.f32.xlu1 %v946_v30  ;;  %v958_v30 = vld [vmem:[%s10301_s19 + $0x14a8] sm:$0xff] }
 0x541   : > { %v7290_v44 = vsel %vm4419_vm1, %v7289_v48, %v7285_v38  ;;  %2617 = vadd.xlane.f32.xlu0 %v945_v13  ;;  %v2484_v41 = vpop.xlane.xlu1 %2483  ;;  %v957_v48 = vld [vmem:[%s10301_s19 + $0x14a0] sm:$0xff] }
 0x542   : > { %v7304_v42 = vrot.slane %v2484_v41, %v10404_v26  ;;  %v7295_v47 = vsel %vm4426_vm2, %v7294_v22, %v7290_v44  ;;  %v2482_v52 = vpop.xlane.xlu0 %2481 }
 0x543   : > { %v7299_v34 = vrot.slane %v2482_v52, %v10407_v27 }
 0x544   : > { %2623 = vadd.xlane.f32.xlu1 %v948_v9 }
 0x545   : > { %v7300_v60 = vsel %vm4433_vm3, %v7299_v34, %v7295_v47  ;;  %2621 = vadd.xlane.f32.xlu0 %v947_v57  ;;  %v2488_v23 = vpop.xlane.xlu1 %2487  ;;  %v959_v34 = vld [vmem:[%s10301_s19 + $0x14b0] sm:$0xff] }
 0x546   : > { %v7314_v58 = vrot.slane %v2488_v23, %v10428_v46  ;;  %v7305_v45 = vsel %vm4440_vm4, %v7304_v42, %v7300_v60  ;;  %v2486_v59 = vpop.xlane.xlu0 %2485  ;;  %v960_v42 = vld [vmem:[%s10301_s19 + $0x14b8] sm:$0xff] }
 0x547   : > { %v7309_v24 = vrot.slane %v2486_v59, %v10420_v40 }
 0x548   : > { %2627 = vadd.xlane.f32.xlu1 %v950_v36 }
 0x549   : > { %v7310_v31 = vsel %vm4447_vm5, %v7309_v24, %v7305_v45  ;;  %2625 = vadd.xlane.f32.xlu0 %v949_v17  ;;  %v2492_v63 = vpop.xlane.xlu1 %2491  ;;  %v962_v45 = vld [vmem:[%s10301_s19 + $0x14c8] sm:$0xff]  ;;  %v961_v24 = vld [vmem:[%s10301_s19 + $0x14c0] sm:$0xff] }
 0x54a   : > { %v7324_v33 = vrot.slane %v2492_v63, %v10435_v53  ;;  %v7315_v0 = vsel %vm4454_vm6, %v7314_v58, %v7310_v31  ;;  %v2490_v56 = vpop.xlane.xlu0 %2489 }
 0x54b   : > { %v7319_v62 = vrot.slane %v2490_v56, %v10438_v54 }
 0x54c   : > { %2631 = vadd.xlane.f32.xlu1 %v952_v32  ;;  %v964_v32 = vld [vmem:[%s10301_s19 + $0x14d8] sm:$0xff] }
 0x54d   : > { %v7320_v11 = vsel %vm4461_vm7, %v7319_v62, %v7315_v0  ;;  %2629 = vadd.xlane.f32.xlu0 %v951_v10  ;;  %v2496_v12 = vpop.xlane.xlu1 %2495  ;;  %v963_v10 = vld [vmem:[%s10301_s19 + $0x14d0] sm:$0xff] }
 0x54e   : > { %v7334_v14 = vrot.slane %v2496_v12, %v10453_v6  ;;  %v7325_v3 = vsel %vm4468_vm8, %v7324_v33, %v7320_v11  ;;  %v2494_v8 = vpop.xlane.xlu0 %2493 }
 0x54f   : > { %v7329_v28 = vrot.slane %v2494_v8, %v10456_v7 }
 0x550   : > { %2635 = vadd.xlane.f32.xlu1 %v954_v49  ;;  %v966_v49 = vld [vmem:[%s10301_s19 + $0x14e8] sm:$0xff] }
 0x551   : > { %v7330_v2 = vsel %vm4475_vm9, %v7329_v28, %v7325_v3  ;;  %2633 = vadd.xlane.f32.xlu0 %v953_v37  ;;  %v2500_v43 = vpop.xlane.xlu1 %2499  ;;  %v965_v37 = vld [vmem:[%s10301_s19 + $0x14e0] sm:$0xff] }
 0x552   : > { %v7344_v61 = vrot.slane %v2500_v43, %v10463_v15  ;;  %v7335_v1 = vsel %vm4482_vm10, %v7334_v14, %v7330_v2  ;;  %v2498_v29 = vpop.xlane.xlu0 %2497 }
 0x553   : > { %v7339_v4 = vrot.slane %v2498_v29, %v10466_v16 }
 0x554   : > { %2639 = vadd.xlane.f32.xlu1 %v956_v50  ;;  %v968_v50 = vld [vmem:[%s10301_s19 + $0x14f8] sm:$0xff] }
 0x555   : > { %v7340_v38 = vsel %vm14428_vm11, %v7339_v4, %v7335_v1  ;;  %2637 = vadd.xlane.f32.xlu0 %v955_v39  ;;  %v2504_v51 = vpop.xlane.xlu1 %2503  ;;  %vm14429_vm11 = vcmask 1044484   ;;  %v967_v39 = vld [vmem:[%s10301_s19 + $0x14f0] sm:$0xff] }
 0x556   : > { %v7354_v22 = vrot.slane %v2504_v51, %v10479_v5  ;;  %v7345_v55 = vsel %vm4496_vm12, %v7344_v61, %v7340_v38  ;;  %v2502_v13 = vpop.xlane.xlu0 %2501 }
 0x557   : > { %v7349_v44 = vrot.slane %v2502_v13, %v10482_v35 }
 0x558   : > { %2643 = vadd.xlane.f32.xlu1 %v958_v30  ;;  %v970_v30 = vld [vmem:[%s10301_s19 + $0x1508] sm:$0xff] }
 0x559   : > { %v7350_v41 = vsel %vm4503_vm13, %v7349_v44, %v7345_v55  ;;  %2641 = vadd.xlane.f32.xlu0 %v957_v48  ;;  %v2508_v9 = vpop.xlane.xlu1 %2507  ;;  %v969_v48 = vld [vmem:[%s10301_s19 + $0x1500] sm:$0xff] }
 0x55a   : > { %v7355_v47 = vsel %vm4510_vm14, %v7354_v22, %v7350_v41  ;;  %v7363_v52 = vrot.slane %v2508_v9, %v10396_v20  ;;  %v2506_v57 = vpop.xlane.xlu0 %2505 }
 0x55b   : > { %v12581_v60 = vsel %vm14429_vm11, %v7355_v47, %v12530_v25  ;;  %v7359_v23 = vrot.slane %v2506_v57, %v10390_v18  ;;  %vm14430_vm11 = vcmask 851712  }
 0x55c   : > { %2647 = vadd.xlane.f32.xlu1 %v960_v42  ;;  %v972_v42 = vld [vmem:[%s10301_s19 + $0x1518] sm:$0xff] }
 0x55d   : > { %v7364_v36 = vsel %vm4412_vm0, %v7363_v52, %v7359_v23  ;;  %2645 = vadd.xlane.f32.xlu0 %v959_v34  ;;  %v2512_v58 = vpop.xlane.xlu1 %2511  ;;  %v971_v34 = vld [vmem:[%s10301_s19 + $0x1510] sm:$0xff] }
 0x55e   : > { %v7373_v59 = vrot.slane %v2512_v58, %v10393_v19  ;;  %v2510_v17 = vpop.xlane.xlu0 %2509 }
 0x55f   : > { %v7368_v31 = vrot.slane %v2510_v17, %v10399_v21 }
 0x560   : > { %2651 = vadd.xlane.f32.xlu1 %v962_v45  ;;  %v974_v45 = vld [vmem:[%s10301_s19 + $0x1528] sm:$0xff] }
 0x561   : > { %v7369_v25 = vsel %vm4419_vm1, %v7368_v31, %v7364_v36  ;;  %2649 = vadd.xlane.f32.xlu0 %v961_v24  ;;  %v2516_v63 = vpop.xlane.xlu1 %2515  ;;  %v973_v31 = vld [vmem:[%s10301_s19 + $0x1520] sm:$0xff] }
 0x562   : > { %v7383_v33 = vrot.slane %v2516_v63, %v10404_v26  ;;  %v7374_v0 = vsel %vm4426_vm2, %v7373_v59, %v7369_v25  ;;  %v2514_v56 = vpop.xlane.xlu0 %2513 }
 0x563   : > { %v7378_v62 = vrot.slane %v2514_v56, %v10407_v27 }
 0x564   : > { %2655 = vadd.xlane.f32.xlu1 %v964_v32 }
 0x565   : > { %v7379_v11 = vsel %vm4433_vm3, %v7378_v62, %v7374_v0  ;;  %2653 = vadd.xlane.f32.xlu0 %v963_v10  ;;  %v2520_v12 = vpop.xlane.xlu1 %2519  ;;  %v975_v10 = vld [vmem:[%s10301_s19 + $0x1530] sm:$0xff] }
 0x566   : > { %v7393_v14 = vrot.slane %v2520_v12, %v10428_v46  ;;  %v7384_v3 = vsel %vm4440_vm4, %v7383_v33, %v7379_v11  ;;  %v2518_v8 = vpop.xlane.xlu0 %2517  ;;  %v976_v33 = vld [vmem:[%s10301_s19 + $0x1538] sm:$0xff]  ;;  %v978_v12 = vld [vmem:[%s10301_s19 + $0x1548] sm:$0xff] }
 0x567   : > { %v7388_v28 = vrot.slane %v2518_v8, %v10420_v40  ;;  %v10116_v8 = vld [vmem:[%s14370_s3] ss:$0 sm:$0xff] }
 0x568   : > { %2659 = vadd.xlane.f32.xlu1 %v966_v49 }
 0x569   : > { %v7389_v2 = vsel %vm4447_vm5, %v7388_v28, %v7384_v3  ;;  %2657 = vadd.xlane.f32.xlu0 %v965_v37  ;;  %v2524_v43 = vpop.xlane.xlu1 %2523  ;;  %v977_v3 = vld [vmem:[%s10301_s19 + $0x1540] sm:$0xff] }
 0x56a   : > { %v7403_v61 = vrot.slane %v2524_v43, %v10435_v53  ;;  %v7394_v1 = vsel %vm4454_vm6, %v7393_v14, %v7389_v2  ;;  %v2522_v29 = vpop.xlane.xlu0 %2521  ;;  %v980_v43 = vld [vmem:[%s10301_s19 + $0x1558] sm:$0xff] }
 0x56b   : > { %v7398_v4 = vrot.slane %v2522_v29, %v10438_v54 }
 0x56c   : > { %2663 = vadd.xlane.f32.xlu1 %v968_v50 }
 0x56d   : > { %v7399_v38 = vsel %vm4461_vm7, %v7398_v4, %v7394_v1  ;;  %2661 = vadd.xlane.f32.xlu0 %v967_v39  ;;  %v2528_v51 = vpop.xlane.xlu1 %2527  ;;  %v982_v4 = vld [vmem:[%s10301_s19 + $0x1568] sm:$0xff] }
 0x56e   : > { %v7413_v22 = vrot.slane %v2528_v51, %v10453_v6  ;;  %v7404_v55 = vsel %vm4468_vm8, %v7403_v61, %v7399_v38  ;;  %v2526_v13 = vpop.xlane.xlu0 %2525  ;;  %v979_v61 = vld [vmem:[%s10301_s19 + $0x1550] sm:$0xff]  ;;  %v981_v51 = vld [vmem:[%s10301_s19 + $0x1560] sm:$0xff] }
 0x56f   : > { %v7408_v44 = vrot.slane %v2526_v13, %v10456_v7  ;;  %v983_v13 = vld [vmem:[%s10301_s19 + $0x1570] sm:$0xff] }
 0x570   : > { %2667 = vadd.xlane.f32.xlu1 %v970_v30 }
 0x571   : > { %v7409_v41 = vsel %vm4475_vm9, %v7408_v44, %v7404_v55  ;;  %2665 = vadd.xlane.f32.xlu0 %v969_v48  ;;  %v2532_v9 = vpop.xlane.xlu1 %2531  ;;  %v986_v44 = vld [vmem:[%s10301_s19 + $0x1588] sm:$0xff] }
 0x572   : > { %v7423_v47 = vrot.slane %v2532_v9, %v10463_v15  ;;  %v7414_v52 = vsel %vm4482_vm10, %v7413_v22, %v7409_v41  ;;  %v2530_v57 = vpop.xlane.xlu0 %2529  ;;  %v984_v22 = vld [vmem:[%s10301_s19 + $0x1578] sm:$0xff]  ;;  %v985_v9 = vld [vmem:[%s10301_s19 + $0x1580] sm:$0xff] }
 0x573   : > { %v7418_v23 = vrot.slane %v2530_v57, %v10466_v16  ;;  %v987_v57 = vld [vmem:[%s10301_s19 + $0x1590] sm:$0xff] }
 0x574   : > { %2671 = vadd.xlane.f32.xlu1 %v972_v42 }
 0x575   : > { %v7419_v36 = vsel %vm14430_vm11, %v7418_v23, %v7414_v52  ;;  %2669 = vadd.xlane.f32.xlu0 %v971_v34  ;;  %v2536_v58 = vpop.xlane.xlu1 %2535  ;;  %vm14431_vm11 = vcmask 1045509   ;;  %v990_v23 = vld [vmem:[%s10301_s19 + $0x15a8] sm:$0xff] }
 0x576   : > { %v7433_v59 = vrot.slane %v2536_v58, %v10479_v5  ;;  %v7424_v17 = vsel %vm4496_vm12, %v7423_v47, %v7419_v36  ;;  %v2534_v24 = vpop.xlane.xlu0 %2533  ;;  %v988_v47 = vld [vmem:[%s10301_s19 + $0x1598] sm:$0xff]  ;;  %v989_v58 = vld [vmem:[%s10301_s19 + $0x15a0] sm:$0xff] }
 0x577   : > { %v7428_v25 = vrot.slane %v2534_v24, %v10482_v35 }
 0x578   : > { %2675 = vadd.xlane.f32.xlu1 %v974_v45 }
 0x579   : > { %v7429_v63 = vsel %vm4503_vm13, %v7428_v25, %v7424_v17  ;;  %2673 = vadd.xlane.f32.xlu0 %v973_v31  ;;  %v12626_v32 = vpop.xlane.xlu1 %2539  ;;  %v992_v31 = vld [vmem:[%s10301_s19 + $0x15b8] sm:$0xff] }
 0x57a   : > { %v7434_v0 = vsel %vm4510_vm14, %v7433_v59, %v7429_v63  ;;  %v12630_v56 = vpop.xlane.xlu0 %2537  ;;  %v7442_v45 = vrot.slane %v12626_v32, %v10396_v20  ;;  %v991_v63 = vld [vmem:[%s10301_s19 + $0x15b0] sm:$0xff] }
 0x57b   : > { %v12635_v62 = vsel %vm14431_vm11, %v7434_v0, %v12581_v60  ;;  %v7438_v59 = vrot.slane %v12630_v56, %v10390_v18  ;;  %vm14432_vm11 = vcmask 851712  }
 0x57c   : > { %2679 = vadd.xlane.f32.xlu1 %v976_v33 }
 0x57d   : > { %2677 = vadd.xlane.f32.xlu0 %v975_v10  ;;  %v12637_v11 = vpop.xlane.xlu1 %2543  ;;  %v7443_v33 = vsel %vm4412_vm0, %v7442_v45, %v7438_v59  ;;  %v997_v59 = vld [vmem:[%s10301_s19 + $0x15e0] sm:$0xff] }
 0x57e   : > { %v10024_v49 = vpop.f32.mrf.mxu0  ;;  %v2542_v14 = vpop.xlane.xlu0 %2541  ;;  %v7452_v0 = vrot.slane %v12637_v11, %v10393_v19 }
 0x57f   : > { %v9673_v37 = vadd.f32 %v10116_v8, %v10024_v49  ;;  %v7447_v17 = vrot.slane %v2542_v14, %v10399_v21  ;;  %v994_v14 = vld [vmem:[%s10301_s19 + $0x15c8] sm:$0xff] }
 0x580   : > { %v9667_v28 = vpop.f32.mrf.mxu0  ;;  %2683 = vadd.xlane.f32.xlu1 %v978_v12 }
 0x581   : > { %v9668_v60 = vadd.f32 %v10116_v8, %v9667_v28  ;;  %2681 = vadd.xlane.f32.xlu0 %v977_v3  ;;  %v12644_v2 = vpop.xlane.xlu1 %2547  ;;  %v9699_v29 = vmax.f32 %v9673_v37, 0.0  ;;  %v7448_v32 = vsel %vm4419_vm1, %v7447_v17, %v7443_v33  ;;  %v993_v8 = vld [vmem:[%s10301_s19 + $0x15c0] sm:$0xff] }
 0x582   : > { %v2546_v50 = vpop.xlane.xlu0 %2545  ;;  %v7462_v37 = vrot.slane %v12644_v2, %v10404_v26  ;;  %v7453_v11 = vsel %vm4426_vm2, %v7452_v0, %v7448_v32  ;;  %v996_v2 = vld [vmem:[%s10301_s19 + $0x15d8] sm:$0xff] }
 0x583   : > { %v9698_v1 = vmax.f32 %v9668_v60, 0.0  ;;  %v7457_v10 = vrot.slane %v2546_v50, %v10407_v27 }
 0x584   : > { %2687 = vadd.xlane.f32.xlu1 %v980_v43 }
 0x585   : > { %10066 = vmatprep.mubr.f32.mxu1 %v9698_v1  ;;  %2685 = vadd.xlane.f32.xlu0 %v979_v61  ;;  %v12648_v39 = vpop.xlane.xlu1 %2551  ;;  %v7458_v60 = vsel %vm4433_vm3, %v7457_v10, %v7453_v11 }
 0x586   : > { %10067 = vmatmul.mubr.f32.gmra.mxu1 %v9699_v29  ;;  %v12651_v38 = vpop.xlane.xlu0 %2549 }
 0x587   : > { %v7467_v43 = vrot.slane %v12651_v38, %v10420_v40 }
 0x588   : > { %2691 = vadd.xlane.f32.xlu1 %v982_v4 }
 0x589   : > { %2689 = vadd.xlane.f32.xlu0 %v981_v51  ;;  %v12654_v30 = vpop.xlane.xlu1 %2555  ;;  %v995_v51 = vld [vmem:[%s10301_s19 + $0x15d0] sm:$0xff] }
 0x58a   : > { %v12657_v55 = vpop.xlane.xlu0 %2553  ;;  %v7482_v17 = vrot.slane %v12654_v30, %v10435_v53  ;;  %v1000_v30 = vld [vmem:[%s10301_s19 + $0x15f8] sm:$0xff] }
 0x58c   : > { %2695 = vadd.xlane.f32.xlu1 %v984_v22  ;;  %v7472_v22 = vrot.slane %v12648_v39, %v10428_v46  ;;  %v998_v39 = vld [vmem:[%s10301_s19 + $0x15e8] sm:$0xff] }
 0x58d   : > { %2693 = vadd.xlane.f32.xlu0 %v983_v13  ;;  %v12660_v48 = vpop.xlane.xlu1 %2559  ;;  %v7463_v13 = vsel %vm4440_vm4, %v7462_v37, %v7458_v60 }
 0x58e   : > { %v12663_v41 = vpop.xlane.xlu0 %2557 }
 0x590   : > { %2699 = vadd.xlane.f32.xlu1 %v986_v44  ;;  %v7468_v44 = vsel %vm4447_vm5, %v7467_v43, %v7463_v13  ;;  %v1001_v43 = vld [vmem:[%s10301_s19 + $0x1600] sm:$0xff] }
 0x591   : > { %2697 = vadd.xlane.f32.xlu0 %v985_v9  ;;  %v12666_v42 = vpop.xlane.xlu1 %2563  ;;  %v7477_v9 = vrot.slane %v12657_v55, %v10438_v54 }
 0x592   : > { %v12669_v52 = vpop.xlane.xlu0 %2561 }
 0x594   : > { %2703 = vadd.xlane.f32.xlu1 %v988_v47 }
 0x595   : > { %2701 = vadd.xlane.f32.xlu0 %v987_v57  ;;  %v12672_v34 = vpop.xlane.xlu1 %2567 }
 0x596   : > { %v12675_v36 = vpop.xlane.xlu0 %2565 }
 0x598   : > { %2707 = vadd.xlane.f32.xlu1 %v990_v23 }
 0x599   : > { %2705 = vadd.xlane.f32.xlu0 %v989_v58  ;;  %v2572_v24 = vpop.xlane.xlu1 %2571 }
 0x59a   : > { %v2570_v25 = vpop.xlane.xlu0 %2569  ;;  %v7521_v56 = vrot.slane %v2572_v24, %v10396_v20  ;;  %v7473_v24 = vsel %vm4454_vm6, %v7472_v22, %v7468_v44  ;;  %v7512_v44 = vrot.slane %v12672_v34, %v10479_v5 }
 0x59b   : > { %v7517_v12 = vrot.slane %v2570_v25, %v10390_v18  ;;  %v7487_v25 = vrot.slane %v12663_v41, %v10456_v7 }
 0x59c   : > { %2711 = vadd.xlane.f32.xlu1 %v992_v31  ;;  %v7478_v31 = vsel %vm4461_vm7, %v7477_v9, %v7473_v24 }
 0x59d   : > { %2709 = vadd.xlane.f32.xlu0 %v991_v63  ;;  %v2576_v49 = vpop.xlane.xlu1 %2575  ;;  %v7522_v50 = vsel %vm4412_vm0, %v7521_v56, %v7517_v12  ;;  %v999_v56 = vld [vmem:[%s10301_s19 + $0x15f0] sm:$0xff]  ;;  %v7492_v12 = vrot.slane %v12660_v48, %v10453_v6  ;;  %v1002_v48 = vld [vmem:[%s10301_s19 + $0x1608] sm:$0xff] }
 0x59e   : > { %v2574_v3 = vpop.xlane.xlu0 %2573  ;;  %v7531_v61 = vrot.slane %v2576_v49, %v10393_v19  ;;  %v7483_v49 = vsel %vm4468_vm8, %v7482_v17, %v7478_v31  ;;  %v1005_v17 = vld [vmem:[%s10301_s19 + $0x1620] sm:$0xff] }
 0x59f   : > { %v7526_v28 = vrot.slane %v2574_v3, %v10399_v21  ;;  %v7497_v3 = vrot.slane %v12669_v52, %v10466_v16 }
 0x5a0   : > { %2715 = vadd.xlane.f32.xlu1 %v994_v14  ;;  %v7488_v14 = vsel %vm4475_vm9, %v7487_v25, %v7483_v49 }
 0x5a1   : > { %v7527_v1 = vsel %vm4419_vm1, %v7526_v28, %v7522_v50  ;;  %2713 = vadd.xlane.f32.xlu0 %v993_v8  ;;  %v2580_v29 = vpop.xlane.xlu1 %2579  ;;  %v7502_v50 = vrot.slane %v12666_v42, %v10463_v15  ;;  %v1004_v42 = vld [vmem:[%s10301_s19 + $0x1618] sm:$0xff] }
 0x5a2   : > { %v2578_v4 = vpop.xlane.xlu0 %2577  ;;  %v7541_v47 = vrot.slane %v2580_v29, %v10404_v26  ;;  %v7532_v57 = vsel %vm4426_vm2, %v7531_v61, %v7527_v1  ;;  %v7493_v61 = vsel %vm4482_vm10, %v7492_v12, %v7488_v14  ;;  %v7507_v29 = vrot.slane %v12675_v36, %v10482_v35 }
 0x5a3   : > { %v7536_v38 = vrot.slane %v2578_v4, %v10407_v27  ;;  %v7498_v1 = vsel %vm14432_vm11, %v7497_v3, %v7493_v61 }
 0x5a4   : > { %2719 = vadd.xlane.f32.xlu1 %v996_v2  ;;  %v7503_v9 = vsel %vm4496_vm12, %v7502_v50, %v7498_v1  ;;  %v1012_v50 = vld [vmem:[%s10301_s19 + $0x1658] sm:$0xff] }
 0x5a5   : > { %v7537_v23 = vsel %vm4433_vm3, %v7536_v38, %v7532_v57  ;;  %2717 = vadd.xlane.f32.xlu0 %v995_v51  ;;  %v2584_v58 = vpop.xlane.xlu1 %2583  ;;  %v1003_v38 = vld [vmem:[%s10301_s19 + $0x1610] sm:$0xff] }
 0x5a6   : > { %v2582_v45 = vpop.xlane.xlu0 %2581  ;;  %v7551_v63 = vrot.slane %v2584_v58, %v10428_v46  ;;  %v7542_v33 = vsel %vm4440_vm4, %v7541_v47, %v7537_v23  ;;  %v7508_v47 = vsel %vm4503_vm13, %v7507_v29, %v7503_v9  ;;  %v1011_v29 = vld [vmem:[%s10301_s19 + $0x1650] sm:$0xff] }
 0x5a7   : > { %v7546_v55 = vrot.slane %v2582_v45, %v10420_v40  ;;  %v1006_v45 = vld [vmem:[%s10301_s19 + $0x1628] sm:$0xff]  ;;  %v7513_v24 = vsel %vm4510_vm14, %v7512_v44, %v7508_v47  ;;  %v1013_v44 = vld [vmem:[%s10301_s19 + $0x1660] sm:$0xff] }
 0x5a8   : > { %2723 = vadd.xlane.f32.xlu1 %v998_v39  ;;  %v9529_v12 = vsel %vm9499_vm15, %v7513_v24, %v12635_v62  ;;  %v1018_v24 = vld [vmem:[%s10301_s19 + $0x1688] sm:$0xff] }
 0x5a9   : > { %v7547_v0 = vsel %vm4447_vm5, %v7546_v55, %v7542_v33  ;;  %2721 = vadd.xlane.f32.xlu0 %v997_v59  ;;  %v2588_v32 = vpop.xlane.xlu1 %2587  ;;  %v1008_v33 = vld [vmem:[%s10301_s19 + $0x1638] sm:$0xff] }
 0x5aa   : > { %v2586_v10 = vpop.xlane.xlu0 %2585  ;;  %v7561_v8 = vrot.slane %v2588_v32, %v10435_v53  ;;  %v7552_v37 = vsel %vm4454_vm6, %v7551_v63, %v7547_v0  ;;  %v3373_v0 = vld [vmem:[%s10884_s14 + $0x20] sm:$0xff] }
 0x5ab   : > { %v7556_v41 = vrot.slane %v2586_v10, %v10438_v54  ;;  %v1007_v10 = vld [vmem:[%s10301_s19 + $0x1630] sm:$0xff] }
 0x5ac   : > { %2727 = vadd.xlane.f32.xlu1 %v1000_v30 }
 0x5ad   : > { %v7557_v11 = vsel %vm4461_vm7, %v7556_v41, %v7552_v37  ;;  %2725 = vadd.xlane.f32.xlu0 %v999_v56  ;;  %v2592_v28 = vpop.xlane.xlu1 %2591  ;;  %v1010_v37 = vld [vmem:[%s10301_s19 + $0x1648] sm:$0xff] }
 0x5ae   : > { %v2590_v60 = vpop.xlane.xlu0 %2589  ;;  %v7571_v2 = vrot.slane %v2592_v28, %v10453_v6  ;;  %v7562_v4 = vsel %vm4468_vm8, %v7561_v8, %v7557_v11 }
 0x5af   : > { %v7566_v52 = vrot.slane %v2590_v60, %v10456_v7 }
 0x5b0   : > { %2731 = vadd.xlane.f32.xlu1 %v1002_v48  ;;  %v1009_v48 = vld [vmem:[%s10301_s19 + $0x1640] sm:$0xff] }
 0x5b1   : > { %v7567_v51 = vsel %vm4475_vm9, %v7566_v52, %v7562_v4  ;;  %2729 = vadd.xlane.f32.xlu0 %v1001_v43  ;;  %v2596_v22 = vpop.xlane.xlu1 %2595 }
 0x5b2   : > { %v2594_v13 = vpop.xlane.xlu0 %2593  ;;  %v7581_v57 = vrot.slane %v2596_v22, %v10463_v15  ;;  %v7572_v23 = vsel %vm4482_vm10, %v7571_v2, %v7567_v51  ;;  %v1014_v22 = vld [vmem:[%s10301_s19 + $0x1668] sm:$0xff] }
 0x5b3   : > { %v7576_v36 = vrot.slane %v2594_v13, %v10466_v16 }
 0x5b4   : > { %2735 = vadd.xlane.f32.xlu1 %v1004_v42 }
 0x5b5   : > { %v7577_v58 = vsel %vm14432_vm11, %v7576_v36, %v7572_v23  ;;  %2733 = vadd.xlane.f32.xlu0 %v1003_v38  ;;  %v2600_v39 = vpop.xlane.xlu1 %2599  ;;  %vm14433_vm11 = vcmask 1047559  }
 0x5b6   : > { %v7591_v34 = vrot.slane %v2600_v39, %v10479_v5  ;;  %v2598_v59 = vpop.xlane.xlu0 %2597  ;;  %v7582_v31 = vsel %vm4496_vm12, %v7581_v57, %v7577_v58  ;;  %v1016_v57 = vld [vmem:[%s10301_s19 + $0x1678] sm:$0xff] }
 0x5b7   : > { %v7586_v55 = vrot.slane %v2598_v59, %v10482_v35 }
 0x5b8   : > { %2739 = vadd.xlane.f32.xlu1 %v1006_v45  ;;  %v1015_v45 = vld [vmem:[%s10301_s19 + $0x1670] sm:$0xff] }
 0x5b9   : > { %v7587_v25 = vsel %vm4503_vm13, %v7586_v55, %v7582_v31  ;;  %2737 = vadd.xlane.f32.xlu0 %v1005_v17  ;;  %v2604_v63 = vpop.xlane.xlu1 %2603 }
 0x5ba   : > { %v7600_v32 = vrot.slane %v2604_v63, %v10396_v20  ;;  %v2602_v30 = vpop.xlane.xlu0 %2601  ;;  %v7592_v56 = vsel %vm4510_vm14, %v7591_v34, %v7587_v25  ;;  %v1017_v63 = vld [vmem:[%s10301_s19 + $0x1680] sm:$0xff] }
 0x5bb   : > { %v7596_v49 = vrot.slane %v2602_v30, %v10390_v18  ;;  %v9530_v41 = vsel %vm14433_vm11, %v7592_v56, %v9529_v12  ;;  %v1020_v30 = vld [vmem:[%s10301_s19 + $0x1698] sm:$0xff]  ;;  %vm14434_vm11 = vcmask 851712  }
 0x5bc   : > { %2743 = vadd.xlane.f32.xlu1 %v1008_v33  ;;  %v9564_v14 = vmul.f32 %v9530_v41, %v3373_v0 }
 0x5bd   : > { %v7601_v3 = vsel %vm4412_vm0, %v7600_v32, %v7596_v49  ;;  %2741 = vadd.xlane.f32.xlu0 %v1007_v10  ;;  %v2608_v8 = vpop.xlane.xlu1 %2607  ;;  %v1019_v49 = vld [vmem:[%s10301_s19 + $0x1690] sm:$0xff] }
 0x5be   : > { %v7610_v11 = vrot.slane %v2608_v8, %v10393_v19  ;;  %10025 = vmatprep.mubr.f32.mxu0 %v9564_v14  ;;  %v2606_v28 = vpop.xlane.xlu0 %2605  ;;  %v1022_v8 = vld [vmem:[%s10301_s19 + $0x16a8] sm:$0xff] }
 0x5bf   : > { %v7605_v62 = vrot.slane %v2606_v28, %v10399_v21 }
 0x5c0   : > { %2747 = vadd.xlane.f32.xlu1 %v1010_v37 }
 0x5c1   : > { %v7606_v60 = vsel %vm4419_vm1, %v7605_v62, %v7601_v3  ;;  %2745 = vadd.xlane.f32.xlu0 %v1009_v48  ;;  %v2612_v43 = vpop.xlane.xlu1 %2611  ;;  %v1021_v48 = vld [vmem:[%s10301_s19 + $0x16a0] sm:$0xff] }
 0x5c2   : > { %v7620_v61 = vrot.slane %v2612_v43, %v10404_v26  ;;  %v7611_v52 = vsel %vm4426_vm2, %v7610_v11, %v7606_v60  ;;  %v2610_v1 = vpop.xlane.xlu0 %2609 }
 0x5c3   : > { %v7615_v2 = vrot.slane %v2610_v1, %v10407_v27 }
 0x5c4   : > { %2751 = vadd.xlane.f32.xlu1 %v1012_v50  ;;  %v1024_v50 = vld [vmem:[%s10301_s19 + $0x16b8] sm:$0xff] }
 0x5c5   : > { %v7616_v4 = vsel %vm4433_vm3, %v7615_v2, %v7611_v52  ;;  %2749 = vadd.xlane.f32.xlu0 %v1011_v29  ;;  %v2616_v51 = vpop.xlane.xlu1 %2615  ;;  %v1023_v29 = vld [vmem:[%s10301_s19 + $0x16b0] sm:$0xff] }
 0x5c6   : > { %v7630_v42 = vrot.slane %v2616_v51, %v10428_v46  ;;  %v7621_v13 = vsel %vm4440_vm4, %v7620_v61, %v7616_v4  ;;  %v2614_v38 = vpop.xlane.xlu0 %2613 }
 0x5c7   : > { %v7625_v9 = vrot.slane %v2614_v38, %v10420_v40  ;;  %v1025_v38 = vld [vmem:[%s10301_s19 + $0x16c0] sm:$0xff] }
 0x5c8   : > { %2755 = vadd.xlane.f32.xlu1 %v1014_v22  ;;  %v1026_v22 = vld [vmem:[%s10301_s19 + $0x16c8] sm:$0xff] }
 0x5c9   : > { %v7626_v36 = vsel %vm4447_vm5, %v7625_v9, %v7621_v13  ;;  %2753 = vadd.xlane.f32.xlu0 %v1013_v44  ;;  %v2620_v47 = vpop.xlane.xlu1 %2619 }
 0x5ca   : > { %v7640_v23 = vrot.slane %v2620_v47, %v10435_v53  ;;  %v7631_v58 = vsel %vm4454_vm6, %v7630_v42, %v7626_v36  ;;  %v2618_v39 = vpop.xlane.xlu0 %2617  ;;  %v1028_v47 = vld [vmem:[%s10301_s19 + $0x16d8] sm:$0xff] }
 0x5cb   : > { %v7635_v34 = vrot.slane %v2618_v39, %v10438_v54  ;;  %v1027_v39 = vld [vmem:[%s10301_s19 + $0x16d0] sm:$0xff] }
 0x5cc   : > { %2759 = vadd.xlane.f32.xlu1 %v1016_v57 }
 0x5cd   : > { %v7636_v59 = vsel %vm4461_vm7, %v7635_v34, %v7631_v58  ;;  %2757 = vadd.xlane.f32.xlu0 %v1015_v45  ;;  %v2624_v17 = vpop.xlane.xlu1 %2623 }
 0x5ce   : > { %v7650_v55 = vrot.slane %v2624_v17, %v10453_v6  ;;  %v7641_v31 = vsel %vm4468_vm8, %v7640_v23, %v7636_v59  ;;  %v2622_v25 = vpop.xlane.xlu0 %2621  ;;  %v1030_v17 = vld [vmem:[%s10301_s19 + $0x16e8] sm:$0xff] }
 0x5cf   : > { %v7645_v33 = vrot.slane %v2622_v25, %v10456_v7  ;;  %v1029_v25 = vld [vmem:[%s10301_s19 + $0x16e0] sm:$0xff] }
 0x5d0   : > { %2763 = vadd.xlane.f32.xlu1 %v1018_v24 }
 0x5d1   : > { %v7646_v0 = vsel %vm4475_vm9, %v7645_v33, %v7641_v31  ;;  %2761 = vadd.xlane.f32.xlu0 %v1017_v63  ;;  %v2628_v32 = vpop.xlane.xlu1 %2627 }
 0x5d2   : > { %v7660_v10 = vrot.slane %v2628_v32, %v10463_v15  ;;  %v7651_v56 = vsel %vm4482_vm10, %v7650_v55, %v7646_v0  ;;  %v2626_v12 = vpop.xlane.xlu0 %2625  ;;  %v1032_v32 = vld [vmem:[%s10301_s19 + $0x16f8] sm:$0xff] }
 0x5d3   : > { %v7655_v41 = vrot.slane %v2626_v12, %v10466_v16  ;;  %v1031_v12 = vld [vmem:[%s10301_s19 + $0x16f0] sm:$0xff] }
 0x5d4   : > { %2767 = vadd.xlane.f32.xlu1 %v1020_v30 }
 0x5d5   : > { %v7656_v14 = vsel %vm14434_vm11, %v7655_v41, %v7651_v56  ;;  %2765 = vadd.xlane.f32.xlu0 %v1019_v49  ;;  %v2632_v3 = vpop.xlane.xlu1 %2631 }
 0x5d6   : > { %v7670_v37 = vrot.slane %v2632_v3, %v10479_v5  ;;  %v7661_v11 = vsel %vm4496_vm12, %v7660_v10, %v7656_v14  ;;  %v2630_v28 = vpop.xlane.xlu0 %2629  ;;  %v1034_v3 = vld [vmem:[%s10301_s19 + $0x1708] sm:$0xff] }
 0x5d7   : > { %v7665_v62 = vrot.slane %v2630_v28, %v10482_v35  ;;  %v1033_v28 = vld [vmem:[%s10301_s19 + $0x1700] sm:$0xff] }
 0x5d8   : > { %2771 = vadd.xlane.f32.xlu1 %v1022_v8 }
 0x5d9   : > { %v7666_v60 = vsel %vm4503_vm13, %v7665_v62, %v7661_v11  ;;  %2769 = vadd.xlane.f32.xlu0 %v1021_v48  ;;  %v2636_v43 = vpop.xlane.xlu1 %2635 }
 0x5da   : > { %v12822_v61 = vsel %vm4510_vm14, %v7670_v37, %v7666_v60  ;;  %v7679_v52 = vrot.slane %v2636_v43, %v10396_v20  ;;  %v2634_v1 = vpop.xlane.xlu0 %2633  ;;  %v1036_v43 = vld [vmem:[%s10301_s19 + $0x1718] sm:$0xff] }
 0x5db   : > { %v7675_v2 = vrot.slane %v2634_v1, %v10390_v18 }
 0x5dc   : > { %2775 = vadd.xlane.f32.xlu1 %v1024_v50 }
 0x5dd   : > { %v7680_v4 = vsel %vm4412_vm0, %v7679_v52, %v7675_v2  ;;  %2773 = vadd.xlane.f32.xlu0 %v1023_v29  ;;  %v2640_v51 = vpop.xlane.xlu1 %2639  ;;  %v1035_v29 = vld [vmem:[%s10301_s19 + $0x1710] sm:$0xff] }
 0x5de   : > { %v7689_v42 = vrot.slane %v2640_v51, %v10393_v19  ;;  %v2638_v13 = vpop.xlane.xlu0 %2637 }
 0x5df   : > { %v7684_v44 = vrot.slane %v2638_v13, %v10399_v21 }
 0x5e0   : > { %2779 = vadd.xlane.f32.xlu1 %v1026_v22  ;;  %v1038_v22 = vld [vmem:[%s10301_s19 + $0x1728] sm:$0xff] }
 0x5e1   : > { %v7685_v9 = vsel %vm4419_vm1, %v7684_v44, %v7680_v4  ;;  %2777 = vadd.xlane.f32.xlu0 %v1025_v38  ;;  %v2644_v36 = vpop.xlane.xlu1 %2643  ;;  %v1037_v44 = vld [vmem:[%s10301_s19 + $0x1720] sm:$0xff] }
 0x5e2   : > { %v7699_v57 = vrot.slane %v2644_v36, %v10404_v26  ;;  %v7690_v23 = vsel %vm4426_vm2, %v7689_v42, %v7685_v9  ;;  %v2642_v58 = vpop.xlane.xlu0 %2641 }
 0x5e3   : > { %v7694_v45 = vrot.slane %v2642_v58, %v10407_v27 }
 0x5e4   : > { %2783 = vadd.xlane.f32.xlu1 %v1028_v47 }
 0x5e5   : > { %v7695_v34 = vsel %vm4433_vm3, %v7694_v45, %v7690_v23  ;;  %2781 = vadd.xlane.f32.xlu0 %v1027_v39  ;;  %v2648_v59 = vpop.xlane.xlu1 %2647  ;;  %v1039_v45 = vld [vmem:[%s10301_s19 + $0x1730] sm:$0xff] }
 0x5e6   : > { %v7709_v24 = vrot.slane %v2648_v59, %v10428_v46  ;;  %v7700_v55 = vsel %vm4440_vm4, %v7699_v57, %v7695_v34  ;;  %v2646_v31 = vpop.xlane.xlu0 %2645  ;;  %v1040_v57 = vld [vmem:[%s10301_s19 + $0x1738] sm:$0xff] }
 0x5e7   : > { %v7704_v63 = vrot.slane %v2646_v31, %v10420_v40 }
 0x5e8   : > { %2787 = vadd.xlane.f32.xlu1 %v1030_v17 }
 0x5e9   : > { %v7705_v33 = vsel %vm4447_vm5, %v7704_v63, %v7700_v55  ;;  %2785 = vadd.xlane.f32.xlu0 %v1029_v25  ;;  %v2652_v0 = vpop.xlane.xlu1 %2651  ;;  %v1042_v55 = vld [vmem:[%s10301_s19 + $0x1748] sm:$0xff]  ;;  %v1041_v63 = vld [vmem:[%s10301_s19 + $0x1740] sm:$0xff] }
 0x5ea   : > { %v7719_v30 = vrot.slane %v2652_v0, %v10435_v53  ;;  %v7710_v10 = vsel %vm4454_vm6, %v7709_v24, %v7705_v33  ;;  %v2650_v56 = vpop.xlane.xlu0 %2649 }
 0x5eb   : > { %v7714_v49 = vrot.slane %v2650_v56, %v10438_v54 }
 0x5ec   : > { %2791 = vadd.xlane.f32.xlu1 %v1032_v32  ;;  %v1044_v32 = vld [vmem:[%s10301_s19 + $0x1758] sm:$0xff] }
 0x5ed   : > { %v7715_v41 = vsel %vm4461_vm7, %v7714_v49, %v7710_v10  ;;  %2789 = vadd.xlane.f32.xlu0 %v1031_v12  ;;  %v2656_v14 = vpop.xlane.xlu1 %2655  ;;  %v1043_v12 = vld [vmem:[%s10301_s19 + $0x1750] sm:$0xff] }
 0x5ee   : > { %v7729_v8 = vrot.slane %v2656_v14, %v10453_v6  ;;  %v7720_v37 = vsel %vm4468_vm8, %v7719_v30, %v7715_v41  ;;  %v2654_v11 = vpop.xlane.xlu0 %2653 }
 0x5ef   : > { %v7724_v48 = vrot.slane %v2654_v11, %v10456_v7 }
 0x5f0   : > { %2795 = vadd.xlane.f32.xlu1 %v1034_v3  ;;  %v1046_v3 = vld [vmem:[%s10301_s19 + $0x1768] sm:$0xff] }
 0x5f1   : > { %v7725_v62 = vsel %vm4475_vm9, %v7724_v48, %v7720_v37  ;;  %2793 = vadd.xlane.f32.xlu0 %v1033_v28  ;;  %v2660_v60 = vpop.xlane.xlu1 %2659  ;;  %v1045_v28 = vld [vmem:[%s10301_s19 + $0x1760] sm:$0xff] }
 0x5f2   : > { %v7739_v50 = vrot.slane %v2660_v60, %v10463_v15  ;;  %v7730_v52 = vsel %vm4482_vm10, %v7729_v8, %v7725_v62  ;;  %v2658_v1 = vpop.xlane.xlu0 %2657 }
 0x5f3   : > { %v7734_v2 = vrot.slane %v2658_v1, %v10466_v16 }
 0x5f4   : > { %2799 = vadd.xlane.f32.xlu1 %v1036_v43  ;;  %v1048_v43 = vld [vmem:[%s10301_s19 + $0x1778] sm:$0xff] }
 0x5f5   : > { %v7735_v4 = vsel %vm14434_vm11, %v7734_v2, %v7730_v52  ;;  %2797 = vadd.xlane.f32.xlu0 %v1035_v29  ;;  %v2664_v51 = vpop.xlane.xlu1 %2663  ;;  %vm14435_vm11 = vcmask 1041409   ;;  %v1047_v29 = vld [vmem:[%s10301_s19 + $0x1770] sm:$0xff] }
 0x5f6   : > { %v7749_v42 = vrot.slane %v2664_v51, %v10479_v5  ;;  %v7740_v13 = vsel %vm4496_vm12, %v7739_v50, %v7735_v4  ;;  %v2662_v38 = vpop.xlane.xlu0 %2661 }
 0x5f7   : > { %v7744_v9 = vrot.slane %v2662_v38, %v10482_v35 }
 0x5f8   : > { %2803 = vadd.xlane.f32.xlu1 %v1038_v22  ;;  %v1050_v22 = vld [vmem:[%s10301_s19 + $0x1788] sm:$0xff] }
 0x5f9   : > { %v7745_v36 = vsel %vm4503_vm13, %v7744_v9, %v7740_v13  ;;  %2801 = vadd.xlane.f32.xlu0 %v1037_v44  ;;  %v2668_v47 = vpop.xlane.xlu1 %2667  ;;  %v1049_v44 = vld [vmem:[%s10301_s19 + $0x1780] sm:$0xff] }
 0x5fa   : > { %v7750_v23 = vsel %vm4510_vm14, %v7749_v42, %v7745_v36  ;;  %v7758_v58 = vrot.slane %v2668_v47, %v10396_v20  ;;  %v2666_v39 = vpop.xlane.xlu0 %2665 }
 0x5fb   : > { %v12875_v34 = vsel %vm14435_vm11, %v7750_v23, %v12822_v61  ;;  %v7754_v59 = vrot.slane %v2666_v39, %v10390_v18  ;;  %vm14436_vm11 = vcmask 851712  }
 0x5fc   : > { %2807 = vadd.xlane.f32.xlu1 %v1040_v57  ;;  %v1052_v57 = vld [vmem:[%s10301_s19 + $0x1798] sm:$0xff] }
 0x5fd   : > { %v7759_v17 = vsel %vm4412_vm0, %v7758_v58, %v7754_v59  ;;  %2805 = vadd.xlane.f32.xlu0 %v1039_v45  ;;  %v2672_v24 = vpop.xlane.xlu1 %2671  ;;  %v1051_v45 = vld [vmem:[%s10301_s19 + $0x1790] sm:$0xff] }
 0x5fe   : > { %v7768_v31 = vrot.slane %v2672_v24, %v10393_v19  ;;  %v2670_v25 = vpop.xlane.xlu0 %2669 }
 0x5ff   : > { %v7763_v33 = vrot.slane %v2670_v25, %v10399_v21 }
 0x600   : > { %2811 = vadd.xlane.f32.xlu1 %v1042_v55  ;;  %v1054_v55 = vld [vmem:[%s10301_s19 + $0x17a8] sm:$0xff] }
 0x601   : > { %v7764_v61 = vsel %vm4419_vm1, %v7763_v33, %v7759_v17  ;;  %2809 = vadd.xlane.f32.xlu0 %v1041_v63  ;;  %v2676_v0 = vpop.xlane.xlu1 %2675  ;;  %v1053_v33 = vld [vmem:[%s10301_s19 + $0x17a0] sm:$0xff] }
 0x602   : > { %v7778_v30 = vrot.slane %v2676_v0, %v10404_v26  ;;  %v7769_v10 = vsel %vm4426_vm2, %v7768_v31, %v7764_v61  ;;  %v2674_v56 = vpop.xlane.xlu0 %2673 }
 0x603   : > { %v7773_v49 = vrot.slane %v2674_v56, %v10407_v27 }
 0x604   : > { %2815 = vadd.xlane.f32.xlu1 %v1044_v32 }
 0x605   : > { %v7774_v41 = vsel %vm4433_vm3, %v7773_v49, %v7769_v10  ;;  %2813 = vadd.xlane.f32.xlu0 %v1043_v12  ;;  %v2680_v14 = vpop.xlane.xlu1 %2679  ;;  %v1055_v49 = vld [vmem:[%s10301_s19 + $0x17b0] sm:$0xff] }
 0x606   : > { %v7788_v8 = vrot.slane %v2680_v14, %v10428_v46  ;;  %v7779_v37 = vsel %vm4440_vm4, %v7778_v30, %v7774_v41  ;;  %v2678_v11 = vpop.xlane.xlu0 %2677  ;;  %v1056_v30 = vld [vmem:[%s10301_s19 + $0x17b8] sm:$0xff] }
 0x607   : > { %v7783_v48 = vrot.slane %v2678_v11, %v10420_v40 }
 0x608   : > { %2819 = vadd.xlane.f32.xlu1 %v1046_v3 }
 0x609   : > { %v7784_v62 = vsel %vm4447_vm5, %v7783_v48, %v7779_v37  ;;  %2817 = vadd.xlane.f32.xlu0 %v1045_v28  ;;  %v2684_v60 = vpop.xlane.xlu1 %2683  ;;  %v1058_v37 = vld [vmem:[%s10301_s19 + $0x17c8] sm:$0xff]  ;;  %v1057_v48 = vld [vmem:[%s10301_s19 + $0x17c0] sm:$0xff] }
 0x60a   : > { %v7798_v50 = vrot.slane %v2684_v60, %v10435_v53  ;;  %v7789_v52 = vsel %vm4454_vm6, %v7788_v8, %v7784_v62  ;;  %v2682_v1 = vpop.xlane.xlu0 %2681 }
 0x60b   : > { %v7793_v2 = vrot.slane %v2682_v1, %v10438_v54 }
 0x60c   : > { %2823 = vadd.xlane.f32.xlu1 %v1048_v43  ;;  %v1060_v43 = vld [vmem:[%s10301_s19 + $0x17d8] sm:$0xff] }
 0x60d   : > { %v7794_v4 = vsel %vm4461_vm7, %v7793_v2, %v7789_v52  ;;  %2821 = vadd.xlane.f32.xlu0 %v1047_v29  ;;  %v2688_v51 = vpop.xlane.xlu1 %2687  ;;  %v1059_v29 = vld [vmem:[%s10301_s19 + $0x17d0] sm:$0xff] }
 0x60e   : > { %v7808_v42 = vrot.slane %v2688_v51, %v10453_v6  ;;  %v7799_v13 = vsel %vm4468_vm8, %v7798_v50, %v7794_v4  ;;  %v2686_v38 = vpop.xlane.xlu0 %2685 }
 0x60f   : > { %v7803_v9 = vrot.slane %v2686_v38, %v10456_v7 }
 0x610   : > { %2827 = vadd.xlane.f32.xlu1 %v1050_v22  ;;  %v1062_v22 = vld [vmem:[%s10301_s19 + $0x17e8] sm:$0xff] }
 0x611   : > { %v7804_v36 = vsel %vm4475_vm9, %v7803_v9, %v7799_v13  ;;  %2825 = vadd.xlane.f32.xlu0 %v1049_v44  ;;  %v2692_v47 = vpop.xlane.xlu1 %2691  ;;  %v1061_v44 = vld [vmem:[%s10301_s19 + $0x17e0] sm:$0xff] }
 0x612   : > { %v7818_v23 = vrot.slane %v2692_v47, %v10463_v15  ;;  %v7809_v58 = vsel %vm4482_vm10, %v7808_v42, %v7804_v36  ;;  %v2690_v39 = vpop.xlane.xlu0 %2689 }
 0x613   : > { %v7813_v59 = vrot.slane %v2690_v39, %v10466_v16 }
 0x614   : > { %2831 = vadd.xlane.f32.xlu1 %v1052_v57  ;;  %v1064_v57 = vld [vmem:[%s10301_s19 + $0x17f8] sm:$0xff] }
 0x615   : > { %v7814_v17 = vsel %vm14436_vm11, %v7813_v59, %v7809_v58  ;;  %2829 = vadd.xlane.f32.xlu0 %v1051_v45  ;;  %v2696_v24 = vpop.xlane.xlu1 %2695  ;;  %vm14437_vm11 = vcmask 1042434   ;;  %v1063_v45 = vld [vmem:[%s10301_s19 + $0x17f0] sm:$0xff] }
 0x616   : > { %v7828_v31 = vrot.slane %v2696_v24, %v10479_v5  ;;  %v7819_v25 = vsel %vm4496_vm12, %v7818_v23, %v7814_v17  ;;  %v2694_v63 = vpop.xlane.xlu0 %2693 }
 0x617   : > { %v7823_v61 = vrot.slane %v2694_v63, %v10482_v35 }
 0x618   : > { %2835 = vadd.xlane.f32.xlu1 %v1054_v55  ;;  %v1066_v55 = vld [vmem:[%s10301_s19 + $0x1808] sm:$0xff] }
 0x619   : > { %v7824_v0 = vsel %vm4503_vm13, %v7823_v61, %v7819_v25  ;;  %2833 = vadd.xlane.f32.xlu0 %v1053_v33  ;;  %v2700_v32 = vpop.xlane.xlu1 %2699  ;;  %v1065_v33 = vld [vmem:[%s10301_s19 + $0x1800] sm:$0xff] }
 0x61a   : > { %v7829_v10 = vsel %vm4510_vm14, %v7828_v31, %v7824_v0  ;;  %v7837_v56 = vrot.slane %v2700_v32, %v10396_v20  ;;  %v2698_v12 = vpop.xlane.xlu0 %2697 }
 0x61b   : > { %v12926_v41 = vsel %vm14437_vm11, %v7829_v10, %v12875_v34  ;;  %v7833_v14 = vrot.slane %v2698_v12, %v10390_v18  ;;  %vm14438_vm11 = vcmask 851712  }
 0x61c   : > { %2839 = vadd.xlane.f32.xlu1 %v1056_v30  ;;  %v1068_v30 = vld [vmem:[%s10301_s19 + $0x1818] sm:$0xff] }
 0x61d   : > { %v7838_v3 = vsel %vm4412_vm0, %v7837_v56, %v7833_v14  ;;  %2837 = vadd.xlane.f32.xlu0 %v1055_v49  ;;  %v2704_v8 = vpop.xlane.xlu1 %2703  ;;  %v1067_v49 = vld [vmem:[%s10301_s19 + $0x1810] sm:$0xff] }
 0x61e   : > { %v7847_v11 = vrot.slane %v2704_v8, %v10393_v19  ;;  %v2702_v28 = vpop.xlane.xlu0 %2701 }
 0x61f   : > { %v7842_v62 = vrot.slane %v2702_v28, %v10399_v21 }
 0x620   : > { %2843 = vadd.xlane.f32.xlu1 %v1058_v37  ;;  %v1070_v37 = vld [vmem:[%s10301_s19 + $0x1828] sm:$0xff] }
 0x621   : > { %v7843_v34 = vsel %vm4419_vm1, %v7842_v62, %v7838_v3  ;;  %2841 = vadd.xlane.f32.xlu0 %v1057_v48  ;;  %v2708_v60 = vpop.xlane.xlu1 %2707  ;;  %v1069_v62 = vld [vmem:[%s10301_s19 + $0x1820] sm:$0xff] }
 0x622   : > { %v7857_v50 = vrot.slane %v2708_v60, %v10404_v26  ;;  %v7848_v52 = vsel %vm4426_vm2, %v7847_v11, %v7843_v34  ;;  %v2706_v1 = vpop.xlane.xlu0 %2705 }
 0x623   : > { %v7852_v2 = vrot.slane %v2706_v1, %v10407_v27 }
 0x624   : > { %2847 = vadd.xlane.f32.xlu1 %v1060_v43 }
 0x625   : > { %v7853_v4 = vsel %vm4433_vm3, %v7852_v2, %v7848_v52  ;;  %2845 = vadd.xlane.f32.xlu0 %v1059_v29  ;;  %v2712_v51 = vpop.xlane.xlu1 %2711  ;;  %v1071_v2 = vld [vmem:[%s10301_s19 + $0x1830] sm:$0xff] }
 0x626   : > { %v7867_v42 = vrot.slane %v2712_v51, %v10428_v46  ;;  %v7858_v13 = vsel %vm4440_vm4, %v7857_v50, %v7853_v4  ;;  %v2710_v38 = vpop.xlane.xlu0 %2709  ;;  %v1072_v50 = vld [vmem:[%s10301_s19 + $0x1838] sm:$0xff] }
 0x627   : > { %v7862_v9 = vrot.slane %v2710_v38, %v10420_v40 }
 0x628   : > { %2851 = vadd.xlane.f32.xlu1 %v1062_v22 }
 0x629   : > { %v7863_v36 = vsel %vm4447_vm5, %v7862_v9, %v7858_v13  ;;  %2849 = vadd.xlane.f32.xlu0 %v1061_v44  ;;  %v2716_v47 = vpop.xlane.xlu1 %2715  ;;  %v1081_v13 = vld [vmem:[%s10301_s19 + $0x1880] sm:$0xff] }
 0x62a   : > { %v7877_v23 = vrot.slane %v2716_v47, %v10435_v53  ;;  %v7868_v58 = vsel %vm4454_vm6, %v7867_v42, %v7863_v36  ;;  %v2714_v39 = vpop.xlane.xlu0 %2713  ;;  %v1073_v9 = vld [vmem:[%s10301_s19 + $0x1840] sm:$0xff] }
 0x62b   : > { %v7872_v59 = vrot.slane %v2714_v39, %v10438_v54 }
 0x62c   : > { %2855 = vadd.xlane.f32.xlu1 %v1064_v57  ;;  %v1083_v57 = vld [vmem:[%s10301_s19 + $0x1890] sm:$0xff] }
 0x62d   : > { %v7873_v17 = vsel %vm4461_vm7, %v7872_v59, %v7868_v58  ;;  %2853 = vadd.xlane.f32.xlu0 %v1063_v45  ;;  %v2720_v24 = vpop.xlane.xlu1 %2719  ;;  %v1082_v45 = vld [vmem:[%s10301_s19 + $0x1888] sm:$0xff] }
 0x62e   : > { %v7887_v31 = vrot.slane %v2720_v24, %v10453_v6  ;;  %v7878_v25 = vsel %vm4468_vm8, %v7877_v23, %v7873_v17  ;;  %v2718_v63 = vpop.xlane.xlu0 %2717 }
 0x62f   : > { %v7882_v61 = vrot.slane %v2718_v63, %v10456_v7 }
 0x630   : > { %2859 = vadd.xlane.f32.xlu1 %v1066_v55  ;;  %v1098_v55 = vld [vmem:[%s10301_s19 + $0x1908] sm:$0xff] }
 0x631   : > { %v7883_v0 = vsel %vm4475_vm9, %v7882_v61, %v7878_v25  ;;  %2857 = vadd.xlane.f32.xlu0 %v1065_v33  ;;  %v2724_v32 = vpop.xlane.xlu1 %2723  ;;  %v1097_v61 = vld [vmem:[%s10301_s19 + $0x1900] sm:$0xff] }
 0x632   : > { %v7897_v10 = vrot.slane %v2724_v32, %v10463_v15  ;;  %v7888_v56 = vsel %vm4482_vm10, %v7887_v31, %v7883_v0  ;;  %v2722_v12 = vpop.xlane.xlu0 %2721  ;;  %v10117_v0 = vld [vmem:[%s14372_s5] ss:$0 sm:$0xff] }
 0x633   : > { %v7892_v14 = vrot.slane %v2722_v12, %v10466_v16 }
 0x634   : > { %2863 = vadd.xlane.f32.xlu1 %v1068_v30 }
 0x635   : > { %v7893_v3 = vsel %vm14438_vm11, %v7892_v14, %v7888_v56  ;;  %2861 = vadd.xlane.f32.xlu0 %v1067_v49  ;;  %v2728_v8 = vpop.xlane.xlu1 %2727  ;;  %vm14439_vm11 = vcmask 1043459   ;;  %v1194_v14 = vld [vmem:[%s10301_s19 + $0x1c08] sm:$0xff] }
 0x636   : > { %v7907_v11 = vrot.slane %v2728_v8, %v10479_v5  ;;  %v7898_v28 = vsel %vm4496_vm12, %v7897_v10, %v7893_v3  ;;  %v2726_v48 = vpop.xlane.xlu0 %2725 }
 0x637   : > { %v7902_v34 = vrot.slane %v2726_v48, %v10482_v35 }
 0x638   : > { %2867 = vadd.xlane.f32.xlu1 %v1070_v37 }
 0x639   : > { %v7903_v60 = vsel %vm4503_vm13, %v7902_v34, %v7898_v28  ;;  %2865 = vadd.xlane.f32.xlu0 %v1069_v62  ;;  %v2732_v43 = vpop.xlane.xlu1 %2731  ;;  %v1210_v34 = vld [vmem:[%s10301_s19 + $0x1c88] sm:$0xff] }
 0x63a   : > { %v7908_v52 = vsel %vm4510_vm14, %v7907_v11, %v7903_v60  ;;  %v7916_v1 = vrot.slane %v2732_v43, %v10396_v20  ;;  %v2730_v29 = vpop.xlane.xlu0 %2729  ;;  %v1193_v11 = vld [vmem:[%s10301_s19 + $0x1c00] sm:$0xff] }
 0x63b   : > { %v12977_v4 = vsel %vm14439_vm11, %v7908_v52, %v12926_v41  ;;  %v7912_v51 = vrot.slane %v2730_v29, %v10390_v18  ;;  %v1209_v52 = vld [vmem:[%s10301_s19 + $0x1c80] sm:$0xff]  ;;  %vm14440_vm11 = vcmask 851712  }
 0x63c   : > { %2871 = vadd.xlane.f32.xlu1 %v1072_v50 }
 0x63d   : > { %v7917_v22 = vsel %vm4412_vm0, %v7916_v1, %v7912_v51  ;;  %2869 = vadd.xlane.f32.xlu0 %v1071_v2  ;;  %v2736_v42 = vpop.xlane.xlu1 %2735  ;;  %v1099_v51 = vld [vmem:[%s10301_s19 + $0x1910] sm:$0xff] }
 0x63e   : > { %v7926_v38 = vrot.slane %v2736_v42, %v10393_v19  ;;  %v2734_v44 = vpop.xlane.xlu0 %2733 }
 0x63f   : > { %v7921_v36 = vrot.slane %v2734_v44, %v10399_v21 }
 0x640   : > { %2889 = vadd.xlane.f32.xlu1 %v1081_v13 }
 0x641   : > { %v7922_v41 = vsel %vm4419_vm1, %v7921_v36, %v7917_v22  ;;  %2873 = vadd.xlane.f32.xlu0 %v1073_v9  ;;  %v2740_v47 = vpop.xlane.xlu1 %2739 }
 0x642   : > { %v7936_v23 = vrot.slane %v2740_v47, %v10404_v26  ;;  %v7927_v58 = vsel %vm4426_vm2, %v7926_v38, %v7922_v41  ;;  %v2738_v39 = vpop.xlane.xlu0 %2737  ;;  %v1084_v38 = vld [vmem:[%s10301_s19 + $0x1898] sm:$0xff]  ;;  %v1114_v41 = vld [vmem:[%s10301_s19 + $0x1988] sm:$0xff] }
 0x643   : > { %v7931_v59 = vrot.slane %v2738_v39, %v10407_v27 }
 0x644   : > { %2893 = vadd.xlane.f32.xlu1 %v1083_v57 }
 0x645   : > { %v7932_v17 = vsel %vm4433_vm3, %v7931_v59, %v7927_v58  ;;  %2891 = vadd.xlane.f32.xlu0 %v1082_v45  ;;  %v2744_v24 = vpop.xlane.xlu1 %2743  ;;  %v1113_v58 = vld [vmem:[%s10301_s19 + $0x1980] sm:$0xff] }
 0x646   : > { %v7946_v31 = vrot.slane %v2744_v24, %v10428_v46  ;;  %v10068_v25 = vpop.f32.mrf.mxu1  ;;  %v7937_v63 = vsel %vm4440_vm4, %v7936_v23, %v7932_v17  ;;  %v2742_v33 = vpop.xlane.xlu0 %2741  ;;  %v1211_v17 = vld [vmem:[%s10301_s19 + $0x1c90] sm:$0xff] }
 0x647   : > { %v9809_v32 = vadd.f32 %v10117_v0, %v10068_v25  ;;  %v7941_v30 = vrot.slane %v2742_v33, %v10420_v40  ;;  %v1195_v25 = vld [vmem:[%s10301_s19 + $0x1c10] sm:$0xff] }
 0x648   : > { %v9803_v10 = vpop.f32.mrf.mxu1  ;;  %2923 = vadd.xlane.f32.xlu1 %v1098_v55 }
 0x649   : > { %9835 = vst [vmem:[%s12102_s7 + $0x18] sm:$0xff] %v9809_v32  ;;  %v7942_v56 = vsel %vm4447_vm5, %v7941_v30, %v7937_v63  ;;  %v9804_v12 = vadd.f32 %v10117_v0, %v9803_v10  ;;  %2921 = vadd.xlane.f32.xlu0 %v1097_v61  ;;  %v2748_v49 = vpop.xlane.xlu1 %2747  ;;  %v1226_v32 = vld [vmem:[%s10301_s19 + $0x1d08] sm:$0xff] }
 0x64a   : > { %v7956_v3 = vrot.slane %v2748_v49, %v10435_v53  ;;  %v7947_v8 = vsel %vm4454_vm6, %v7946_v31, %v7942_v56  ;;  %v2746_v37 = vpop.xlane.xlu0 %2745  ;;  %v1225_v56 = vld [vmem:[%s10301_s19 + $0x1d00] sm:$0xff] }
 0x64b   : > { %9834 = vst [vmem:[%s12102_s7 + $0x10] sm:$0xff] %v9804_v12  ;;  %v7951_v28 = vrot.slane %v2746_v37, %v10438_v54 }
 0x64c   : > { %3115 = vadd.xlane.f32.xlu1 %v1194_v14  ;;  %v1100_v14 = vld [vmem:[%s10301_s19 + $0x1918] sm:$0xff] }
 0x64d   : > { %v7952_v48 = vsel %vm4461_vm7, %v7951_v28, %v7947_v8  ;;  %3113 = vadd.xlane.f32.xlu0 %v1193_v11  ;;  %v2752_v62 = vpop.xlane.xlu1 %2751  ;;  %v1085_v11 = vld [vmem:[%s10301_s19 + $0x18a0] sm:$0xff] }
 0x64e   : > { %v7966_v60 = vrot.slane %v2752_v62, %v10453_v6  ;;  %v7957_v43 = vsel %vm4468_vm8, %v7956_v3, %v7952_v48  ;;  %v2750_v50 = vpop.xlane.xlu0 %2749 }
 0x64f   : > { %v7961_v1 = vrot.slane %v2750_v50, %v10456_v7 }
 0x650   : > { %3147 = vadd.xlane.f32.xlu1 %v1210_v34  ;;  %v1129_v34 = vld [vmem:[%s10301_s19 + $0x1a00] sm:$0xff] }
 0x651   : > { %v7962_v29 = vsel %vm4475_vm9, %v7961_v1, %v7957_v43  ;;  %3145 = vadd.xlane.f32.xlu0 %v1209_v52  ;;  %v2756_v2 = vpop.xlane.xlu1 %2755  ;;  %v1115_v52 = vld [vmem:[%s10301_s19 + $0x1990] sm:$0xff] }
 0x652   : > { %v7976_v22 = vrot.slane %v2756_v2, %v10463_v15  ;;  %v7967_v42 = vsel %vm4482_vm10, %v7966_v60, %v7962_v29  ;;  %v2754_v13 = vpop.xlane.xlu0 %2753 }
 0x653   : > { %v7971_v44 = vrot.slane %v2754_v13, %v10466_v16 }
 0x654   : > { %2925 = vadd.xlane.f32.xlu1 %v1099_v51  ;;  %v1196_v51 = vld [vmem:[%s10301_s19 + $0x1c18] sm:$0xff] }
 0x655   : > { %v7972_v9 = vsel %vm14440_vm11, %v7971_v44, %v7967_v42  ;;  %2895 = vadd.xlane.f32.xlu0 %v1084_v38  ;;  %v2760_v36 = vpop.xlane.xlu1 %2759  ;;  %vm14441_vm11 = vcmask 1044484   ;;  %v1130_v38 = vld [vmem:[%s10301_s19 + $0x1a08] sm:$0xff] }
 0x656   : > { %v7986_v47 = vrot.slane %v2760_v36, %v10479_v5  ;;  %v7977_v57 = vsel %vm4496_vm12, %v7976_v22, %v7972_v9  ;;  %v2758_v23 = vpop.xlane.xlu0 %2757 }
 0x657   : > { %v7981_v39 = vrot.slane %v2758_v23, %v10482_v35 }
 0x658   : > { %2955 = vadd.xlane.f32.xlu1 %v1114_v41  ;;  %v1227_v41 = vld [vmem:[%s10301_s19 + $0x1d10] sm:$0xff] }
 0x659   : > { %v7982_v45 = vsel %vm4503_vm13, %v7981_v39, %v7977_v57  ;;  %2953 = vadd.xlane.f32.xlu0 %v1113_v58  ;;  %v2764_v59 = vpop.xlane.xlu1 %2763  ;;  %v1212_v58 = vld [vmem:[%s10301_s19 + $0x1c98] sm:$0xff] }
 0x65a   : > { %v7987_v24 = vsel %vm4510_vm14, %v7986_v47, %v7982_v45  ;;  %v7995_v55 = vrot.slane %v2764_v59, %v10396_v20  ;;  %v2762_v31 = vpop.xlane.xlu0 %2761 }
 0x65b   : > { %v13033_v63 = vsel %vm14441_vm11, %v7987_v24, %v12977_v4  ;;  %v7991_v33 = vrot.slane %v2762_v31, %v10390_v18  ;;  %vm14442_vm11 = vcmask 851712  }
 0x65c   : > { %3149 = vadd.xlane.f32.xlu1 %v1211_v17  ;;  %v1242_v17 = vld [vmem:[%s10301_s19 + $0x1d88] sm:$0xff] }
 0x65d   : > { %v7996_v61 = vsel %vm4412_vm0, %v7995_v55, %v7991_v33  ;;  %3117 = vadd.xlane.f32.xlu0 %v1195_v25  ;;  %v2768_v0 = vpop.xlane.xlu1 %2767  ;;  %v1241_v25 = vld [vmem:[%s10301_s19 + $0x1d80] sm:$0xff] }
 0x65e   : > { %v8005_v30 = vrot.slane %v2768_v0, %v10393_v19  ;;  %v2766_v10 = vpop.xlane.xlu0 %2765 }
 0x65f   : > { %v8000_v12 = vrot.slane %v2766_v10, %v10399_v21 }
 0x660   : > { %3179 = vadd.xlane.f32.xlu1 %v1226_v32  ;;  %v1101_v32 = vld [vmem:[%s10301_s19 + $0x1920] sm:$0xff] }
 0x661   : > { %v8001_v4 = vsel %vm4419_vm1, %v8000_v12, %v7996_v61  ;;  %3177 = vadd.xlane.f32.xlu0 %v1225_v56  ;;  %v2772_v49 = vpop.xlane.xlu1 %2771  ;;  %v1086_v12 = vld [vmem:[%s10301_s19 + $0x18a8] sm:$0xff] }
 0x662   : > { %v8015_v3 = vrot.slane %v2772_v49, %v10404_v26  ;;  %v8006_v8 = vsel %vm4426_vm2, %v8005_v30, %v8001_v4  ;;  %v2770_v37 = vpop.xlane.xlu0 %2769 }
 0x663   : > { %v8010_v28 = vrot.slane %v2770_v37, %v10407_v27 }
 0x664   : > { %2927 = vadd.xlane.f32.xlu1 %v1100_v14 }
 0x665   : > { %v8011_v48 = vsel %vm4433_vm3, %v8010_v28, %v8006_v8  ;;  %2897 = vadd.xlane.f32.xlu0 %v1085_v11  ;;  %v2776_v62 = vpop.xlane.xlu1 %2775  ;;  %v1116_v11 = vld [vmem:[%s10301_s19 + $0x1998] sm:$0xff] }
 0x666   : > { %v8025_v60 = vrot.slane %v2776_v62, %v10428_v46  ;;  %v8016_v43 = vsel %vm4440_vm4, %v8015_v3, %v8011_v48  ;;  %v2774_v50 = vpop.xlane.xlu0 %2773  ;;  %v1131_v3 = vld [vmem:[%s10301_s19 + $0x1a10] sm:$0xff]  ;;  %v1146_v62 = vld [vmem:[%s10301_s19 + $0x1a88] sm:$0xff] }
 0x667   : > { %v8020_v1 = vrot.slane %v2774_v50, %v10420_v40  ;;  %v1213_v50 = vld [vmem:[%s10301_s19 + $0x1ca0] sm:$0xff] }
 0x668   : > { %2985 = vadd.xlane.f32.xlu1 %v1129_v34 }
 0x669   : > { %v8021_v29 = vsel %vm4447_vm5, %v8020_v1, %v8016_v43  ;;  %2957 = vadd.xlane.f32.xlu0 %v1115_v52  ;;  %v2780_v2 = vpop.xlane.xlu1 %2779  ;;  %v1197_v1 = vld [vmem:[%s10301_s19 + $0x1c20] sm:$0xff] }
 0x66a   : > { %v8035_v22 = vrot.slane %v2780_v2, %v10435_v53  ;;  %v8026_v42 = vsel %vm4454_vm6, %v8025_v60, %v8021_v29  ;;  %v2778_v13 = vpop.xlane.xlu0 %2777  ;;  %v1145_v60 = vld [vmem:[%s10301_s19 + $0x1a80] sm:$0xff]  ;;  %v1243_v29 = vld [vmem:[%s10301_s19 + $0x1d90] sm:$0xff] }
 0x66b   : > { %v8030_v44 = vrot.slane %v2778_v13, %v10438_v54 }
 0x66c   : > { %3119 = vadd.xlane.f32.xlu1 %v1196_v51  ;;  %v1228_v51 = vld [vmem:[%s10301_s19 + $0x1d18] sm:$0xff] }
 0x66d   : > { %v8031_v9 = vsel %vm4461_vm7, %v8030_v44, %v8026_v42  ;;  %2987 = vadd.xlane.f32.xlu0 %v1130_v38  ;;  %v2784_v36 = vpop.xlane.xlu1 %2783  ;;  %v1258_v42 = vld [vmem:[%s10301_s19 + $0x1e08] sm:$0xff]  ;;  %v1257_v38 = vld [vmem:[%s10301_s19 + $0x1e00] sm:$0xff] }
 0x66e   : > { %v8045_v47 = vrot.slane %v2784_v36, %v10453_v6  ;;  %v8036_v57 = vsel %vm4468_vm8, %v8035_v22, %v8031_v9  ;;  %v2782_v23 = vpop.xlane.xlu0 %2781  ;;  %v1102_v9 = vld [vmem:[%s10301_s19 + $0x1928] sm:$0xff] }
 0x66f   : > { %v8040_v39 = vrot.slane %v2782_v23, %v10456_v7 }
 0x670   : > { %3181 = vadd.xlane.f32.xlu1 %v1227_v41  ;;  %v1087_v41 = vld [vmem:[%s10301_s19 + $0x18b0] sm:$0xff] }
 0x671   : > { %v8041_v45 = vsel %vm4475_vm9, %v8040_v39, %v8036_v57  ;;  %3151 = vadd.xlane.f32.xlu0 %v1212_v58  ;;  %v2788_v59 = vpop.xlane.xlu1 %2787  ;;  %v1132_v57 = vld [vmem:[%s10301_s19 + $0x1a18] sm:$0xff]  ;;  %v1117_v58 = vld [vmem:[%s10301_s19 + $0x19a0] sm:$0xff] }
 0x672   : > { %v8055_v24 = vrot.slane %v2788_v59, %v10463_v15  ;;  %v8046_v55 = vsel %vm4482_vm10, %v8045_v47, %v8041_v45  ;;  %v2786_v31 = vpop.xlane.xlu0 %2785  ;;  %v1161_v45 = vld [vmem:[%s10301_s19 + $0x1b00] sm:$0xff] }
 0x673   : > { %v8050_v33 = vrot.slane %v2786_v31, %v10466_v16 }
 0x674   : > { %3211 = vadd.xlane.f32.xlu1 %v1242_v17  ;;  %v1147_v17 = vld [vmem:[%s10301_s19 + $0x1a90] sm:$0xff] }
 0x675   : > { %v8051_v61 = vsel %vm14442_vm11, %v8050_v33, %v8046_v55  ;;  %3209 = vadd.xlane.f32.xlu0 %v1241_v25  ;;  %v2792_v0 = vpop.xlane.xlu1 %2791  ;;  %vm14443_vm11 = vcmask 1045509   ;;  %v1198_v33 = vld [vmem:[%s10301_s19 + $0x1c28] sm:$0xff] }
 0x676   : > { %v8065_v30 = vrot.slane %v2792_v0, %v10479_v5  ;;  %v8056_v10 = vsel %vm4496_vm12, %v8055_v24, %v8051_v61  ;;  %v2790_v56 = vpop.xlane.xlu0 %2789  ;;  %v1162_v0 = vld [vmem:[%s10301_s19 + $0x1b08] sm:$0xff] }
 0x677   : > { %v8060_v4 = vrot.slane %v2790_v56, %v10482_v35 }
 0x678   : > { %2929 = vadd.xlane.f32.xlu1 %v1101_v32 }
 0x679   : > { %v8061_v49 = vsel %vm4503_vm13, %v8060_v4, %v8056_v10  ;;  %2899 = vadd.xlane.f32.xlu0 %v1086_v12  ;;  %v2796_v14 = vpop.xlane.xlu1 %2795 }
 0x67a   : > { %v8066_v8 = vsel %vm4510_vm14, %v8065_v30, %v8061_v49  ;;  %v2794_v37 = vpop.xlane.xlu0 %2793  ;;  %v8074_v24 = vrot.slane %v2796_v14, %v10396_v20  ;;  %v1229_v14 = vld [vmem:[%s10301_s19 + $0x1d20] sm:$0xff] }
 0x67b   : > { %v13083_v28 = vsel %vm14443_vm11, %v8066_v8, %v13033_v63  ;;  %v8070_v55 = vrot.slane %v2794_v37, %v10390_v18  ;;  %v1214_v8 = vld [vmem:[%s10301_s19 + $0x1ca8] sm:$0xff]  ;;  %vm14444_vm11 = vcmask 851712  }
 0x67c   : > { %2989 = vadd.xlane.f32.xlu1 %v1131_v3 }
 0x67d   : > { %2959 = vadd.xlane.f32.xlu0 %v1116_v11  ;;  %v13085_v48 = vpop.xlane.xlu1 %2799  ;;  %v8075_v32 = vsel %vm4412_vm0, %v8074_v24, %v8070_v55  ;;  %v1273_v55 = vld [vmem:[%s10301_s19 + $0x1e80] sm:$0xff] }
 0x67e   : > { %v2798_v34 = vpop.xlane.xlu0 %2797  ;;  %v8084_v30 = vrot.slane %v13085_v48, %v10393_v19 }
 0x67f   : > { %v8079_v31 = vrot.slane %v2798_v34, %v10399_v21 }
 0x680   : > { %3019 = vadd.xlane.f32.xlu1 %v1146_v62 }
 0x681   : > { %3017 = vadd.xlane.f32.xlu0 %v1145_v60  ;;  %v13089_v43 = vpop.xlane.xlu1 %2803  ;;  %v8080_v10 = vsel %vm4419_vm1, %v8079_v31, %v8075_v32 }
 0x682   : > { %v2802_v52 = vpop.xlane.xlu0 %2801  ;;  %v8094_v37 = vrot.slane %v13089_v43, %v10404_v26  ;;  %v8085_v11 = vsel %vm4426_vm2, %v8084_v30, %v8080_v10  ;;  %v1259_v43 = vld [vmem:[%s10301_s19 + $0x1e10] sm:$0xff] }
 0x683   : > { %v8089_v56 = vrot.slane %v2802_v52, %v10407_v27 }
 0x684   : > { %3153 = vadd.xlane.f32.xlu1 %v1213_v50 }
 0x685   : > { %3121 = vadd.xlane.f32.xlu0 %v1197_v1  ;;  %v13093_v63 = vpop.xlane.xlu1 %2807  ;;  %v8090_v62 = vsel %vm4433_vm3, %v8089_v56, %v8085_v11 }
 0x686   : > { %v13096_v2 = vpop.xlane.xlu0 %2805 }
 0x687   : > { %v8099_v34 = vrot.slane %v13096_v2, %v10420_v40 }
 0x688   : > { %3213 = vadd.xlane.f32.xlu1 %v1243_v29 }
 0x689   : > { %3183 = vadd.xlane.f32.xlu0 %v1228_v51  ;;  %v13099_v22 = vpop.xlane.xlu1 %2811  ;;  %v1244_v51 = vld [vmem:[%s10301_s19 + $0x1d98] sm:$0xff] }
 0x68a   : > { %v13102_v13 = vpop.xlane.xlu0 %2809  ;;  %v8114_v31 = vrot.slane %v13099_v22, %v10435_v53  ;;  %v1103_v22 = vld [vmem:[%s10301_s19 + $0x1930] sm:$0xff] }
 0x68c   : > { %3243 = vadd.xlane.f32.xlu1 %v1258_v42  ;;  %v8104_v42 = vrot.slane %v13093_v63, %v10428_v46  ;;  %v1274_v63 = vld [vmem:[%s10301_s19 + $0x1e88] sm:$0xff] }
 0x68d   : > { %3241 = vadd.xlane.f32.xlu0 %v1257_v38  ;;  %v13105_v44 = vpop.xlane.xlu1 %2815  ;;  %v8095_v38 = vsel %vm4440_vm4, %v8094_v37, %v8090_v62 }
 0x68e   : > { %v13108_v36 = vpop.xlane.xlu0 %2813 }
 0x690   : > { %2931 = vadd.xlane.f32.xlu1 %v1102_v9  ;;  %v8100_v9 = vsel %vm4447_vm5, %v8099_v34, %v8095_v38  ;;  %v1118_v34 = vld [vmem:[%s10301_s19 + $0x19a8] sm:$0xff] }
 0x691   : > { %2901 = vadd.xlane.f32.xlu0 %v1087_v41  ;;  %v13111_v47 = vpop.xlane.xlu1 %2819  ;;  %v8109_v41 = vrot.slane %v13102_v13, %v10438_v54 }
 0x692   : > { %v13114_v23 = vpop.xlane.xlu0 %2817 }
 0x694   : > { %2991 = vadd.xlane.f32.xlu1 %v1132_v57 }
 0x695   : > { %2961 = vadd.xlane.f32.xlu0 %v1117_v58  ;;  %v13117_v39 = vpop.xlane.xlu1 %2823 }
 0x696   : > { %v13120_v59 = vpop.xlane.xlu0 %2821 }
 0x698   : > { %3049 = vadd.xlane.f32.xlu1 %v1161_v45 }
 0x699   : > { %3021 = vadd.xlane.f32.xlu0 %v1147_v17  ;;  %v2828_v25 = vpop.xlane.xlu1 %2827 }
 0x69a   : > { %v2826_v61 = vpop.xlane.xlu0 %2825  ;;  %v8153_v12 = vrot.slane %v2828_v25, %v10396_v20  ;;  %v8105_v25 = vsel %vm4454_vm6, %v8104_v42, %v8100_v9  ;;  %v8144_v9 = vrot.slane %v13117_v39, %v10479_v5 }
 0x69b   : > { %v8149_v4 = vrot.slane %v2826_v61, %v10390_v18  ;;  %v8119_v61 = vrot.slane %v13108_v36, %v10456_v7 }
 0x69c   : > { %3123 = vadd.xlane.f32.xlu1 %v1198_v33  ;;  %v8110_v33 = vsel %vm4461_vm7, %v8109_v41, %v8105_v25 }
 0x69d   : > { %3051 = vadd.xlane.f32.xlu0 %v1162_v0  ;;  %v2832_v49 = vpop.xlane.xlu1 %2831  ;;  %v8154_v60 = vsel %vm4412_vm0, %v8153_v12, %v8149_v4  ;;  %v1088_v12 = vld [vmem:[%s10301_s19 + $0x18b8] sm:$0xff]  ;;  %v8124_v4 = vrot.slane %v13105_v44, %v10453_v6  ;;  %v1133_v44 = vld [vmem:[%s10301_s19 + $0x1a20] sm:$0xff] }
 0x69e   : > { %v2830_v3 = vpop.xlane.xlu0 %2829  ;;  %v8163_v50 = vrot.slane %v2832_v49, %v10393_v19  ;;  %v8115_v49 = vsel %vm4468_vm8, %v8114_v31, %v8110_v33  ;;  %v1177_v31 = vld [vmem:[%s10301_s19 + $0x1b80] sm:$0xff] }
 0x69f   : > { %v8158_v48 = vrot.slane %v2830_v3, %v10399_v21  ;;  %v8129_v3 = vrot.slane %v13114_v23, %v10466_v16 }
 0x6a0   : > { %3185 = vadd.xlane.f32.xlu1 %v1229_v14  ;;  %v8120_v14 = vsel %vm4475_vm9, %v8119_v61, %v8115_v49 }
 0x6a1   : > { %v8159_v52 = vsel %vm4419_vm1, %v8158_v48, %v8154_v60  ;;  %3155 = vadd.xlane.f32.xlu0 %v1214_v8  ;;  %v2836_v1 = vpop.xlane.xlu1 %2835  ;;  %v8134_v60 = vrot.slane %v13111_v47, %v10463_v15  ;;  %v1163_v47 = vld [vmem:[%s10301_s19 + $0x1b10] sm:$0xff] }
 0x6a2   : > { %v2834_v29 = vpop.xlane.xlu0 %2833  ;;  %v8173_v57 = vrot.slane %v2836_v1, %v10404_v26  ;;  %v8164_v58 = vsel %vm4426_vm2, %v8163_v50, %v8159_v52  ;;  %v8125_v50 = vsel %vm4482_vm10, %v8124_v4, %v8120_v14  ;;  %v8139_v1 = vrot.slane %v13120_v59, %v10482_v35 }
 0x6a3   : > { %v8168_v2 = vrot.slane %v2834_v29, %v10407_v27  ;;  %v8130_v52 = vsel %vm14444_vm11, %v8129_v3, %v8125_v50 }
 0x6a4   : > { %3245 = vadd.xlane.f32.xlu1 %v1259_v43  ;;  %v8135_v41 = vsel %vm4496_vm12, %v8134_v60, %v8130_v52  ;;  %v1275_v60 = vld [vmem:[%s10301_s19 + $0x1e90] sm:$0xff] }
 0x6a5   : > { %v8169_v45 = vsel %vm4433_vm3, %v8168_v2, %v8164_v58  ;;  %3215 = vadd.xlane.f32.xlu0 %v1244_v51  ;;  %v2840_v17 = vpop.xlane.xlu1 %2839  ;;  %v1148_v2 = vld [vmem:[%s10301_s19 + $0x1a98] sm:$0xff] }
 0x6a6   : > { %v2838_v24 = vpop.xlane.xlu0 %2837  ;;  %v8183_v0 = vrot.slane %v2840_v17, %v10428_v46  ;;  %v8174_v32 = vsel %vm4440_vm4, %v8173_v57, %v8169_v45  ;;  %v8140_v57 = vsel %vm4503_vm13, %v8139_v1, %v8135_v41  ;;  %v1260_v1 = vld [vmem:[%s10301_s19 + $0x1e18] sm:$0xff] }
 0x6a7   : > { %v8178_v13 = vrot.slane %v2838_v24, %v10420_v40  ;;  %v1178_v24 = vld [vmem:[%s10301_s19 + $0x1b88] sm:$0xff]  ;;  %v8145_v25 = vsel %vm4510_vm14, %v8144_v9, %v8140_v57  ;;  %v1289_v9 = vld [vmem:[%s10301_s19 + $0x1f00] sm:$0xff] }
 0x6a8   : > { %3275 = vadd.xlane.f32.xlu1 %v1274_v63  ;;  %v9536_v4 = vsel %vm9499_vm15, %v8145_v25, %v13083_v28 }
 0x6a9   : > { %v8179_v30 = vsel %vm4447_vm5, %v8178_v13, %v8174_v32  ;;  %3273 = vadd.xlane.f32.xlu0 %v1273_v55  ;;  %v2844_v10 = vpop.xlane.xlu1 %2843  ;;  %v1215_v32 = vld [vmem:[%s10301_s19 + $0x1cb0] sm:$0xff] }
 0x6aa   : > { %v2842_v56 = vpop.xlane.xlu0 %2841  ;;  %v8193_v8 = vrot.slane %v2844_v10, %v10435_v53  ;;  %v8184_v37 = vsel %vm4454_vm6, %v8183_v0, %v8179_v30  ;;  %v3374_v30 = vld [vmem:[%s10884_s14 + $0x28] sm:$0xff] }
 0x6ab   : > { %v8188_v36 = vrot.slane %v2842_v56, %v10438_v54  ;;  %v1199_v56 = vld [vmem:[%s10301_s19 + $0x1c30] sm:$0xff] }
 0x6ac   : > { %2933 = vadd.xlane.f32.xlu1 %v1103_v22 }
 0x6ad   : > { %v8189_v11 = vsel %vm4461_vm7, %v8188_v36, %v8184_v37  ;;  %2903 = vadd.xlane.f32.xlu0 %v1088_v12  ;;  %v2848_v48 = vpop.xlane.xlu1 %2847  ;;  %v1245_v37 = vld [vmem:[%s10301_s19 + $0x1da0] sm:$0xff] }
 0x6ae   : > { %v2846_v62 = vpop.xlane.xlu0 %2845  ;;  %v8203_v43 = vrot.slane %v2848_v48, %v10453_v6  ;;  %v8194_v29 = vsel %vm4468_vm8, %v8193_v8, %v8189_v11 }
 0x6af   : > { %v8198_v23 = vrot.slane %v2846_v62, %v10456_v7 }
 0x6b0   : > { %2993 = vadd.xlane.f32.xlu1 %v1133_v44  ;;  %v1230_v44 = vld [vmem:[%s10301_s19 + $0x1d28] sm:$0xff] }
 0x6b1   : > { %v8199_v51 = vsel %vm4475_vm9, %v8198_v23, %v8194_v29  ;;  %2963 = vadd.xlane.f32.xlu0 %v1118_v34  ;;  %v2852_v42 = vpop.xlane.xlu1 %2851 }
 0x6b2   : > { %v2850_v38 = vpop.xlane.xlu0 %2849  ;;  %v8213_v58 = vrot.slane %v2852_v42, %v10463_v15  ;;  %v8204_v45 = vsel %vm4482_vm10, %v8203_v43, %v8199_v51  ;;  %v1290_v42 = vld [vmem:[%s10301_s19 + $0x1f08] sm:$0xff] }
 0x6b3   : > { %v8208_v59 = vrot.slane %v2850_v38, %v10466_v16 }
 0x6b4   : > { %3053 = vadd.xlane.f32.xlu1 %v1163_v47 }
 0x6b5   : > { %v8209_v17 = vsel %vm14444_vm11, %v8208_v59, %v8204_v45  ;;  %3023 = vadd.xlane.f32.xlu0 %v1148_v2  ;;  %v2856_v63 = vpop.xlane.xlu1 %2855  ;;  %vm14445_vm11 = vcmask 1047559  }
 0x6b6   : > { %v8223_v39 = vrot.slane %v2856_v63, %v10479_v5  ;;  %v2854_v55 = vpop.xlane.xlu0 %2853  ;;  %v8214_v33 = vsel %vm4496_vm12, %v8213_v58, %v8209_v17  ;;  %v1104_v58 = vld [vmem:[%s10301_s19 + $0x1938] sm:$0xff]  ;;  %v1089_v63 = vld [vmem:[%s10301_s19 + $0x18c0] sm:$0xff] }
 0x6b7   : > { %v8218_v13 = vrot.slane %v2854_v55, %v10482_v35 }
 0x6b8   : > { %3083 = vadd.xlane.f32.xlu1 %v1178_v24 }
 0x6b9   : > { %v8219_v61 = vsel %vm4503_vm13, %v8218_v13, %v8214_v33  ;;  %3081 = vadd.xlane.f32.xlu0 %v1177_v31  ;;  %v2860_v0 = vpop.xlane.xlu1 %2859  ;;  %v1134_v31 = vld [vmem:[%s10301_s19 + $0x1a28] sm:$0xff]  ;;  %v1119_v33 = vld [vmem:[%s10301_s19 + $0x19b0] sm:$0xff] }
 0x6ba   : > { %v8232_v10 = vrot.slane %v2860_v0, %v10396_v20  ;;  %v2858_v22 = vpop.xlane.xlu0 %2857  ;;  %v8224_v12 = vsel %vm4510_vm14, %v8223_v39, %v8219_v61 }
 0x6bb   : > { %v8228_v49 = vrot.slane %v2858_v22, %v10390_v18  ;;  %v9537_v36 = vsel %vm14445_vm11, %v8224_v12, %v9536_v4  ;;  %v1149_v12 = vld [vmem:[%s10301_s19 + $0x1aa0] sm:$0xff] }
 0x6bc   : > { %3157 = vadd.xlane.f32.xlu1 %v1215_v32  ;;  %v9565_v14 = vmul.f32 %v9537_v36, %v3374_v30 }
 0x6bd   : > { %v8233_v3 = vsel %vm4412_vm0, %v8232_v10, %v8228_v49  ;;  %3125 = vadd.xlane.f32.xlu0 %v1199_v56  ;;  %v2864_v8 = vpop.xlane.xlu1 %2863  ;;  %v1164_v10 = vld [vmem:[%s10301_s19 + $0x1b18] sm:$0xff] }
 0x6be   : > { %v8242_v11 = vrot.slane %v2864_v8, %v10393_v19  ;;  %10026 = vmatmul.mubr.f32.gmra.mxu0 %v9565_v14  ;;  %v2862_v48 = vpop.xlane.xlu0 %2861 }
 0x6bf   : > { %v8237_v28 = vrot.slane %v2862_v48, %v10399_v21 }
 0x6c0   : > { %3217 = vadd.xlane.f32.xlu1 %v1245_v37 }
 0x6c1   : > { %v8238_v62 = vsel %vm4419_vm1, %v8237_v28, %v8233_v3  ;;  %3187 = vadd.xlane.f32.xlu0 %v1230_v44  ;;  %v2868_v34 = vpop.xlane.xlu1 %2867  ;;  %v1200_v3 = vld [vmem:[%s10301_s19 + $0x1c38] sm:$0xff] }
 0x6c2   : > { %v8252_v50 = vrot.slane %v2868_v34, %v10404_v26  ;;  %v8243_v23 = vsel %vm4426_vm2, %v8242_v11, %v8238_v62  ;;  %v2866_v52 = vpop.xlane.xlu0 %2865  ;;  %v1179_v11 = vld [vmem:[%s10301_s19 + $0x1b90] sm:$0xff] }
 0x6c3   : > { %v8247_v43 = vrot.slane %v2866_v52, %v10407_v27  ;;  %v1231_v62 = vld [vmem:[%s10301_s19 + $0x1d30] sm:$0xff] }
 0x6c4   : > { %3277 = vadd.xlane.f32.xlu1 %v1275_v60 }
 0x6c5   : > { %v8248_v29 = vsel %vm4433_vm3, %v8247_v43, %v8243_v23  ;;  %3247 = vadd.xlane.f32.xlu0 %v1260_v1  ;;  %v2872_v51 = vpop.xlane.xlu1 %2871  ;;  %v1261_v43 = vld [vmem:[%s10301_s19 + $0x1e20] sm:$0xff] }
 0x6c6   : > { %v8262_v47 = vrot.slane %v2872_v51, %v10428_v46  ;;  %v8253_v38 = vsel %vm4440_vm4, %v8252_v50, %v8248_v29  ;;  %v2870_v2 = vpop.xlane.xlu0 %2869  ;;  %v1216_v50 = vld [vmem:[%s10301_s19 + $0x1cb8] sm:$0xff] }
 0x6c7   : > { %v8257_v41 = vrot.slane %v2870_v2, %v10420_v40 }
 0x6c8   : > { %3307 = vadd.xlane.f32.xlu1 %v1290_v42  ;;  %v1246_v42 = vld [vmem:[%s10301_s19 + $0x1da8] sm:$0xff] }
 0x6c9   : > { %v8258_v59 = vsel %vm4447_vm5, %v8257_v41, %v8253_v38  ;;  %3305 = vadd.xlane.f32.xlu0 %v1289_v9  ;;  %v2890_v57 = vpop.xlane.xlu1 %2889  ;;  %v1291_v41 = vld [vmem:[%s10301_s19 + $0x1f10] sm:$0xff] }
 0x6ca   : > { %v8263_v45 = vsel %vm4454_vm6, %v8262_v47, %v8258_v59  ;;  %v2874_v17 = vpop.xlane.xlu0 %2873  ;;  %v8307_v61 = vrot.slane %v2890_v57, %v10390_v18 }
 0x6cb   : > { %v8267_v24 = vrot.slane %v2874_v17, %v10438_v54 }
 0x6cc   : > { %2935 = vadd.xlane.f32.xlu1 %v1104_v58  ;;  %v1276_v58 = vld [vmem:[%s10301_s19 + $0x1e98] sm:$0xff] }
 0x6cd   : > { %v13244_v39 = vsel %vm4461_vm7, %v8267_v24, %v8263_v45  ;;  %2905 = vadd.xlane.f32.xlu0 %v1089_v63  ;;  %v2894_v55 = vpop.xlane.xlu1 %2893  ;;  %v1306_v24 = vld [vmem:[%s10301_s19 + $0x1f88] sm:$0xff] }
 0x6ce   : > { %v8316_v25 = vrot.slane %v2894_v55, %v10399_v21  ;;  %v2892_v13 = vpop.xlane.xlu0 %2891 }
 0x6cf   : > { %v8311_v0 = vrot.slane %v2892_v13, %v10396_v20 }
 0x6d0   : > { %2995 = vadd.xlane.f32.xlu1 %v1134_v31 }
 0x6d1   : > { %v8312_v32 = vsel %vm4412_vm0, %v8311_v0, %v8307_v61  ;;  %2965 = vadd.xlane.f32.xlu0 %v1119_v33  ;;  %v2924_v30 = vpop.xlane.xlu1 %2923 }
 0x6d2   : > { %v8390_v22 = vrot.slane %v2924_v30, %v10396_v20  ;;  %v2922_v56 = vpop.xlane.xlu0 %2921  ;;  %v8317_v4 = vsel %vm4419_vm1, %v8316_v25, %v8312_v32  ;;  %v1305_v25 = vld [vmem:[%s10301_s19 + $0x1f80] sm:$0xff]  ;;  %v1090_v32 = vld [vmem:[%s10301_s19 + $0x18c8] sm:$0xff] }
 0x6d3   : > { %v8386_v49 = vrot.slane %v2922_v56, %v10390_v18 }
 0x6d4   : > { %3055 = vadd.xlane.f32.xlu1 %v1164_v10 }
 0x6d5   : > { %v8391_v36 = vsel %vm4412_vm0, %v8390_v22, %v8386_v49  ;;  %3025 = vadd.xlane.f32.xlu0 %v1149_v12  ;;  %v3116_v14 = vpop.xlane.xlu1 %3115  ;;  %v1074_v22 = vld [vmem:[%s10301_s19 + $0x1848] sm:$0xff]  ;;  %v1120_v49 = vld [vmem:[%s10301_s19 + $0x19b8] sm:$0xff] }
 0x6d6   : > { %v8864_v8 = vrot.slane %v3116_v14, %v10396_v20  ;;  %v3114_v37 = vpop.xlane.xlu0 %3113 }
 0x6d7   : > { %v8860_v48 = vrot.slane %v3114_v37, %v10390_v18 }
 0x6d8   : > { %3127 = vadd.xlane.f32.xlu1 %v1200_v3  ;;  %v1105_v3 = vld [vmem:[%s10301_s19 + $0x1940] sm:$0xff] }
 0x6d9   : > { %v8865_v44 = vsel %vm4412_vm0, %v8864_v8, %v8860_v48  ;;  %3085 = vadd.xlane.f32.xlu0 %v1179_v11  ;;  %v3148_v28 = vpop.xlane.xlu1 %3147 }
 0x6da   : > { %v8943_v34 = vrot.slane %v3148_v28, %v10396_v20  ;;  %v3146_v60 = vpop.xlane.xlu0 %3145 }
 0x6db   : > { %v8939_v23 = vrot.slane %v3146_v60, %v10390_v18 }
 0x6dc   : > { %3189 = vadd.xlane.f32.xlu1 %v1231_v62  ;;  %v1135_v62 = vld [vmem:[%s10301_s19 + $0x1a30] sm:$0xff] }
 0x6dd   : > { %v8944_v52 = vsel %vm4412_vm0, %v8943_v34, %v8939_v23  ;;  %3159 = vadd.xlane.f32.xlu0 %v1216_v50  ;;  %v2926_v1 = vpop.xlane.xlu1 %2925  ;;  %v1180_v23 = vld [vmem:[%s10301_s19 + $0x1b98] sm:$0xff] }
 0x6de   : > { %v8395_v29 = vrot.slane %v2926_v1, %v10399_v21  ;;  %v2896_v51 = vpop.xlane.xlu0 %2895 }
 0x6df   : > { %v8321_v47 = vrot.slane %v2896_v51, %v10393_v19 }
 0x6e0   : > { %v8396_v38 = vsel %vm4419_vm1, %v8395_v29, %v8391_v36  ;;  %3249 = vadd.xlane.f32.xlu1 %v1261_v43  ;;  %v1165_v43 = vld [vmem:[%s10301_s19 + $0x1b20] sm:$0xff] }
 0x6e1   : > { %v8322_v2 = vsel %vm4426_vm2, %v8321_v47, %v8317_v4  ;;  %3219 = vadd.xlane.f32.xlu0 %v1246_v42  ;;  %v2956_v9 = vpop.xlane.xlu1 %2955 }
 0x6e2   : > { %v8469_v59 = vrot.slane %v2956_v9, %v10396_v20  ;;  %v2954_v57 = vpop.xlane.xlu0 %2953 }
 0x6e3   : > { %v8465_v45 = vrot.slane %v2954_v57, %v10390_v18 }
 0x6e4   : > { %3309 = vadd.xlane.f32.xlu1 %v1291_v41 }
 0x6e5   : > { %v8470_v17 = vsel %vm4412_vm0, %v8469_v59, %v8465_v45  ;;  %3279 = vadd.xlane.f32.xlu0 %v1276_v58  ;;  %v3150_v63 = vpop.xlane.xlu1 %3149  ;;  %v1201_v59 = vld [vmem:[%s10301_s19 + $0x1c40] sm:$0xff] }
 0x6e6   : > { %v8948_v55 = vrot.slane %v3150_v63, %v10399_v21  ;;  %v3118_v31 = vpop.xlane.xlu0 %3117  ;;  %v1247_v63 = vld [vmem:[%s10301_s19 + $0x1db0] sm:$0xff] }
 0x6e7   : > { %v8869_v13 = vrot.slane %v3118_v31, %v10399_v21  ;;  %v1232_v31 = vld [vmem:[%s10301_s19 + $0x1d38] sm:$0xff] }
 0x6e8   : > { %v8949_v33 = vsel %vm4419_vm1, %v8948_v55, %v8944_v52  ;;  %3339 = vadd.xlane.f32.xlu1 %v1306_v24 }
 0x6e9   : > { %v8870_v61 = vsel %vm4419_vm1, %v8869_v13, %v8865_v44  ;;  %3337 = vadd.xlane.f32.xlu0 %v1305_v25  ;;  %v3180_v0 = vpop.xlane.xlu1 %3179  ;;  %v1150_v44 = vld [vmem:[%s10301_s19 + $0x1aa8] sm:$0xff] }
 0x6ea   : > { %v9022_v30 = vrot.slane %v3180_v0, %v10396_v20  ;;  %v3178_v10 = vpop.xlane.xlu0 %3177  ;;  %v1277_v0 = vld [vmem:[%s10301_s19 + $0x1ea0] sm:$0xff] }
 0x6eb   : > { %v9018_v56 = vrot.slane %v3178_v10, %v10390_v18 }
 0x6ec   : > { %2907 = vadd.xlane.f32.xlu1 %v1090_v32 }
 0x6ed   : > { %v9023_v12 = vsel %vm4412_vm0, %v9022_v30, %v9018_v56  ;;  %2875 = vadd.xlane.f32.xlu0 %v1074_v22  ;;  %v2928_v4 = vpop.xlane.xlu1 %2927  ;;  %v1262_v30 = vld [vmem:[%s10301_s19 + $0x1e28] sm:$0xff] }
 0x6ee   : > { %v8400_v36 = vrot.slane %v2928_v4, %v10393_v19  ;;  %v2898_v14 = vpop.xlane.xlu0 %2897  ;;  %v1307_v4 = vld [vmem:[%s10301_s19 + $0x1f90] sm:$0xff] }
 0x6ef   : > { %v8326_v8 = vrot.slane %v2898_v14, %v10407_v27  ;;  %v1292_v14 = vld [vmem:[%s10301_s19 + $0x1f18] sm:$0xff] }
 0x6f0   : > { %v8401_v37 = vsel %vm4426_vm2, %v8400_v36, %v8396_v38  ;;  %2967 = vadd.xlane.f32.xlu1 %v1120_v49 }
 0x6f1   : > { %v8327_v11 = vsel %vm4433_vm3, %v8326_v8, %v8322_v2  ;;  %2937 = vadd.xlane.f32.xlu0 %v1105_v3  ;;  %v2986_v48 = vpop.xlane.xlu1 %2985  ;;  %v1217_v2 = vld [vmem:[%s10301_s19 + $0x1cc0] sm:$0xff] }
 0x6f2   : > { %v2958_v28 = vpop.xlane.xlu0 %2957  ;;  %v8544_v29 = vrot.slane %v2986_v48, %v10390_v18 }
 0x6f3   : > { %v8474_v34 = vrot.slane %v2958_v28, %v10399_v21 }
 0x6f4   : > { %3027 = vadd.xlane.f32.xlu1 %v1150_v44 }
 0x6f5   : > { %v8475_v60 = vsel %vm4419_vm1, %v8474_v34, %v8470_v17  ;;  %2997 = vadd.xlane.f32.xlu0 %v1135_v62  ;;  %v3120_v50 = vpop.xlane.xlu1 %3119  ;;  %v1075_v62 = vld [vmem:[%s10301_s19 + $0x1850] sm:$0xff] }
 0x6f6   : > { %v8874_v52 = vrot.slane %v3120_v50, %v10393_v19  ;;  %v2988_v1 = vpop.xlane.xlu0 %2987 }
 0x6f7   : > { %v8548_v51 = vrot.slane %v2988_v1, %v10396_v20 }
 0x6f8   : > { %v8875_v42 = vsel %vm4426_vm2, %v8874_v52, %v8870_v61  ;;  %3087 = vadd.xlane.f32.xlu1 %v1180_v23  ;;  %v1121_v52 = vld [vmem:[%s10301_s19 + $0x19c0] sm:$0xff] }
 0x6f9   : > { %v8549_v47 = vsel %vm4412_vm0, %v8548_v51, %v8544_v29  ;;  %3057 = vadd.xlane.f32.xlu0 %v1165_v43  ;;  %v3182_v38 = vpop.xlane.xlu1 %3181  ;;  %v1106_v43 = vld [vmem:[%s10301_s19 + $0x1948] sm:$0xff] }
 0x6fa   : > { %v9027_v9 = vrot.slane %v3182_v38, %v10399_v21  ;;  %v3152_v41 = vpop.xlane.xlu0 %3151 }
 0x6fb   : > { %v8953_v57 = vrot.slane %v3152_v41, %v10393_v19 }
 0x6fc   : > { %v9028_v58 = vsel %vm4419_vm1, %v9027_v9, %v9023_v12  ;;  %3161 = vadd.xlane.f32.xlu1 %v1217_v2  ;;  %v1151_v2 = vld [vmem:[%s10301_s19 + $0x1ab0] sm:$0xff] }
 0x6fd   : > { %v8954_v45 = vsel %vm4426_vm2, %v8953_v57, %v8949_v33  ;;  %3129 = vadd.xlane.f32.xlu0 %v1201_v59  ;;  %v3212_v17 = vpop.xlane.xlu1 %3211  ;;  %v1136_v59 = vld [vmem:[%s10301_s19 + $0x1a38] sm:$0xff] }
 0x6fe   : > { %v9101_v24 = vrot.slane %v3212_v17, %v10396_v20  ;;  %v3210_v55 = vpop.xlane.xlu0 %3209 }
 0x6ff   : > { %v9097_v25 = vrot.slane %v3210_v55, %v10390_v18 }
 0x700   : > { %3221 = vadd.xlane.f32.xlu1 %v1247_v63  ;;  %v1181_v63 = vld [vmem:[%s10301_s19 + $0x1ba0] sm:$0xff] }
 0x701   : > { %v9102_v13 = vsel %vm4412_vm0, %v9101_v24, %v9097_v25  ;;  %3191 = vadd.xlane.f32.xlu0 %v1232_v31  ;;  %v2930_v61 = vpop.xlane.xlu1 %2929  ;;  %v1166_v31 = vld [vmem:[%s10301_s19 + $0x1b28] sm:$0xff] }
 0x702   : > { %v8405_v32 = vrot.slane %v2930_v61, %v10407_v27  ;;  %v2900_v33 = vpop.xlane.xlu0 %2899 }
 0x703   : > { %v8331_v10 = vrot.slane %v2900_v33, %v10404_v26  ;;  %v1202_v33 = vld [vmem:[%s10301_s19 + $0x1c48] sm:$0xff] }
 0x704   : > { %v8406_v22 = vsel %vm4433_vm3, %v8405_v32, %v8401_v37  ;;  %3281 = vadd.xlane.f32.xlu1 %v1277_v0  ;;  %v1218_v0 = vld [vmem:[%s10301_s19 + $0x1cc8] sm:$0xff] }
 0x705   : > { %v8332_v56 = vsel %vm4440_vm4, %v8331_v10, %v8327_v11  ;;  %3251 = vadd.xlane.f32.xlu0 %v1262_v30  ;;  %v2990_v12 = vpop.xlane.xlu1 %2989  ;;  %v1091_v11 = vld [vmem:[%s10301_s19 + $0x18d0] sm:$0xff] }
 0x706   : > { %v8553_v49 = vrot.slane %v2990_v12, %v10399_v21  ;;  %v2960_v36 = vpop.xlane.xlu0 %2959 }
 0x707   : > { %v8479_v3 = vrot.slane %v2960_v36, %v10393_v19 }
 0x708   : > { %v8554_v8 = vsel %vm4419_vm1, %v8553_v49, %v8549_v47  ;;  %3341 = vadd.xlane.f32.xlu1 %v1307_v4  ;;  %v1248_v49 = vld [vmem:[%s10301_s19 + $0x1db8] sm:$0xff] }
 0x709   : > { %v8480_v37 = vsel %vm4426_vm2, %v8479_v3, %v8475_v60  ;;  %3311 = vadd.xlane.f32.xlu0 %v1292_v14  ;;  %v3020_v48 = vpop.xlane.xlu1 %3019  ;;  %v1233_v3 = vld [vmem:[%s10301_s19 + $0x1d40] sm:$0xff] }
 0x70a   : > { %v8627_v44 = vrot.slane %v3020_v48, %v10396_v20  ;;  %v3018_v28 = vpop.xlane.xlu0 %3017 }
 0x70b   : > { %v8623_v34 = vrot.slane %v3018_v28, %v10390_v18 }
 0x70c   : > { %2909 = vadd.xlane.f32.xlu1 %v1091_v11 }
 0x70d   : > { %v8628_v50 = vsel %vm4412_vm0, %v8627_v44, %v8623_v34  ;;  %2877 = vadd.xlane.f32.xlu0 %v1075_v62  ;;  %v3154_v23 = vpop.xlane.xlu1 %3153  ;;  %v1278_v44 = vld [vmem:[%s10301_s19 + $0x1ea8] sm:$0xff]  ;;  %v1263_v62 = vld [vmem:[%s10301_s19 + $0x1e30] sm:$0xff] }
 0x70e   : > { %v8958_v1 = vrot.slane %v3154_v23, %v10407_v27  ;;  %v3122_v60 = vpop.xlane.xlu0 %3121 }
 0x70f   : > { %v8879_v29 = vrot.slane %v3122_v60, %v10407_v27  ;;  %v1293_v60 = vld [vmem:[%s10301_s19 + $0x1f20] sm:$0xff] }
 0x710   : > { %v13340_v51 = vsel %vm4433_vm3, %v8958_v1, %v8954_v45  ;;  %2969 = vadd.xlane.f32.xlu1 %v1121_v52  ;;  %v1308_v52 = vld [vmem:[%s10301_s19 + $0x1f98] sm:$0xff] }
 0x711   : > { %v8880_v47 = vsel %vm4433_vm3, %v8879_v29, %v8875_v42  ;;  %2939 = vadd.xlane.f32.xlu0 %v1106_v43  ;;  %v3214_v38 = vpop.xlane.xlu1 %3213 }
 0x712   : > { %v9106_v9 = vrot.slane %v3214_v38, %v10399_v21  ;;  %v3184_v41 = vpop.xlane.xlu0 %3183 }
 0x713   : > { %v9032_v57 = vrot.slane %v3184_v41, %v10393_v19 }
 0x714   : > { %v13348_v17 = vsel %vm4419_vm1, %v9106_v9, %v9102_v13  ;;  %3029 = vadd.xlane.f32.xlu1 %v1151_v2  ;;  %v1092_v9 = vld [vmem:[%s10301_s19 + $0x18d8] sm:$0xff] }
 0x715   : > { %v9033_v45 = vsel %vm4426_vm2, %v9032_v57, %v9028_v58  ;;  %2999 = vadd.xlane.f32.xlu0 %v1136_v59  ;;  %v3244_v42 = vpop.xlane.xlu1 %3243  ;;  %v1076_v57 = vld [vmem:[%s10301_s19 + $0x1858] sm:$0xff] }
 0x716   : > { %v9180_v24 = vrot.slane %v3244_v42, %v10396_v20  ;;  %v3242_v55 = vpop.xlane.xlu0 %3241 }
 0x717   : > { %v9176_v25 = vrot.slane %v3242_v55, %v10390_v18  ;;  %v1122_v55 = vld [vmem:[%s10301_s19 + $0x19c8] sm:$0xff] }
 0x718   : > { %3089 = vadd.xlane.f32.xlu1 %v1181_v63 }
 0x719   : > { %v9181_v61 = vsel %vm4412_vm0, %v9180_v24, %v9176_v25  ;;  %3059 = vadd.xlane.f32.xlu0 %v1166_v31  ;;  %v2932_v13 = vpop.xlane.xlu1 %2931 }
 0x71a   : > { %v8410_v32 = vrot.slane %v2932_v13, %v10404_v26  ;;  %v2902_v58 = vpop.xlane.xlu0 %2901  ;;  %v1107_v13 = vld [vmem:[%s10301_s19 + $0x1950] sm:$0xff] }
 0x71b   : > { %v8336_v30 = vrot.slane %v2902_v58, %v10420_v40  ;;  %v1152_v58 = vld [vmem:[%s10301_s19 + $0x1ab8] sm:$0xff] }
 0x71c   : > { %v13361_v10 = vsel %vm4440_vm4, %v8410_v32, %v8406_v22  ;;  %3163 = vadd.xlane.f32.xlu1 %v1218_v0 }
 0x71d   : > { %v13364_v12 = vsel %vm4447_vm5, %v8336_v30, %v8332_v56  ;;  %3131 = vadd.xlane.f32.xlu0 %v1202_v33  ;;  %v2992_v4 = vpop.xlane.xlu1 %2991 }
 0x71e   : > { %v8558_v36 = vrot.slane %v2992_v4, %v10393_v19  ;;  %v2962_v14 = vpop.xlane.xlu0 %2961  ;;  %v1137_v4 = vld [vmem:[%s10301_s19 + $0x1a40] sm:$0xff] }
 0x71f   : > { %v8484_v48 = vrot.slane %v2962_v14, %v10407_v27  ;;  %v1182_v14 = vld [vmem:[%s10301_s19 + $0x1ba8] sm:$0xff] }
 0x720   : > { %v13371_v11 = vsel %vm4426_vm2, %v8558_v36, %v8554_v8  ;;  %3223 = vadd.xlane.f32.xlu1 %v1248_v49 }
 0x721   : > { %v13374_v22 = vsel %vm4433_vm3, %v8484_v48, %v8480_v37  ;;  %3193 = vadd.xlane.f32.xlu0 %v1233_v3  ;;  %v3050_v56 = vpop.xlane.xlu1 %3049  ;;  %v1167_v48 = vld [vmem:[%s10301_s19 + $0x1b30] sm:$0xff] }
 0x722   : > { %v3022_v28 = vpop.xlane.xlu0 %3021  ;;  %v8702_v43 = vrot.slane %v3050_v56, %v10390_v18 }
 0x723   : > { %v8632_v34 = vrot.slane %v3022_v28, %v10399_v21 }
 0x724   : > { %3283 = vadd.xlane.f32.xlu1 %v1278_v44 }
 0x725   : > { %v13380_v23 = vsel %vm4419_vm1, %v8632_v34, %v8628_v50  ;;  %3253 = vadd.xlane.f32.xlu0 %v1263_v62  ;;  %v3124_v8 = vpop.xlane.xlu1 %3123  ;;  %v1219_v34 = vld [vmem:[%s10301_s19 + $0x1cd0] sm:$0xff] }
 0x726   : > { %v8884_v1 = vrot.slane %v3124_v8, %v10404_v26  ;;  %v3052_v37 = vpop.xlane.xlu0 %3051 }
 0x727   : > { %v8706_v29 = vrot.slane %v3052_v37, %v10396_v20 }
 0x728   : > { %v13388_v38 = vsel %vm4440_vm4, %v8884_v1, %v8880_v47  ;;  %3343 = vadd.xlane.f32.xlu1 %v1308_v52  ;;  %v1203_v1 = vld [vmem:[%s10301_s19 + $0x1c50] sm:$0xff] }
 0x729   : > { %v8707_v50 = vsel %vm4412_vm0, %v8706_v29, %v8702_v43  ;;  %3313 = vadd.xlane.f32.xlu0 %v1293_v60  ;;  %v3186_v2 = vpop.xlane.xlu1 %3185  ;;  %v1249_v43 = vld [vmem:[%s10301_s19 + $0x1dc0] sm:$0xff] }
 0x72a   : > { %v9037_v41 = vrot.slane %v3186_v2, %v10407_v27  ;;  %v3156_v59 = vpop.xlane.xlu0 %3155 }
 0x72b   : > { %v8963_v42 = vrot.slane %v3156_v59, %v10404_v26 }
 0x72c   : > { %v13396_v63 = vsel %vm4433_vm3, %v9037_v41, %v9033_v45  ;;  %2911 = vadd.xlane.f32.xlu1 %v1092_v9  ;;  %v1234_v9 = vld [vmem:[%s10301_s19 + $0x1d48] sm:$0xff] }
 0x72d   : > { %v13400_v47 = vsel %vm4440_vm4, %v8963_v42, %v13340_v51  ;;  %2879 = vadd.xlane.f32.xlu0 %v1076_v57  ;;  %v3246_v24 = vpop.xlane.xlu1 %3245  ;;  %v1279_v57 = vld [vmem:[%s10301_s19 + $0x1eb0] sm:$0xff] }
 0x72e   : > { %v9185_v31 = vrot.slane %v3246_v24, %v10399_v21  ;;  %v3216_v25 = vpop.xlane.xlu0 %3215 }
 0x72f   : > { %v9111_v0 = vrot.slane %v3216_v25, %v10393_v19 }
 0x730   : > { %v13407_v32 = vsel %vm4419_vm1, %v9185_v31, %v9181_v61  ;;  %2971 = vadd.xlane.f32.xlu1 %v1122_v55  ;;  %v1264_v55 = vld [vmem:[%s10301_s19 + $0x1e38] sm:$0xff] }
 0x731   : > { %v13411_v51 = vsel %vm4426_vm2, %v9111_v0, %v13348_v17  ;;  %2941 = vadd.xlane.f32.xlu0 %v1107_v13  ;;  %v3276_v45 = vpop.xlane.xlu1 %3275  ;;  %v1309_v13 = vld [vmem:[%s10301_s19 + $0x1fa0] sm:$0xff] }
 0x732   : > { %v9259_v33 = vrot.slane %v3276_v45, %v10396_v20  ;;  %v3274_v30 = vpop.xlane.xlu0 %3273  ;;  %v1294_v45 = vld [vmem:[%s10301_s19 + $0x1f28] sm:$0xff] }
 0x733   : > { %v9255_v49 = vrot.slane %v3274_v30, %v10390_v18 }
 0x734   : > { %3031 = vadd.xlane.f32.xlu1 %v1152_v58 }
 0x735   : > { %v13418_v61 = vsel %vm4412_vm0, %v9259_v33, %v9255_v49  ;;  %3001 = vadd.xlane.f32.xlu0 %v1137_v4  ;;  %v2934_v36 = vpop.xlane.xlu1 %2933  ;;  %v1093_v49 = vld [vmem:[%s10301_s19 + $0x18e0] sm:$0xff] }
 0x736   : > { %v8415_v17 = vrot.slane %v2934_v36, %v10420_v40  ;;  %v2904_v3 = vpop.xlane.xlu0 %2903 }
 0x737   : > { %v8341_v56 = vrot.slane %v2904_v3, %v10428_v46 }
 0x738   : > { %v13426_v44 = vsel %vm4447_vm5, %v8415_v17, %v13361_v10  ;;  %3091 = vadd.xlane.f32.xlu1 %v1182_v14  ;;  %v1077_v17 = vld [vmem:[%s10301_s19 + $0x1860] sm:$0xff] }
 0x739   : > { %v13430_v28 = vsel %vm4454_vm6, %v8341_v56, %v13364_v12  ;;  %3061 = vadd.xlane.f32.xlu0 %v1167_v48  ;;  %v2994_v62 = vpop.xlane.xlu1 %2993  ;;  %v1123_v56 = vld [vmem:[%s10301_s19 + $0x19d0] sm:$0xff] }
 0x73a   : > { %v8563_v8 = vrot.slane %v2994_v62, %v10407_v27  ;;  %v2964_v52 = vpop.xlane.xlu0 %2963 }
 0x73b   : > { %v8489_v37 = vrot.slane %v2964_v52, %v10404_v26 }
 0x73c   : > { %v13438_v10 = vsel %vm4433_vm3, %v8563_v8, %v13371_v11  ;;  %3165 = vadd.xlane.f32.xlu1 %v1219_v34  ;;  %v1108_v8 = vld [vmem:[%s10301_s19 + $0x1958] sm:$0xff] }
 0x73d   : > { %v13442_v12 = vsel %vm4440_vm4, %v8489_v37, %v13374_v22  ;;  %3133 = vadd.xlane.f32.xlu0 %v1203_v1  ;;  %v3054_v60 = vpop.xlane.xlu1 %3053  ;;  %v1153_v37 = vld [vmem:[%s10301_s19 + $0x1ac0] sm:$0xff] }
 0x73e   : > { %v8711_v29 = vrot.slane %v3054_v60, %v10399_v21  ;;  %v3024_v2 = vpop.xlane.xlu0 %3023 }
 0x73f   : > { %v8637_v41 = vrot.slane %v3024_v2, %v10393_v19 }
 0x740   : > { %v13449_v59 = vsel %vm4419_vm1, %v8711_v29, %v8707_v50  ;;  %3225 = vadd.xlane.f32.xlu1 %v1249_v43  ;;  %v1138_v29 = vld [vmem:[%s10301_s19 + $0x1a48] sm:$0xff] }
 0x741   : > { %v13453_v11 = vsel %vm4426_vm2, %v8637_v41, %v13380_v23  ;;  %3195 = vadd.xlane.f32.xlu0 %v1234_v9  ;;  %v3084_v22 = vpop.xlane.xlu1 %3083  ;;  %v1183_v41 = vld [vmem:[%s10301_s19 + $0x1bb0] sm:$0xff] }
 0x742   : > { %v8785_v42 = vrot.slane %v3084_v22, %v10396_v20  ;;  %v3082_v24 = vpop.xlane.xlu0 %3081 }
 0x743   : > { %v8781_v31 = vrot.slane %v3082_v24, %v10390_v18 }
 0x744   : > { %3285 = vadd.xlane.f32.xlu1 %v1279_v57  ;;  %v1168_v57 = vld [vmem:[%s10301_s19 + $0x1b38] sm:$0xff] }
 0x745   : > { %v13460_v50 = vsel %vm4412_vm0, %v8785_v42, %v8781_v31  ;;  %3255 = vadd.xlane.f32.xlu0 %v1264_v55  ;;  %v3158_v25 = vpop.xlane.xlu1 %3157 }
 0x746   : > { %v8968_v23 = vrot.slane %v3158_v25, %v10420_v40  ;;  %v3126_v0 = vpop.xlane.xlu0 %3125  ;;  %v1220_v25 = vld [vmem:[%s10301_s19 + $0x1cd8] sm:$0xff] }
 0x747   : > { %v8889_v58 = vrot.slane %v3126_v0, %v10420_v40  ;;  %v1204_v0 = vld [vmem:[%s10301_s19 + $0x1c58] sm:$0xff] }
 0x748   : > { %v13468_v33 = vsel %vm4447_vm5, %v8968_v23, %v13400_v47  ;;  %3345 = vadd.xlane.f32.xlu1 %v1309_v13 }
 0x749   : > { %v13472_v30 = vsel %vm4447_vm5, %v8889_v58, %v13388_v38  ;;  %3315 = vadd.xlane.f32.xlu0 %v1294_v45  ;;  %v3218_v4 = vpop.xlane.xlu1 %3217 }
 0x74a   : > { %v9116_v36 = vrot.slane %v3218_v4, %v10407_v27  ;;  %v3188_v14 = vpop.xlane.xlu0 %3187  ;;  %v1250_v4 = vld [vmem:[%s10301_s19 + $0x1dc8] sm:$0xff] }
 0x74b   : > { %v9042_v3 = vrot.slane %v3188_v14, %v10404_v26  ;;  %v1235_v14 = vld [vmem:[%s10301_s19 + $0x1d50] sm:$0xff] }
 0x74c   : > { %v13480_v47 = vsel %vm4433_vm3, %v9116_v36, %v13411_v51  ;;  %2913 = vadd.xlane.f32.xlu1 %v1093_v49 }
 0x74d   : > { %v13484_v38 = vsel %vm4440_vm4, %v9042_v3, %v13396_v63  ;;  %2881 = vadd.xlane.f32.xlu0 %v1077_v17  ;;  %v3278_v48 = vpop.xlane.xlu1 %3277 }
 0x74e   : > { %v9264_v62 = vrot.slane %v3278_v48, %v10399_v21  ;;  %v3248_v34 = vpop.xlane.xlu0 %3247  ;;  %v1280_v48 = vld [vmem:[%s10301_s19 + $0x1eb8] sm:$0xff] }
 0x74f   : > { %v9190_v52 = vrot.slane %v3248_v34, %v10393_v19  ;;  %v1265_v34 = vld [vmem:[%s10301_s19 + $0x1e40] sm:$0xff] }
 0x750   : > { %v13492_v51 = vsel %vm4419_vm1, %v9264_v62, %v13418_v61  ;;  %2973 = vadd.xlane.f32.xlu1 %v1123_v56 }
 0x751   : > { %v13496_v63 = vsel %vm4426_vm2, %v9190_v52, %v13407_v32  ;;  %2943 = vadd.xlane.f32.xlu0 %v1108_v8  ;;  %v3308_v1 = vpop.xlane.xlu1 %3307 }
 0x752   : > { %v9338_v60 = vrot.slane %v3308_v1, %v10396_v20  ;;  %v3306_v43 = vpop.xlane.xlu0 %3305  ;;  %v1310_v1 = vld [vmem:[%s10301_s19 + $0x1fa8] sm:$0xff] }
 0x753   : > { %v9334_v2 = vrot.slane %v3306_v43, %v10390_v18  ;;  %v1295_v43 = vld [vmem:[%s10301_s19 + $0x1f30] sm:$0xff] }
 0x754   : > { %3033 = vadd.xlane.f32.xlu1 %v1153_v37 }
 0x755   : > { %v13503_v61 = vsel %vm4412_vm0, %v9338_v60, %v9334_v2  ;;  %3003 = vadd.xlane.f32.xlu0 %v1138_v29  ;;  %v2936_v9 = vpop.xlane.xlu1 %2935 }
 0x756   : > { %v8420_v32 = vrot.slane %v2936_v9, %v10428_v46  ;;  %v2906_v22 = vpop.xlane.xlu0 %2905  ;;  %v1094_v9 = vld [vmem:[%s10301_s19 + $0x18e8] sm:$0xff] }
 0x757   : > { %v8346_v42 = vrot.slane %v2906_v22, %v10438_v54  ;;  %v1078_v22 = vld [vmem:[%s10301_s19 + $0x1868] sm:$0xff] }
 0x758   : > { %v13511_v24 = vsel %vm4454_vm6, %v8420_v32, %v13426_v44  ;;  %3093 = vadd.xlane.f32.xlu1 %v1183_v41 }
 0x759   : > { %v13515_v55 = vsel %vm4461_vm7, %v8346_v42, %v13430_v28  ;;  %3063 = vadd.xlane.f32.xlu0 %v1168_v57  ;;  %v2996_v31 = vpop.xlane.xlu1 %2995 }
 0x75a   : > { %v8568_v13 = vrot.slane %v2996_v31, %v10404_v26  ;;  %v2966_v23 = vpop.xlane.xlu0 %2965  ;;  %v1124_v31 = vld [vmem:[%s10301_s19 + $0x19d8] sm:$0xff] }
 0x75b   : > { %v8494_v45 = vrot.slane %v2966_v23, %v10420_v40  ;;  %v1109_v23 = vld [vmem:[%s10301_s19 + $0x1960] sm:$0xff] }
 0x75c   : > { %v13523_v44 = vsel %vm4440_vm4, %v8568_v13, %v13438_v10  ;;  %3167 = vadd.xlane.f32.xlu1 %v1220_v25 }
 0x75d   : > { %v13527_v28 = vsel %vm4447_vm5, %v8494_v45, %v13442_v12  ;;  %3135 = vadd.xlane.f32.xlu0 %v1204_v0  ;;  %v3056_v58 = vpop.xlane.xlu1 %3055 }
 0x75e   : > { %v8716_v49 = vrot.slane %v3056_v58, %v10393_v19  ;;  %v3026_v36 = vpop.xlane.xlu0 %3025  ;;  %v1154_v58 = vld [vmem:[%s10301_s19 + $0x1ac8] sm:$0xff] }
 0x75f   : > { %v8642_v17 = vrot.slane %v3026_v36, %v10407_v27  ;;  %v1139_v36 = vld [vmem:[%s10301_s19 + $0x1a50] sm:$0xff] }
 0x760   : > { %v13535_v10 = vsel %vm4426_vm2, %v8716_v49, %v13449_v59  ;;  %3227 = vadd.xlane.f32.xlu1 %v1250_v4 }
 0x761   : > { %v13539_v12 = vsel %vm4433_vm3, %v8642_v17, %v13453_v11  ;;  %3197 = vadd.xlane.f32.xlu0 %v1235_v14  ;;  %v3128_v3 = vpop.xlane.xlu1 %3127 }
 0x762   : > { %v8894_v56 = vrot.slane %v3128_v3, %v10428_v46  ;;  %v3086_v62 = vpop.xlane.xlu0 %3085  ;;  %v1184_v3 = vld [vmem:[%s10301_s19 + $0x1bb8] sm:$0xff] }
 0x763   : > { %v8790_v8 = vrot.slane %v3086_v62, %v10399_v21 }
 0x764   : > { %v13547_v59 = vsel %vm4454_vm6, %v8894_v56, %v13472_v30  ;;  %3287 = vadd.xlane.f32.xlu1 %v1280_v48  ;;  %v1169_v56 = vld [vmem:[%s10301_s19 + $0x1b40] sm:$0xff] }
 0x765   : > { %v13551_v11 = vsel %vm4419_vm1, %v8790_v8, %v13460_v50  ;;  %3257 = vadd.xlane.f32.xlu0 %v1265_v34  ;;  %v3190_v52 = vpop.xlane.xlu1 %3189  ;;  %v1221_v8 = vld [vmem:[%s10301_s19 + $0x1ce0] sm:$0xff] }
 0x766   : > { %v9047_v37 = vrot.slane %v3190_v52, %v10420_v40  ;;  %v3160_v60 = vpop.xlane.xlu0 %3159 }
 0x767   : > { %v8973_v29 = vrot.slane %v3160_v60, %v10428_v46 }
 0x768   : > { %v13559_v30 = vsel %vm4447_vm5, %v9047_v37, %v13484_v38  ;;  %3347 = vadd.xlane.f32.xlu1 %v1310_v1  ;;  %v1205_v37 = vld [vmem:[%s10301_s19 + $0x1c60] sm:$0xff] }
 0x769   : > { %v13563_v50 = vsel %vm4454_vm6, %v8973_v29, %v13468_v33  ;;  %3317 = vadd.xlane.f32.xlu0 %v1295_v43  ;;  %v3250_v2 = vpop.xlane.xlu1 %3249  ;;  %v1251_v29 = vld [vmem:[%s10301_s19 + $0x1dd0] sm:$0xff] }
 0x76a   : > { %v9195_v41 = vrot.slane %v3250_v2, %v10407_v27  ;;  %v3220_v32 = vpop.xlane.xlu0 %3219 }
 0x76b   : > { %v9121_v57 = vrot.slane %v3220_v32, %v10404_v26  ;;  %v1236_v32 = vld [vmem:[%s10301_s19 + $0x1d58] sm:$0xff] }
 0x76c   : > { %v13571_v38 = vsel %vm4433_vm3, %v9195_v41, %v13496_v63  ;;  %2915 = vadd.xlane.f32.xlu1 %v1094_v9 }
 0x76d   : > { %v13575_v33 = vsel %vm4440_vm4, %v9121_v57, %v13480_v47  ;;  %2883 = vadd.xlane.f32.xlu0 %v1078_v22  ;;  %v3310_v42 = vpop.xlane.xlu1 %3309 }
 0x76e   : > { %v9343_v25 = vrot.slane %v3310_v42, %v10399_v21  ;;  %v3280_v13 = vpop.xlane.xlu0 %3279 }
 0x76f   : > { %v9269_v0 = vrot.slane %v3280_v13, %v10393_v19 }
 0x770   : > { %v13583_v63 = vsel %vm4419_vm1, %v9343_v25, %v13503_v61  ;;  %2975 = vadd.xlane.f32.xlu1 %v1124_v31 }
 0x771   : > { %v13587_v47 = vsel %vm4426_vm2, %v9269_v0, %v13492_v51  ;;  %2945 = vadd.xlane.f32.xlu0 %v1109_v23  ;;  %v3340_v45 = vpop.xlane.xlu1 %3339  ;;  %v1281_v23 = vld [vmem:[%s10301_s19 + $0x1ec0] sm:$0xff] }
 0x772   : > { %v9417_v4 = vrot.slane %v3340_v45, %v10396_v20  ;;  %v3338_v49 = vpop.xlane.xlu0 %3337  ;;  %v1266_v45 = vld [vmem:[%s10301_s19 + $0x1e48] sm:$0xff] }
 0x773   : > { %v9413_v14 = vrot.slane %v3338_v49, %v10390_v18 }
 0x774   : > { %3035 = vadd.xlane.f32.xlu1 %v1154_v58 }
 0x775   : > { %v13594_v61 = vsel %vm4412_vm0, %v9417_v4, %v9413_v14  ;;  %3005 = vadd.xlane.f32.xlu0 %v1139_v36  ;;  %v2908_v17 = vpop.xlane.xlu1 %2907  ;;  %vm14446_vm0 = vcmask 851712  }
 0x776   : > { %v8351_v51 = vrot.slane %v2908_v17, %v10435_v53  ;;  %v2876_v48 = vpop.xlane.xlu0 %2875  ;;  %v1311_v17 = vld [vmem:[%s10301_s19 + $0x1fb0] sm:$0xff]  ;;  %vm14452_vm11 = vmmov %vm14446_vm0 }
 0x777   : > { %v8272_v62 = vrot.slane %v2876_v48, %v10435_v53  ;;  %v1296_v48 = vld [vmem:[%s10301_s19 + $0x1f38] sm:$0xff] }
 0x778   : > { %v13602_v20 = vsel %vm4468_vm8, %v8351_v51, %v13515_v55  ;;  %3095 = vadd.xlane.f32.xlu1 %v1184_v3 }
 0x779   : > { %v13606_v18 = vsel %vm4468_vm8, %v8272_v62, %v13244_v39  ;;  %3065 = vadd.xlane.f32.xlu0 %v1169_v56  ;;  %v2968_v34 = vpop.xlane.xlu1 %2967 }
 0x77a   : > { %v8499_v52 = vrot.slane %v2968_v34, %v10428_v46  ;;  %v2938_v1 = vpop.xlane.xlu0 %2937  ;;  %v1095_v34 = vld [vmem:[%s10301_s19 + $0x18f0] sm:$0xff] }
 0x77b   : > { %v8425_v60 = vrot.slane %v2938_v1, %v10438_v54  ;;  %v1079_v1 = vld [vmem:[%s10301_s19 + $0x1870] sm:$0xff] }
 0x77c   : > { %v13614_v43 = vsel %vm4454_vm6, %v8499_v52, %v13527_v28  ;;  %3169 = vadd.xlane.f32.xlu1 %v1221_v8 }
 0x77d   : > { %v13618_v55 = vsel %vm4461_vm7, %v8425_v60, %v13511_v24  ;;  %3137 = vadd.xlane.f32.xlu0 %v1205_v37  ;;  %v3028_v39 = vpop.xlane.xlu1 %3027  ;;  %v10118_v24 = vld [vmem:[%s14370_s3] ss:$0 sm:$0xff] }
 0x77e   : > { %v8647_v2 = vrot.slane %v3028_v39, %v10404_v26  ;;  %v10027_v9 = vpop.f32.mrf.mxu0  ;;  %v2998_v41 = vpop.xlane.xlu0 %2997  ;;  %v1125_v39 = vld [vmem:[%s10301_s19 + $0x19e0] sm:$0xff] }
 0x77f   : > { %v8573_v22 = vrot.slane %v2998_v41, %v10420_v40  ;;  %v9683_v57 = vadd.f32 %v10118_v24, %v10027_v9  ;;  %v1110_v9 = vld [vmem:[%s10301_s19 + $0x1968] sm:$0xff] }
 0x780   : > { %v13626_v28 = vsel %vm4440_vm4, %v8647_v2, %v13539_v12  ;;  %v9677_v42 = vpop.f32.mrf.mxu0  ;;  %3229 = vadd.xlane.f32.xlu1 %v1251_v29 }
 0x781   : > { %v13633_v31 = vsel %vm4447_vm5, %v8573_v22, %v13523_v44  ;;  %v9678_v25 = vadd.f32 %v10118_v24, %v9677_v42  ;;  %3199 = vadd.xlane.f32.xlu0 %v1236_v32  ;;  %v3088_v13 = vpop.xlane.xlu1 %3087  ;;  %v9701_v49 = vmax.f32 %v9683_v57, 0.0  ;;  %v1155_v22 = vld [vmem:[%s10301_s19 + $0x1ad0] sm:$0xff]  ;;  %v1140_v42 = vld [vmem:[%s10301_s19 + $0x1a58] sm:$0xff] }
 0x782   : > { %v8795_v0 = vrot.slane %v3088_v13, %v10393_v19  ;;  %v3058_v12 = vpop.xlane.xlu0 %3057 }
 0x783   : > { %v9700_v58 = vmax.f32 %v9678_v25, 0.0  ;;  %v8721_v4 = vrot.slane %v3058_v12, %v10407_v27  ;;  %v1170_v12 = vld [vmem:[%s10301_s19 + $0x1b48] sm:$0xff] }
 0x784   : > { %v13641_v36 = vsel %vm4426_vm2, %v8795_v0, %v13551_v11  ;;  %3289 = vadd.xlane.f32.xlu1 %v1281_v23  ;;  %v1185_v23 = vld [vmem:[%s10301_s19 + $0x1bc0] sm:$0xff] }
 0x785   : > { %v13645_v44 = vsel %vm4433_vm3, %v8721_v4, %v13535_v10  ;;  %10069 = vmatprep.mubr.f32.mxu1 %v9700_v58  ;;  %3259 = vadd.xlane.f32.xlu0 %v1266_v45  ;;  %v3162_v14 = vpop.xlane.xlu1 %3161  ;;  %v1222_v4 = vld [vmem:[%s10301_s19 + $0x1ce8] sm:$0xff] }
 0x786   : > { %v8978_v3 = vrot.slane %v3162_v14, %v10438_v54  ;;  %10070 = vmatmul.mubr.f32.gmra.mxu1 %v9701_v49  ;;  %v3130_v51 = vpop.xlane.xlu0 %3129 }
 0x787   : > { %v8899_v56 = vrot.slane %v3130_v51, %v10438_v54 }
 0x788   : > { %v13653_v11 = vsel %vm4461_vm7, %v8978_v3, %v13563_v50  ;;  %3349 = vadd.xlane.f32.xlu1 %v1311_v17  ;;  %v1206_v17 = vld [vmem:[%s10301_s19 + $0x1c68] sm:$0xff] }
 0x789   : > { %v13657_v10 = vsel %vm4461_vm7, %v8899_v56, %v13547_v59  ;;  %3319 = vadd.xlane.f32.xlu0 %v1296_v48  ;;  %v3222_v62 = vpop.xlane.xlu1 %3221  ;;  %v1252_v48 = vld [vmem:[%s10301_s19 + $0x1dd8] sm:$0xff] }
 0x78a   : > { %v9126_v8 = vrot.slane %v3222_v62, %v10420_v40  ;;  %v3192_v52 = vpop.xlane.xlu0 %3191 }
 0x78b   : > { %v9052_v37 = vrot.slane %v3192_v52, %v10428_v46 }
 0x78c   : > { %v13665_v50 = vsel %vm4447_vm5, %v9126_v8, %v13575_v33  ;;  %2917 = vadd.xlane.f32.xlu1 %v1095_v34  ;;  %v1237_v34 = vld [vmem:[%s10301_s19 + $0x1d60] sm:$0xff] }
 0x78d   : > { %v13669_v59 = vsel %vm4454_vm6, %v9052_v37, %v13559_v30  ;;  %2885 = vadd.xlane.f32.xlu0 %v1079_v1  ;;  %v3282_v60 = vpop.xlane.xlu1 %3281  ;;  %v1282_v1 = vld [vmem:[%s10301_s19 + $0x1ec8] sm:$0xff] }
 0x78e   : > { %v9274_v29 = vrot.slane %v3282_v60, %v10407_v27  ;;  %v3252_v2 = vpop.xlane.xlu0 %3251 }
 0x78f   : > { %v9200_v41 = vrot.slane %v3252_v2, %v10404_v26 }
 0x790   : > { %v13677_v33 = vsel %vm4433_vm3, %v9274_v29, %v13587_v47  ;;  %2977 = vadd.xlane.f32.xlu1 %v1125_v39  ;;  %v1267_v39 = vld [vmem:[%s10301_s19 + $0x1e50] sm:$0xff] }
 0x791   : > { %v13681_v30 = vsel %vm4440_vm4, %v9200_v41, %v13571_v38  ;;  %2947 = vadd.xlane.f32.xlu0 %v1110_v9  ;;  %v3342_v32 = vpop.xlane.xlu1 %3341  ;;  %v1312_v9 = vld [vmem:[%s10301_s19 + $0x1fb8] sm:$0xff] }
 0x792   : > { %v9422_v24 = vrot.slane %v3342_v32, %v10399_v21  ;;  %v3312_v57 = vpop.xlane.xlu0 %3311 }
 0x793   : > { %v9348_v25 = vrot.slane %v3312_v57, %v10393_v19 }
 0x794   : > { %v13689_v47 = vsel %vm4419_vm1, %v9422_v24, %v13594_v61  ;;  %3037 = vadd.xlane.f32.xlu1 %v1155_v22  ;;  %v1297_v22 = vld [vmem:[%s10301_s19 + $0x1f40] sm:$0xff]  ;;  %vm14447_vm1 = vmmov %vm14446_vm0 }
 0x795   : > { %v13693_v38 = vsel %vm4426_vm2, %v9348_v25, %v13583_v63  ;;  %3007 = vadd.xlane.f32.xlu0 %v1140_v42  ;;  %v2910_v13 = vpop.xlane.xlu1 %2909  ;;  %v1096_v42 = vld [vmem:[%s10301_s19 + $0x18f8] sm:$0xff] }
 0x796   : > { %v8356_v21 = vrot.slane %v2910_v13, %v10456_v7  ;;  %v2878_v0 = vpop.xlane.xlu0 %2877 }
 0x797   : > { %v8277_v45 = vrot.slane %v2878_v0, %v10456_v7 }
 0x798   : > { %v13701_v61 = vsel %vm4475_vm9, %v8356_v21, %v13602_v20  ;;  %3097 = vadd.xlane.f32.xlu1 %v1185_v23  ;;  %v1080_v23 = vld [vmem:[%s10301_s19 + $0x1878] sm:$0xff] }
 0x799   : > { %v13705_v63 = vsel %vm4475_vm9, %v8277_v45, %v13606_v18  ;;  %3067 = vadd.xlane.f32.xlu0 %v1170_v12  ;;  %v2970_v58 = vpop.xlane.xlu1 %2969  ;;  %v1126_v12 = vld [vmem:[%s10301_s19 + $0x19e8] sm:$0xff] }
 0x79a   : > { %v8504_v49 = vrot.slane %v2970_v58, %v10438_v54  ;;  %v2940_v14 = vpop.xlane.xlu0 %2939 }
 0x79b   : > { %v8430_v3 = vrot.slane %v2940_v14, %v10435_v53 }
 0x79c   : > { %v13713_v20 = vsel %vm4461_vm7, %v8504_v49, %v13614_v43  ;;  %3171 = vadd.xlane.f32.xlu1 %v1222_v4  ;;  %v1111_v4 = vld [vmem:[%s10301_s19 + $0x1970] sm:$0xff] }
 0x79d   : > { %v13717_v18 = vsel %vm4468_vm8, %v8430_v3, %v13618_v55  ;;  %3139 = vadd.xlane.f32.xlu0 %v1206_v17  ;;  %v3030_v51 = vpop.xlane.xlu1 %3029  ;;  %v1156_v17 = vld [vmem:[%s10301_s19 + $0x1ad8] sm:$0xff] }
 0x79e   : > { %v8652_v56 = vrot.slane %v3030_v51, %v10420_v40  ;;  %v3000_v62 = vpop.xlane.xlu0 %2999 }
 0x79f   : > { %v8578_v8 = vrot.slane %v3000_v62, %v10428_v46 }
 0x7a0   : > { %v13725_v43 = vsel %vm4447_vm5, %v8652_v56, %v13626_v28  ;;  %3231 = vadd.xlane.f32.xlu1 %v1252_v48  ;;  %v1141_v48 = vld [vmem:[%s10301_s19 + $0x1a60] sm:$0xff] }
 0x7a1   : > { %v13729_v55 = vsel %vm4454_vm6, %v8578_v8, %v13633_v31  ;;  %3201 = vadd.xlane.f32.xlu0 %v1237_v34  ;;  %v3090_v52 = vpop.xlane.xlu1 %3089  ;;  %v1186_v34 = vld [vmem:[%s10301_s19 + $0x1bc8] sm:$0xff] }
 0x7a2   : > { %v8800_v37 = vrot.slane %v3090_v52, %v10407_v27  ;;  %v3060_v60 = vpop.xlane.xlu0 %3059  ;;  %v1171_v52 = vld [vmem:[%s10301_s19 + $0x1b50] sm:$0xff] }
 0x7a3   : > { %v8726_v29 = vrot.slane %v3060_v60, %v10404_v26  ;;  %v1223_v60 = vld [vmem:[%s10301_s19 + $0x1cf0] sm:$0xff] }
 0x7a4   : > { %v13737_v28 = vsel %vm4433_vm3, %v8800_v37, %v13641_v36  ;;  %3291 = vadd.xlane.f32.xlu1 %v1282_v1 }
 0x7a5   : > { %v13741_v31 = vsel %vm4440_vm4, %v8726_v29, %v13645_v44  ;;  %3261 = vadd.xlane.f32.xlu0 %v1267_v39  ;;  %v3164_v2 = vpop.xlane.xlu1 %3163 }
 0x7a6   : > { %v8983_v41 = vrot.slane %v3164_v2, %v10435_v53  ;;  %v3132_v32 = vpop.xlane.xlu0 %3131  ;;  %v1207_v2 = vld [vmem:[%s10301_s19 + $0x1c70] sm:$0xff] }
 0x7a7   : > { %v8904_v24 = vrot.slane %v3132_v32, %v10435_v53  ;;  %v1253_v32 = vld [vmem:[%s10301_s19 + $0x1de0] sm:$0xff] }
 0x7a8   : > { %v13749_v36 = vsel %vm4468_vm8, %v8983_v41, %v13653_v11  ;;  %3351 = vadd.xlane.f32.xlu1 %v1312_v9 }
 0x7a9   : > { %v13753_v44 = vsel %vm4468_vm8, %v8904_v24, %v13657_v10  ;;  %3321 = vadd.xlane.f32.xlu0 %v1297_v22  ;;  %v3224_v57 = vpop.xlane.xlu1 %3223 }
 0x7aa   : > { %v9131_v25 = vrot.slane %v3224_v57, %v10428_v46  ;;  %v3194_v13 = vpop.xlane.xlu0 %3193  ;;  %v1238_v57 = vld [vmem:[%s10301_s19 + $0x1d68] sm:$0xff] }
 0x7ab   : > { %v9057_v21 = vrot.slane %v3194_v13, %v10438_v54  ;;  %v1283_v13 = vld [vmem:[%s10301_s19 + $0x1ed0] sm:$0xff] }
 0x7ac   : > { %v13761_v11 = vsel %vm4454_vm6, %v9131_v25, %v13665_v50  ;;  %2919 = vadd.xlane.f32.xlu1 %v1096_v42 }
 0x7ad   : > { %v13765_v10 = vsel %vm4461_vm7, %v9057_v21, %v13669_v59  ;;  %2887 = vadd.xlane.f32.xlu0 %v1080_v23  ;;  %v3284_v0 = vpop.xlane.xlu1 %3283 }
 0x7ae   : > { %v9279_v45 = vrot.slane %v3284_v0, %v10404_v26  ;;  %v3254_v58 = vpop.xlane.xlu0 %3253  ;;  %v1268_v0 = vld [vmem:[%s10301_s19 + $0x1e58] sm:$0xff] }
 0x7af   : > { %v9205_v49 = vrot.slane %v3254_v58, %v10420_v40  ;;  %v1313_v58 = vld [vmem:[%s10301_s19 + $0x1fc0] sm:$0xff] }
 0x7b0   : > { %v13773_v50 = vsel %vm4440_vm4, %v9279_v45, %v13677_v33  ;;  %2979 = vadd.xlane.f32.xlu1 %v1126_v12 }
 0x7b1   : > { %v13777_v59 = vsel %vm4447_vm5, %v9205_v49, %v13681_v30  ;;  %2949 = vadd.xlane.f32.xlu0 %v1111_v4  ;;  %v3344_v14 = vpop.xlane.xlu1 %3343 }
 0x7b2   : > { %v9427_v3 = vrot.slane %v3344_v14, %v10393_v19  ;;  %v3314_v51 = vpop.xlane.xlu0 %3313  ;;  %v1298_v14 = vld [vmem:[%s10301_s19 + $0x1f48] sm:$0xff] }
 0x7b3   : > { %v9353_v56 = vrot.slane %v3314_v51, %v10407_v27  ;;  %v1127_v51 = vld [vmem:[%s10301_s19 + $0x19f0] sm:$0xff] }
 0x7b4   : > { %v13785_v33 = vsel %vm4426_vm2, %v9427_v3, %v13689_v47  ;;  %3039 = vadd.xlane.f32.xlu1 %v1156_v17  ;;  %vm14448_vm2 = vmmov %vm14446_vm0 }
 0x7b5   : > { %v13789_v30 = vsel %vm4433_vm3, %v9353_v56, %v13693_v38  ;;  %3009 = vadd.xlane.f32.xlu0 %v1141_v48  ;;  %v2912_v62 = vpop.xlane.xlu1 %2911 }
 0x7b6   : > { %v8361_v19 = vrot.slane %v2912_v62, %v10453_v6  ;;  %v2880_v8 = vpop.xlane.xlu0 %2879  ;;  %v1112_v62 = vld [vmem:[%s10301_s19 + $0x1978] sm:$0xff] }
 0x7b7   : > { %v8282_v1 = vrot.slane %v2880_v8, %v10453_v6  ;;  %v1157_v8 = vld [vmem:[%s10301_s19 + $0x1ae0] sm:$0xff] }
 0x7b8   : > { %v13797_v47 = vsel %vm4482_vm10, %v8361_v19, %v13701_v61  ;;  %3099 = vadd.xlane.f32.xlu1 %v1186_v34 }
 0x7b9   : > { %v13801_v38 = vsel %vm4482_vm10, %v8282_v1, %v13705_v63  ;;  %3069 = vadd.xlane.f32.xlu0 %v1171_v52  ;;  %v2972_v37 = vpop.xlane.xlu1 %2971 }
 0x7ba   : > { %v8509_v39 = vrot.slane %v2972_v37, %v10435_v53  ;;  %v2942_v29 = vpop.xlane.xlu0 %2941  ;;  %v1142_v37 = vld [vmem:[%s10301_s19 + $0x1a68] sm:$0xff] }
 0x7bb   : > { %v8435_v9 = vrot.slane %v2942_v29, %v10456_v7  ;;  %v1187_v29 = vld [vmem:[%s10301_s19 + $0x1bd0] sm:$0xff] }
 0x7bc   : > { %v13809_v61 = vsel %vm4468_vm8, %v8509_v39, %v13713_v20  ;;  %3173 = vadd.xlane.f32.xlu1 %v1223_v60 }
 0x7bd   : > { %v13813_v63 = vsel %vm4475_vm9, %v8435_v9, %v13717_v18  ;;  %3141 = vadd.xlane.f32.xlu0 %v1207_v2  ;;  %v3032_v41 = vpop.xlane.xlu1 %3031 }
 0x7be   : > { %v8657_v22 = vrot.slane %v3032_v41, %v10428_v46  ;;  %v3002_v24 = vpop.xlane.xlu0 %3001  ;;  %v1172_v41 = vld [vmem:[%s10301_s19 + $0x1b58] sm:$0xff] }
 0x7bf   : > { %v8583_v42 = vrot.slane %v3002_v24, %v10438_v54  ;;  %v1224_v24 = vld [vmem:[%s10301_s19 + $0x1cf8] sm:$0xff] }
 0x7c0   : > { %v13821_v20 = vsel %vm4454_vm6, %v8657_v22, %v13725_v43  ;;  %3233 = vadd.xlane.f32.xlu1 %v1253_v32 }
 0x7c1   : > { %v13825_v18 = vsel %vm4461_vm7, %v8583_v42, %v13729_v55  ;;  %3203 = vadd.xlane.f32.xlu0 %v1238_v57  ;;  %v3092_v25 = vpop.xlane.xlu1 %3091  ;;  %v1208_v42 = vld [vmem:[%s10301_s19 + $0x1c78] sm:$0xff] }
 0x7c2   : > { %v8805_v23 = vrot.slane %v3092_v25, %v10404_v26  ;;  %v3062_v21 = vpop.xlane.xlu0 %3061 }
 0x7c3   : > { %v8731_v12 = vrot.slane %v3062_v21, %v10420_v40 }
 0x7c4   : > { %v13833_v43 = vsel %vm4440_vm4, %v8805_v23, %v13737_v28  ;;  %3293 = vadd.xlane.f32.xlu1 %v1283_v13  ;;  %v1254_v23 = vld [vmem:[%s10301_s19 + $0x1de8] sm:$0xff] }
 0x7c5   : > { %v13837_v55 = vsel %vm4447_vm5, %v8731_v12, %v13741_v31  ;;  %3263 = vadd.xlane.f32.xlu0 %v1268_v0  ;;  %v3166_v45 = vpop.xlane.xlu1 %3165  ;;  %v1239_v12 = vld [vmem:[%s10301_s19 + $0x1d70] sm:$0xff] }
 0x7c6   : > { %v8988_v4 = vrot.slane %v3166_v45, %v10456_v7  ;;  %v3134_v49 = vpop.xlane.xlu0 %3133 }
 0x7c7   : > { %v8909_v17 = vrot.slane %v3134_v49, %v10456_v7 }
 0x7c8   : > { %v13845_v28 = vsel %vm4475_vm9, %v8988_v4, %v13749_v36  ;;  %3353 = vadd.xlane.f32.xlu1 %v1313_v58  ;;  %v1284_v4 = vld [vmem:[%s10301_s19 + $0x1ed8] sm:$0xff] }
 0x7c9   : > { %v13849_v31 = vsel %vm4475_vm9, %v8909_v17, %v13753_v44  ;;  %3323 = vadd.xlane.f32.xlu0 %v1298_v14  ;;  %v3226_v3 = vpop.xlane.xlu1 %3225  ;;  %v1269_v17 = vld [vmem:[%s10301_s19 + $0x1e60] sm:$0xff] }
 0x7ca   : > { %v9136_v48 = vrot.slane %v3226_v3, %v10438_v54  ;;  %v3196_v56 = vpop.xlane.xlu0 %3195 }
 0x7cb   : > { %v9062_v34 = vrot.slane %v3196_v56, %v10435_v53 }
 0x7cc   : > { %v13857_v36 = vsel %vm4461_vm7, %v9136_v48, %v13761_v11  ;;  %2981 = vadd.xlane.f32.xlu1 %v1127_v51  ;;  %v1314_v48 = vld [vmem:[%s10301_s19 + $0x1fc8] sm:$0xff] }
 0x7cd   : > { %v13861_v44 = vsel %vm4468_vm8, %v9062_v34, %v13765_v10  ;;  %2951 = vadd.xlane.f32.xlu0 %v1112_v62  ;;  %v3286_v19 = vpop.xlane.xlu1 %3285  ;;  %v1299_v34 = vld [vmem:[%s10301_s19 + $0x1f50] sm:$0xff] }
 0x7ce   : > { %v9284_v52 = vrot.slane %v3286_v19, %v10420_v40  ;;  %v3256_v1 = vpop.xlane.xlu0 %3255 }
 0x7cf   : > { %v9210_v60 = vrot.slane %v3256_v1, %v10428_v46 }
 0x7d0   : > { %v13869_v11 = vsel %vm4447_vm5, %v9284_v52, %v13773_v50  ;;  %3041 = vadd.xlane.f32.xlu1 %v1157_v8  ;;  %v1143_v52 = vld [vmem:[%s10301_s19 + $0x1a70] sm:$0xff] }
 0x7d1   : > { %v13873_v10 = vsel %vm4454_vm6, %v9210_v60, %v13777_v59  ;;  %3011 = vadd.xlane.f32.xlu0 %v1142_v37  ;;  %v3346_v39 = vpop.xlane.xlu1 %3345  ;;  %v1128_v60 = vld [vmem:[%s10301_s19 + $0x19f8] sm:$0xff] }
 0x7d2   : > { %v9432_v2 = vrot.slane %v3346_v39, %v10407_v27  ;;  %v3316_v9 = vpop.xlane.xlu0 %3315 }
 0x7d3   : > { %v9358_v32 = vrot.slane %v3316_v9, %v10404_v26 }
 0x7d4   : > { %v13881_v50 = vsel %vm4433_vm3, %v9432_v2, %v13785_v33  ;;  %3101 = vadd.xlane.f32.xlu1 %v1187_v29  ;;  %v1173_v2 = vld [vmem:[%s10301_s19 + $0x1b60] sm:$0xff]  ;;  %vm14449_vm3 = vmmov %vm14446_vm0 }
 0x7d5   : > { %v13885_v59 = vsel %vm4440_vm4, %v9358_v32, %v13789_v30  ;;  %3071 = vadd.xlane.f32.xlu0 %v1172_v41  ;;  %v2914_v22 = vpop.xlane.xlu1 %2913  ;;  %v1158_v32 = vld [vmem:[%s10301_s19 + $0x1ae8] sm:$0xff] }
 0x7d6   : > { %v8366_v27 = vrot.slane %v2914_v22, %v10466_v16  ;;  %v2882_v57 = vpop.xlane.xlu0 %2881 }
 0x7d7   : > { %v8287_v25 = vrot.slane %v2882_v57, %v10466_v16 }
 0x7d8   : > { %v13893_v33 = vsel %vm14446_vm0, %v8366_v27, %v13797_v47  ;;  %3175 = vadd.xlane.f32.xlu1 %v1224_v24  ;;  %v1240_v27 = vld [vmem:[%s10301_s19 + $0x1d78] sm:$0xff] }
 0x7d9   : > { %v13897_v30 = vsel %vm14447_vm1, %v8287_v25, %v13801_v38  ;;  %3143 = vadd.xlane.f32.xlu0 %v1208_v42  ;;  %v2974_v13 = vpop.xlane.xlu1 %2973  ;;  %v1188_v25 = vld [vmem:[%s10301_s19 + $0x1bd8] sm:$0xff] }
 0x7da   : > { %v8514_v21 = vrot.slane %v2974_v13, %v10456_v7  ;;  %v2944_v0 = vpop.xlane.xlu0 %2943 }
 0x7db   : > { %v8440_v45 = vrot.slane %v2944_v0, %v10453_v6 }
 0x7dc   : > { %v13905_v47 = vsel %vm4475_vm9, %v8514_v21, %v13809_v61  ;;  %3235 = vadd.xlane.f32.xlu1 %v1254_v23  ;;  %v1270_v21 = vld [vmem:[%s10301_s19 + $0x1e68] sm:$0xff] }
 0x7dd   : > { %v13909_v38 = vsel %vm4482_vm10, %v8440_v45, %v13813_v63  ;;  %3205 = vadd.xlane.f32.xlu0 %v1239_v12  ;;  %v3034_v58 = vpop.xlane.xlu1 %3033  ;;  %v1255_v45 = vld [vmem:[%s10301_s19 + $0x1df0] sm:$0xff] }
 0x7de   : > { %v8662_v49 = vrot.slane %v3034_v58, %v10438_v54  ;;  %v3004_v14 = vpop.xlane.xlu0 %3003 }
 0x7df   : > { %v8588_v3 = vrot.slane %v3004_v14, %v10435_v53 }
 0x7e0   : > { %v13917_v61 = vsel %vm4461_vm7, %v8662_v49, %v13821_v20  ;;  %3295 = vadd.xlane.f32.xlu1 %v1284_v4  ;;  %v1300_v49 = vld [vmem:[%s10301_s19 + $0x1f58] sm:$0xff] }
 0x7e1   : > { %v13921_v63 = vsel %vm4468_vm8, %v8588_v3, %v13825_v18  ;;  %3265 = vadd.xlane.f32.xlu0 %v1269_v17  ;;  %v3094_v51 = vpop.xlane.xlu1 %3093  ;;  %v1285_v17 = vld [vmem:[%s10301_s19 + $0x1ee0] sm:$0xff] }
 0x7e2   : > { %v8810_v56 = vrot.slane %v3094_v51, %v10420_v40  ;;  %v3064_v62 = vpop.xlane.xlu0 %3063 }
 0x7e3   : > { %v8736_v19 = vrot.slane %v3064_v62, %v10428_v46 }
 0x7e4   : > { %v13929_v20 = vsel %vm4447_vm5, %v8810_v56, %v13833_v43  ;;  %3355 = vadd.xlane.f32.xlu1 %v1314_v48  ;;  %v1144_v48 = vld [vmem:[%s10301_s19 + $0x1a78] sm:$0xff] }
 0x7e5   : > { %v13933_v18 = vsel %vm4454_vm6, %v8736_v19, %v13837_v55  ;;  %3325 = vadd.xlane.f32.xlu0 %v1299_v34  ;;  %v3168_v8 = vpop.xlane.xlu1 %3167  ;;  %v1315_v34 = vld [vmem:[%s10301_s19 + $0x1fd0] sm:$0xff] }
 0x7e6   : > { %v8993_v1 = vrot.slane %v3168_v8, %v10453_v6  ;;  %v3136_v37 = vpop.xlane.xlu0 %3135 }
 0x7e7   : > { %v8914_v39 = vrot.slane %v3136_v37, %v10453_v6 }
 0x7e8   : > { %v13941_v43 = vsel %vm4482_vm10, %v8993_v1, %v13845_v28  ;;  %3013 = vadd.xlane.f32.xlu1 %v1143_v52  ;;  %v1174_v52 = vld [vmem:[%s10301_s19 + $0x1b68] sm:$0xff] }
 0x7e9   : > { %v13945_v55 = vsel %vm4482_vm10, %v8914_v39, %v13849_v31  ;;  %2983 = vadd.xlane.f32.xlu0 %v1128_v60  ;;  %v3228_v29 = vpop.xlane.xlu1 %3227  ;;  %v1159_v60 = vld [vmem:[%s10301_s19 + $0x1af0] sm:$0xff] }
 0x7ea   : > { %v9141_v9 = vrot.slane %v3228_v29, %v10435_v53  ;;  %v3198_v41 = vpop.xlane.xlu0 %3197 }
 0x7eb   : > { %v9067_v22 = vrot.slane %v3198_v41, %v10456_v7 }
 0x7ec   : > { %v13953_v28 = vsel %vm4468_vm8, %v9141_v9, %v13857_v36  ;;  %3073 = vadd.xlane.f32.xlu1 %v1173_v2  ;;  %v1256_v2 = vld [vmem:[%s10301_s19 + $0x1df8] sm:$0xff] }
 0x7ed   : > { %v13957_v31 = vsel %vm4475_vm9, %v9067_v22, %v13861_v44  ;;  %3043 = vadd.xlane.f32.xlu0 %v1158_v32  ;;  %v3288_v24 = vpop.xlane.xlu1 %3287  ;;  %v1189_v32 = vld [vmem:[%s10301_s19 + $0x1be0] sm:$0xff] }
 0x7ee   : > { %v9289_v57 = vrot.slane %v3288_v24, %v10428_v46  ;;  %v3258_v42 = vpop.xlane.xlu0 %3257 }
 0x7ef   : > { %v9215_v13 = vrot.slane %v3258_v42, %v10438_v54 }
 0x7f0   : > { %v13965_v36 = vsel %vm4454_vm6, %v9289_v57, %v13869_v11  ;;  %3207 = vadd.xlane.f32.xlu1 %v1240_v27  ;;  %v1286_v27 = vld [vmem:[%s10301_s19 + $0x1ee8] sm:$0xff] }
 0x7f1   : > { %v13969_v44 = vsel %vm4461_vm7, %v9215_v13, %v13873_v10  ;;  %3103 = vadd.xlane.f32.xlu0 %v1188_v25  ;;  %v3348_v23 = vpop.xlane.xlu1 %3347  ;;  %v1271_v25 = vld [vmem:[%s10301_s19 + $0x1e70] sm:$0xff] }
 0x7f2   : > { %v9437_v0 = vrot.slane %v3348_v23, %v10404_v26  ;;  %v3318_v12 = vpop.xlane.xlu0 %3317 }
 0x7f3   : > { %v9363_v58 = vrot.slane %v3318_v12, %v10420_v40 }
 0x7f4   : > { %v13977_v11 = vsel %vm4440_vm4, %v9437_v0, %v13881_v50  ;;  %3267 = vadd.xlane.f32.xlu1 %v1270_v21  ;;  %vm14450_vm4 = vmmov %vm14446_vm0  ;;  %v1316_v21 = vld [vmem:[%s10301_s19 + $0x1fd8] sm:$0xff] }
 0x7f5   : > { %v13981_v10 = vsel %vm4447_vm5, %v9363_v58, %v13885_v59  ;;  %3237 = vadd.xlane.f32.xlu0 %v1255_v45  ;;  %v2916_v4 = vpop.xlane.xlu1 %2915  ;;  %v1301_v45 = vld [vmem:[%s10301_s19 + $0x1f60] sm:$0xff] }
 0x7f6   : > { %v8371_v26 = vrot.slane %v2916_v4, %v10463_v15  ;;  %v2884_v14 = vpop.xlane.xlu0 %2883 }
 0x7f7   : > { %v8292_v3 = vrot.slane %v2884_v14, %v10463_v15 }
 0x7f8   : > { %v13989_v50 = vsel %vm4496_vm12, %v8371_v26, %v13893_v33  ;;  %3327 = vadd.xlane.f32.xlu1 %v1300_v49  ;;  %v1175_v49 = vld [vmem:[%s10301_s19 + $0x1b70] sm:$0xff] }
 0x7f9   : > { %v13993_v59 = vsel %vm4496_vm12, %v8292_v3, %v13897_v30  ;;  %3297 = vadd.xlane.f32.xlu0 %v1285_v17  ;;  %v2976_v51 = vpop.xlane.xlu1 %2975  ;;  %v1160_v17 = vld [vmem:[%s10301_s19 + $0x1af8] sm:$0xff] }
 0x7fa   : > { %v8519_v56 = vrot.slane %v2976_v51, %v10453_v6  ;;  %v2946_v62 = vpop.xlane.xlu0 %2945 }
 0x7fb   : > { %v8445_v19 = vrot.slane %v2946_v62, %v10466_v16 }
 0x7fc   : > { %v14001_v33 = vsel %vm4482_vm10, %v8519_v56, %v13905_v47  ;;  %3015 = vadd.xlane.f32.xlu1 %v1144_v48  ;;  %v1272_v48 = vld [vmem:[%s10301_s19 + $0x1e78] sm:$0xff] }
 0x7fd   : > { %v14005_v30 = vsel %vm14448_vm2, %v8445_v19, %v13909_v38  ;;  %3357 = vadd.xlane.f32.xlu0 %v1315_v34  ;;  %v3036_v8 = vpop.xlane.xlu1 %3035  ;;  %v1190_v34 = vld [vmem:[%s10301_s19 + $0x1be8] sm:$0xff]  ;;  %vm14455_vm2 = vcmask 1042434  }
 0x7fe   : > { %v8667_v1 = vrot.slane %v3036_v8, %v10435_v53  ;;  %v3006_v37 = vpop.xlane.xlu0 %3005 }
 0x7ff   : > { %v8593_v39 = vrot.slane %v3006_v37, %v10456_v7  ;;  %v1287_v37 = vld [vmem:[%s10301_s19 + $0x1ef0] sm:$0xff] }
 0x800   : > { %v14013_v47 = vsel %vm4468_vm8, %v8667_v1, %v13917_v61  ;;  %3075 = vadd.xlane.f32.xlu1 %v1174_v52  ;;  %v1302_v52 = vld [vmem:[%s10301_s19 + $0x1f68] sm:$0xff] }
 0x801   : > { %v14017_v38 = vsel %vm4475_vm9, %v8593_v39, %v13921_v63  ;;  %3045 = vadd.xlane.f32.xlu0 %v1159_v60  ;;  %v3096_v29 = vpop.xlane.xlu1 %3095 }
 0x802   : > { %v8815_v9 = vrot.slane %v3096_v29, %v10428_v46  ;;  %v3066_v41 = vpop.xlane.xlu0 %3065  ;;  %v1176_v29 = vld [vmem:[%s10301_s19 + $0x1b78] sm:$0xff] }
 0x803   : > { %v8741_v22 = vrot.slane %v3066_v41, %v10438_v54  ;;  %v1317_v41 = vld [vmem:[%s10301_s19 + $0x1fe0] sm:$0xff] }
 0x804   : > { %v14025_v61 = vsel %vm4454_vm6, %v8815_v9, %v13929_v20  ;;  %3239 = vadd.xlane.f32.xlu1 %v1256_v2 }
 0x805   : > { %v14029_v63 = vsel %vm4461_vm7, %v8741_v22, %v13933_v18  ;;  %3105 = vadd.xlane.f32.xlu0 %v1189_v32  ;;  %v3170_v24 = vpop.xlane.xlu1 %3169 }
 0x806   : > { %v8998_v57 = vrot.slane %v3170_v24, %v10466_v16  ;;  %v3138_v42 = vpop.xlane.xlu0 %3137  ;;  %v1288_v24 = vld [vmem:[%s10301_s19 + $0x1ef8] sm:$0xff] }
 0x807   : > { %v8919_v13 = vrot.slane %v3138_v42, %v10466_v16  ;;  %v1191_v42 = vld [vmem:[%s10301_s19 + $0x1bf0] sm:$0xff] }
 0x808   : > { %v14037_v20 = vsel %vm14449_vm3, %v8998_v57, %v13941_v43  ;;  %3299 = vadd.xlane.f32.xlu1 %v1286_v27 }
 0x809   : > { %v14041_v18 = vsel %vm14450_vm4, %v8919_v13, %v13945_v55  ;;  %3269 = vadd.xlane.f32.xlu0 %v1271_v25  ;;  %v3230_v23 = vpop.xlane.xlu1 %3229  ;;  %vm14458_vm4 = vmmov %vm14447_vm1 }
 0x80a   : > { %v9146_v0 = vrot.slane %v3230_v23, %v10456_v7  ;;  %v3200_v12 = vpop.xlane.xlu0 %3199  ;;  %v1318_v23 = vld [vmem:[%s10301_s19 + $0x1fe8] sm:$0xff] }
 0x80b   : > { %v9072_v58 = vrot.slane %v3200_v12, %v10453_v6  ;;  %v1303_v12 = vld [vmem:[%s10301_s19 + $0x1f70] sm:$0xff] }
 0x80c   : > { %v14049_v43 = vsel %vm4475_vm9, %v9146_v0, %v13953_v28  ;;  %3359 = vadd.xlane.f32.xlu1 %v1316_v21 }
 0x80d   : > { %v14053_v55 = vsel %vm4482_vm10, %v9072_v58, %v13957_v31  ;;  %3329 = vadd.xlane.f32.xlu0 %v1301_v45  ;;  %v3290_v4 = vpop.xlane.xlu1 %3289 }
 0x80e   : > { %v9294_v26 = vrot.slane %v3290_v4, %v10438_v54  ;;  %v3260_v14 = vpop.xlane.xlu0 %3259  ;;  %v1304_v4 = vld [vmem:[%s10301_s19 + $0x1f78] sm:$0xff] }
 0x80f   : > { %v9220_v3 = vrot.slane %v3260_v14, %v10435_v53  ;;  %v1192_v14 = vld [vmem:[%s10301_s19 + $0x1bf8] sm:$0xff] }
 0x810   : > { %v14061_v28 = vsel %vm4461_vm7, %v9294_v26, %v13965_v36  ;;  %3077 = vadd.xlane.f32.xlu1 %v1175_v49 }
 0x811   : > { %v14065_v31 = vsel %vm4468_vm8, %v9220_v3, %v13969_v44  ;;  %3047 = vadd.xlane.f32.xlu0 %v1160_v17  ;;  %v3350_v51 = vpop.xlane.xlu1 %3349 }
 0x812   : > { %v9442_v56 = vrot.slane %v3350_v51, %v10420_v40  ;;  %v3320_v62 = vpop.xlane.xlu0 %3319 }
 0x813   : > { %v9368_v19 = vrot.slane %v3320_v62, %v10428_v46  ;;  %v1319_v62 = vld [vmem:[%s10301_s19 + $0x1ff0] sm:$0xff] }
 0x814   : > { %v14073_v36 = vsel %vm4447_vm5, %v9442_v56, %v13977_v11  ;;  %3271 = vadd.xlane.f32.xlu1 %v1272_v48  ;;  %vm14451_vm5 = vmmov %vm14446_vm0  ;;  %vm14453_vm0 = vcmask 1041409  }
 0x815   : > { %v14077_v44 = vsel %vm4454_vm6, %v9368_v19, %v13981_v10  ;;  %3107 = vadd.xlane.f32.xlu0 %v1190_v34  ;;  %v2918_v8 = vpop.xlane.xlu1 %2917  ;;  %vm14457_vm3 = vmmov %vm14453_vm0 }
 0x816   : > { %v8376_v40 = vrot.slane %v2918_v8, %v10482_v35  ;;  %v2886_v1 = vpop.xlane.xlu0 %2885 }
 0x817   : > { %v8297_v60 = vrot.slane %v2886_v1, %v10482_v35 }
 0x818   : > { %v14085_v11 = vsel %vm4503_vm13, %v8376_v40, %v13989_v50  ;;  %3331 = vadd.xlane.f32.xlu1 %v1302_v52 }
 0x819   : > { %v14089_v10 = vsel %vm4503_vm13, %v8297_v60, %v13993_v59  ;;  %3301 = vadd.xlane.f32.xlu0 %v1287_v37  ;;  %v2978_v39 = vpop.xlane.xlu1 %2977 }
 0x81a   : > { %v8524_v2 = vrot.slane %v2978_v39, %v10466_v16  ;;  %v2948_v9 = vpop.xlane.xlu0 %2947 }
 0x81b   : > { %v8450_v32 = vrot.slane %v2948_v9, %v10463_v15 }
 0x81c   : > { %v14097_v50 = vsel %vm14451_vm5, %v8524_v2, %v14001_v33  ;;  %3079 = vadd.xlane.f32.xlu1 %v1176_v29  ;;  %vm14459_vm5 = vcmask 1043459  }
 0x81d   : > { %v14101_v59 = vsel %vm4496_vm12, %v8450_v32, %v14005_v30  ;;  %3361 = vadd.xlane.f32.xlu0 %v1317_v41  ;;  %v3038_v22 = vpop.xlane.xlu1 %3037 }
 0x81e   : > { %v8672_v27 = vrot.slane %v3038_v22, %v10456_v7  ;;  %v3008_v57 = vpop.xlane.xlu0 %3007 }
 0x81f   : > { %v8598_v25 = vrot.slane %v3008_v57, %v10453_v6 }
 0x820   : > { %v14109_v33 = vsel %vm4475_vm9, %v8672_v27, %v14013_v47  ;;  %3303 = vadd.xlane.f32.xlu1 %v1288_v24 }
 0x821   : > { %v14113_v30 = vsel %vm4482_vm10, %v8598_v25, %v14017_v38  ;;  %3109 = vadd.xlane.f32.xlu0 %v1191_v42  ;;  %v3098_v13 = vpop.xlane.xlu1 %3097 }
 0x822   : > { %v8820_v21 = vrot.slane %v3098_v13, %v10438_v54  ;;  %v3068_v0 = vpop.xlane.xlu0 %3067 }
 0x823   : > { %v8746_v45 = vrot.slane %v3068_v0, %v10435_v53 }
 0x824   : > { %v8821_v47 = vsel %vm4461_vm7, %v8820_v21, %v14025_v61  ;;  %3363 = vadd.xlane.f32.xlu1 %v1318_v23 }
 0x825   : > { %v8747_v58 = vsel %vm4468_vm8, %v8746_v45, %v14029_v63  ;;  %3333 = vadd.xlane.f32.xlu0 %v1303_v12  ;;  %v3172_v38 = vpop.xlane.xlu1 %3171  ;;  %v1320_v63 = vld [vmem:[%s10301_s19 + $0x1ff8] sm:$0xff] }
 0x826   : > { %v9003_v49 = vrot.slane %v3172_v38, %v10463_v15  ;;  %v3140_v26 = vpop.xlane.xlu0 %3139 }
 0x827   : > { %v8924_v17 = vrot.slane %v3140_v26, %v10463_v15 }
 0x828   : > { %v9004_v3 = vsel %vm4496_vm12, %v9003_v49, %v14037_v20  ;;  %3335 = vadd.xlane.f32.xlu1 %v1304_v4 }
 0x829   : > { %v8925_v61 = vsel %vm4496_vm12, %v8924_v17, %v14041_v18  ;;  %3111 = vadd.xlane.f32.xlu0 %v1192_v14  ;;  %v3232_v51 = vpop.xlane.xlu1 %3231 }
 0x82a   : > { %v9151_v48 = vrot.slane %v3232_v51, %v10453_v6  ;;  %v3202_v56 = vpop.xlane.xlu0 %3201 }
 0x82b   : > { %v9077_v34 = vrot.slane %v3202_v56, %v10466_v16 }
 0x82c   : > { %v9152_v19 = vsel %vm4482_vm10, %v9151_v48, %v14049_v43  ;;  %3367 = vadd.xlane.f32.xlu1 %v1320_v63 }
 0x82d   : > { %v9078_v20 = vsel %vm14452_vm11, %v9077_v34, %v14053_v55  ;;  %3365 = vadd.xlane.f32.xlu0 %v1319_v62  ;;  %v3292_v8 = vpop.xlane.xlu1 %3291  ;;  %vm14461_vm11 = vcmask 1044484  }
 0x82e   : > { %v9299_v18 = vrot.slane %v3292_v8, %v10435_v53  ;;  %v3262_v52 = vpop.xlane.xlu0 %3261 }
 0x82f   : > { %v9225_v40 = vrot.slane %v3262_v52, %v10456_v7 }
 0x830   : > { %v9300_v1 = vsel %vm4468_vm8, %v9299_v18, %v14061_v28 }
 0x831   : > { %v9226_v37 = vsel %vm4475_vm9, %v9225_v40, %v14065_v31  ;;  %v3352_v60 = vpop.xlane.xlu1 %3351 }
 0x832   : > { %v9447_v43 = vrot.slane %v3352_v60, %v10428_v46  ;;  %v3322_v39 = vpop.xlane.xlu0 %3321 }
 0x833   : > { %v9373_v29 = vrot.slane %v3322_v39, %v10438_v54 }
 0x834   : > { %v9448_v55 = vsel %vm4454_vm6, %v9447_v43, %v14073_v36  ;;  %vm14454_vm6 = vmmov %vm14447_vm1 }
 0x835   : > { %v9374_v2 = vsel %vm4461_vm7, %v9373_v29, %v14077_v44  ;;  %v2920_v9 = vpop.xlane.xlu1 %2919 }
 0x836   : > { %v8381_v41 = vrot.slane %v2920_v9, %v10479_v5  ;;  %v2888_v32 = vpop.xlane.xlu0 %2887 }
 0x837   : > { %v8302_v28 = vrot.slane %v2888_v32, %v10479_v5 }
 0x838   : > { %v8382_v31 = vsel %vm4510_vm14, %v8381_v41, %v14085_v11 }
 0x839   : > { %v8303_v46 = vsel %vm4510_vm14, %v8302_v28, %v14089_v10  ;;  %v2980_v22 = vpop.xlane.xlu1 %2979 }
 0x83a   : > { %v9538_v24 = vsel %vm14453_vm0, %v8382_v31, %v8303_v46  ;;  %v8529_v36 = vrot.slane %v2980_v22, %v10463_v15  ;;  %v2950_v27 = vpop.xlane.xlu0 %2949  ;;  %vm14462_vm0 = vmmov %vm14459_vm5 }
 0x83b   : > { %v8455_v44 = vrot.slane %v2950_v27, %v10482_v35 }
 0x83c   : > { %v8530_v57 = vsel %vm4496_vm12, %v8529_v36, %v14097_v50 }
 0x83d   : > { %v8456_v42 = vsel %vm4503_vm13, %v8455_v44, %v14101_v59  ;;  %v3040_v25 = vpop.xlane.xlu1 %3039 }
 0x83e   : > { %v8677_v11 = vrot.slane %v3040_v25, %v10453_v6  ;;  %v3010_v13 = vpop.xlane.xlu0 %3009 }
 0x83f   : > { %v8603_v10 = vrot.slane %v3010_v13, %v10466_v16 }
 0x840   : > { %v8678_v23 = vsel %vm4482_vm10, %v8677_v11, %v14109_v33 }
 0x841   : > { %v8604_v21 = vsel %vm14454_vm6, %v8603_v10, %v14113_v30  ;;  %v3100_v0 = vpop.xlane.xlu1 %3099  ;;  %v14178_v30 = vld [vmem:[%s14372_s5] ss:$0 sm:$0xff]  ;;  %vm14463_vm6 = vcmask 1045509  }
 0x842   : > { %v8825_v12 = vrot.slane %v3100_v0, %v10435_v53  ;;  %v3070_v50 = vpop.xlane.xlu0 %3069 }
 0x843   : > { %v8751_v45 = vrot.slane %v3070_v50, %v10456_v7 }
 0x844   : > { %v8826_v59 = vsel %vm4468_vm8, %v8825_v12, %v8821_v47 }
 0x845   : > { %v8752_v38 = vsel %vm4475_vm9, %v8751_v45, %v8747_v58  ;;  %v3174_v4 = vpop.xlane.xlu1 %3173 }
 0x846   : > { %v9008_v49 = vrot.slane %v3174_v4, %v10482_v35  ;;  %v10071_v26 = vpop.f32.mrf.mxu1  ;;  %v3142_v33 = vpop.xlane.xlu0 %3141 }
 0x847   : > { %v9819_v14 = vadd.f32 %v14178_v30, %v10071_v26  ;;  %v8929_v17 = vrot.slane %v3142_v33, %v10482_v35 }
 0x848   : > { %v9009_v51 = vsel %vm4503_vm13, %v9008_v49, %v9004_v3  ;;  %v9813_v47 = vpop.f32.mrf.mxu1 }
 0x849   : > { %9837 = vst [vmem:[%s12102_s7 + $0x28] sm:$0xff] %v9819_v14  ;;  %v8930_v58 = vsel %vm4503_vm13, %v8929_v17, %v8925_v61  ;;  %v9814_v63 = vadd.f32 %v14178_v30, %v9813_v47  ;;  %v3234_v48 = vpop.xlane.xlu1 %3233 }
 0x84a   : > { %v9156_v56 = vrot.slane %v3234_v48, %v10466_v16  ;;  %v3204_v62 = vpop.xlane.xlu0 %3203 }
 0x84b   : > { %9836 = vst [vmem:[%s12102_s7 + $0x20] sm:$0xff] %v9814_v63  ;;  %v9082_v34 = vrot.slane %v3204_v62, %v10463_v15 }
 0x84c   : > { %v9157_v8 = vsel %vm14447_vm1, %v9156_v56, %v9152_v19 }
 0x84d   : > { %v9083_v18 = vsel %vm4496_vm12, %v9082_v34, %v9078_v20  ;;  %v3294_v52 = vpop.xlane.xlu1 %3293 }
 0x84e   : > { %v9304_v3 = vrot.slane %v3294_v52, %v10456_v7  ;;  %v3264_v40 = vpop.xlane.xlu0 %3263 }
 0x84f   : > { %v9230_v60 = vrot.slane %v3264_v40, %v10453_v6 }
 0x850   : > { %v9305_v61 = vsel %vm4475_vm9, %v9304_v3, %v9300_v1 }
 0x851   : > { %v9231_v43 = vsel %vm4482_vm10, %v9230_v60, %v9226_v37  ;;  %v3354_v39 = vpop.xlane.xlu1 %3353 }
 0x852   : > { %v9452_v29 = vrot.slane %v3354_v39, %v10438_v54  ;;  %v3324_v9 = vpop.xlane.xlu0 %3323 }
 0x853   : > { %v9378_v41 = vrot.slane %v3324_v9, %v10435_v53 }
 0x854   : > { %v9453_v19 = vsel %vm4461_vm7, %v9452_v29, %v9448_v55  ;;  %vm14456_vm7 = vmmov %vm14447_vm1 }
 0x855   : > { %v9379_v20 = vsel %vm4468_vm8, %v9378_v41, %v9374_v2  ;;  %v2982_v32 = vpop.xlane.xlu1 %2981  ;;  %vm14464_vm1 = vmmov %vm14461_vm11 }
 0x856   : > { %v8534_v28 = vrot.slane %v2982_v32, %v10482_v35  ;;  %v2952_v31 = vpop.xlane.xlu0 %2951 }
 0x857   : > { %v8460_v46 = vrot.slane %v2952_v31, %v10479_v5 }
 0x858   : > { %v8535_v1 = vsel %vm4503_vm13, %v8534_v28, %v8530_v57 }
 0x859   : > { %v8461_v37 = vsel %vm4510_vm14, %v8460_v46, %v8456_v42  ;;  %v3042_v22 = vpop.xlane.xlu1 %3041 }
 0x85a   : > { %v9539_v54 = vsel %vm14455_vm2, %v8461_v37, %v9538_v24  ;;  %v8682_v36 = vrot.slane %v3042_v22, %v10466_v16  ;;  %v3012_v27 = vpop.xlane.xlu0 %3011 }
 0x85b   : > { %v8608_v55 = vrot.slane %v3012_v27, %v10463_v15 }
 0x85c   : > { %v14207_v2 = vsel %vm14456_vm7, %v8682_v36, %v8678_v23 }
 0x85d   : > { %v8609_v44 = vsel %vm4496_vm12, %v8608_v55, %v8604_v21  ;;  %v3102_v25 = vpop.xlane.xlu1 %3101 }
 0x85e   : > { %v8830_v11 = vrot.slane %v3102_v25, %v10456_v7  ;;  %v3072_v13 = vpop.xlane.xlu0 %3071 }
 0x85f   : > { %v8756_v57 = vrot.slane %v3072_v13, %v10453_v6 }
 0x860   : > { %v14213_v42 = vsel %vm4475_vm9, %v8830_v11, %v8826_v59 }
 0x861   : > { %v14216_v24 = vsel %vm4482_vm10, %v8756_v57, %v8752_v38  ;;  %v3176_v10 = vpop.xlane.xlu1 %3175 }
 0x862   : > { %v9013_v0 = vrot.slane %v3176_v10, %v10479_v5  ;;  %v3144_v12 = vpop.xlane.xlu0 %3143 }
 0x863   : > { %v8934_v23 = vrot.slane %v3144_v12, %v10479_v5 }
 0x864   : > { %v9014_v21 = vsel %vm4510_vm14, %v9013_v0, %v9009_v51 }
 0x865   : > { %v8935_v50 = vsel %vm4510_vm14, %v8934_v23, %v8930_v58  ;;  %v3236_v45 = vpop.xlane.xlu1 %3235 }
 0x866   : > { %v9545_v4 = vsel %vm14457_vm3, %v9014_v21, %v8935_v50  ;;  %v9161_v49 = vrot.slane %v3236_v45, %v10463_v15  ;;  %v3206_v59 = vpop.xlane.xlu0 %3205  ;;  %vm14467_vm3 = vmmov %vm14463_vm6 }
 0x867   : > { %v9087_v26 = vrot.slane %v3206_v59, %v10482_v35 }
 0x868   : > { %v9162_v38 = vsel %vm4496_vm12, %v9161_v49, %v9157_v8 }
 0x869   : > { %v9088_v33 = vsel %vm4503_vm13, %v9087_v26, %v9083_v18  ;;  %v3296_v14 = vpop.xlane.xlu1 %3295 }
 0x86a   : > { %v9309_v17 = vrot.slane %v3296_v14, %v10453_v6  ;;  %v3266_v47 = vpop.xlane.xlu0 %3265 }
 0x86b   : > { %v9235_v51 = vrot.slane %v3266_v47, %v10466_v16 }
 0x86c   : > { %v14230_v58 = vsel %vm4482_vm10, %v9309_v17, %v9305_v61 }
 0x86d   : > { %v9236_v63 = vsel %vm14458_vm4, %v9235_v51, %v9231_v43  ;;  %v3356_v48 = vpop.xlane.xlu1 %3355 }
 0x86e   : > { %v9457_v56 = vrot.slane %v3356_v48, %v10435_v53  ;;  %v3326_v62 = vpop.xlane.xlu0 %3325 }
 0x86f   : > { %v9383_v34 = vrot.slane %v3326_v62, %v10456_v7 }
 0x870   : > { %v14236_v8 = vsel %vm4468_vm8, %v9457_v56, %v9453_v19  ;;  %vm14460_vm8 = vmmov %vm14455_vm2 }
 0x871   : > { %v14239_v18 = vsel %vm4475_vm9, %v9383_v34, %v9379_v20  ;;  %v3014_v52 = vpop.xlane.xlu1 %3013  ;;  %vm14465_vm2 = vmmov %vm14458_vm4 }
 0x872   : > { %v2984_v3 = vpop.xlane.xlu0 %2983  ;;  %v8613_v46 = vrot.slane %v3014_v52, %v10482_v35  ;;  %vm14466_vm7 = vmmov %vm14465_vm2 }
 0x873   : > { %v8539_v40 = vrot.slane %v2984_v3, %v10479_v5  ;;  %vm14468_vm4 = vmmov %vm14465_vm2 }
 0x875   : > { %v8540_v60 = vsel %vm4510_vm14, %v8539_v40, %v8535_v1  ;;  %v3074_v61 = vpop.xlane.xlu1 %3073 }
 0x876   : > { %v9540_v43 = vsel %vm14459_vm5, %v8540_v60, %v9539_v54  ;;  %v3044_v39 = vpop.xlane.xlu0 %3043  ;;  %v8614_v54 = vsel %vm4503_vm13, %v8613_v46, %v8609_v44  ;;  %v8761_v40 = vrot.slane %v3074_v61, %v10466_v16  ;;  %vm14469_vm5 = vmmov %vm14465_vm2 }
 0x879   : > { %v3208_v53 = vpop.xlane.xlu1 %3207 }
 0x87a   : > { %v9092_v29 = vrot.slane %v3208_v53, %v10479_v5  ;;  %v14245_v9 = vpop.xlane.xlu0 %3103 }
 0x87c   : > { %v9093_v41 = vsel %vm4510_vm14, %v9092_v29, %v9088_v33 }
 0x87d   : > { %v9546_v19 = vsel %vm14460_vm8, %v9093_v41, %v9545_v4  ;;  %v3268_v20 = vpop.xlane.xlu1 %3267  ;;  %v8687_v4 = vrot.slane %v3044_v39, %v10463_v15  ;;  %vm14470_vm8 = vcmask 1047559  }
 0x87e   : > { %v3238_v32 = vpop.xlane.xlu0 %3237  ;;  %v9240_v26 = vrot.slane %v3268_v20, %v10463_v15 }
 0x87f   : > { %v9166_v11 = vrot.slane %v3238_v32, %v10482_v35 }
 0x880   : > { %v9241_v56 = vsel %vm4496_vm12, %v9240_v26, %v9236_v63  ;;  %v8762_v63 = vsel %vm14465_vm2, %v8761_v40, %v14216_v24 }
 0x881   : > { %v14249_v28 = vpop.xlane.xlu1 %3327  ;;  %v9167_v0 = vsel %vm4503_vm13, %v9166_v11, %v9162_v38  ;;  %v8688_v38 = vsel %vm4496_vm12, %v8687_v4, %v14207_v2 }
 0x882   : > { %v3298_v31 = vpop.xlane.xlu0 %3297 }
 0x883   : > { %v9314_v41 = vrot.slane %v3298_v31, %v10466_v16 }
 0x885   : > { %v3016_v1 = vpop.xlane.xlu1 %3015 }
 0x886   : > { %v8618_v37 = vrot.slane %v3016_v1, %v10479_v5  ;;  %v14253_v22 = vpop.xlane.xlu0 %3357 }
 0x887   : > { %v9462_v26 = vrot.slane %v14253_v22, %v10456_v7 }
 0x888   : > { %v8619_v36 = vsel %vm4510_vm14, %v8618_v37, %v8614_v54 }
 0x889   : > { %v9541_v27 = vsel %vm14461_vm11, %v8619_v36, %v9540_v43  ;;  %v3076_v55 = vpop.xlane.xlu1 %3075  ;;  %v9315_v36 = vsel %vm14466_vm7, %v9314_v41, %v14230_v58  ;;  %vm14471_vm11 = vmmov %vm14465_vm2 }
 0x88a   : > { %v3046_v25 = vpop.xlane.xlu0 %3045  ;;  %v8766_v39 = vrot.slane %v3076_v55, %v10463_v15 }
 0x88b   : > { %v8692_v49 = vrot.slane %v3046_v25, %v10482_v35 }
 0x88c   : > { %v8767_v20 = vsel %vm4496_vm12, %v8766_v39, %v8762_v63 }
 0x88d   : > { %v3240_v13 = vpop.xlane.xlu1 %3239  ;;  %v8693_v47 = vsel %vm4503_vm13, %v8692_v49, %v8688_v38 }
 0x88e   : > { %v9171_v57 = vrot.slane %v3240_v13, %v10479_v5  ;;  %v14260_v10 = vpop.xlane.xlu0 %3105  ;;  %v9388_v13 = vrot.slane %v14249_v28, %v10453_v6 }
 0x890   : > { %v9172_v12 = vsel %vm4510_vm14, %v9171_v57, %v9167_v0  ;;  %v8835_v0 = vrot.slane %v14245_v9, %v10453_v6 }
 0x891   : > { %v9547_v23 = vsel %vm14462_vm0, %v9172_v12, %v9546_v19  ;;  %v3300_v44 = vpop.xlane.xlu1 %3299 }
 0x892   : > { %v3270_v21 = vpop.xlane.xlu0 %3269  ;;  %v9319_v32 = vrot.slane %v3300_v44, %v10463_v15  ;;  %v8840_v44 = vrot.slane %v14260_v10, %v10466_v16 }
 0x893   : > { %v9245_v14 = vrot.slane %v3270_v21, %v10482_v35 }
 0x895   : > { %v14265_v50 = vpop.xlane.xlu1 %3359  ;;  %v9246_v3 = vsel %vm4503_vm13, %v9245_v14, %v9241_v56 }
 0x896   : > { %v3330_v45 = vpop.xlane.xlu0 %3329  ;;  %v9467_v14 = vrot.slane %v14265_v50, %v10453_v6  ;;  %v3375_v6 = vld [vmem:[%s10884_s14 + $0x30] sm:$0xff]  ;;  %v9463_v50 = vsel %vm4475_vm9, %v9462_v26, %v14236_v8  ;;  %vm14472_vm9 = vmmov %vm14470_vm8 }
 0x897   : > { %v9393_v58 = vrot.slane %v3330_v45, %v10466_v16  ;;  %v8836_v45 = vsel %vm4482_vm10, %v8835_v0, %v14213_v42 }
 0x898   : > { %v8841_v38 = vsel %vm14469_vm5, %v8840_v44, %v8836_v45 }
 0x899   : > { %v3078_v59 = vpop.xlane.xlu1 %3077 }
 0x89a   : > { %v3048_v33 = vpop.xlane.xlu0 %3047  ;;  %v8771_v29 = vrot.slane %v3078_v59, %v10482_v35  ;;  %v9389_v59 = vsel %vm4482_vm10, %v9388_v13, %v14239_v18 }
 0x89b   : > { %v8697_v17 = vrot.slane %v3048_v33, %v10479_v5  ;;  %v9394_v10 = vsel %vm14468_vm4, %v9393_v58, %v9389_v59 }
 0x89c   : > { %v8772_v1 = vsel %vm4503_vm13, %v8771_v29, %v8767_v20  ;;  %v3376_v29 = vld [vmem:[%s10884_s14 + $0x38] sm:$0xff] }
 0x89d   : > { %v8698_v51 = vsel %vm4510_vm14, %v8697_v17, %v8693_v47  ;;  %v3272_v48 = vpop.xlane.xlu1 %3271 }
 0x89e   : > { %v9542_v62 = vsel %vm14463_vm6, %v8698_v51, %v9541_v27  ;;  %v9250_v34 = vrot.slane %v3272_v48, %v10479_v5  ;;  %v3108_v52 = vpop.xlane.xlu0 %3107  ;;  %v9320_v27 = vsel %vm4496_vm12, %v9319_v32, %v9315_v36 }
 0x89f   : > { %v8845_v49 = vrot.slane %v3108_v52, %v10463_v15 }
 0x8a0   : > { %v9251_v2 = vsel %vm4510_vm14, %v9250_v34, %v9246_v3  ;;  %v9468_v3 = vsel %vm4482_vm10, %v9467_v14, %v9463_v50 }
 0x8a1   : > { %v9548_v60 = vsel %vm14464_vm1, %v9251_v2, %v9547_v23  ;;  %v3332_v43 = vpop.xlane.xlu1 %3331  ;;  %v8846_v51 = vsel %vm4496_vm12, %v8845_v49, %v8841_v38 }
 0x8a2   : > { %v3302_v53 = vpop.xlane.xlu0 %3301  ;;  %v9398_v21 = vrot.slane %v3332_v43, %v10463_v15 }
 0x8a3   : > { %v9324_v37 = vrot.slane %v3302_v53, %v10482_v35 }
 0x8a4   : > { %v9399_v17 = vsel %vm4496_vm12, %v9398_v21, %v9394_v10 }
 0x8a5   : > { %v3080_v19 = vpop.xlane.xlu1 %3079  ;;  %v9325_v11 = vsel %vm4503_vm13, %v9324_v37, %v9320_v27 }
 0x8a6   : > { %v8776_v61 = vrot.slane %v3080_v19, %v10479_v5  ;;  %v3362_v46 = vpop.xlane.xlu0 %3361 }
 0x8a7   : > { %v9472_v42 = vrot.slane %v3362_v46, %v10466_v16 }
 0x8a8   : > { %v8777_v54 = vsel %vm4510_vm14, %v8776_v61, %v8772_v1 }
 0x8a9   : > { %v3304_v24 = vpop.xlane.xlu1 %3303  ;;  %v9543_v31 = vsel %vm9499_vm15, %v8777_v54, %v9542_v62 }
 0x8aa   : > { %v9329_v55 = vrot.slane %v3304_v24, %v10479_v5  ;;  %v3110_v25 = vpop.xlane.xlu0 %3109 }
 0x8ab   : > { %v8850_v9 = vrot.slane %v3110_v25, %v10482_v35 }
 0x8ac   : > { %v9330_v57 = vsel %vm4510_vm14, %v9329_v55, %v9325_v11 }
 0x8ad   : > { %v9549_v12 = vsel %vm14467_vm3, %v9330_v57, %v9548_v60  ;;  %v3364_v23 = vpop.xlane.xlu1 %3363  ;;  %v8851_v22 = vsel %vm4503_vm13, %v8850_v9, %v8846_v51 }
 0x8ae   : > { %v3334_v4 = vpop.xlane.xlu0 %3333  ;;  %v9477_v56 = vrot.slane %v3364_v23, %v10463_v15  ;;  %v9473_v15 = vsel %vm14471_vm11, %v9472_v42, %v9468_v3 }
 0x8af   : > { %v9403_v28 = vrot.slane %v3334_v4, %v10482_v35 }
 0x8b0   : > { %v9478_v53 = vsel %vm4496_vm12, %v9477_v56, %v9473_v15 }
 0x8b1   : > { %v3336_v33 = vpop.xlane.xlu1 %3335  ;;  %v9404_v48 = vsel %vm4503_vm13, %v9403_v28, %v9399_v17 }
 0x8b2   : > { %v9408_v18 = vrot.slane %v3336_v33, %v10479_v5  ;;  %v3112_v47 = vpop.xlane.xlu0 %3111 }
 0x8b3   : > { %v8855_v7 = vrot.slane %v3112_v47, %v10479_v5 }
 0x8b4   : > { %v9409_v62 = vsel %vm4510_vm14, %v9408_v18, %v9404_v48 }
 0x8b5   : > { %v8856_v34 = vsel %vm4510_vm14, %v8855_v7, %v8851_v22  ;;  %v3368_v52 = vpop.xlane.xlu1 %3367  ;;  %v9550_v16 = vsel %vm9499_vm15, %v9409_v62, %v9549_v12 }
 0x8b6   : > { %v3366_v2 = vpop.xlane.xlu0 %3365  ;;  %v9487_v40 = vrot.slane %v3368_v52, %v10479_v5  ;;  %v9544_v60 = vsel %vm14470_vm8, %v8856_v34, %v9543_v31 }
 0x8b7   : > { %v9482_v43 = vrot.slane %v3366_v2, %v10482_v35  ;;  %v9566_v39 = vmul.f32 %v9544_v60, %v3375_v6  ;;  %v10120_v35 = vld [vmem:[%s14370_s3] ss:$0 sm:$0xff] }
 0x8b9   : > { %v9483_v8 = vsel %vm4503_vm13, %v9482_v43, %v9478_v53  ;;  %10028 = vmatprep.mubr.f32.mxu0 %v9566_v39 }
 0x8ba   : > { %v9488_v63 = vsel %vm4510_vm14, %v9487_v40, %v9483_v8 }
 0x8bb   : > { %v9551_v41 = vsel %vm14472_vm9, %v9488_v63, %v9550_v16 }
 0x8bc   : > { %v9567_v19 = vmul.f32 %v9551_v41, %v3376_v29 }
 0x8be   : > { %10029 = vmatmul.mubr.f32.gmra.mxu0 %v9567_v19 }
 0x97e   : > { %v10030_v5 = vpop.f32.mrf.mxu0 }
 0x97f   : > { %v9693_v20 = vadd.f32 %v10120_v35, %v10030_v5 }
 0x980   : > { %v9687_v32 = vpop.f32.mrf.mxu0 }
 0x981   : > { %v9688_v61 = vadd.f32 %v10120_v35, %v9687_v32  ;;  %v9703_v1 = vmax.f32 %v9693_v20, 0.0 }
 0x983   : > { %v9702_v46 = vmax.f32 %v9688_v61, 0.0 }
 0x985   : > { %10072 = vmatprep.mubr.f32.mxu1 %v9702_v46 }
 0x986   : > { %10073 = vmatmul.mubr.f32.gmra.mxu1 %v9703_v1 }
 0xa46   : > { %v10074_v37 = vpop.f32.mrf.mxu1 }
 0xa47   : > { %v9829_v54 = vadd.f32 %v14178_v30, %v10074_v37 }
 0xa48   : > { %v9823_v36 = vpop.f32.mrf.mxu1 }
 0xa49   : > { %9839 = vst [vmem:[%s12102_s7 + $0x38] sm:$0xff] %v9829_v54  ;;  %v9824_v24 = vadd.f32 %v14178_v30, %v9823_v36 }
 0xa4b   : > { %9838 = vst [vmem:[%s12102_s7 + $0x30] sm:$0xff] %v9824_v24 }
 0xa4c PF: > { %p16_p9 = scmp.ge.s32.totalorder %s10243_s26, 4   ;;  %s14473_s21 = smov %s10175_s22 }
 0xa4d   : > { %s14474_s22 = smov %s10179_s23  ;;  %s14475_s23 = smov %s10253_s29 }
 0xa4e   : > { %s14476_s24 = smov %s10243_s26  ;;  %18 = sbr.rel (!%p16_p9) target bundleno = 3 (0x3), region = 87 }
 0xa53   :  { %9862 = vsyncpa [#allocation3], 1 }
 0xa54   :  { %9864 = vsyncpa [#allocation3 + $0x1], 1 }

</bundles_post_ra>
